<compile_context>
chip_gen: v7x
topology: tpu7x:2x2x1
jax: 0.10.0
libtpu: 0.0.40
codegen_flags: <defaults>
</compile_context>

<pallas_src>
import functools

import jax
import jax.numpy as jnp
from jax.experimental import pallas as pl
from jax.experimental.pallas import tpu as pltpu

EPS = 1e-5

# MXU operand dtype.  bf16 operands + f32 accumulation is MXU-native on v5e/v6e/v7x and
# halves activation/weight traffic; set to jnp.float32 for bit-closer (PyTorch-like)
# numerics.  Accumulation, BN, ReLU and pooling are f32 regardless of this setting.
_MXU_DTYPE = jnp.bfloat16


def _shift_w(a, ox):
    """operand[..., w, :] = a[..., w+ox, :] with zero fill at the W edges (sublane axis)."""
    if ox == 0:
        return a
    N, H, W, C = a.shape
    zcol = jnp.zeros((N, H, 1, C), a.dtype)
    if ox == -1:
        return jnp.concatenate([zcol, a[:, :, : W - 1, :]], axis=2)
    return jnp.concatenate([a[:, :, 1:, :], zcol], axis=2)


def _shift_h(a, oy):
    """operand[:, h] = a[:, h+oy] with zero fill at the H edges (leading axis, cheap)."""
    if oy == 0:
        return a
    N, H, W, C = a.shape
    zrow = jnp.zeros((N, 1, W, C), a.dtype)
    if oy == -1:
        return jnp.concatenate([zrow, a[:, : H - 1, :, :]], axis=1)
    return jnp.concatenate([a[:, 1:, :, :], zrow], axis=1)


def _conv3x3_bn_relu(a, w_ref, gamma, beta):
    """3x3 SAME conv (9 accumulating MXU matmuls) + batch-stat BN + ReLU.

    a      : (N, H, W, Cin) activation value (bf16 operands for the MXU)
    w_ref  : (9, Cin, Cout) VMEM ref, tap-major (ky, kx) flattened HWIO weights
    gamma, beta : (1, Cout) f32 values
    returns: (N*H*W, Cout) f32
    """
    N, H, W, Cin = a.shape
    Cout = w_ref.shape[-1]
    M = N * H * W

    # Three W-shifted (sublane) variants, each reused across the three H taps.
    a_w = (_shift_w(a, -1), a, _shift_w(a, +1))

    acc = jnp.zeros((M, Cout), jnp.float32)
    for ky in range(3):                       # output[h,w] += in[h+ky-1, w+kx-1] * W[ky,kx]
        for kx in range(3):
            t = _shift_h(a_w[kx], ky - 1).reshape(M, Cin)
            # f32 accumulation on the MXU; consecutive taps accumulate in place
            # (maps well onto v7x's MRB, cheap on v5e/v6e too).
            acc += jnp.dot(t, w_ref[ky * 3 + kx],
                           preferred_element_type=jnp.float32)

    # BatchNorm2d (training-mode batch stats, biased var, eps=1e-5) folded into one
    # scale/shift; one-pass E[x^2]-E[x]^2 variance is fine in f32 at M <= 512.
    inv_m = 1.0 / M
    mean = jnp.sum(acc, axis=0, keepdims=True) * inv_m            # (1, Cout)
    ex2 = jnp.sum(acc * acc, axis=0, keepdims=True) * inv_m
    var = ex2 - mean * mean
    scale = gamma * jax.lax.rsqrt(var + EPS)                      # rsqrt -> EUP slot
    shift = beta - mean * scale
    return jnp.maximum(acc * scale + shift, 0.0)                  # fused BN + ReLU


def _maxpool2x2(y4):
    """2x2 max pool, stride 2: (N, H, W, C) -> (N, H//2, W//2, C), all f32."""
    N, H, W, C = y4.shape
    yh = jnp.max(y4.reshape(N, H // 2, 2, W, C), axis=2)          # H pairs (leading axis)
    # TODO(synk): for W < 8 (layers 3-4) this W-pair reshape repacks sublane-padded
    # tiles; negligible at these sizes, revisit with an (M, C)-resident pool if scaled.
    return jnp.max(yh.reshape(N, H // 2, W // 2, 2, C), axis=3)


def _fused_kernel(x_ref,
                  w1, g1, b1, w2, g2, b2, w3, g3, b3, w4, g4, b4,
                  out_ref, *, N, H0, W0, chans):
    """Entire DualBranchCNN forward in one kernel; intermediates never leave VMEM."""
    ws = (w1, w2, w3, w4)
    gs = (g1, g2, g3, g4)
    bs = (b1, b2, b3, b4)

    H, W = H0, W0
    a = x_ref[...]                                                # (N, H, W, Cin) bf16
    for i in range(4):
        cout = chans[i]
        y = _conv3x3_bn_relu(a, ws[i], gs[i][...], bs[i][...])    # (N*H*W, cout) f32
        if i < 3:
            # MaxPool2d(2,2) in f32, then one cast to bf16 for the next layer's MXU
            # operands (keeps bf16 off the VPU elementwise path, important on v5e).
            a = _maxpool2x2(y.reshape(N, H, W, cout)).astype(_MXU_DTYPE)
            H, W = H // 2, W // 2
        else:
            # AdaptiveAvgPool2d((1,1)) -> lane-dense (N, feature_dim) f32 output.
            out_ref[...] = jnp.mean(y.reshape(N, H * W, cout),
                                    axis=1).astype(out_ref.dtype)


@jax.jit
def dual_branch_cnn_forward(x_nchw, params):
    """Pallas forward of DualBranchCNN.  x_nchw: (N, Cin, H, W) -> (N, feat, 1, 1)."""
    N, Cin, H, W = x_nchw.shape
    assert H % 8 == 0 and W % 8 == 0, "three 2x2 max-pools need H, W divisible by 8"
    chans = tuple(int(params[f"w{i}"].shape[-1]) for i in range(1, 5))
    cins = (Cin,) + chans[:-1]

    # NCHW -> NHWC (C on lanes, W on sublanes); bf16 MXU operands.
    x = jnp.transpose(x_nchw, (0, 2, 3, 1)).astype(_MXU_DTYPE)

    vmem = pl.BlockSpec(memory_space=pltpu.MemorySpace.VMEM)
    ins, in_specs = [x], [vmem]
    for i in range(4):
        cin, cout = cins[i], chans[i]
        # HWIO (3,3,Cin,Cout) -> tap-major (9, Cin, Cout); bf16 halves the weight DMA.
        ins.append(params[f"w{i+1}"].reshape(9, cin, cout).astype(_MXU_DTYPE))
        ins.append(params[f"g{i+1}"].reshape(1, cout).astype(jnp.float32))
        ins.append(params[f"b{i+1}"].reshape(1, cout).astype(jnp.float32))
        in_specs += [vmem, vmem, vmem]

    # TODO(synk): at much larger N/H/W add a "parallel" grid axis (split Cout or N) so
    # v7x's second TensorCore is used, hoist layer 1's Cin=4 lane layout / padding out
    # of the kernel, and switch BN to a cross-tile two-pass reduction.  At these sizes
    # everything fits in VMEM and a single grid-less call is overhead-optimal.
    kernel = functools.partial(_fused_kernel, N=N, H0=H, W0=W, chans=chans)
    feat = pl.pallas_call(
        kernel,
        out_shape=jax.ShapeDtypeStruct((N, chans[-1]), jnp.float32),
        in_specs=in_specs,
        out_specs=vmem,
        compiler_params=pltpu.CompilerParams(vmem_limit_bytes=32 * 1024 * 1024),
    )(*ins)
    return feat[:, :, None, None]                                 # (N, feat, 1, 1)


# ---------------- matched-precision pure-JAX reference (for verification) ----------------
def _ref_block(x, w, gamma, beta, pool):
    y = jax.lax.conv_general_dilated(
        x.astype(_MXU_DTYPE), w.astype(_MXU_DTYPE),
        window_strides=(1, 1), padding="SAME",
        dimension_numbers=("NHWC", "HWIO", "NHWC"),
        preferred_element_type=jnp.float32)
    mean = jnp.mean(y, axis=(0, 1, 2), keepdims=True)
    var = jnp.mean(jnp.square(y - mean), axis=(0, 1, 2), keepdims=True)
    y = (y - mean) * jax.lax.rsqrt(var + EPS) * gamma.reshape(1, 1, 1, -1) \
        + beta.reshape(1, 1, 1, -1)
    y = jnp.maximum(y, 0.0)
    if pool == "max":
        return jax.lax.reduce_window(y, -jnp.inf, jax.lax.max,
                                     (1, 2, 2, 1), (1, 2, 2, 1), "VALID")
    return jnp.mean(y, axis=(1, 2))


def _ref_forward(x_nchw, params):
    """Same quantization points as the kernel (bf16 MXU operands, f32 accum/BN)."""
    x = jnp.transpose(x_nchw, (0, 2, 3, 1))
    x = _ref_block(x, params["w1"], params["g1"], params["b1"], "max")
    x = _ref_block(x, params["w2"], params["g2"], params["b2"], "max")
    x = _ref_block(x, params["w3"], params["g3"], params["b3"], "max")
    feat = _ref_block(x, params["w4"], params["g4"], params["b4"], "avg")
    return feat[:, :, None, None]


# -------------------- deterministic parameter construction --------------------
def make_params(key, in_channels, feature_dim):
    chans = [(in_channels, 64), (64, 128), (128, 128), (128, feature_dim)]
    params = {}
    for i, (cin, cout) in enumerate(chans, start=1):
        key, kw, kg, kb = jax.random.split(key, 4)
        fan_in = cin * 9
        scale = jnp.sqrt(2.0 / fan_in)                            # kaiming-like
        params[f"w{i}"] = (jax.random.normal(kw, (3, 3, cin, cout), jnp.float32)
                           * scale)                               # HWIO
        params[f"g{i}"] = 1.0 + 0.1 * jax.random.normal(kg, (cout,), jnp.float32)
        params[f"b{i}"] = 0.1 * jax.random.normal(kb, (cout,), jnp.float32)
    return params


if __name__ == "__main__":
    in_channels = 4
    feature_dim = 256
    N, H, W = 2, 16, 16

    key = jax.random.PRNGKey(0)
    key, kx = jax.random.split(key)
    x = jax.random.normal(kx, (N, in_channels, H, W), jnp.float32)  # NCHW input
    params = make_params(key, in_channels, feature_dim)

    out = jax.block_until_ready(dual_branch_cnn_forward(x, params))
    assert out.shape == (N, feature_dim, 1, 1), out.shape

    ref = jax.block_until_ready(_ref_forward(x, params))
    assert jnp.allclose(out, ref, atol=2e-3, rtol=2e-3), \
        float(jnp.max(jnp.abs(out - ref)))

    print("KERNEL_OK")
</pallas_src>

<mosaic_0001>
module attributes {stable_mosaic.version = 11 : i64} {
  func.func @_fused_kernel(%arg0: memref<2x16x16x4xbf16, #tpu.memory_space<vmem>>, %arg1: memref<9x4x64xbf16, #tpu.memory_space<vmem>>, %arg2: memref<1x64xf32, #tpu.memory_space<vmem>>, %arg3: memref<1x64xf32, #tpu.memory_space<vmem>>, %arg4: memref<9x64x128xbf16, #tpu.memory_space<vmem>>, %arg5: memref<1x128xf32, #tpu.memory_space<vmem>>, %arg6: memref<1x128xf32, #tpu.memory_space<vmem>>, %arg7: memref<9x128x128xbf16, #tpu.memory_space<vmem>>, %arg8: memref<1x128xf32, #tpu.memory_space<vmem>>, %arg9: memref<1x128xf32, #tpu.memory_space<vmem>>, %arg10: memref<9x128x256xbf16, #tpu.memory_space<vmem>>, %arg11: memref<1x256xf32, #tpu.memory_space<vmem>>, %arg12: memref<1x256xf32, #tpu.memory_space<vmem>>, %arg13: memref<2x256xf32, #tpu.memory_space<vmem>>) attributes {dimension_semantics = [], scalar_prefetch = 0 : i64, scratch_operands = 0 : i64, tpu.core_type = #tpu.core_type<tc>} {
    %c0 = arith.constant 0 : index
    %c0_0 = arith.constant 0 : index
    %c0_1 = arith.constant 0 : index
    %c0_2 = arith.constant 0 : index
    %0 = vector.load %arg0[%c0, %c0_0, %c0_1, %c0_2] : memref<2x16x16x4xbf16, #tpu.memory_space<vmem>>, vector<2x16x16x4xbf16>
    %c0_3 = arith.constant 0 : index
    %c0_4 = arith.constant 0 : index
    %1 = vector.load %arg2[%c0_3, %c0_4] : memref<1x64xf32, #tpu.memory_space<vmem>>, vector<1x64xf32>
    %c0_5 = arith.constant 0 : index
    %c0_6 = arith.constant 0 : index
    %2 = vector.load %arg3[%c0_5, %c0_6] : memref<1x64xf32, #tpu.memory_space<vmem>>, vector<1x64xf32>
    %cst = arith.constant 0.000000e+00 : bf16
    %3 = vector.broadcast %cst : bf16 to vector<2x16x1x4xbf16>
    %4 = vector.extract_strided_slice %0 {offsets = [0, 0, 0, 0], sizes = [2, 16, 15, 4], strides = [1, 1, 1, 1]} : vector<2x16x16x4xbf16> to vector<2x16x15x4xbf16>
    %5 = tpu.concatenate %3, %4 in 2 : vector<2x16x1x4xbf16>, vector<2x16x15x4xbf16> -> vector<2x16x16x4xbf16>
    %cst_7 = arith.constant 0.000000e+00 : bf16
    %6 = vector.broadcast %cst_7 : bf16 to vector<2x16x1x4xbf16>
    %7 = vector.extract_strided_slice %0 {offsets = [0, 0, 1, 0], sizes = [2, 16, 15, 4], strides = [1, 1, 1, 1]} : vector<2x16x16x4xbf16> to vector<2x16x15x4xbf16>
    %8 = tpu.concatenate %7, %6 in 2 : vector<2x16x15x4xbf16>, vector<2x16x1x4xbf16> -> vector<2x16x16x4xbf16>
    %cst_8 = arith.constant 0.000000e+00 : f32
    %9 = vector.broadcast %cst_8 : f32 to vector<512x64xf32>
    %cst_9 = arith.constant 0.000000e+00 : bf16
    %10 = vector.broadcast %cst_9 : bf16 to vector<2x1x16x4xbf16>
    %11 = vector.extract_strided_slice %5 {offsets = [0, 0, 0, 0], sizes = [2, 15, 16, 4], strides = [1, 1, 1, 1]} : vector<2x16x16x4xbf16> to vector<2x15x16x4xbf16>
    %12 = tpu.concatenate %10, %11 in 1 : vector<2x1x16x4xbf16>, vector<2x15x16x4xbf16> -> vector<2x16x16x4xbf16>
    %13 = vector.shape_cast %12 : vector<2x16x16x4xbf16> to vector<512x4xbf16>
    %c0_10 = arith.constant 0 : index
    %c0_11 = arith.constant 0 : index
    %c0_12 = arith.constant 0 : index
    %14 = vector.load %arg1[%c0_10, %c0_11, %c0_12] : memref<9x4x64xbf16, #tpu.memory_space<vmem>>, vector<1x4x64xbf16>
    %15 = vector.shape_cast %14 : vector<1x4x64xbf16> to vector<4x64xbf16>
    %cst_13 = arith.constant dense<0.000000e+00> : vector<512x64xf32>
    %16 = tpu.matmul %13, %15, %cst_13 {dimension_numbers = #tpu.dot_dimension_numbers<[1], [0], [0], [1], [0, 0, 1, 1], [], []>} : vector<512x4xbf16>, vector<4x64xbf16>, vector<512x64xf32> -> vector<512x64xf32>
    %17 = arith.addf %9, %16 : vector<512x64xf32>
    %cst_14 = arith.constant 0.000000e+00 : bf16
    %18 = vector.broadcast %cst_14 : bf16 to vector<2x1x16x4xbf16>
    %19 = vector.extract_strided_slice %0 {offsets = [0, 0, 0, 0], sizes = [2, 15, 16, 4], strides = [1, 1, 1, 1]} : vector<2x16x16x4xbf16> to vector<2x15x16x4xbf16>
    %20 = tpu.concatenate %18, %19 in 1 : vector<2x1x16x4xbf16>, vector<2x15x16x4xbf16> -> vector<2x16x16x4xbf16>
    %21 = vector.shape_cast %20 : vector<2x16x16x4xbf16> to vector<512x4xbf16>
    %c1 = arith.constant 1 : index
    %c0_15 = arith.constant 0 : index
    %c0_16 = arith.constant 0 : index
    %22 = vector.load %arg1[%c1, %c0_15, %c0_16] : memref<9x4x64xbf16, #tpu.memory_space<vmem>>, vector<1x4x64xbf16>
    %23 = vector.shape_cast %22 : vector<1x4x64xbf16> to vector<4x64xbf16>
    %cst_17 = arith.constant dense<0.000000e+00> : vector<512x64xf32>
    %24 = tpu.matmul %21, %23, %cst_17 {dimension_numbers = #tpu.dot_dimension_numbers<[1], [0], [0], [1], [0, 0, 1, 1], [], []>} : vector<512x4xbf16>, vector<4x64xbf16>, vector<512x64xf32> -> vector<512x64xf32>
    %25 = arith.addf %17, %24 : vector<512x64xf32>
    %cst_18 = arith.constant 0.000000e+00 : bf16
    %26 = vector.broadcast %cst_18 : bf16 to vector<2x1x16x4xbf16>
    %27 = vector.extract_strided_slice %8 {offsets = [0, 0, 0, 0], sizes = [2, 15, 16, 4], strides = [1, 1, 1, 1]} : vector<2x16x16x4xbf16> to vector<2x15x16x4xbf16>
    %28 = tpu.concatenate %26, %27 in 1 : vector<2x1x16x4xbf16>, vector<2x15x16x4xbf16> -> vector<2x16x16x4xbf16>
    %29 = vector.shape_cast %28 : vector<2x16x16x4xbf16> to vector<512x4xbf16>
    %c2 = arith.constant 2 : index
    %c0_19 = arith.constant 0 : index
    %c0_20 = arith.constant 0 : index
    %30 = vector.load %arg1[%c2, %c0_19, %c0_20] : memref<9x4x64xbf16, #tpu.memory_space<vmem>>, vector<1x4x64xbf16>
    %31 = vector.shape_cast %30 : vector<1x4x64xbf16> to vector<4x64xbf16>
    %cst_21 = arith.constant dense<0.000000e+00> : vector<512x64xf32>
    %32 = tpu.matmul %29, %31, %cst_21 {dimension_numbers = #tpu.dot_dimension_numbers<[1], [0], [0], [1], [0, 0, 1, 1], [], []>} : vector<512x4xbf16>, vector<4x64xbf16>, vector<512x64xf32> -> vector<512x64xf32>
    %33 = arith.addf %25, %32 : vector<512x64xf32>
    %34 = vector.shape_cast %5 : vector<2x16x16x4xbf16> to vector<512x4xbf16>
    %c3 = arith.constant 3 : index
    %c0_22 = arith.constant 0 : index
    %c0_23 = arith.constant 0 : index
    %35 = vector.load %arg1[%c3, %c0_22, %c0_23] : memref<9x4x64xbf16, #tpu.memory_space<vmem>>, vector<1x4x64xbf16>
    %36 = vector.shape_cast %35 : vector<1x4x64xbf16> to vector<4x64xbf16>
    %cst_24 = arith.constant dense<0.000000e+00> : vector<512x64xf32>
    %37 = tpu.matmul %34, %36, %cst_24 {dimension_numbers = #tpu.dot_dimension_numbers<[1], [0], [0], [1], [0, 0, 1, 1], [], []>} : vector<512x4xbf16>, vector<4x64xbf16>, vector<512x64xf32> -> vector<512x64xf32>
    %38 = arith.addf %33, %37 : vector<512x64xf32>
    %39 = vector.shape_cast %0 : vector<2x16x16x4xbf16> to vector<512x4xbf16>
    %c4 = arith.constant 4 : index
    %c0_25 = arith.constant 0 : index
    %c0_26 = arith.constant 0 : index
    %40 = vector.load %arg1[%c4, %c0_25, %c0_26] : memref<9x4x64xbf16, #tpu.memory_space<vmem>>, vector<1x4x64xbf16>
    %41 = vector.shape_cast %40 : vector<1x4x64xbf16> to vector<4x64xbf16>
    %cst_27 = arith.constant dense<0.000000e+00> : vector<512x64xf32>
    %42 = tpu.matmul %39, %41, %cst_27 {dimension_numbers = #tpu.dot_dimension_numbers<[1], [0], [0], [1], [0, 0, 1, 1], [], []>} : vector<512x4xbf16>, vector<4x64xbf16>, vector<512x64xf32> -> vector<512x64xf32>
    %43 = arith.addf %38, %42 : vector<512x64xf32>
    %44 = vector.shape_cast %8 : vector<2x16x16x4xbf16> to vector<512x4xbf16>
    %c5 = arith.constant 5 : index
    %c0_28 = arith.constant 0 : index
    %c0_29 = arith.constant 0 : index
    %45 = vector.load %arg1[%c5, %c0_28, %c0_29] : memref<9x4x64xbf16, #tpu.memory_space<vmem>>, vector<1x4x64xbf16>
    %46 = vector.shape_cast %45 : vector<1x4x64xbf16> to vector<4x64xbf16>
    %cst_30 = arith.constant dense<0.000000e+00> : vector<512x64xf32>
    %47 = tpu.matmul %44, %46, %cst_30 {dimension_numbers = #tpu.dot_dimension_numbers<[1], [0], [0], [1], [0, 0, 1, 1], [], []>} : vector<512x4xbf16>, vector<4x64xbf16>, vector<512x64xf32> -> vector<512x64xf32>
    %48 = arith.addf %43, %47 : vector<512x64xf32>
    %cst_31 = arith.constant 0.000000e+00 : bf16
    %49 = vector.broadcast %cst_31 : bf16 to vector<2x1x16x4xbf16>
    %50 = vector.extract_strided_slice %5 {offsets = [0, 1, 0, 0], sizes = [2, 15, 16, 4], strides = [1, 1, 1, 1]} : vector<2x16x16x4xbf16> to vector<2x15x16x4xbf16>
    %51 = tpu.concatenate %50, %49 in 1 : vector<2x15x16x4xbf16>, vector<2x1x16x4xbf16> -> vector<2x16x16x4xbf16>
    %52 = vector.shape_cast %51 : vector<2x16x16x4xbf16> to vector<512x4xbf16>
    %c6 = arith.constant 6 : index
    %c0_32 = arith.constant 0 : index
    %c0_33 = arith.constant 0 : index
    %53 = vector.load %arg1[%c6, %c0_32, %c0_33] : memref<9x4x64xbf16, #tpu.memory_space<vmem>>, vector<1x4x64xbf16>
    %54 = vector.shape_cast %53 : vector<1x4x64xbf16> to vector<4x64xbf16>
    %cst_34 = arith.constant dense<0.000000e+00> : vector<512x64xf32>
    %55 = tpu.matmul %52, %54, %cst_34 {dimension_numbers = #tpu.dot_dimension_numbers<[1], [0], [0], [1], [0, 0, 1, 1], [], []>} : vector<512x4xbf16>, vector<4x64xbf16>, vector<512x64xf32> -> vector<512x64xf32>
    %56 = arith.addf %48, %55 : vector<512x64xf32>
    %cst_35 = arith.constant 0.000000e+00 : bf16
    %57 = vector.broadcast %cst_35 : bf16 to vector<2x1x16x4xbf16>
    %58 = vector.extract_strided_slice %0 {offsets = [0, 1, 0, 0], sizes = [2, 15, 16, 4], strides = [1, 1, 1, 1]} : vector<2x16x16x4xbf16> to vector<2x15x16x4xbf16>
    %59 = tpu.concatenate %58, %57 in 1 : vector<2x15x16x4xbf16>, vector<2x1x16x4xbf16> -> vector<2x16x16x4xbf16>
    %60 = vector.shape_cast %59 : vector<2x16x16x4xbf16> to vector<512x4xbf16>
    %c7 = arith.constant 7 : index
    %c0_36 = arith.constant 0 : index
    %c0_37 = arith.constant 0 : index
    %61 = vector.load %arg1[%c7, %c0_36, %c0_37] : memref<9x4x64xbf16, #tpu.memory_space<vmem>>, vector<1x4x64xbf16>
    %62 = vector.shape_cast %61 : vector<1x4x64xbf16> to vector<4x64xbf16>
    %cst_38 = arith.constant dense<0.000000e+00> : vector<512x64xf32>
    %63 = tpu.matmul %60, %62, %cst_38 {dimension_numbers = #tpu.dot_dimension_numbers<[1], [0], [0], [1], [0, 0, 1, 1], [], []>} : vector<512x4xbf16>, vector<4x64xbf16>, vector<512x64xf32> -> vector<512x64xf32>
    %64 = arith.addf %56, %63 : vector<512x64xf32>
    %cst_39 = arith.constant 0.000000e+00 : bf16
    %65 = vector.broadcast %cst_39 : bf16 to vector<2x1x16x4xbf16>
    %66 = vector.extract_strided_slice %8 {offsets = [0, 1, 0, 0], sizes = [2, 15, 16, 4], strides = [1, 1, 1, 1]} : vector<2x16x16x4xbf16> to vector<2x15x16x4xbf16>
    %67 = tpu.concatenate %66, %65 in 1 : vector<2x15x16x4xbf16>, vector<2x1x16x4xbf16> -> vector<2x16x16x4xbf16>
    %68 = vector.shape_cast %67 : vector<2x16x16x4xbf16> to vector<512x4xbf16>
    %c8 = arith.constant 8 : index
    %c0_40 = arith.constant 0 : index
    %c0_41 = arith.constant 0 : index
    %69 = vector.load %arg1[%c8, %c0_40, %c0_41] : memref<9x4x64xbf16, #tpu.memory_space<vmem>>, vector<1x4x64xbf16>
    %70 = vector.shape_cast %69 : vector<1x4x64xbf16> to vector<4x64xbf16>
    %cst_42 = arith.constant dense<0.000000e+00> : vector<512x64xf32>
    %71 = tpu.matmul %68, %70, %cst_42 {dimension_numbers = #tpu.dot_dimension_numbers<[1], [0], [0], [1], [0, 0, 1, 1], [], []>} : vector<512x4xbf16>, vector<4x64xbf16>, vector<512x64xf32> -> vector<512x64xf32>
    %72 = arith.addf %64, %71 : vector<512x64xf32>
    %cst_43 = arith.constant dense<0.000000e+00> : vector<64xf32>
    %73 = vector.multi_reduction <add>, %72, %cst_43 [0] : vector<512x64xf32> to vector<64xf32>
    %74 = vector.shape_cast %73 : vector<64xf32> to vector<1x64xf32>
    %cst_44 = arith.constant 0.001953125 : f32
    %75 = vector.broadcast %cst_44 : f32 to vector<1x64xf32>
    %76 = arith.mulf %74, %75 : vector<1x64xf32>
    %77 = arith.mulf %72, %72 : vector<512x64xf32>
    %cst_45 = arith.constant dense<0.000000e+00> : vector<64xf32>
    %78 = vector.multi_reduction <add>, %77, %cst_45 [0] : vector<512x64xf32> to vector<64xf32>
    %79 = vector.shape_cast %78 : vector<64xf32> to vector<1x64xf32>
    %cst_46 = arith.constant 0.001953125 : f32
    %80 = vector.broadcast %cst_46 : f32 to vector<1x64xf32>
    %81 = arith.mulf %79, %80 : vector<1x64xf32>
    %82 = arith.mulf %76, %76 : vector<1x64xf32>
    %83 = arith.subf %81, %82 : vector<1x64xf32>
    %cst_47 = arith.constant 9.99999974E-6 : f32
    %84 = vector.broadcast %cst_47 : f32 to vector<1x64xf32>
    %85 = arith.addf %83, %84 : vector<1x64xf32>
    %86 = math.rsqrt %85 : vector<1x64xf32>
    %87 = arith.mulf %1, %86 : vector<1x64xf32>
    %88 = arith.mulf %76, %87 : vector<1x64xf32>
    %89 = arith.subf %2, %88 : vector<1x64xf32>
    %90 = vector.broadcast %87 : vector<1x64xf32> to vector<512x64xf32>
    %91 = arith.mulf %72, %90 : vector<512x64xf32>
    %92 = vector.broadcast %89 : vector<1x64xf32> to vector<512x64xf32>
    %93 = arith.addf %91, %92 : vector<512x64xf32>
    %cst_48 = arith.constant 0.000000e+00 : f32
    %94 = vector.broadcast %cst_48 : f32 to vector<512x64xf32>
    %95 = arith.maximumf %93, %94 : vector<512x64xf32>
    %96 = vector.shape_cast %95 : vector<512x64xf32> to vector<2x16x16x64xf32>
    %97 = vector.shape_cast %96 : vector<2x16x16x64xf32> to vector<2x8x2x16x64xf32>
    %cst_49 = arith.constant dense<0xFF800000> : vector<2x8x16x64xf32>
    %98 = vector.multi_reduction <maximumf>, %97, %cst_49 [2] : vector<2x8x2x16x64xf32> to vector<2x8x16x64xf32>
    %99 = vector.shape_cast %98 : vector<2x8x16x64xf32> to vector<2x8x8x2x64xf32>
    %cst_50 = arith.constant dense<0xFF800000> : vector<2x8x8x64xf32>
    %100 = vector.multi_reduction <maximumf>, %99, %cst_50 [3] : vector<2x8x8x2x64xf32> to vector<2x8x8x64xf32>
    %101 = arith.truncf %100 : vector<2x8x8x64xf32> to vector<2x8x8x64xbf16>
    %c0_51 = arith.constant 0 : index
    %c0_52 = arith.constant 0 : index
    %102 = vector.load %arg5[%c0_51, %c0_52] : memref<1x128xf32, #tpu.memory_space<vmem>>, vector<1x128xf32>
    %c0_53 = arith.constant 0 : index
    %c0_54 = arith.constant 0 : index
    %103 = vector.load %arg6[%c0_53, %c0_54] : memref<1x128xf32, #tpu.memory_space<vmem>>, vector<1x128xf32>
    %cst_55 = arith.constant 0.000000e+00 : bf16
    %104 = vector.broadcast %cst_55 : bf16 to vector<2x8x1x64xbf16>
    %105 = vector.extract_strided_slice %101 {offsets = [0, 0, 0, 0], sizes = [2, 8, 7, 64], strides = [1, 1, 1, 1]} : vector<2x8x8x64xbf16> to vector<2x8x7x64xbf16>
    %106 = tpu.concatenate %104, %105 in 2 : vector<2x8x1x64xbf16>, vector<2x8x7x64xbf16> -> vector<2x8x8x64xbf16>
    %cst_56 = arith.constant 0.000000e+00 : bf16
    %107 = vector.broadcast %cst_56 : bf16 to vector<2x8x1x64xbf16>
    %108 = vector.extract_strided_slice %101 {offsets = [0, 0, 1, 0], sizes = [2, 8, 7, 64], strides = [1, 1, 1, 1]} : vector<2x8x8x64xbf16> to vector<2x8x7x64xbf16>
    %109 = tpu.concatenate %108, %107 in 2 : vector<2x8x7x64xbf16>, vector<2x8x1x64xbf16> -> vector<2x8x8x64xbf16>
    %cst_57 = arith.constant 0.000000e+00 : f32
    %110 = vector.broadcast %cst_57 : f32 to vector<128x128xf32>
    %cst_58 = arith.constant 0.000000e+00 : bf16
    %111 = vector.broadcast %cst_58 : bf16 to vector<2x1x8x64xbf16>
    %112 = vector.extract_strided_slice %106 {offsets = [0, 0, 0, 0], sizes = [2, 7, 8, 64], strides = [1, 1, 1, 1]} : vector<2x8x8x64xbf16> to vector<2x7x8x64xbf16>
    %113 = tpu.concatenate %111, %112 in 1 : vector<2x1x8x64xbf16>, vector<2x7x8x64xbf16> -> vector<2x8x8x64xbf16>
    %114 = vector.shape_cast %113 : vector<2x8x8x64xbf16> to vector<128x64xbf16>
    %c0_59 = arith.constant 0 : index
    %c0_60 = arith.constant 0 : index
    %c0_61 = arith.constant 0 : index
    %115 = vector.load %arg4[%c0_59, %c0_60, %c0_61] : memref<9x64x128xbf16, #tpu.memory_space<vmem>>, vector<1x64x128xbf16>
    %116 = vector.shape_cast %115 : vector<1x64x128xbf16> to vector<64x128xbf16>
    %cst_62 = arith.constant dense<0.000000e+00> : vector<128x128xf32>
    %117 = tpu.matmul %114, %116, %cst_62 {dimension_numbers = #tpu.dot_dimension_numbers<[1], [0], [0], [1], [0, 0, 1, 1], [], []>} : vector<128x64xbf16>, vector<64x128xbf16>, vector<128x128xf32> -> vector<128x128xf32>
    %118 = arith.addf %110, %117 : vector<128x128xf32>
    %cst_63 = arith.constant 0.000000e+00 : bf16
    %119 = vector.broadcast %cst_63 : bf16 to vector<2x1x8x64xbf16>
    %120 = vector.extract_strided_slice %101 {offsets = [0, 0, 0, 0], sizes = [2, 7, 8, 64], strides = [1, 1, 1, 1]} : vector<2x8x8x64xbf16> to vector<2x7x8x64xbf16>
    %121 = tpu.concatenate %119, %120 in 1 : vector<2x1x8x64xbf16>, vector<2x7x8x64xbf16> -> vector<2x8x8x64xbf16>
    %122 = vector.shape_cast %121 : vector<2x8x8x64xbf16> to vector<128x64xbf16>
    %c1_64 = arith.constant 1 : index
    %c0_65 = arith.constant 0 : index
    %c0_66 = arith.constant 0 : index
    %123 = vector.load %arg4[%c1_64, %c0_65, %c0_66] : memref<9x64x128xbf16, #tpu.memory_space<vmem>>, vector<1x64x128xbf16>
    %124 = vector.shape_cast %123 : vector<1x64x128xbf16> to vector<64x128xbf16>
    %cst_67 = arith.constant dense<0.000000e+00> : vector<128x128xf32>
    %125 = tpu.matmul %122, %124, %cst_67 {dimension_numbers = #tpu.dot_dimension_numbers<[1], [0], [0], [1], [0, 0, 1, 1], [], []>} : vector<128x64xbf16>, vector<64x128xbf16>, vector<128x128xf32> -> vector<128x128xf32>
    %126 = arith.addf %118, %125 : vector<128x128xf32>
    %cst_68 = arith.constant 0.000000e+00 : bf16
    %127 = vector.broadcast %cst_68 : bf16 to vector<2x1x8x64xbf16>
    %128 = vector.extract_strided_slice %109 {offsets = [0, 0, 0, 0], sizes = [2, 7, 8, 64], strides = [1, 1, 1, 1]} : vector<2x8x8x64xbf16> to vector<2x7x8x64xbf16>
    %129 = tpu.concatenate %127, %128 in 1 : vector<2x1x8x64xbf16>, vector<2x7x8x64xbf16> -> vector<2x8x8x64xbf16>
    %130 = vector.shape_cast %129 : vector<2x8x8x64xbf16> to vector<128x64xbf16>
    %c2_69 = arith.constant 2 : index
    %c0_70 = arith.constant 0 : index
    %c0_71 = arith.constant 0 : index
    %131 = vector.load %arg4[%c2_69, %c0_70, %c0_71] : memref<9x64x128xbf16, #tpu.memory_space<vmem>>, vector<1x64x128xbf16>
    %132 = vector.shape_cast %131 : vector<1x64x128xbf16> to vector<64x128xbf16>
    %cst_72 = arith.constant dense<0.000000e+00> : vector<128x128xf32>
    %133 = tpu.matmul %130, %132, %cst_72 {dimension_numbers = #tpu.dot_dimension_numbers<[1], [0], [0], [1], [0, 0, 1, 1], [], []>} : vector<128x64xbf16>, vector<64x128xbf16>, vector<128x128xf32> -> vector<128x128xf32>
    %134 = arith.addf %126, %133 : vector<128x128xf32>
    %135 = vector.shape_cast %106 : vector<2x8x8x64xbf16> to vector<128x64xbf16>
    %c3_73 = arith.constant 3 : index
    %c0_74 = arith.constant 0 : index
    %c0_75 = arith.constant 0 : index
    %136 = vector.load %arg4[%c3_73, %c0_74, %c0_75] : memref<9x64x128xbf16, #tpu.memory_space<vmem>>, vector<1x64x128xbf16>
    %137 = vector.shape_cast %136 : vector<1x64x128xbf16> to vector<64x128xbf16>
    %cst_76 = arith.constant dense<0.000000e+00> : vector<128x128xf32>
    %138 = tpu.matmul %135, %137, %cst_76 {dimension_numbers = #tpu.dot_dimension_numbers<[1], [0], [0], [1], [0, 0, 1, 1], [], []>} : vector<128x64xbf16>, vector<64x128xbf16>, vector<128x128xf32> -> vector<128x128xf32>
    %139 = arith.addf %134, %138 : vector<128x128xf32>
    %140 = vector.shape_cast %101 : vector<2x8x8x64xbf16> to vector<128x64xbf16>
    %c4_77 = arith.constant 4 : index
    %c0_78 = arith.constant 0 : index
    %c0_79 = arith.constant 0 : index
    %141 = vector.load %arg4[%c4_77, %c0_78, %c0_79] : memref<9x64x128xbf16, #tpu.memory_space<vmem>>, vector<1x64x128xbf16>
    %142 = vector.shape_cast %141 : vector<1x64x128xbf16> to vector<64x128xbf16>
    %cst_80 = arith.constant dense<0.000000e+00> : vector<128x128xf32>
    %143 = tpu.matmul %140, %142, %cst_80 {dimension_numbers = #tpu.dot_dimension_numbers<[1], [0], [0], [1], [0, 0, 1, 1], [], []>} : vector<128x64xbf16>, vector<64x128xbf16>, vector<128x128xf32> -> vector<128x128xf32>
    %144 = arith.addf %139, %143 : vector<128x128xf32>
    %145 = vector.shape_cast %109 : vector<2x8x8x64xbf16> to vector<128x64xbf16>
    %c5_81 = arith.constant 5 : index
    %c0_82 = arith.constant 0 : index
    %c0_83 = arith.constant 0 : index
    %146 = vector.load %arg4[%c5_81, %c0_82, %c0_83] : memref<9x64x128xbf16, #tpu.memory_space<vmem>>, vector<1x64x128xbf16>
    %147 = vector.shape_cast %146 : vector<1x64x128xbf16> to vector<64x128xbf16>
    %cst_84 = arith.constant dense<0.000000e+00> : vector<128x128xf32>
    %148 = tpu.matmul %145, %147, %cst_84 {dimension_numbers = #tpu.dot_dimension_numbers<[1], [0], [0], [1], [0, 0, 1, 1], [], []>} : vector<128x64xbf16>, vector<64x128xbf16>, vector<128x128xf32> -> vector<128x128xf32>
    %149 = arith.addf %144, %148 : vector<128x128xf32>
    %cst_85 = arith.constant 0.000000e+00 : bf16
    %150 = vector.broadcast %cst_85 : bf16 to vector<2x1x8x64xbf16>
    %151 = vector.extract_strided_slice %106 {offsets = [0, 1, 0, 0], sizes = [2, 7, 8, 64], strides = [1, 1, 1, 1]} : vector<2x8x8x64xbf16> to vector<2x7x8x64xbf16>
    %152 = tpu.concatenate %151, %150 in 1 : vector<2x7x8x64xbf16>, vector<2x1x8x64xbf16> -> vector<2x8x8x64xbf16>
    %153 = vector.shape_cast %152 : vector<2x8x8x64xbf16> to vector<128x64xbf16>
    %c6_86 = arith.constant 6 : index
    %c0_87 = arith.constant 0 : index
    %c0_88 = arith.constant 0 : index
    %154 = vector.load %arg4[%c6_86, %c0_87, %c0_88] : memref<9x64x128xbf16, #tpu.memory_space<vmem>>, vector<1x64x128xbf16>
    %155 = vector.shape_cast %154 : vector<1x64x128xbf16> to vector<64x128xbf16>
    %cst_89 = arith.constant dense<0.000000e+00> : vector<128x128xf32>
    %156 = tpu.matmul %153, %155, %cst_89 {dimension_numbers = #tpu.dot_dimension_numbers<[1], [0], [0], [1], [0, 0, 1, 1], [], []>} : vector<128x64xbf16>, vector<64x128xbf16>, vector<128x128xf32> -> vector<128x128xf32>
    %157 = arith.addf %149, %156 : vector<128x128xf32>
    %cst_90 = arith.constant 0.000000e+00 : bf16
    %158 = vector.broadcast %cst_90 : bf16 to vector<2x1x8x64xbf16>
    %159 = vector.extract_strided_slice %101 {offsets = [0, 1, 0, 0], sizes = [2, 7, 8, 64], strides = [1, 1, 1, 1]} : vector<2x8x8x64xbf16> to vector<2x7x8x64xbf16>
    %160 = tpu.concatenate %159, %158 in 1 : vector<2x7x8x64xbf16>, vector<2x1x8x64xbf16> -> vector<2x8x8x64xbf16>
    %161 = vector.shape_cast %160 : vector<2x8x8x64xbf16> to vector<128x64xbf16>
    %c7_91 = arith.constant 7 : index
    %c0_92 = arith.constant 0 : index
    %c0_93 = arith.constant 0 : index
    %162 = vector.load %arg4[%c7_91, %c0_92, %c0_93] : memref<9x64x128xbf16, #tpu.memory_space<vmem>>, vector<1x64x128xbf16>
    %163 = vector.shape_cast %162 : vector<1x64x128xbf16> to vector<64x128xbf16>
    %cst_94 = arith.constant dense<0.000000e+00> : vector<128x128xf32>
    %164 = tpu.matmul %161, %163, %cst_94 {dimension_numbers = #tpu.dot_dimension_numbers<[1], [0], [0], [1], [0, 0, 1, 1], [], []>} : vector<128x64xbf16>, vector<64x128xbf16>, vector<128x128xf32> -> vector<128x128xf32>
    %165 = arith.addf %157, %164 : vector<128x128xf32>
    %cst_95 = arith.constant 0.000000e+00 : bf16
    %166 = vector.broadcast %cst_95 : bf16 to vector<2x1x8x64xbf16>
    %167 = vector.extract_strided_slice %109 {offsets = [0, 1, 0, 0], sizes = [2, 7, 8, 64], strides = [1, 1, 1, 1]} : vector<2x8x8x64xbf16> to vector<2x7x8x64xbf16>
    %168 = tpu.concatenate %167, %166 in 1 : vector<2x7x8x64xbf16>, vector<2x1x8x64xbf16> -> vector<2x8x8x64xbf16>
    %169 = vector.shape_cast %168 : vector<2x8x8x64xbf16> to vector<128x64xbf16>
    %c8_96 = arith.constant 8 : index
    %c0_97 = arith.constant 0 : index
    %c0_98 = arith.constant 0 : index
    %170 = vector.load %arg4[%c8_96, %c0_97, %c0_98] : memref<9x64x128xbf16, #tpu.memory_space<vmem>>, vector<1x64x128xbf16>
    %171 = vector.shape_cast %170 : vector<1x64x128xbf16> to vector<64x128xbf16>
    %cst_99 = arith.constant dense<0.000000e+00> : vector<128x128xf32>
    %172 = tpu.matmul %169, %171, %cst_99 {dimension_numbers = #tpu.dot_dimension_numbers<[1], [0], [0], [1], [0, 0, 1, 1], [], []>} : vector<128x64xbf16>, vector<64x128xbf16>, vector<128x128xf32> -> vector<128x128xf32>
    %173 = arith.addf %165, %172 : vector<128x128xf32>
    %cst_100 = arith.constant dense<0.000000e+00> : vector<128xf32>
    %174 = vector.multi_reduction <add>, %173, %cst_100 [0] : vector<128x128xf32> to vector<128xf32>
    %175 = vector.shape_cast %174 : vector<128xf32> to vector<1x128xf32>
    %cst_101 = arith.constant 7.812500e-03 : f32
    %176 = vector.broadcast %cst_101 : f32 to vector<1x128xf32>
    %177 = arith.mulf %175, %176 : vector<1x128xf32>
    %178 = arith.mulf %173, %173 : vector<128x128xf32>
    %cst_102 = arith.constant dense<0.000000e+00> : vector<128xf32>
    %179 = vector.multi_reduction <add>, %178, %cst_102 [0] : vector<128x128xf32> to vector<128xf32>
    %180 = vector.shape_cast %179 : vector<128xf32> to vector<1x128xf32>
    %cst_103 = arith.constant 7.812500e-03 : f32
    %181 = vector.broadcast %cst_103 : f32 to vector<1x128xf32>
    %182 = arith.mulf %180, %181 : vector<1x128xf32>
    %183 = arith.mulf %177, %177 : vector<1x128xf32>
    %184 = arith.subf %182, %183 : vector<1x128xf32>
    %cst_104 = arith.constant 9.99999974E-6 : f32
    %185 = vector.broadcast %cst_104 : f32 to vector<1x128xf32>
    %186 = arith.addf %184, %185 : vector<1x128xf32>
    %187 = math.rsqrt %186 : vector<1x128xf32>
    %188 = arith.mulf %102, %187 : vector<1x128xf32>
    %189 = arith.mulf %177, %188 : vector<1x128xf32>
    %190 = arith.subf %103, %189 : vector<1x128xf32>
    %191 = vector.broadcast %188 : vector<1x128xf32> to vector<128x128xf32>
    %192 = arith.mulf %173, %191 : vector<128x128xf32>
    %193 = vector.broadcast %190 : vector<1x128xf32> to vector<128x128xf32>
    %194 = arith.addf %192, %193 : vector<128x128xf32>
    %cst_105 = arith.constant 0.000000e+00 : f32
    %195 = vector.broadcast %cst_105 : f32 to vector<128x128xf32>
    %196 = arith.maximumf %194, %195 : vector<128x128xf32>
    %197 = vector.shape_cast %196 : vector<128x128xf32> to vector<2x8x8x128xf32>
    %198 = vector.shape_cast %197 : vector<2x8x8x128xf32> to vector<2x4x2x8x128xf32>
    %cst_106 = arith.constant dense<0xFF800000> : vector<2x4x8x128xf32>
    %199 = vector.multi_reduction <maximumf>, %198, %cst_106 [2] : vector<2x4x2x8x128xf32> to vector<2x4x8x128xf32>
    %200 = vector.shape_cast %199 : vector<2x4x8x128xf32> to vector<2x4x4x2x128xf32>
    %cst_107 = arith.constant dense<0xFF800000> : vector<2x4x4x128xf32>
    %201 = vector.multi_reduction <maximumf>, %200, %cst_107 [3] : vector<2x4x4x2x128xf32> to vector<2x4x4x128xf32>
    %202 = arith.truncf %201 : vector<2x4x4x128xf32> to vector<2x4x4x128xbf16>
    %c0_108 = arith.constant 0 : index
    %c0_109 = arith.constant 0 : index
    %203 = vector.load %arg8[%c0_108, %c0_109] : memref<1x128xf32, #tpu.memory_space<vmem>>, vector<1x128xf32>
    %c0_110 = arith.constant 0 : index
    %c0_111 = arith.constant 0 : index
    %204 = vector.load %arg9[%c0_110, %c0_111] : memref<1x128xf32, #tpu.memory_space<vmem>>, vector<1x128xf32>
    %cst_112 = arith.constant 0.000000e+00 : bf16
    %205 = vector.broadcast %cst_112 : bf16 to vector<2x4x1x128xbf16>
    %206 = vector.extract_strided_slice %202 {offsets = [0, 0, 0, 0], sizes = [2, 4, 3, 128], strides = [1, 1, 1, 1]} : vector<2x4x4x128xbf16> to vector<2x4x3x128xbf16>
    %207 = tpu.concatenate %205, %206 in 2 : vector<2x4x1x128xbf16>, vector<2x4x3x128xbf16> -> vector<2x4x4x128xbf16>
    %cst_113 = arith.constant 0.000000e+00 : bf16
    %208 = vector.broadcast %cst_113 : bf16 to vector<2x4x1x128xbf16>
    %209 = vector.extract_strided_slice %202 {offsets = [0, 0, 1, 0], sizes = [2, 4, 3, 128], strides = [1, 1, 1, 1]} : vector<2x4x4x128xbf16> to vector<2x4x3x128xbf16>
    %210 = tpu.concatenate %209, %208 in 2 : vector<2x4x3x128xbf16>, vector<2x4x1x128xbf16> -> vector<2x4x4x128xbf16>
    %cst_114 = arith.constant 0.000000e+00 : f32
    %211 = vector.broadcast %cst_114 : f32 to vector<32x128xf32>
    %cst_115 = arith.constant 0.000000e+00 : bf16
    %212 = vector.broadcast %cst_115 : bf16 to vector<2x1x4x128xbf16>
    %213 = vector.extract_strided_slice %207 {offsets = [0, 0, 0, 0], sizes = [2, 3, 4, 128], strides = [1, 1, 1, 1]} : vector<2x4x4x128xbf16> to vector<2x3x4x128xbf16>
    %214 = tpu.concatenate %212, %213 in 1 : vector<2x1x4x128xbf16>, vector<2x3x4x128xbf16> -> vector<2x4x4x128xbf16>
    %215 = vector.shape_cast %214 : vector<2x4x4x128xbf16> to vector<32x128xbf16>
    %c0_116 = arith.constant 0 : index
    %c0_117 = arith.constant 0 : index
    %c0_118 = arith.constant 0 : index
    %216 = vector.load %arg7[%c0_116, %c0_117, %c0_118] : memref<9x128x128xbf16, #tpu.memory_space<vmem>>, vector<1x128x128xbf16>
    %217 = vector.shape_cast %216 : vector<1x128x128xbf16> to vector<128x128xbf16>
    %cst_119 = arith.constant dense<0.000000e+00> : vector<32x128xf32>
    %218 = tpu.matmul %215, %217, %cst_119 {dimension_numbers = #tpu.dot_dimension_numbers<[1], [0], [0], [1], [0, 0, 1, 1], [], []>} : vector<32x128xbf16>, vector<128x128xbf16>, vector<32x128xf32> -> vector<32x128xf32>
    %219 = arith.addf %211, %218 : vector<32x128xf32>
    %cst_120 = arith.constant 0.000000e+00 : bf16
    %220 = vector.broadcast %cst_120 : bf16 to vector<2x1x4x128xbf16>
    %221 = vector.extract_strided_slice %202 {offsets = [0, 0, 0, 0], sizes = [2, 3, 4, 128], strides = [1, 1, 1, 1]} : vector<2x4x4x128xbf16> to vector<2x3x4x128xbf16>
    %222 = tpu.concatenate %220, %221 in 1 : vector<2x1x4x128xbf16>, vector<2x3x4x128xbf16> -> vector<2x4x4x128xbf16>
    %223 = vector.shape_cast %222 : vector<2x4x4x128xbf16> to vector<32x128xbf16>
    %c1_121 = arith.constant 1 : index
    %c0_122 = arith.constant 0 : index
    %c0_123 = arith.constant 0 : index
    %224 = vector.load %arg7[%c1_121, %c0_122, %c0_123] : memref<9x128x128xbf16, #tpu.memory_space<vmem>>, vector<1x128x128xbf16>
    %225 = vector.shape_cast %224 : vector<1x128x128xbf16> to vector<128x128xbf16>
    %cst_124 = arith.constant dense<0.000000e+00> : vector<32x128xf32>
    %226 = tpu.matmul %223, %225, %cst_124 {dimension_numbers = #tpu.dot_dimension_numbers<[1], [0], [0], [1], [0, 0, 1, 1], [], []>} : vector<32x128xbf16>, vector<128x128xbf16>, vector<32x128xf32> -> vector<32x128xf32>
    %227 = arith.addf %219, %226 : vector<32x128xf32>
    %cst_125 = arith.constant 0.000000e+00 : bf16
    %228 = vector.broadcast %cst_125 : bf16 to vector<2x1x4x128xbf16>
    %229 = vector.extract_strided_slice %210 {offsets = [0, 0, 0, 0], sizes = [2, 3, 4, 128], strides = [1, 1, 1, 1]} : vector<2x4x4x128xbf16> to vector<2x3x4x128xbf16>
    %230 = tpu.concatenate %228, %229 in 1 : vector<2x1x4x128xbf16>, vector<2x3x4x128xbf16> -> vector<2x4x4x128xbf16>
    %231 = vector.shape_cast %230 : vector<2x4x4x128xbf16> to vector<32x128xbf16>
    %c2_126 = arith.constant 2 : index
    %c0_127 = arith.constant 0 : index
    %c0_128 = arith.constant 0 : index
    %232 = vector.load %arg7[%c2_126, %c0_127, %c0_128] : memref<9x128x128xbf16, #tpu.memory_space<vmem>>, vector<1x128x128xbf16>
    %233 = vector.shape_cast %232 : vector<1x128x128xbf16> to vector<128x128xbf16>
    %cst_129 = arith.constant dense<0.000000e+00> : vector<32x128xf32>
    %234 = tpu.matmul %231, %233, %cst_129 {dimension_numbers = #tpu.dot_dimension_numbers<[1], [0], [0], [1], [0, 0, 1, 1], [], []>} : vector<32x128xbf16>, vector<128x128xbf16>, vector<32x128xf32> -> vector<32x128xf32>
    %235 = arith.addf %227, %234 : vector<32x128xf32>
    %236 = vector.shape_cast %207 : vector<2x4x4x128xbf16> to vector<32x128xbf16>
    %c3_130 = arith.constant 3 : index
    %c0_131 = arith.constant 0 : index
    %c0_132 = arith.constant 0 : index
    %237 = vector.load %arg7[%c3_130, %c0_131, %c0_132] : memref<9x128x128xbf16, #tpu.memory_space<vmem>>, vector<1x128x128xbf16>
    %238 = vector.shape_cast %237 : vector<1x128x128xbf16> to vector<128x128xbf16>
    %cst_133 = arith.constant dense<0.000000e+00> : vector<32x128xf32>
    %239 = tpu.matmul %236, %238, %cst_133 {dimension_numbers = #tpu.dot_dimension_numbers<[1], [0], [0], [1], [0, 0, 1, 1], [], []>} : vector<32x128xbf16>, vector<128x128xbf16>, vector<32x128xf32> -> vector<32x128xf32>
    %240 = arith.addf %235, %239 : vector<32x128xf32>
    %241 = vector.shape_cast %202 : vector<2x4x4x128xbf16> to vector<32x128xbf16>
    %c4_134 = arith.constant 4 : index
    %c0_135 = arith.constant 0 : index
    %c0_136 = arith.constant 0 : index
    %242 = vector.load %arg7[%c4_134, %c0_135, %c0_136] : memref<9x128x128xbf16, #tpu.memory_space<vmem>>, vector<1x128x128xbf16>
    %243 = vector.shape_cast %242 : vector<1x128x128xbf16> to vector<128x128xbf16>
    %cst_137 = arith.constant dense<0.000000e+00> : vector<32x128xf32>
    %244 = tpu.matmul %241, %243, %cst_137 {dimension_numbers = #tpu.dot_dimension_numbers<[1], [0], [0], [1], [0, 0, 1, 1], [], []>} : vector<32x128xbf16>, vector<128x128xbf16>, vector<32x128xf32> -> vector<32x128xf32>
    %245 = arith.addf %240, %244 : vector<32x128xf32>
    %246 = vector.shape_cast %210 : vector<2x4x4x128xbf16> to vector<32x128xbf16>
    %c5_138 = arith.constant 5 : index
    %c0_139 = arith.constant 0 : index
    %c0_140 = arith.constant 0 : index
    %247 = vector.load %arg7[%c5_138, %c0_139, %c0_140] : memref<9x128x128xbf16, #tpu.memory_space<vmem>>, vector<1x128x128xbf16>
    %248 = vector.shape_cast %247 : vector<1x128x128xbf16> to vector<128x128xbf16>
    %cst_141 = arith.constant dense<0.000000e+00> : vector<32x128xf32>
    %249 = tpu.matmul %246, %248, %cst_141 {dimension_numbers = #tpu.dot_dimension_numbers<[1], [0], [0], [1], [0, 0, 1, 1], [], []>} : vector<32x128xbf16>, vector<128x128xbf16>, vector<32x128xf32> -> vector<32x128xf32>
    %250 = arith.addf %245, %249 : vector<32x128xf32>
    %cst_142 = arith.constant 0.000000e+00 : bf16
    %251 = vector.broadcast %cst_142 : bf16 to vector<2x1x4x128xbf16>
    %252 = vector.extract_strided_slice %207 {offsets = [0, 1, 0, 0], sizes = [2, 3, 4, 128], strides = [1, 1, 1, 1]} : vector<2x4x4x128xbf16> to vector<2x3x4x128xbf16>
    %253 = tpu.concatenate %252, %251 in 1 : vector<2x3x4x128xbf16>, vector<2x1x4x128xbf16> -> vector<2x4x4x128xbf16>
    %254 = vector.shape_cast %253 : vector<2x4x4x128xbf16> to vector<32x128xbf16>
    %c6_143 = arith.constant 6 : index
    %c0_144 = arith.constant 0 : index
    %c0_145 = arith.constant 0 : index
    %255 = vector.load %arg7[%c6_143, %c0_144, %c0_145] : memref<9x128x128xbf16, #tpu.memory_space<vmem>>, vector<1x128x128xbf16>
    %256 = vector.shape_cast %255 : vector<1x128x128xbf16> to vector<128x128xbf16>
    %cst_146 = arith.constant dense<0.000000e+00> : vector<32x128xf32>
    %257 = tpu.matmul %254, %256, %cst_146 {dimension_numbers = #tpu.dot_dimension_numbers<[1], [0], [0], [1], [0, 0, 1, 1], [], []>} : vector<32x128xbf16>, vector<128x128xbf16>, vector<32x128xf32> -> vector<32x128xf32>
    %258 = arith.addf %250, %257 : vector<32x128xf32>
    %cst_147 = arith.constant 0.000000e+00 : bf16
    %259 = vector.broadcast %cst_147 : bf16 to vector<2x1x4x128xbf16>
    %260 = vector.extract_strided_slice %202 {offsets = [0, 1, 0, 0], sizes = [2, 3, 4, 128], strides = [1, 1, 1, 1]} : vector<2x4x4x128xbf16> to vector<2x3x4x128xbf16>
    %261 = tpu.concatenate %260, %259 in 1 : vector<2x3x4x128xbf16>, vector<2x1x4x128xbf16> -> vector<2x4x4x128xbf16>
    %262 = vector.shape_cast %261 : vector<2x4x4x128xbf16> to vector<32x128xbf16>
    %c7_148 = arith.constant 7 : index
    %c0_149 = arith.constant 0 : index
    %c0_150 = arith.constant 0 : index
    %263 = vector.load %arg7[%c7_148, %c0_149, %c0_150] : memref<9x128x128xbf16, #tpu.memory_space<vmem>>, vector<1x128x128xbf16>
    %264 = vector.shape_cast %263 : vector<1x128x128xbf16> to vector<128x128xbf16>
    %cst_151 = arith.constant dense<0.000000e+00> : vector<32x128xf32>
    %265 = tpu.matmul %262, %264, %cst_151 {dimension_numbers = #tpu.dot_dimension_numbers<[1], [0], [0], [1], [0, 0, 1, 1], [], []>} : vector<32x128xbf16>, vector<128x128xbf16>, vector<32x128xf32> -> vector<32x128xf32>
    %266 = arith.addf %258, %265 : vector<32x128xf32>
    %cst_152 = arith.constant 0.000000e+00 : bf16
    %267 = vector.broadcast %cst_152 : bf16 to vector<2x1x4x128xbf16>
    %268 = vector.extract_strided_slice %210 {offsets = [0, 1, 0, 0], sizes = [2, 3, 4, 128], strides = [1, 1, 1, 1]} : vector<2x4x4x128xbf16> to vector<2x3x4x128xbf16>
    %269 = tpu.concatenate %268, %267 in 1 : vector<2x3x4x128xbf16>, vector<2x1x4x128xbf16> -> vector<2x4x4x128xbf16>
    %270 = vector.shape_cast %269 : vector<2x4x4x128xbf16> to vector<32x128xbf16>
    %c8_153 = arith.constant 8 : index
    %c0_154 = arith.constant 0 : index
    %c0_155 = arith.constant 0 : index
    %271 = vector.load %arg7[%c8_153, %c0_154, %c0_155] : memref<9x128x128xbf16, #tpu.memory_space<vmem>>, vector<1x128x128xbf16>
    %272 = vector.shape_cast %271 : vector<1x128x128xbf16> to vector<128x128xbf16>
    %cst_156 = arith.constant dense<0.000000e+00> : vector<32x128xf32>
    %273 = tpu.matmul %270, %272, %cst_156 {dimension_numbers = #tpu.dot_dimension_numbers<[1], [0], [0], [1], [0, 0, 1, 1], [], []>} : vector<32x128xbf16>, vector<128x128xbf16>, vector<32x128xf32> -> vector<32x128xf32>
    %274 = arith.addf %266, %273 : vector<32x128xf32>
    %cst_157 = arith.constant dense<0.000000e+00> : vector<128xf32>
    %275 = vector.multi_reduction <add>, %274, %cst_157 [0] : vector<32x128xf32> to vector<128xf32>
    %276 = vector.shape_cast %275 : vector<128xf32> to vector<1x128xf32>
    %cst_158 = arith.constant 3.125000e-02 : f32
    %277 = vector.broadcast %cst_158 : f32 to vector<1x128xf32>
    %278 = arith.mulf %276, %277 : vector<1x128xf32>
    %279 = arith.mulf %274, %274 : vector<32x128xf32>
    %cst_159 = arith.constant dense<0.000000e+00> : vector<128xf32>
    %280 = vector.multi_reduction <add>, %279, %cst_159 [0] : vector<32x128xf32> to vector<128xf32>
    %281 = vector.shape_cast %280 : vector<128xf32> to vector<1x128xf32>
    %cst_160 = arith.constant 3.125000e-02 : f32
    %282 = vector.broadcast %cst_160 : f32 to vector<1x128xf32>
    %283 = arith.mulf %281, %282 : vector<1x128xf32>
    %284 = arith.mulf %278, %278 : vector<1x128xf32>
    %285 = arith.subf %283, %284 : vector<1x128xf32>
    %cst_161 = arith.constant 9.99999974E-6 : f32
    %286 = vector.broadcast %cst_161 : f32 to vector<1x128xf32>
    %287 = arith.addf %285, %286 : vector<1x128xf32>
    %288 = math.rsqrt %287 : vector<1x128xf32>
    %289 = arith.mulf %203, %288 : vector<1x128xf32>
    %290 = arith.mulf %278, %289 : vector<1x128xf32>
    %291 = arith.subf %204, %290 : vector<1x128xf32>
    %292 = vector.broadcast %289 : vector<1x128xf32> to vector<32x128xf32>
    %293 = arith.mulf %274, %292 : vector<32x128xf32>
    %294 = vector.broadcast %291 : vector<1x128xf32> to vector<32x128xf32>
    %295 = arith.addf %293, %294 : vector<32x128xf32>
    %cst_162 = arith.constant 0.000000e+00 : f32
    %296 = vector.broadcast %cst_162 : f32 to vector<32x128xf32>
    %297 = arith.maximumf %295, %296 : vector<32x128xf32>
    %298 = vector.shape_cast %297 : vector<32x128xf32> to vector<2x4x4x128xf32>
    %299 = vector.shape_cast %298 : vector<2x4x4x128xf32> to vector<2x2x2x4x128xf32>
    %cst_163 = arith.constant dense<0xFF800000> : vector<2x2x4x128xf32>
    %300 = vector.multi_reduction <maximumf>, %299, %cst_163 [2] : vector<2x2x2x4x128xf32> to vector<2x2x4x128xf32>
    %301 = vector.shape_cast %300 : vector<2x2x4x128xf32> to vector<2x2x2x2x128xf32>
    %cst_164 = arith.constant dense<0xFF800000> : vector<2x2x2x128xf32>
    %302 = vector.multi_reduction <maximumf>, %301, %cst_164 [3] : vector<2x2x2x2x128xf32> to vector<2x2x2x128xf32>
    %303 = arith.truncf %302 : vector<2x2x2x128xf32> to vector<2x2x2x128xbf16>
    %c0_165 = arith.constant 0 : index
    %c0_166 = arith.constant 0 : index
    %304 = vector.load %arg11[%c0_165, %c0_166] : memref<1x256xf32, #tpu.memory_space<vmem>>, vector<1x256xf32>
    %c0_167 = arith.constant 0 : index
    %c0_168 = arith.constant 0 : index
    %305 = vector.load %arg12[%c0_167, %c0_168] : memref<1x256xf32, #tpu.memory_space<vmem>>, vector<1x256xf32>
    %cst_169 = arith.constant 0.000000e+00 : bf16
    %306 = vector.broadcast %cst_169 : bf16 to vector<2x2x1x128xbf16>
    %307 = vector.extract_strided_slice %303 {offsets = [0, 0, 0, 0], sizes = [2, 2, 1, 128], strides = [1, 1, 1, 1]} : vector<2x2x2x128xbf16> to vector<2x2x1x128xbf16>
    %308 = tpu.concatenate %306, %307 in 2 : vector<2x2x1x128xbf16>, vector<2x2x1x128xbf16> -> vector<2x2x2x128xbf16>
    %cst_170 = arith.constant 0.000000e+00 : bf16
    %309 = vector.broadcast %cst_170 : bf16 to vector<2x2x1x128xbf16>
    %310 = vector.extract_strided_slice %303 {offsets = [0, 0, 1, 0], sizes = [2, 2, 1, 128], strides = [1, 1, 1, 1]} : vector<2x2x2x128xbf16> to vector<2x2x1x128xbf16>
    %311 = tpu.concatenate %310, %309 in 2 : vector<2x2x1x128xbf16>, vector<2x2x1x128xbf16> -> vector<2x2x2x128xbf16>
    %cst_171 = arith.constant 0.000000e+00 : f32
    %312 = vector.broadcast %cst_171 : f32 to vector<8x256xf32>
    %cst_172 = arith.constant 0.000000e+00 : bf16
    %313 = vector.broadcast %cst_172 : bf16 to vector<2x1x2x128xbf16>
    %314 = vector.extract_strided_slice %308 {offsets = [0, 0, 0, 0], sizes = [2, 1, 2, 128], strides = [1, 1, 1, 1]} : vector<2x2x2x128xbf16> to vector<2x1x2x128xbf16>
    %315 = tpu.concatenate %313, %314 in 1 : vector<2x1x2x128xbf16>, vector<2x1x2x128xbf16> -> vector<2x2x2x128xbf16>
    %316 = vector.shape_cast %315 : vector<2x2x2x128xbf16> to vector<8x128xbf16>
    %c0_173 = arith.constant 0 : index
    %c0_174 = arith.constant 0 : index
    %c0_175 = arith.constant 0 : index
    %317 = vector.load %arg10[%c0_173, %c0_174, %c0_175] : memref<9x128x256xbf16, #tpu.memory_space<vmem>>, vector<1x128x256xbf16>
    %318 = vector.shape_cast %317 : vector<1x128x256xbf16> to vector<128x256xbf16>
    %cst_176 = arith.constant dense<0.000000e+00> : vector<8x256xf32>
    %319 = tpu.matmul %316, %318, %cst_176 {dimension_numbers = #tpu.dot_dimension_numbers<[1], [0], [0], [1], [0, 0, 1, 1], [], []>} : vector<8x128xbf16>, vector<128x256xbf16>, vector<8x256xf32> -> vector<8x256xf32>
    %320 = arith.addf %312, %319 : vector<8x256xf32>
    %cst_177 = arith.constant 0.000000e+00 : bf16
    %321 = vector.broadcast %cst_177 : bf16 to vector<2x1x2x128xbf16>
    %322 = vector.extract_strided_slice %303 {offsets = [0, 0, 0, 0], sizes = [2, 1, 2, 128], strides = [1, 1, 1, 1]} : vector<2x2x2x128xbf16> to vector<2x1x2x128xbf16>
    %323 = tpu.concatenate %321, %322 in 1 : vector<2x1x2x128xbf16>, vector<2x1x2x128xbf16> -> vector<2x2x2x128xbf16>
    %324 = vector.shape_cast %323 : vector<2x2x2x128xbf16> to vector<8x128xbf16>
    %c1_178 = arith.constant 1 : index
    %c0_179 = arith.constant 0 : index
    %c0_180 = arith.constant 0 : index
    %325 = vector.load %arg10[%c1_178, %c0_179, %c0_180] : memref<9x128x256xbf16, #tpu.memory_space<vmem>>, vector<1x128x256xbf16>
    %326 = vector.shape_cast %325 : vector<1x128x256xbf16> to vector<128x256xbf16>
    %cst_181 = arith.constant dense<0.000000e+00> : vector<8x256xf32>
    %327 = tpu.matmul %324, %326, %cst_181 {dimension_numbers = #tpu.dot_dimension_numbers<[1], [0], [0], [1], [0, 0, 1, 1], [], []>} : vector<8x128xbf16>, vector<128x256xbf16>, vector<8x256xf32> -> vector<8x256xf32>
    %328 = arith.addf %320, %327 : vector<8x256xf32>
    %cst_182 = arith.constant 0.000000e+00 : bf16
    %329 = vector.broadcast %cst_182 : bf16 to vector<2x1x2x128xbf16>
    %330 = vector.extract_strided_slice %311 {offsets = [0, 0, 0, 0], sizes = [2, 1, 2, 128], strides = [1, 1, 1, 1]} : vector<2x2x2x128xbf16> to vector<2x1x2x128xbf16>
    %331 = tpu.concatenate %329, %330 in 1 : vector<2x1x2x128xbf16>, vector<2x1x2x128xbf16> -> vector<2x2x2x128xbf16>
    %332 = vector.shape_cast %331 : vector<2x2x2x128xbf16> to vector<8x128xbf16>
    %c2_183 = arith.constant 2 : index
    %c0_184 = arith.constant 0 : index
    %c0_185 = arith.constant 0 : index
    %333 = vector.load %arg10[%c2_183, %c0_184, %c0_185] : memref<9x128x256xbf16, #tpu.memory_space<vmem>>, vector<1x128x256xbf16>
    %334 = vector.shape_cast %333 : vector<1x128x256xbf16> to vector<128x256xbf16>
    %cst_186 = arith.constant dense<0.000000e+00> : vector<8x256xf32>
    %335 = tpu.matmul %332, %334, %cst_186 {dimension_numbers = #tpu.dot_dimension_numbers<[1], [0], [0], [1], [0, 0, 1, 1], [], []>} : vector<8x128xbf16>, vector<128x256xbf16>, vector<8x256xf32> -> vector<8x256xf32>
    %336 = arith.addf %328, %335 : vector<8x256xf32>
    %337 = vector.shape_cast %308 : vector<2x2x2x128xbf16> to vector<8x128xbf16>
    %c3_187 = arith.constant 3 : index
    %c0_188 = arith.constant 0 : index
    %c0_189 = arith.constant 0 : index
    %338 = vector.load %arg10[%c3_187, %c0_188, %c0_189] : memref<9x128x256xbf16, #tpu.memory_space<vmem>>, vector<1x128x256xbf16>
    %339 = vector.shape_cast %338 : vector<1x128x256xbf16> to vector<128x256xbf16>
    %cst_190 = arith.constant dense<0.000000e+00> : vector<8x256xf32>
    %340 = tpu.matmul %337, %339, %cst_190 {dimension_numbers = #tpu.dot_dimension_numbers<[1], [0], [0], [1], [0, 0, 1, 1], [], []>} : vector<8x128xbf16>, vector<128x256xbf16>, vector<8x256xf32> -> vector<8x256xf32>
    %341 = arith.addf %336, %340 : vector<8x256xf32>
    %342 = vector.shape_cast %303 : vector<2x2x2x128xbf16> to vector<8x128xbf16>
    %c4_191 = arith.constant 4 : index
    %c0_192 = arith.constant 0 : index
    %c0_193 = arith.constant 0 : index
    %343 = vector.load %arg10[%c4_191, %c0_192, %c0_193] : memref<9x128x256xbf16, #tpu.memory_space<vmem>>, vector<1x128x256xbf16>
    %344 = vector.shape_cast %343 : vector<1x128x256xbf16> to vector<128x256xbf16>
    %cst_194 = arith.constant dense<0.000000e+00> : vector<8x256xf32>
    %345 = tpu.matmul %342, %344, %cst_194 {dimension_numbers = #tpu.dot_dimension_numbers<[1], [0], [0], [1], [0, 0, 1, 1], [], []>} : vector<8x128xbf16>, vector<128x256xbf16>, vector<8x256xf32> -> vector<8x256xf32>
    %346 = arith.addf %341, %345 : vector<8x256xf32>
    %347 = vector.shape_cast %311 : vector<2x2x2x128xbf16> to vector<8x128xbf16>
    %c5_195 = arith.constant 5 : index
    %c0_196 = arith.constant 0 : index
    %c0_197 = arith.constant 0 : index
    %348 = vector.load %arg10[%c5_195, %c0_196, %c0_197] : memref<9x128x256xbf16, #tpu.memory_space<vmem>>, vector<1x128x256xbf16>
    %349 = vector.shape_cast %348 : vector<1x128x256xbf16> to vector<128x256xbf16>
    %cst_198 = arith.constant dense<0.000000e+00> : vector<8x256xf32>
    %350 = tpu.matmul %347, %349, %cst_198 {dimension_numbers = #tpu.dot_dimension_numbers<[1], [0], [0], [1], [0, 0, 1, 1], [], []>} : vector<8x128xbf16>, vector<128x256xbf16>, vector<8x256xf32> -> vector<8x256xf32>
    %351 = arith.addf %346, %350 : vector<8x256xf32>
    %cst_199 = arith.constant 0.000000e+00 : bf16
    %352 = vector.broadcast %cst_199 : bf16 to vector<2x1x2x128xbf16>
    %353 = vector.extract_strided_slice %308 {offsets = [0, 1, 0, 0], sizes = [2, 1, 2, 128], strides = [1, 1, 1, 1]} : vector<2x2x2x128xbf16> to vector<2x1x2x128xbf16>
    %354 = tpu.concatenate %353, %352 in 1 : vector<2x1x2x128xbf16>, vector<2x1x2x128xbf16> -> vector<2x2x2x128xbf16>
    %355 = vector.shape_cast %354 : vector<2x2x2x128xbf16> to vector<8x128xbf16>
    %c6_200 = arith.constant 6 : index
    %c0_201 = arith.constant 0 : index
    %c0_202 = arith.constant 0 : index
    %356 = vector.load %arg10[%c6_200, %c0_201, %c0_202] : memref<9x128x256xbf16, #tpu.memory_space<vmem>>, vector<1x128x256xbf16>
    %357 = vector.shape_cast %356 : vector<1x128x256xbf16> to vector<128x256xbf16>
    %cst_203 = arith.constant dense<0.000000e+00> : vector<8x256xf32>
    %358 = tpu.matmul %355, %357, %cst_203 {dimension_numbers = #tpu.dot_dimension_numbers<[1], [0], [0], [1], [0, 0, 1, 1], [], []>} : vector<8x128xbf16>, vector<128x256xbf16>, vector<8x256xf32> -> vector<8x256xf32>
    %359 = arith.addf %351, %358 : vector<8x256xf32>
    %cst_204 = arith.constant 0.000000e+00 : bf16
    %360 = vector.broadcast %cst_204 : bf16 to vector<2x1x2x128xbf16>
    %361 = vector.extract_strided_slice %303 {offsets = [0, 1, 0, 0], sizes = [2, 1, 2, 128], strides = [1, 1, 1, 1]} : vector<2x2x2x128xbf16> to vector<2x1x2x128xbf16>
    %362 = tpu.concatenate %361, %360 in 1 : vector<2x1x2x128xbf16>, vector<2x1x2x128xbf16> -> vector<2x2x2x128xbf16>
    %363 = vector.shape_cast %362 : vector<2x2x2x128xbf16> to vector<8x128xbf16>
    %c7_205 = arith.constant 7 : index
    %c0_206 = arith.constant 0 : index
    %c0_207 = arith.constant 0 : index
    %364 = vector.load %arg10[%c7_205, %c0_206, %c0_207] : memref<9x128x256xbf16, #tpu.memory_space<vmem>>, vector<1x128x256xbf16>
    %365 = vector.shape_cast %364 : vector<1x128x256xbf16> to vector<128x256xbf16>
    %cst_208 = arith.constant dense<0.000000e+00> : vector<8x256xf32>
    %366 = tpu.matmul %363, %365, %cst_208 {dimension_numbers = #tpu.dot_dimension_numbers<[1], [0], [0], [1], [0, 0, 1, 1], [], []>} : vector<8x128xbf16>, vector<128x256xbf16>, vector<8x256xf32> -> vector<8x256xf32>
    %367 = arith.addf %359, %366 : vector<8x256xf32>
    %cst_209 = arith.constant 0.000000e+00 : bf16
    %368 = vector.broadcast %cst_209 : bf16 to vector<2x1x2x128xbf16>
    %369 = vector.extract_strided_slice %311 {offsets = [0, 1, 0, 0], sizes = [2, 1, 2, 128], strides = [1, 1, 1, 1]} : vector<2x2x2x128xbf16> to vector<2x1x2x128xbf16>
    %370 = tpu.concatenate %369, %368 in 1 : vector<2x1x2x128xbf16>, vector<2x1x2x128xbf16> -> vector<2x2x2x128xbf16>
    %371 = vector.shape_cast %370 : vector<2x2x2x128xbf16> to vector<8x128xbf16>
    %c8_210 = arith.constant 8 : index
    %c0_211 = arith.constant 0 : index
    %c0_212 = arith.constant 0 : index
    %372 = vector.load %arg10[%c8_210, %c0_211, %c0_212] : memref<9x128x256xbf16, #tpu.memory_space<vmem>>, vector<1x128x256xbf16>
    %373 = vector.shape_cast %372 : vector<1x128x256xbf16> to vector<128x256xbf16>
    %cst_213 = arith.constant dense<0.000000e+00> : vector<8x256xf32>
    %374 = tpu.matmul %371, %373, %cst_213 {dimension_numbers = #tpu.dot_dimension_numbers<[1], [0], [0], [1], [0, 0, 1, 1], [], []>} : vector<8x128xbf16>, vector<128x256xbf16>, vector<8x256xf32> -> vector<8x256xf32>
    %375 = arith.addf %367, %374 : vector<8x256xf32>
    %cst_214 = arith.constant dense<0.000000e+00> : vector<256xf32>
    %376 = vector.multi_reduction <add>, %375, %cst_214 [0] : vector<8x256xf32> to vector<256xf32>
    %377 = vector.shape_cast %376 : vector<256xf32> to vector<1x256xf32>
    %cst_215 = arith.constant 1.250000e-01 : f32
    %378 = vector.broadcast %cst_215 : f32 to vector<1x256xf32>
    %379 = arith.mulf %377, %378 : vector<1x256xf32>
    %380 = arith.mulf %375, %375 : vector<8x256xf32>
    %cst_216 = arith.constant dense<0.000000e+00> : vector<256xf32>
    %381 = vector.multi_reduction <add>, %380, %cst_216 [0] : vector<8x256xf32> to vector<256xf32>
    %382 = vector.shape_cast %381 : vector<256xf32> to vector<1x256xf32>
    %cst_217 = arith.constant 1.250000e-01 : f32
    %383 = vector.broadcast %cst_217 : f32 to vector<1x256xf32>
    %384 = arith.mulf %382, %383 : vector<1x256xf32>
    %385 = arith.mulf %379, %379 : vector<1x256xf32>
    %386 = arith.subf %384, %385 : vector<1x256xf32>
    %cst_218 = arith.constant 9.99999974E-6 : f32
    %387 = vector.broadcast %cst_218 : f32 to vector<1x256xf32>
    %388 = arith.addf %386, %387 : vector<1x256xf32>
    %389 = math.rsqrt %388 : vector<1x256xf32>
    %390 = arith.mulf %304, %389 : vector<1x256xf32>
    %391 = arith.mulf %379, %390 : vector<1x256xf32>
    %392 = arith.subf %305, %391 : vector<1x256xf32>
    %393 = vector.broadcast %390 : vector<1x256xf32> to vector<8x256xf32>
    %394 = arith.mulf %375, %393 : vector<8x256xf32>
    %395 = vector.broadcast %392 : vector<1x256xf32> to vector<8x256xf32>
    %396 = arith.addf %394, %395 : vector<8x256xf32>
    %cst_219 = arith.constant 0.000000e+00 : f32
    %397 = vector.broadcast %cst_219 : f32 to vector<8x256xf32>
    %398 = arith.maximumf %396, %397 : vector<8x256xf32>
    %399 = vector.shape_cast %398 : vector<8x256xf32> to vector<2x4x256xf32>
    %cst_220 = arith.constant dense<0.000000e+00> : vector<2x256xf32>
    %400 = vector.multi_reduction <add>, %399, %cst_220 [1] : vector<2x4x256xf32> to vector<2x256xf32>
    %cst_221 = arith.constant 4.000000e+00 : f32
    %401 = vector.broadcast %cst_221 : f32 to vector<2x256xf32>
    %402 = arith.divf %400, %401 : vector<2x256xf32>
    %c0_222 = arith.constant 0 : index
    %c0_223 = arith.constant 0 : index
    %403 = vector.load %arg13[%c0_222, %c0_223] : memref<2x256xf32, #tpu.memory_space<vmem>>, vector<2x256xf32>
    tpu.vector_store %arg13[%c0_222, %c0_223], %402 {strides = array<i32>} : memref<2x256xf32, #tpu.memory_space<vmem>>, vector<2x256xf32>,
    return
  }
}

</mosaic_0001>

<bundles_post_ra>
// kernel: dual_branch_cnn_forward.1
= control target key start
LH: loop header
LB: loop body
LE: loop exit
PB: predicated region body
PF: predicated region fallthrough
CT: control target
= control target key end

     0   :  { %vm760_vm0 = vcmask 1041408   ;;  %vm527_vm1 = vcmask 1040384   ;;  %v24224_v1 = vmov 0   ;;  %vm528_vm2 = vsmask.f32 256  ;;  %s24210_s1 = inlined_call_operand.vmem [shape: bf16[9,4,64], index: 1, kind: input, shape index: {}]   ;;  %s24211_s0 = inlined_call_operand.vmem [shape: bf16[2,16,16,4], index: 0, kind: input, shape index: {}]   ;;  %s24212_s4 = inlined_call_operand.vmem [shape: bf16[9,64,128], index: 4, kind: input, shape index: {}]   ;;  %s24213_s2 = inlined_call_operand.vmem [shape: f32[1,64], index: 2, kind: input, shape index: {}]   ;;  %s24214_s3 = inlined_call_operand.vmem [shape: f32[1,64], index: 3, kind: input, shape index: {}]   ;;  %s24215_s7 = inlined_call_operand.vmem [shape: bf16[9,128,128], index: 7, kind: input, shape index: {}]   ;;  %s24216_s5 = inlined_call_operand.vmem [shape: f32[1,128], index: 5, kind: input, shape index: {}]   ;;  %s24217_s6 = inlined_call_operand.vmem [shape: f32[1,128], index: 6, kind: input, shape index: {}]   ;;  %s24218_s10 = inlined_call_operand.vmem [shape: bf16[9,128,256], index: 10, kind: input, shape index: {}]   ;;  %s24219_s8 = inlined_call_operand.vmem [shape: f32[1,128], index: 8, kind: input, shape index: {}]   ;;  %s24220_s9 = inlined_call_operand.vmem [shape: f32[1,128], index: 9, kind: input, shape index: {}]   ;;  %s24221_s11 = inlined_call_operand.vmem [shape: f32[1,256], index: 11, kind: input, shape index: {}]   ;;  %s24222_s12 = inlined_call_operand.vmem [shape: f32[1,256], index: 12, kind: input, shape index: {}]   ;;  %s24223_s13 = inlined_call_operand.vmem [shape: f32[2,256], index: 13, kind: output, shape index: {}]  }
   0x1   :  { %v693_v0 = vld [vmem:[%s24210_s1] sm:$0x3]  ;;  %14410 = vmatprep.mubr.bf16.mxu0 %v24224_v1  ;;  %v12937_v2 = vld [vmem:[%s24210_s1 + $0x4] sm:$0x3]  ;;  %14344 = vmatprep.mubr.bf16.mxu1 %v24224_v1  ;;  %vm696_vm3 = vcmask 31744   ;;  %v16525_v5 = vld [vmem:[%s24211_s0 + $0x8] sm:$0xff]  }
   0x2   :  { %16039 = vmatprep.subr.msk.bf16.mxu0 %vm760_vm0, %v693_v0  ;;  %v16514_v3 = vsel %vm760_vm0, %v693_v0, 0  ;;  %v16519_v4 = vld [vmem:[%s24211_s0] sm:$0xff]   ;;  %24792 = vst [vmem:[#allocation4_spill] sm:$0xff] %v16525_v5  ;;  %v279_v8 = vshrl.u32 %v16525_v5, 16  ;;  %v282_v9 = vshll.u32 %v16525_v5, 16  ;;  %v16535_v10 = vld [vmem:[%s24211_s0 + $0x10] sm:$0xff]   ;;  %vm16543_vm4 = vmand %vm527_vm1, %vm528_vm2 }
   0x3   :  { %24790 = vst [vmem:[#allocation2_spill] sm:$0xff] %v16514_v3  ;;  %24791 = vst [vmem:[#allocation3_spill] sm:$0xff] %v16519_v4  ;;  %14409 = vmatpush3.bf16.msra.mxu0 %v16514_v3  ;;  %v272_v6 = vshrl.u32 %v16519_v4, 16  ;;  %v275_v7 = vshll.u32 %v16519_v4, 16  ;;  %v16540_v11 = vld [vmem:[%s24211_s0 + $0x18] sm:$0xff]   ;;  %v24795_v14 = vmov 0 }
   0x4   :  { %16041 = vmatprep.subr.msk.bf16.mxu0 %vm760_vm0, %v12937_v2  ;;  %24793 = vst [vmem:[#allocation5_spill] sm:$0xff] %v16535_v10  ;;  %24794 = vst [vmem:[#allocation6_spill] sm:$0xff] %v16540_v11  ;;  %v24796_v14 = vsel %vm16543_vm4, 4294967295, %v24795_v14  ;;  %v1528_v15 = vsel %vm760_vm0, %v12937_v2, 0  ;;  %v281_v16 = vrot.slane %v279_v8, 7  ;;  %v286_v17 = vshrl.u32 %v16535_v10, 16 }
   0x5   :  { %v274_v12 = vrot.slane %v272_v6, 7  ;;  %v562_v13 = vrot.slane %v275_v7, 1  ;;  %24797 = vst [vmem:[#allocation7_spill] sm:$0xff] %v24796_v14  ;;  %v293_v18 = vshrl.u32 %v16540_v11, 16  ;;  %v289_v20 = vshll.u32 %v16535_v10, 16  ;;  %v16556_v21 = vld [vmem:[%s24211_s0 + $0x20] sm:$0xff]  }
   0x6   :  { %24798 = vst [vmem:[#allocation8_spill] sm:$0xff] %v16556_v21  ;;  %v284_v23 = vor.u32 %v282_v9, %v281_v16  ;;  %v288_v24 = vrot.slane %v286_v17, 7  ;;  %v296_v26 = vshll.u32 %v16540_v11, 16  ;;  %v16570_v27 = vld [vmem:[%s24211_s0 + $0x28] sm:$0xff]   ;;  %v300_v31 = vshrl.u32 %v16556_v21, 16  ;;  %v16600_v37 = vld [vmem:[%s24211_s0 + $0x30] sm:$0xff]  }
   0x7   :  { %v277_v19 = vor.u32 %v275_v7, %v274_v12  ;;  %v16558_v22 = vor.u32 %v562_v13, %v272_v6  ;;  %v295_v25 = vrot.slane %v293_v18, 7  ;;  %24799 = vst [vmem:[#allocation9_spill] sm:$0xff] %v16570_v27  ;;  %v307_v33 = vshrl.u32 %v16570_v27, 16  ;;  %24800 = vst [vmem:[#allocation10_spill] sm:$0xff] %v16600_v37  ;;  %v16612_v41 = vld [vmem:[%s24211_s0 + $0x38] sm:$0xff]   ;;  %v16623_v46 = vld [vmem:[%s24211_s0 + $0x40] sm:$0xff]  }
   0x8   :  { %v16580_v29 = vsel %vm16543_vm4, 0, %v284_v23  ;;  %v291_v30 = vor.u32 %v289_v20, %v288_v24  ;;  %v302_v35 = vrot.slane %v300_v31, 7  ;;  %v303_v36 = vshll.u32 %v16556_v21, 16  ;;  %24801 = vst [vmem:[#allocation11_spill] sm:$0xff] %v16612_v41  ;;  %24802 = vst [vmem:[#allocation12_spill] sm:$0xff] %v16623_v46  ;;  %v16642_v53 = vld [vmem:[%s24211_s0 + $0x48] sm:$0xff]  }
   0x9   :  { %v16574_v28 = vsel %vm16543_vm4, 0, %v277_v19  ;;  %v298_v32 = vor.u32 %v296_v26, %v295_v25  ;;  %v309_v39 = vrot.slane %v307_v33, 7  ;;  %v310_v40 = vshll.u32 %v16570_v27, 16  ;;  %24803 = vst [vmem:[#allocation13_spill] sm:$0xff] %v16642_v53  ;;  %v16650_v55 = vld [vmem:[%s24211_s0 + $0x50] sm:$0xff]   ;;  %v16658_v59 = vld [vmem:[%s24211_s0 + $0x58] sm:$0xff]  }
   0xa   :  { %14411 = vmatmul.mubr.msk.bf16.vlgmr.msra.gmra.mrb[0].mxu0 %vm696_vm3, %v16574_v28  ;;  %v16592_v34 = vsel %vm16543_vm4, 0, %v291_v30  ;;  %v305_v42 = vor.u32 %v303_v36, %v302_v35  ;;  %v314_v43 = vshrl.u32 %v16600_v37, 16  ;;  %v321_v45 = vshrl.u32 %v16612_v41, 16  ;;  %24804 = vst [vmem:[#allocation14_spill] sm:$0xff] %v16650_v55  ;;  %24805 = vst [vmem:[#allocation15_spill] sm:$0xff] %v16658_v59  ;;  %v16669_v0 = vld [vmem:[%s24211_s0 + $0x60] sm:$0xff]  }
   0xb   :  { %14475 = vmatpush3.bf16.msra.mxu0 %v1528_v15  ;;  %14414 = vmatprep.mubr.msk.bf16.mxu0 %vm696_vm3, %v16580_v29  ;;  %v16604_v38 = vsel %vm16543_vm4, 0, %v298_v32  ;;  %v312_v44 = vor.u32 %v310_v40, %v309_v39  ;;  %v317_v49 = vshll.u32 %v16600_v37, 16  ;;  %v324_v52 = vshll.u32 %v16612_v41, 16  ;;  %24806 = vst [vmem:[#allocation16_spill] sm:$0xff] %v16669_v0  ;;  %v16688_v25 = vld [vmem:[%s24211_s0 + $0x68] sm:$0xff]   ;;  %v16724_v1 = vld [vmem:[%s24211_s0 + $0x80] sm:$0xff]  }
   0xc   :  { %v16627_v47 = vsel %vm16543_vm4, 0, %v305_v42  ;;  %v316_v48 = vrot.slane %v314_v43, 7  ;;  %v323_v51 = vrot.slane %v321_v45, 7  ;;  %v328_v54 = vshrl.u32 %v16623_v46, 16  ;;  %24807 = vst [vmem:[#allocation17_spill] sm:$0xff] %v16688_v25  ;;  %24809 = vst [vmem:[#allocation19_spill] sm:$0xff] %v16724_v1 }
   0xd   :  { %v16634_v50 = vsel %vm16543_vm4, 0, %v312_v44  ;;  %v335_v58 = vshrl.u32 %v16642_v53, 16  ;;  %v331_v61 = vshll.u32 %v16623_v46, 16  ;;  %v342_v62 = vshrl.u32 %v16650_v55, 16  ;;  %v16693_v30 = vld [vmem:[%s24210_s1 + $0x6] sm:$0x3] }
   0xe   :  { %v319_v56 = vor.u32 %v317_v49, %v316_v48  ;;  %v326_v57 = vor.u32 %v324_v52, %v323_v51  ;;  %v330_v60 = vrot.slane %v328_v54, 7  ;;  %v338_v7 = vshll.u32 %v16642_v53, 16  ;;  %16042 = vmatprep.subr.msk.bf16.mxu0 %vm760_vm0, %v16693_v30  ;;  %v16706_v48 = vld [vmem:[%s24211_s0 + $0x70] sm:$0xff]   ;;  %v16863_v11 = vld [vmem:[%s24211_s0 + $0xb8] sm:$0xff]  }
   0xf   :  { %v337_v6 = vrot.slane %v335_v58, 7  ;;  %v349_v12 = vshrl.u32 %v16658_v59, 16  ;;  %v344_v15 = vrot.slane %v342_v62, 7  ;;  %v345_v16 = vshll.u32 %v16650_v55, 16  ;;  %24808 = vst [vmem:[#allocation18_spill] sm:$0xff] %v16706_v48  ;;  %v16838_v55 = vld [vmem:[%s24211_s0 + $0xa8] sm:$0xff]  }
  0x10   :  { %v16664_v63 = vsel %vm16543_vm4, 0, %v319_v56  ;;  %v16673_v2 = vsel %vm16543_vm4, 0, %v326_v57  ;;  %v333_v13 = vor.u32 %v331_v61, %v330_v60  ;;  %v356_v19 = vshrl.u32 %v16669_v0, 16  ;;  %24817 = vst [vmem:[#allocation27_spill] sm:$0xff] %v16838_v55  ;;  %24821 = vst [vmem:[#allocation30_spill] sm:$0xff] %v16863_v11 }
  0x11   :  { %v564_v23 = vrot.slane %v282_v9, 1  ;;  %v340_v24 = vor.u32 %v338_v7, %v337_v6  ;;  %v351_v32 = vrot.slane %v349_v12, 7  ;;  %v352_v35 = vshll.u32 %v16658_v59, 16 }
  0x12   :  { %14415 = vmatmul.mubr.msk.bf16.gmra.mrb[4].mxu0 %vm696_vm3, %v16592_v34  ;;  %v16700_v9 = vsel %vm16543_vm4, 0, %v333_v13  ;;  %v359_v39 = vshll.u32 %v16669_v0, 16  ;;  %v347_v42 = vor.u32 %v345_v16, %v344_v15  ;;  %v358_v44 = vrot.slane %v356_v19, 7 }
  0x13   :  { %14418 = vmatprep.mubr.msk.bf16.mxu0 %vm696_vm3, %v16604_v38  ;;  %v16710_v51 = vor.u32 %v564_v23, %v279_v8  ;;  %v566_v56 = vrot.slane %v289_v20, 1  ;;  %v16716_v57 = vsel %vm16543_vm4, 0, %v340_v24  ;;  %v363_v60 = vshrl.u32 %v16688_v25, 16  ;;  %v24875_v14 = vld [vmem:[#allocation19_spill] sm:$0xff] }
  0x14   :  { %v568_v6 = vrot.slane %v296_v26, 1  ;;  %v570_v13 = vrot.slane %v303_v36, 1  ;;  %v354_v15 = vor.u32 %v352_v35, %v351_v32  ;;  %v572_v20 = vrot.slane %v310_v40, 1 }
  0x15   :  { %v16728_v8 = vor.u32 %v566_v56, %v286_v17  ;;  %v574_v23 = vrot.slane %v317_v49, 1  ;;  %v366_v24 = vshll.u32 %v16688_v25, 16  ;;  %v576_v32 = vrot.slane %v324_v52, 1 }
  0x16   :  { %v16735_v26 = vor.u32 %v568_v6, %v293_v18  ;;  %v16739_v36 = vor.u32 %v570_v13, %v300_v31  ;;  %v370_v17 = vshrl.u32 %v16706_v48, 16  ;;  %v16746_v40 = vor.u32 %v572_v20, %v307_v33 }
  0x17   :  { %v16750_v49 = vor.u32 %v574_v23, %v314_v43  ;;  %v578_v18 = vrot.slane %v331_v61, 1  ;;  %v16754_v56 = vsel %vm16543_vm4, 0, %v347_v42  ;;  %v365_v31 = vrot.slane %v363_v60, 7  ;;  %v16771_v42 = vld [vmem:[%s24211_s0 + $0x88] sm:$0xff]  }
  0x18   :  { %v16758_v52 = vor.u32 %v576_v32, %v321_v45  ;;  %v580_v6 = vrot.slane %v338_v7, 1  ;;  %v16762_v13 = vsel %vm16543_vm4, 0, %v354_v15  ;;  %v373_v33 = vshll.u32 %v16706_v48, 16  ;;  %24811 = vst [vmem:[#allocation21_spill] sm:$0xff] %v16771_v42  ;;  %v16779_v15 = vld [vmem:[%s24211_s0 + $0x90] sm:$0xff]  }
  0x19   :  { %24810 = vst [vmem:[#allocation20_spill] sm:$0xff] %v16762_v13  ;;  %v16765_v20 = vor.u32 %v578_v18, %v328_v54  ;;  %v582_v43 = vrot.slane %v345_v16, 1  ;;  %v387_v61 = vshll.u32 %v16724_v1, 16  ;;  %v584_v45 = vrot.slane %v352_v35, 1  ;;  %24812 = vst [vmem:[#allocation22_spill] sm:$0xff] %v16779_v15 }
  0x1a   :  { %14419 = vmatmul.mubr.msk.bf16.gmra.mrb[8].mxu0 %vm696_vm3, %v16627_v47  ;;  %v16773_v23 = vor.u32 %v580_v6, %v335_v58  ;;  %v586_v7 = vrot.slane %v359_v39, 1  ;;  %v384_v32 = vshrl.u32 %v16724_v1, 16  ;;  %v588_v16 = vrot.slane %v366_v24, 1 }
  0x1b   :  { %14422 = vmatprep.mubr.msk.bf16.mxu0 %vm696_vm3, %v16634_v50  ;;  %v16781_v54 = vor.u32 %v582_v43, %v342_v62  ;;  %v590_v18 = vrot.slane %v373_v33, 1  ;;  %v394_v3 = vshll.u32 %v16771_v42, 16  ;;  %v16784_v48 = vor.u32 %v584_v45, %v349_v12 }
  0x1c   :  { %v16786_v25 = vor.u32 %v586_v7, %v356_v19  ;;  %v594_v58 = vrot.slane %v387_v61, 1  ;;  %v401_v35 = vshll.u32 %v16779_v15, 16  ;;  %v16789_v6 = vor.u32 %v588_v16, %v363_v60 }
  0x1d   :  { %v16791_v1 = vor.u32 %v590_v18, %v370_v17  ;;  %v391_v62 = vshrl.u32 %v16771_v42, 16  ;;  %v596_v0 = vrot.slane %v394_v3, 1  ;;  %v361_v12 = vor.u32 %v359_v39, %v358_v44  ;;  %v16808_v18 = vld [vmem:[%s24211_s0 + $0x98] sm:$0xff]   ;;  %v16817_v39 = vld [vmem:[%s24211_s0 + $0xa0] sm:$0xff]  }
  0x1e   :  { %v16796_v43 = vor.u32 %v594_v58, %v384_v32  ;;  %v398_v19 = vshrl.u32 %v16779_v15, 16  ;;  %v598_v45 = vrot.slane %v401_v35, 1  ;;  %v368_v7 = vor.u32 %v366_v24, %v365_v31  ;;  %24813 = vst [vmem:[#allocation23_spill] sm:$0xff] %v16808_v18  ;;  %24815 = vst [vmem:[#allocation25_spill] sm:$0xff] %v16817_v39 }
  0x1f   :  { %v16801_v60 = vor.u32 %v596_v0, %v391_v62  ;;  %v16812_v58 = vsel %vm16543_vm4, 0, %v361_v12  ;;  %v372_v42 = vrot.slane %v370_v17, 7  ;;  %v408_v44 = vshll.u32 %v16808_v18, 16 }
  0x20   :  { %v16803_v16 = vor.u32 %v598_v45, %v398_v19  ;;  %24814 = vst [vmem:[#allocation24_spill] sm:$0xff] %v16812_v58  ;;  %v16821_v0 = vsel %vm16543_vm4, 0, %v368_v7  ;;  %v415_v24 = vshll.u32 %v16817_v39, 16  ;;  %v405_v31 = vshrl.u32 %v16808_v18, 16 }
  0x21   :  { %24816 = vst [vmem:[#allocation26_spill] sm:$0xff] %v16821_v0  ;;  %v600_v12 = vrot.slane %v408_v44, 1  ;;  %v375_v17 = vor.u32 %v373_v33, %v372_v42  ;;  %v412_v45 = vshrl.u32 %v16817_v39, 16  ;;  %v386_v53 = vrot.slane %v384_v32, 7  ;;  %v16847_v33 = vld [vmem:[%s24211_s0 + $0xb0] sm:$0xff]  }
  0x22   :  { %14423 = vmatmul.mubr.msk.bf16.gmra.mrb[12].mxu0 %vm696_vm3, %v16664_v63  ;;  %v602_v15 = vrot.slane %v415_v24, 1  ;;  %24819 = vst [vmem:[#allocation29_spill] sm:$0xff] %v16847_v33  ;;  %v393_v42 = vrot.slane %v391_v62, 7  ;;  %v419_v39 = vshrl.u32 %v16838_v55, 16  ;;  %v24820_v41 = vmov 0  }
  0x23   :  { %14426 = vmatprep.mubr.msk.bf16.mxu0 %vm696_vm3, %v16673_v2  ;;  %v16831_v59 = vor.u32 %v600_v12, %v405_v31  ;;  %v16842_v18 = vsel %vm16543_vm4, 0, %v375_v17  ;;  %v422_v12 = vshll.u32 %v16838_v55, 16  ;;  %v389_v17 = vor.u32 %v387_v61, %v386_v53  ;;  %v16872_v53 = vld [vmem:[%s24211_s0 + $0xc0] sm:$0xff]  }
  0x24   :  { %v16833_v7 = vor.u32 %v602_v15, %v412_v45  ;;  %24818 = vst [vmem:[#allocation28_spill] sm:$0xff] %v16842_v18  ;;  %v429_v15 = vshll.u32 %v16847_v33, 16  ;;  %v426_v32 = vshrl.u32 %v16847_v33, 16  ;;  %v396_v27 = vor.u32 %v394_v3, %v393_v42 }
  0x25   :  { %v604_v46 = vrot.slane %v422_v12, 1  ;;  %v16867_v55 = vsel %vm16543_vm4, 0, %v389_v17  ;;  %v400_v10 = vrot.slane %v398_v19, 7  ;;  %v443_v61 = vshll.u32 %v16872_v53, 16 }
  0x26   :  { %v606_v37 = vrot.slane %v429_v15, 1  ;;  %24822 = vst [vmem:[#allocation31_spill] sm:$0xff] %v16867_v55  ;;  %v16876_v3 = vsel %vm16543_vm4, 0, %v396_v27  ;;  %v433_v42 = vshrl.u32 %v16863_v11, 16  ;;  %v440_v33 = vshrl.u32 %v16872_v53, 16 }
  0x27   :  { %v16856_v21 = vor.u32 %v604_v46, %v419_v39  ;;  %v436_v46 = vshll.u32 %v16863_v11, 16  ;;  %v403_v17 = vor.u32 %v401_v35, %v400_v10  ;;  %v610_v5 = vrot.slane %v443_v61, 1 }
  0x28   :  { %v16858_v62 = vor.u32 %v606_v37, %v426_v32  ;;  %v407_v37 = vrot.slane %v405_v31, 7  ;;  %vm658_vm5 = vcmask 1047552   ;;  %vm659_vm6 = vsmask.f32 7424 }
  0x29   :  { %v608_v19 = vrot.slane %v436_v46, 1  ;;  %v16888_v31 = vor.u32 %v610_v5, %v440_v33  ;;  %vm16933_vm7 = vmand %vm658_vm5, %vm659_vm6  ;;  %vm4053_vm8 = vcmask 523264   ;;  %vm5397_vm9 = vcmask 517120  }
  0x2a   :  { %14427 = vmatmul.mubr.msk.bf16.gmra.mrb[16].mxu0 %vm696_vm3, %v16700_v9  ;;  %v410_v27 = vor.u32 %v408_v44, %v407_v37  ;;  %v428_v44 = vrot.slane %v426_v32, 7  ;;  %v435_v37 = vrot.slane %v433_v42, 7  ;;  %v16940_v32 = vsel %vm16933_vm7, %v16558_v22, 0 }
  0x2b   :  { %14430 = vmatprep.mubr.msk.bf16.mxu0 %vm696_vm3, %v16716_v57  ;;  %v16886_v4 = vor.u32 %v608_v19, %v433_v42  ;;  %v16952_v42 = vld [vmem:[%s24210_s1 + $0x8] sm:$0x3]  ;;  %v16963_v22 = vsel %vm16933_vm7, %v16728_v8, 0  ;;  %v16982_v8 = vsel %vm16933_vm7, %v16746_v40, 0  ;;  %v17005_v40 = vsel %vm16933_vm7, %v16765_v20, 0 }
  0x2c   :  { %v16896_v11 = vsel %vm16543_vm4, 0, %v410_v27  ;;  %v438_v19 = vor.u32 %v436_v46, %v435_v37  ;;  %v1892_v46 = vsel %vm760_vm0, %v16693_v30, 0  ;;  %v16968_v30 = vsel %vm16933_vm7, %v16735_v26, 0 }
  0x2d   :  { %24824 = vst [vmem:[#allocation33_spill] sm:$0xff] %v16896_v11  ;;  %v16991_v26 = vsel %vm16933_vm7, %v16750_v49, 0  ;;  %v17010_v49 = vsel %vm16933_vm7, %v16773_v23, 0  ;;  %v17024_v20 = vsel %vm16933_vm7, %v16784_v48, 0  ;;  %v17033_v23 = vsel %vm16933_vm7, %v16786_v25, 0 }
  0x2e   :  { %24831 = vst [vmem:[#allocation38_spill] sm:$0xff] %v17010_v49  ;;  %v17047_v48 = vsel %vm16933_vm7, %v16791_v1, 0  ;;  %v17055_v25 = vsel %vm16933_vm7, %v16796_v43, 0  ;;  %v17069_v1 = vsel %vm16933_vm7, %v16803_v16, 0  ;;  %v17074_v43 = vsel %vm16933_vm7, %v16831_v59, 0  ;;  %v17093_v59 = vld [vmem:[%s24211_s0 + $0xc8] sm:$0xff]  }
  0x2f   :  { %v17088_v16 = vsel %vm16933_vm7, %v16856_v21, 0  ;;  %v17108_v21 = vld [vmem:[%s24211_s0 + $0xd0] sm:$0xff]   ;;  %v17113_v27 = vsel %vm16933_vm7, %v16886_v4, 0  ;;  %vm6830_vm10 = vcmask 1041409   ;;  %vm6648_vm11 = vcmask 1042434  }
  0x30   :  { %24833 = vst [vmem:[#allocation40_spill] sm:$0xff] %v17088_v16  ;;  %24835 = vst [vmem:[#allocation42_spill] sm:$0xff] %v17108_v21  ;;  %vm6650_vm12 = vcmask 1043459   ;;  %vm6652_vm13 = vcmask 1044484   ;;  %vm6654_vm14 = vcmask 1045509   ;;  %vm6656_vm15 = vcmask 1046534  }
  0x31   :  { %24836 = vst [vmem:[#allocation43_spill] sm:$0xff] %v17113_v27  ;;  %vm6658_vm1 = vcmask 1047559   ;;  %vm6959_vm2 = vcmask 1043456   ;;  %vm9591_vm6 = vsmask.f32 1280 }
  0x32   :  { %14431 = vmatmul.mubr.msk.bf16.gmra.mrb[20].mxu0 %vm696_vm3, %v16754_v56 }
  0x33   :  { %14434 = vmatprep.mubr.msk.bf16.mxu0 %vm696_vm3, %v16762_v13 }
  0x3a   :  { %14435 = vmatmul.mubr.msk.bf16.gmra.mrb[24].mxu0 %vm696_vm3, %v16812_v58 }
  0x3b   :  { %14438 = vmatprep.mubr.msk.bf16.mxu0 %vm696_vm3, %v16821_v0  ;;  %v421_v0 = vrot.slane %v419_v39, 7  ;;  %v431_v39 = vor.u32 %v429_v15, %v428_v44  ;;  %v24272_v44 = vshll.u32 %v17108_v21, 16 }
  0x3d   :  { %v424_v35 = vor.u32 %v422_v12, %v421_v0  ;;  %v442_v0 = vrot.slane %v440_v33, 7  ;;  %v24899_v33 = vld [vmem:[#allocation2_spill] sm:$0xff] }
  0x3f   :  { %v445_v12 = vor.u32 %v443_v61, %v442_v0  ;;  %v16947_v61 = vsel %vm16933_vm7, %v16710_v51, 0  ;;  %v16977_v51 = vsel %vm16933_vm7, %v16739_v36, 0  ;;  %v16996_v36 = vsel %vm16933_vm7, %v16758_v52, 0 }
  0x40   :  { %v17019_v52 = vsel %vm16933_vm7, %v16781_v54, 0  ;;  %v17038_v54 = vsel %vm16933_vm7, %v16789_v6, 0  ;;  %v17060_v6 = vsel %vm16933_vm7, %v16801_v60, 0  ;;  %v17083_v60 = vsel %vm16933_vm7, %v16833_v7, 0 }
  0x41   :  { %v16928_v15 = vsel %vm16543_vm4, 0, %v445_v12  ;;  %24832 = vst [vmem:[#allocation39_spill] sm:$0xff] %v17019_v52  ;;  %v17103_v7 = vsel %vm16933_vm7, %v16858_v62, 0  ;;  %v17121_v62 = vld [vmem:[%s24211_s0 + $0xd8] sm:$0xff]   ;;  %v614_v0 = vrot.slane %v24272_v44, 1  ;;  %v17142_v12 = vld [vmem:[%s24211_s0 + $0xe0] sm:$0xff]  }
  0x42   :  { %14439 = vmatmul.mubr.msk.bf16.gmra.mrb[28].mxu0 %vm696_vm3, %v16842_v18  ;;  %v16892_v18 = vsel %vm16543_vm4, 0, %v403_v17  ;;  %v24271_v17 = vshll.u32 %v17093_v59, 16  ;;  %24834 = vst [vmem:[#allocation41_spill] sm:$0xff] %v17103_v7  ;;  %24837 = vst [vmem:[#allocation44_spill] sm:$0xff] %v17121_v62  ;;  %v24274_v37 = vshll.u32 %v17121_v62, 16  ;;  %v24281_v44 = vshll.u32 %v17142_v12, 16 }
  0x43   :  { %14442 = vmatprep.mubr.bf16.mxu0 %v24820_v41  ;;  %24823 = vst [vmem:[#allocation32_spill] sm:$0xff] %v16892_v18 }
  0x4a   :  { %14443 = vmatmul.mubr.msk.bf16.gmra.mrb[32].mxu0 %vm696_vm3, %v16867_v55  ;;  %v414_v55 = vrot.slane %v412_v45, 7  ;;  %v16908_v45 = vsel %vm16543_vm4, 0, %v424_v35  ;;  %v612_v35 = vrot.slane %v24271_v17, 1  ;;  %v17154_v17 = vld [vmem:[%s24211_s0 + $0xe8] sm:$0xff]  }
  0x4b   :  { %14446 = vmatprep.mubr.msk.bf16.mxu0 %vm696_vm3, %v16876_v3  ;;  %24826 = vst [vmem:[#allocation35_spill] sm:$0xff] %v16908_v45 }
  0x4c   :  { %v417_v10 = vor.u32 %v415_v24, %v414_v55  ;;  %v16916_v55 = vsel %vm16543_vm4, 0, %v431_v39  ;;  %v16920_v24 = vsel %vm16543_vm4, 0, %v438_v19  ;;  %v17134_v39 = vsel %vm16933_vm7, %v16888_v31, 0 }
  0x4d   :  { %24827 = vst [vmem:[#allocation36_spill] sm:$0xff] %v16916_v55  ;;  %24828 = vst [vmem:[#allocation37_spill] sm:$0xff] %v16920_v24  ;;  %v24280_v19 = vshrl.u32 %v17108_v21, 16  ;;  %v616_v31 = vrot.slane %v24274_v37, 1  ;;  %v24287_v37 = vshll.u32 %v17154_v17, 16 }
  0x4e   :  { %v16904_v5 = vsel %vm16543_vm4, 0, %v417_v10  ;;  %v24273_v10 = vshrl.u32 %v17093_v59, 16  ;;  %24838 = vst [vmem:[#allocation45_spill] sm:$0xff] %v17134_v39 }
  0x4f   :  { %24825 = vst [vmem:[#allocation34_spill] sm:$0xff] %v16904_v5 }
  0x50   :  { %v613_v4 = vor.u32 %v612_v35, %v24273_v10  ;;  %v24282_v35 = vshrl.u32 %v17121_v62, 16 }
  0x52   :  { %14447 = vmatmul.mubr.msk.bf16.gmra.mrb[36].mxu0 %vm696_vm3, %v16892_v18  ;;  %v617_v10 = vor.u32 %v616_v31, %v24282_v35  ;;  %v24291_v31 = vshrl.u32 %v17154_v17, 16 }
  0x53   :  { %14450 = vmatprep.mubr.msk.bf16.mxu0 %vm696_vm3, %v16896_v11 }
  0x5a   :  { %14451 = vmatmul.mubr.msk.bf16.gmra.mrb[40].mxu0 %vm696_vm3, %v16904_v5 }
  0x5b   :  { %14454 = vmatprep.mubr.msk.bf16.mxu0 %vm696_vm3, %v16908_v45 }
  0x62   :  { %14455 = vmatmul.mubr.msk.bf16.gmra.mrb[44].mxu0 %vm696_vm3, %v16916_v55 }
  0x63   :  { %14458 = vmatprep.mubr.msk.bf16.mxu0 %vm696_vm3, %v16920_v24 }
  0x6a   :  { %14459 = vmatmul.mubr.msk.bf16.gmra.mrb[48].mxu0 %vm696_vm3, %v16928_v15 }
  0x6b   :  { %14476 = vmatprep.mubr.bf16.mxu0 %v24820_v41 }
  0x72   :  { %14477 = vmatmul.mubr.msk.bf16.vlgmr.msra.gmra.mrb[0].mxu0 %vm696_vm3, %v16940_v32 }
  0x73   :  { %14541 = vmatpush3.bf16.msra.mxu0 %v1892_v46  ;;  %14480 = vmatprep.mubr.msk.bf16.mxu0 %vm696_vm3, %v16947_v61  ;;  %v17146_v46 = vsel %vm16933_vm7, %v613_v4, 0  ;;  %v615_v4 = vor.u32 %v614_v0, %v24280_v19  ;;  %v17176_v0 = vld [vmem:[%s24211_s0 + $0xf0] sm:$0xff]   ;;  %v17180_v19 = vsel %vm16933_vm7, %v617_v10, 0 }
  0x74   :  { %16043 = vmatprep.subr.msk.bf16.mxu0 %vm760_vm0, %v16952_v42  ;;  %24839 = vst [vmem:[#allocation46_spill] sm:$0xff] %v17146_v46  ;;  %v24290_v35 = vshll.u32 %v17176_v0, 16 }
  0x7a   :  { %14481 = vmatmul.mubr.msk.bf16.gmra.mrb[4].mxu0 %vm696_vm3, %v16963_v22 }
  0x7b   :  { %14484 = vmatprep.mubr.msk.bf16.mxu0 %vm696_vm3, %v16968_v30 }
  0x82   :  { %14485 = vmatmul.mubr.msk.bf16.gmra.mrb[8].mxu0 %vm696_vm3, %v16977_v51 }
  0x83   :  { %14488 = vmatprep.mubr.msk.bf16.mxu0 %vm696_vm3, %v16982_v8 }
  0x8a   :  { %14489 = vmatmul.mubr.msk.bf16.gmra.mrb[12].mxu0 %vm696_vm3, %v16991_v26 }
  0x8b   :  { %14492 = vmatprep.mubr.msk.bf16.mxu0 %vm696_vm3, %v16996_v36 }
  0x92   :  { %14493 = vmatmul.mubr.msk.bf16.gmra.mrb[16].mxu0 %vm696_vm3, %v17005_v40 }
  0x93   :  { %14496 = vmatprep.mubr.msk.bf16.mxu0 %vm696_vm3, %v17010_v49 }
  0x9a   :  { %14497 = vmatmul.mubr.msk.bf16.gmra.mrb[20].mxu0 %vm696_vm3, %v17019_v52 }
  0x9b   :  { %14500 = vmatprep.mubr.msk.bf16.mxu0 %vm696_vm3, %v17024_v20 }
  0xa2   :  { %14501 = vmatmul.mubr.msk.bf16.gmra.mrb[24].mxu0 %vm696_vm3, %v17033_v23 }
  0xa3   :  { %14504 = vmatprep.mubr.msk.bf16.mxu0 %vm696_vm3, %v17038_v54 }
  0xaa   :  { %14505 = vmatmul.mubr.msk.bf16.gmra.mrb[28].mxu0 %vm696_vm3, %v17047_v48 }
  0xab   :  { %14508 = vmatprep.mubr.bf16.mxu0 %v24820_v41  ;;  %v17168_v41 = vsel %vm16933_vm7, %v615_v4, 0  ;;  %v620_v4 = vrot.slane %v24287_v37, 1  ;;  %v622_v37 = vrot.slane %v24290_v35, 1  ;;  %v24843_v35 = vld [vmem:[#allocation28_spill] sm:$0xff] }
  0xac   :  { %24840 = vst [vmem:[#allocation47_spill] sm:$0xff] %v17168_v41 }
  0xb2   :  { %14509 = vmatmul.mubr.msk.bf16.gmra.mrb[32].mxu0 %vm696_vm3, %v17055_v25 }
  0xb3   :  { %14512 = vmatprep.mubr.msk.bf16.mxu0 %vm696_vm3, %v17060_v6 }
  0xba   :  { %14513 = vmatmul.mubr.msk.bf16.gmra.mrb[36].mxu0 %vm696_vm3, %v17069_v1 }
  0xbb   :  { %14516 = vmatprep.mubr.msk.bf16.mxu0 %vm696_vm3, %v17074_v43 }
  0xc2   :  { %14517 = vmatmul.mubr.msk.bf16.gmra.mrb[40].mxu0 %vm696_vm3, %v17083_v60 }
  0xc3   :  { %14520 = vmatprep.mubr.msk.bf16.mxu0 %vm696_vm3, %v17088_v16 }
  0xca   :  { %14521 = vmatmul.mubr.msk.bf16.gmra.mrb[44].mxu0 %vm696_vm3, %v17103_v7  ;;  %v482_v7 = vshrl.u32 %v17176_v0, 16 }
  0xcb   :  { %14524 = vmatprep.mubr.msk.bf16.mxu0 %vm696_vm3, %v17113_v27  ;;  %v468_v27 = vshrl.u32 %v17142_v12, 16 }
  0xd2   :  { %14525 = vmatmul.mubr.msk.bf16.gmra.mrb[48].mxu0 %vm696_vm3, %v17134_v39  ;;  %v618_v39 = vrot.slane %v24281_v44, 1 }
  0xd3   :  { %14528 = vmatprep.mubr.msk.bf16.mxu0 %vm696_vm3, %v17146_v46  ;;  %v621_v46 = vor.u32 %v620_v4, %v24291_v31  ;;  %v17220_v4 = vld [vmem:[%s24210_s1 + $0xa] sm:$0x3] }
  0xd4   :  { %v619_v44 = vor.u32 %v618_v39, %v468_v27  ;;  %v623_v39 = vor.u32 %v622_v37, %v482_v7 }
  0xd6   :  { %v17194_v10 = vsel %vm16933_vm7, %v619_v44, 0  ;;  %v17209_v44 = vsel %vm16933_vm7, %v623_v39, 0 }
  0xda   :  { %14529 = vmatmul.mubr.msk.bf16.gmra.mrb[52].mxu0 %vm696_vm3, %v17168_v41  ;;  %v17201_v41 = vsel %vm16933_vm7, %v621_v46, 0  ;;  %v2254_v46 = vsel %vm760_vm0, %v16952_v42, 0 }
  0xdb   :  { %14532 = vmatprep.mubr.msk.bf16.mxu0 %vm696_vm3, %v17180_v19  ;;  %24841 = vst [vmem:[#allocation48_spill] sm:$0xff] %v17201_v41 }
  0xe2   :  { %14533 = vmatmul.mubr.msk.bf16.gmra.mrb[56].mxu0 %vm696_vm3, %v17194_v10 }
  0xe3   :  { %14536 = vmatprep.mubr.msk.bf16.mxu0 %vm696_vm3, %v17201_v41 }
  0xea   :  { %14537 = vmatmul.mubr.msk.bf16.gmra.mrb[60].mxu0 %vm696_vm3, %v17209_v44 }
  0xeb   :  { %14542 = vmatprep.mubr.msk.bf16.mxu0 %vm696_vm3, %v16574_v28  ;;  %v17247_v28 = vld [vmem:[%s24211_s0 + $0x78] sm:$0xff]  }
  0xec   :  { %v24294_v42 = vshrl.u32 %v17247_v28, 16  ;;  %v24295_v39 = vshll.u32 %v17247_v28, 16 }
  0xee   :  { %v379_v37 = vrot.slane %v24294_v42, 7 }
  0xf0   :  { %v382_v31 = vor.u32 %v24295_v39, %v379_v37  ;;  %v24846_v37 = vshrl.u32 %v17108_v21, 16  ;;  %v24847_v39 = vshll.u32 %v17093_v59, 16 }
  0xf2   :  { %14543 = vmatmul.mubr.msk.bf16.vlgmr.msra.gmra.mrb[0].mxu0 %vm696_vm3, %v16580_v29  ;;  %v456_v42 = vrot.slane %v24846_v37, 7 }
  0xf3   :  { %14607 = vmatpush3.bf16.msra.mxu0 %v2254_v46  ;;  %14546 = vmatprep.mubr.msk.bf16.mxu0 %vm696_vm3, %v16592_v34  ;;  %v24842_v46 = vld [vmem:[#allocation26_spill] sm:$0xff] }
  0xf4   :  { %16044 = vmatprep.subr.msk.bf16.mxu0 %vm760_vm0, %v17220_v4 }
  0xfa   :  { %14547 = vmatmul.mubr.msk.bf16.gmra.mrb[4].mxu0 %vm696_vm3, %v16604_v38 }
  0xfb   :  { %14550 = vmatprep.mubr.msk.bf16.mxu0 %vm696_vm3, %v16627_v47 }
 0x102   :  { %14551 = vmatmul.mubr.msk.bf16.gmra.mrb[8].mxu0 %vm696_vm3, %v16634_v50 }
 0x103   :  { %14554 = vmatprep.mubr.msk.bf16.mxu0 %vm696_vm3, %v16664_v63 }
 0x10a   :  { %14555 = vmatmul.mubr.msk.bf16.gmra.mrb[12].mxu0 %vm696_vm3, %v16673_v2 }
 0x10b   :  { %14558 = vmatprep.mubr.msk.bf16.mxu0 %vm696_vm3, %v16700_v9 }
 0x112   :  { %14559 = vmatmul.mubr.msk.bf16.gmra.mrb[16].mxu0 %vm696_vm3, %v16716_v57 }
 0x113   :  { %14562 = vmatprep.mubr.msk.bf16.mxu0 %vm696_vm3, %v16754_v56 }
 0x11a   :  { %14563 = vmatmul.mubr.msk.bf16.gmra.mrb[20].mxu0 %vm696_vm3, %v16762_v13  ;;  %v17265_v13 = vsel %vm16543_vm4, 0, %v382_v31 }
 0x11b   :  { %14566 = vmatprep.mubr.msk.bf16.mxu0 %vm696_vm3, %v16812_v58  ;;  %v24844_v58 = vld [vmem:[#allocation31_spill] sm:$0xff] }
 0x122   :  { %14567 = vmatmul.mubr.msk.bf16.gmra.mrb[24].mxu0 %vm696_vm3, %v24842_v46 }
 0x123   :  { %14570 = vmatprep.mubr.msk.bf16.mxu0 %vm696_vm3, %v24843_v35 }
 0x12a   :  { %14571 = vmatmul.mubr.msk.bf16.gmra.mrb[28].mxu0 %vm696_vm3, %v17265_v13 }
 0x12b   :  { %14574 = vmatprep.mubr.msk.bf16.mxu0 %vm696_vm3, %v24844_v58  ;;  %v24845_v58 = vshrl.u32 %v17093_v59, 16 }
 0x12d   :  { %v449_v31 = vrot.slane %v24845_v58, 7  ;;  %v24850_v58 = vshrl.u32 %v17121_v62, 16 }
 0x132   :  { %14575 = vmatmul.mubr.msk.bf16.gmra.mrb[32].mxu0 %vm696_vm3, %v16876_v3 }
 0x133   :  { %14578 = vmatprep.mubr.msk.bf16.mxu0 %vm696_vm3, %v16892_v18  ;;  %v463_v18 = vrot.slane %v24850_v58, 7 }
 0x13a   :  { %14579 = vmatmul.mubr.msk.bf16.gmra.mrb[36].mxu0 %vm696_vm3, %v16896_v11 }
 0x13b   :  { %14582 = vmatprep.mubr.msk.bf16.mxu0 %vm696_vm3, %v16904_v5  ;;  %v452_v5 = vor.u32 %v24847_v39, %v449_v31 }
 0x142   :  { %14583 = vmatmul.mubr.msk.bf16.gmra.mrb[40].mxu0 %vm696_vm3, %v16908_v45  ;;  %v24848_v45 = vshll.u32 %v17108_v21, 16 }
 0x143   :  { %14586 = vmatprep.mubr.msk.bf16.mxu0 %vm696_vm3, %v16916_v55  ;;  %v17297_v55 = vsel %vm16543_vm4, 0, %v452_v5  ;;  %v24853_v5 = vshll.u32 %v17142_v12, 16 }
 0x144   :  { %v459_v11 = vor.u32 %v24848_v45, %v456_v42  ;;  %24849 = vst [vmem:[#allocation26_spill] sm:$0xff] %v17297_v55  ;;  %v24852_v45 = vshll.u32 %v17121_v62, 16 }
 0x146   :  { %v17303_v37 = vsel %vm16543_vm4, 0, %v459_v11  ;;  %v466_v42 = vor.u32 %v24852_v45, %v463_v18  ;;  %v24854_v11 = vshrl.u32 %v17154_v17, 16  ;;  %v484_v18 = vrot.slane %v482_v7, 7 }
 0x147   :  { %24851 = vst [vmem:[#allocation28_spill] sm:$0xff] %v17303_v37 }
 0x148   :  { %v17315_v31 = vsel %vm16543_vm4, 0, %v466_v42  ;;  %v477_v58 = vrot.slane %v24854_v11, 7 }
 0x14a   :  { %14587 = vmatmul.mubr.msk.bf16.gmra.mrb[44].mxu0 %vm696_vm3, %v16920_v24  ;;  %v470_v24 = vrot.slane %v468_v27, 7  ;;  %v17322_v27 = vld [vmem:[%s24211_s0 + $0xf8] sm:$0xff]  }
 0x14b   :  { %14590 = vmatprep.mubr.msk.bf16.mxu0 %vm696_vm3, %v16928_v15  ;;  %v24308_v42 = vshrl.u32 %v17322_v27, 16 }
 0x14c   :  { %v473_v39 = vor.u32 %v24853_v5, %v470_v24  ;;  %v24856_v24 = vshll.u32 %v17154_v17, 16  ;;  %v24857_v5 = vshll.u32 %v17176_v0, 16 }
 0x14d   :  { %v491_v7 = vrot.slane %v24308_v42, 7  ;;  %v24866_v42 = vld [vmem:[#allocation10_spill] sm:$0xff] }
 0x14e   :  { %v480_v45 = vor.u32 %v24856_v24, %v477_v58  ;;  %v487_v11 = vor.u32 %v24857_v5, %v484_v18  ;;  %v24860_v24 = vld [vmem:[#allocation3_spill] sm:$0xff] }
 0x14f   :  { %v13067_v5 = vld [vmem:[%s24210_s1 + $0xc] sm:$0x3] }
 0x152   :  { %14591 = vmatmul.mubr.msk.bf16.gmra.mrb[48].mxu0 %vm696_vm3, %v17297_v55  ;;  %v17339_v55 = vsel %vm16543_vm4, 0, %v480_v45  ;;  %v2618_v45 = vsel %vm760_vm0, %v17220_v4, 0  ;;  %v24865_v4 = vld [vmem:[#allocation9_spill] sm:$0xff] }
 0x153   :  { %14594 = vmatprep.mubr.msk.bf16.mxu0 %vm696_vm3, %v17303_v37  ;;  %v17326_v37 = vsel %vm16543_vm4, 0, %v473_v39  ;;  %v24309_v39 = vshll.u32 %v17322_v27, 16 }
 0x154   :  { %24855 = vst [vmem:[#allocation31_spill] sm:$0xff] %v17326_v37 }
 0x155   :  { %v494_v58 = vor.u32 %v24309_v39, %v491_v7  ;;  %v24862_v7 = vld [vmem:[#allocation5_spill] sm:$0xff]  ;;  %v24867_v39 = vld [vmem:[#allocation11_spill] sm:$0xff] }
 0x157   :  { %v17356_v18 = vsel %vm16543_vm4, 0, %v494_v58  ;;  %v24863_v58 = vld [vmem:[#allocation6_spill] sm:$0xff] }
 0x158   :  { %24859 = vst [vmem:[#allocation50_spill] sm:$0xff] %v17356_v18 }
 0x15a   :  { %14595 = vmatmul.mubr.msk.bf16.gmra.mrb[52].mxu0 %vm696_vm3, %v17315_v31 }
 0x15b   :  { %14598 = vmatprep.mubr.msk.bf16.mxu0 %vm696_vm3, %v17326_v37  ;;  %v17346_v37 = vsel %vm16543_vm4, 0, %v487_v11  ;;  %v24861_v11 = vld [vmem:[#allocation4_spill] sm:$0xff] }
 0x15c   :  { %24858 = vst [vmem:[#allocation49_spill] sm:$0xff] %v17346_v37 }
 0x162   :  { %14599 = vmatmul.mubr.msk.bf16.gmra.mrb[56].mxu0 %vm696_vm3, %v17339_v55 }
 0x163   :  { %14602 = vmatprep.mubr.msk.bf16.mxu0 %vm696_vm3, %v17346_v37  ;;  %v24882_v37 = vld [vmem:[#allocation30_spill] sm:$0xff] }
 0x16a   :  { %14603 = vmatmul.mubr.msk.bf16.gmra.mrb[60].mxu0 %vm696_vm3, %v17356_v18  ;;  %v24876_v18 = vld [vmem:[#allocation21_spill] sm:$0xff] }
 0x16b   :  { %14608 = vmatprep.mubr.msk.bf16.mxu0 %vm696_vm3, %v24860_v24  ;;  %v24864_v24 = vld [vmem:[#allocation8_spill] sm:$0xff] }
 0x172   :  { %14609 = vmatmul.mubr.msk.bf16.vlgmr.msra.gmra.mrb[0].mxu0 %vm696_vm3, %v24861_v11  ;;  %v24869_v11 = vld [vmem:[#allocation13_spill] sm:$0xff] }
 0x173   :  { %14673 = vmatpush3.bf16.msra.mxu0 %v2618_v45  ;;  %14612 = vmatprep.mubr.msk.bf16.mxu0 %vm696_vm3, %v24862_v7  ;;  %v24868_v45 = vld [vmem:[#allocation12_spill] sm:$0xff]  ;;  %v24870_v7 = vld [vmem:[#allocation14_spill] sm:$0xff] }
 0x174   :  { %16045 = vmatprep.subr.msk.bf16.mxu0 %vm760_vm0, %v13067_v5 }
 0x17a   :  { %14613 = vmatmul.mubr.msk.bf16.gmra.mrb[4].mxu0 %vm696_vm3, %v24863_v58  ;;  %v24871_v58 = vld [vmem:[#allocation15_spill] sm:$0xff] }
 0x17b   :  { %14616 = vmatprep.mubr.msk.bf16.mxu0 %vm696_vm3, %v24864_v24  ;;  %v24872_v24 = vld [vmem:[#allocation16_spill] sm:$0xff] }
 0x182   :  { %14617 = vmatmul.mubr.msk.bf16.gmra.mrb[8].mxu0 %vm696_vm3, %v24865_v4  ;;  %v24873_v4 = vld [vmem:[#allocation17_spill] sm:$0xff] }
 0x183   :  { %14620 = vmatprep.mubr.msk.bf16.mxu0 %vm696_vm3, %v24866_v42  ;;  %v24874_v42 = vld [vmem:[#allocation18_spill] sm:$0xff] }
 0x18a   :  { %14621 = vmatmul.mubr.msk.bf16.gmra.mrb[12].mxu0 %vm696_vm3, %v24867_v39 }
 0x18b   :  { %14624 = vmatprep.mubr.msk.bf16.mxu0 %vm696_vm3, %v24868_v45 }
 0x192   :  { %14625 = vmatmul.mubr.msk.bf16.gmra.mrb[16].mxu0 %vm696_vm3, %v24869_v11 }
 0x193   :  { %14628 = vmatprep.mubr.msk.bf16.mxu0 %vm696_vm3, %v24870_v7  ;;  %v24877_v7 = vld [vmem:[#allocation22_spill] sm:$0xff] }
 0x19a   :  { %14629 = vmatmul.mubr.msk.bf16.gmra.mrb[20].mxu0 %vm696_vm3, %v24871_v58  ;;  %v24878_v58 = vld [vmem:[#allocation23_spill] sm:$0xff] }
 0x19b   :  { %14632 = vmatprep.mubr.msk.bf16.mxu0 %vm696_vm3, %v24872_v24  ;;  %v24879_v24 = vld [vmem:[#allocation25_spill] sm:$0xff] }
 0x1a2   :  { %14633 = vmatmul.mubr.msk.bf16.gmra.mrb[24].mxu0 %vm696_vm3, %v24873_v4  ;;  %v24880_v4 = vld [vmem:[#allocation27_spill] sm:$0xff] }
 0x1a3   :  { %14636 = vmatprep.mubr.msk.bf16.mxu0 %vm696_vm3, %v24874_v42  ;;  %v24881_v42 = vld [vmem:[#allocation29_spill] sm:$0xff] }
 0x1aa   :  { %14637 = vmatmul.mubr.msk.bf16.gmra.mrb[28].mxu0 %vm696_vm3, %v17247_v28 }
 0x1ab   :  { %14640 = vmatprep.mubr.msk.bf16.mxu0 %vm696_vm3, %v24875_v14 }
 0x1b2   :  { %14641 = vmatmul.mubr.msk.bf16.gmra.mrb[32].mxu0 %vm696_vm3, %v24876_v18 }
 0x1b3   :  { %14644 = vmatprep.mubr.msk.bf16.mxu0 %vm696_vm3, %v24877_v7 }
 0x1ba   :  { %14645 = vmatmul.mubr.msk.bf16.gmra.mrb[36].mxu0 %vm696_vm3, %v24878_v58 }
 0x1bb   :  { %14648 = vmatprep.mubr.msk.bf16.mxu0 %vm696_vm3, %v24879_v24 }
 0x1c2   :  { %14649 = vmatmul.mubr.msk.bf16.gmra.mrb[40].mxu0 %vm696_vm3, %v24880_v4 }
 0x1c3   :  { %14652 = vmatprep.mubr.msk.bf16.mxu0 %vm696_vm3, %v24881_v42 }
 0x1ca   :  { %14653 = vmatmul.mubr.msk.bf16.gmra.mrb[44].mxu0 %vm696_vm3, %v24882_v37 }
 0x1cb   :  { %14656 = vmatprep.mubr.msk.bf16.mxu0 %vm696_vm3, %v16872_v53 }
 0x1d2   :  { %14657 = vmatmul.mubr.msk.bf16.gmra.mrb[48].mxu0 %vm696_vm3, %v17093_v59 }
 0x1d3   :  { %14660 = vmatprep.mubr.msk.bf16.mxu0 %vm696_vm3, %v17108_v21  ;;  %v2976_v21 = vsel %vm760_vm0, %v13067_v5, 0  ;;  %v24884_v5 = vshrl.u32 %v17247_v28, 16 }
 0x1da   :  { %14661 = vmatmul.mubr.msk.bf16.gmra.mrb[52].mxu0 %vm696_vm3, %v17121_v62  ;;  %v13098_v62 = vld [vmem:[%s24210_s1 + $0xe] sm:$0x3] }
 0x1db   :  { %14664 = vmatprep.mubr.msk.bf16.mxu0 %vm696_vm3, %v17142_v12 }
 0x1e2   :  { %14665 = vmatmul.mubr.msk.bf16.gmra.mrb[56].mxu0 %vm696_vm3, %v17154_v17 }
 0x1e3   :  { %14668 = vmatprep.mubr.msk.bf16.mxu0 %vm696_vm3, %v17176_v0 }
 0x1ea   :  { %14669 = vmatmul.mubr.msk.bf16.gmra.mrb[60].mxu0 %vm696_vm3, %v17322_v27 }
 0x1eb   :  { %14674 = vmatprep.mubr.msk.bf16.mxu0 %vm696_vm3, %v16940_v32  ;;  %v24883_v32 = vshll.u32 %v17247_v28, 16 }
 0x1f2   :  { %14675 = vmatmul.mubr.msk.bf16.vlgmr.msra.gmra.mrb[0].mxu0 %vm696_vm3, %v16947_v61 }
 0x1f3   :  { %14739 = vmatpush3.bf16.msra.mxu0 %v2976_v21  ;;  %14678 = vmatprep.mubr.msk.bf16.mxu0 %vm696_vm3, %v16963_v22  ;;  %v592_v21 = vrot.slane %v24883_v32, 1  ;;  %v24886_v32 = vld [vmem:[#allocation43_spill] sm:$0xff] }
 0x1f4   :  { %16046 = vmatprep.subr.msk.bf16.mxu0 %vm760_vm0, %v13098_v62 }
 0x1fa   :  { %14679 = vmatmul.mubr.msk.bf16.gmra.mrb[4].mxu0 %vm696_vm3, %v16968_v30 }
 0x1fb   :  { %14682 = vmatprep.mubr.msk.bf16.mxu0 %vm696_vm3, %v16977_v51 }
 0x202   :  { %14683 = vmatmul.mubr.msk.bf16.gmra.mrb[8].mxu0 %vm696_vm3, %v16982_v8 }
 0x203   :  { %14686 = vmatprep.mubr.msk.bf16.mxu0 %vm696_vm3, %v16991_v26 }
 0x20a   :  { %14687 = vmatmul.mubr.msk.bf16.gmra.mrb[12].mxu0 %vm696_vm3, %v16996_v36 }
 0x20b   :  { %14690 = vmatprep.mubr.msk.bf16.mxu0 %vm696_vm3, %v17005_v40 }
 0x212   :  { %14691 = vmatmul.mubr.msk.bf16.gmra.mrb[16].mxu0 %vm696_vm3, %v17010_v49  ;;  %v593_v49 = vor.u32 %v592_v21, %v24884_v5  ;;  %v24888_v21 = vld [vmem:[#allocation46_spill] sm:$0xff]  ;;  %v24889_v5 = vld [vmem:[#allocation47_spill] sm:$0xff] }
 0x213   :  { %14694 = vmatprep.mubr.msk.bf16.mxu0 %vm696_vm3, %v17019_v52 }
 0x214   :  { %v17471_v52 = vsel %vm16933_vm7, %v593_v49, 0  ;;  %v24885_v49 = vld [vmem:[#allocation41_spill] sm:$0xff] }
 0x21a   :  { %14695 = vmatmul.mubr.msk.bf16.gmra.mrb[20].mxu0 %vm696_vm3, %v17024_v20 }
 0x21b   :  { %14698 = vmatprep.mubr.msk.bf16.mxu0 %vm696_vm3, %v17033_v23 }
 0x222   :  { %14699 = vmatmul.mubr.msk.bf16.gmra.mrb[24].mxu0 %vm696_vm3, %v17038_v54 }
 0x223   :  { %14702 = vmatprep.mubr.msk.bf16.mxu0 %vm696_vm3, %v17047_v48 }
 0x22a   :  { %14703 = vmatmul.mubr.msk.bf16.gmra.mrb[28].mxu0 %vm696_vm3, %v17471_v52 }
 0x22b   :  { %14706 = vmatprep.mubr.msk.bf16.mxu0 %vm696_vm3, %v17055_v25  ;;  %v24887_v25 = vld [vmem:[#allocation45_spill] sm:$0xff] }
 0x232   :  { %14707 = vmatmul.mubr.msk.bf16.gmra.mrb[32].mxu0 %vm696_vm3, %v17060_v6 }
 0x233   :  { %14710 = vmatprep.mubr.msk.bf16.mxu0 %vm696_vm3, %v17069_v1 }
 0x23a   :  { %14711 = vmatmul.mubr.msk.bf16.gmra.mrb[36].mxu0 %vm696_vm3, %v17074_v43 }
 0x23b   :  { %14714 = vmatprep.mubr.msk.bf16.mxu0 %vm696_vm3, %v17083_v60 }
 0x242   :  { %14715 = vmatmul.mubr.msk.bf16.gmra.mrb[40].mxu0 %vm696_vm3, %v17088_v16 }
 0x243   :  { %14718 = vmatprep.mubr.msk.bf16.mxu0 %vm696_vm3, %v24885_v49  ;;  %v24890_v49 = vshll.u32 %v17322_v27, 16 }
 0x245   :  { %v624_v16 = vrot.slane %v24890_v49, 1  ;;  %v3340_v49 = vsel %vm760_vm0, %v13098_v62, 0  ;;  %v24901_v62 = vld [vmem:[#allocation37_spill] sm:$0xff] }
 0x24a   :  { %14719 = vmatmul.mubr.msk.bf16.gmra.mrb[44].mxu0 %vm696_vm3, %v24886_v32 }
 0x24b   :  { %14722 = vmatprep.mubr.msk.bf16.mxu0 %vm696_vm3, %v24887_v25 }
 0x252   :  { %14723 = vmatmul.mubr.msk.bf16.gmra.mrb[48].mxu0 %vm696_vm3, %v24888_v21  ;;  %v24891_v21 = vshrl.u32 %v17322_v27, 16 }
 0x253   :  { %14726 = vmatprep.mubr.msk.bf16.mxu0 %vm696_vm3, %v24889_v5 }
 0x254   :  { %v625_v25 = vor.u32 %v624_v16, %v24891_v21  ;;  %v24900_v16 = vld [vmem:[#allocation36_spill] sm:$0xff]  ;;  %v16422_v21 = vld [vmem:[%s24211_s0 + $0x20] sm:$0xff]  }
 0x256   :  { %v17511_v5 = vsel %vm16933_vm7, %v625_v25, 0  ;;  %v24902_v25 = vld [vmem:[#allocation26_spill] sm:$0xff]  ;;  %vm23052_vm7 = vmand %vm760_vm0, %vm9591_vm6 }
 0x25a   :  { %14727 = vmatmul.mubr.msk.bf16.gmra.mrb[52].mxu0 %vm696_vm3, %v17180_v19 }
 0x25b   :  { %14730 = vmatprep.mubr.msk.bf16.mxu0 %vm696_vm3, %v17194_v10 }
 0x262   :  { %14731 = vmatmul.mubr.msk.bf16.gmra.mrb[56].mxu0 %vm696_vm3, %v17201_v41  ;;  %v13132_v41 = vld [vmem:[%s24210_s1 + $0x10] sm:$0x3] }
 0x263   :  { %14734 = vmatprep.mubr.msk.bf16.mxu0 %vm696_vm3, %v17209_v44 }
 0x26a   :  { %14735 = vmatmul.mubr.msk.bf16.gmra.mrb[60].mxu0 %vm696_vm3, %v17511_v5 }
 0x26b   :  { %14740 = vmatprep.mubr.msk.bf16.mxu0 %vm696_vm3, %v16580_v29  ;;  %v24892_v29 = vld [vmem:[#allocation20_spill] sm:$0xff] }
 0x272   :  { %14741 = vmatmul.mubr.msk.bf16.vlgmr.msra.gmra.mrb[0].mxu0 %vm696_vm3, %v16592_v34  ;;  %v24893_v34 = vld [vmem:[#allocation24_spill] sm:$0xff] }
 0x273   :  { %14805 = vmatpush3.bf16.msra.mxu0 %v3340_v49  ;;  %14744 = vmatprep.mubr.msk.bf16.mxu0 %vm696_vm3, %v16604_v38  ;;  %v24894_v38 = vmov 0   ;;  %v16423_v49 = vld [vmem:[%s24211_s0 + $0x28] sm:$0xff]  }
 0x274   :  { %16047 = vmatprep.subr.msk.bf16.mxu0 %vm760_vm0, %v13132_v41 }
 0x27a   :  { %14745 = vmatmul.mubr.msk.bf16.gmra.mrb[4].mxu0 %vm696_vm3, %v16627_v47  ;;  %v24895_v47 = vld [vmem:[#allocation32_spill] sm:$0xff] }
 0x27b   :  { %14748 = vmatprep.mubr.msk.bf16.mxu0 %vm696_vm3, %v16634_v50  ;;  %v24896_v50 = vld [vmem:[#allocation33_spill] sm:$0xff] }
 0x282   :  { %14749 = vmatmul.mubr.msk.bf16.gmra.mrb[8].mxu0 %vm696_vm3, %v16664_v63  ;;  %v24897_v63 = vld [vmem:[#allocation34_spill] sm:$0xff] }
 0x283   :  { %14752 = vmatprep.mubr.msk.bf16.mxu0 %vm696_vm3, %v16673_v2  ;;  %v12876_v2 = vld [vmem:[%s24210_s1 + $0x2] sm:$0x3] }
 0x284   :  { %16038 = vmatprep.subr.msk.bf16.mxu1 %vm760_vm0, %v12876_v2 }
 0x28a   :  { %14753 = vmatmul.mubr.msk.bf16.gmra.mrb[12].mxu0 %vm696_vm3, %v16700_v9  ;;  %v24898_v9 = vld [vmem:[#allocation35_spill] sm:$0xff] }
 0x28b   :  { %14756 = vmatprep.mubr.msk.bf16.mxu0 %vm696_vm3, %v16716_v57  ;;  %v762_v57 = vsel %vm760_vm0, %v12876_v2, 0  ;;  %v24910_v2 = vld [vmem:[#allocation17_spill] sm:$0xff] }
 0x28c   :  { %14343 = vmatpush3.bf16.msra.mxu1 %v762_v57  ;;  %v16427_v57 = vld [vmem:[%s24211_s0 + $0x48] sm:$0xff]  }
 0x292   :  { %14757 = vmatmul.mubr.msk.bf16.gmra.mrb[16].mxu0 %vm696_vm3, %v16754_v56  ;;  %v16417_v56 = vld [vmem:[%s24210_s1] sm:$0x3] }
 0x293   :  { %14760 = vmatprep.mubr.msk.bf16.mxu0 %vm696_vm3, %v24892_v29  ;;  %16040 = vmatprep.subr.msk.bf16.mxu1 %vm760_vm0, %v16417_v56  ;;  %v24903_v29 = vld [vmem:[#allocation28_spill] sm:$0xff] }
 0x294   :  { %v16428_v56 = vld [vmem:[%s24211_s0 + $0x50] sm:$0xff]  }
 0x29a   :  { %14761 = vmatmul.mubr.msk.bf16.gmra.mrb[20].mxu0 %vm696_vm3, %v24893_v34  ;;  %v24904_v34 = vld [vmem:[#allocation31_spill] sm:$0xff] }
 0x29b   :  { %14764 = vmatprep.mubr.msk.bf16.mxu0 %vm696_vm3, %v24842_v46  ;;  %v16421_v46 = vld [vmem:[%s24211_s0 + $0x18] sm:$0xff]  }
 0x2a2   :  { %14765 = vmatmul.mubr.msk.bf16.gmra.mrb[24].mxu0 %vm696_vm3, %v24843_v35  ;;  %v16420_v35 = vld [vmem:[%s24211_s0 + $0x10] sm:$0xff]  }
 0x2a3   :  { %14768 = vmatprep.mubr.msk.bf16.mxu0 %vm696_vm3, %v17265_v13  ;;  %v16418_v13 = vld [vmem:[%s24211_s0] sm:$0xff]  }
 0x2a4   :  { %14345 = vmatmul.mubr.msk.bf16.vlgmr.msra.gmra.mrb[0].mxu1 %vm696_vm3, %v16418_v13  ;;  %v13099_v13 = vcombine.low %v24894_v38, %v24894_v38 }
 0x2a5   :  { %15333 = vmatpush3.bf16.msra.mxu1 %v24899_v33  ;;  %v24913_v33 = vld [vmem:[#allocation44_spill] sm:$0xff] }
 0x2aa   :  { %14769 = vmatmul.mubr.bf16.gmra.mrb[28].mxu0 %v24894_v38 }
 0x2ab   :  { %14772 = vmatprep.mubr.msk.bf16.mxu0 %vm696_vm3, %v16876_v3  ;;  %v16419_v3 = vld [vmem:[%s24211_s0 + $0x8] sm:$0xff]  }
 0x2ac   :  { %14348 = vmatprep.mubr.msk.bf16.mxu1 %vm696_vm3, %v16419_v3 }
 0x2ad   :  { %14349 = vmatmul.mubr.msk.bf16.gmra.mrb[4].mxu1 %vm696_vm3, %v16420_v35 }
 0x2ae   :  { %14352 = vmatprep.mubr.msk.bf16.mxu1 %vm696_vm3, %v16421_v46 }
 0x2b2   :  { %14773 = vmatmul.mubr.msk.bf16.gmra.mrb[32].mxu0 %vm696_vm3, %v24895_v47  ;;  %v24905_v47 = vld [vmem:[#allocation49_spill] sm:$0xff] }
 0x2b3   :  { %14776 = vmatprep.mubr.msk.bf16.mxu0 %vm696_vm3, %v24896_v50  ;;  %v24906_v50 = vld [vmem:[#allocation50_spill] sm:$0xff] }
 0x2b5   :  { %14353 = vmatmul.mubr.msk.bf16.gmra.mrb[8].mxu1 %vm696_vm3, %v16422_v21 }
 0x2b6   :  { %14356 = vmatprep.mubr.msk.bf16.mxu1 %vm696_vm3, %v16423_v49 }
 0x2ba   :  { %14777 = vmatmul.mubr.msk.bf16.gmra.mrb[36].mxu0 %vm696_vm3, %v24897_v63  ;;  %v24907_v63 = vld [vmem:[#allocation14_spill] sm:$0xff] }
 0x2bb   :  { %14780 = vmatprep.mubr.msk.bf16.mxu0 %vm696_vm3, %v24898_v9  ;;  %v24911_v9 = vld [vmem:[#allocation18_spill] sm:$0xff] }
 0x2c2   :  { %14781 = vmatmul.mubr.msk.bf16.gmra.mrb[40].mxu0 %vm696_vm3, %v24900_v16 }
 0x2c3   :  { %14784 = vmatprep.mubr.msk.bf16.mxu0 %vm696_vm3, %v24901_v62 }
 0x2ca   :  { %14785 = vmatmul.mubr.msk.bf16.gmra.mrb[44].mxu0 %vm696_vm3, %v16928_v15  ;;  %v16424_v15 = vld [vmem:[%s24211_s0 + $0x30] sm:$0xff]  }
 0x2cb   :  { %14788 = vmatprep.mubr.msk.bf16.mxu0 %vm696_vm3, %v24902_v25  ;;  %14357 = vmatmul.mubr.msk.bf16.gmra.mrb[12].mxu1 %vm696_vm3, %v16424_v15 }
 0x2cc   :  { %14360 = vmatprep.mubr.msk.bf16.mxu1 %vm696_vm3, %v24867_v39  ;;  %v24908_v39 = vld [vmem:[#allocation15_spill] sm:$0xff] }
 0x2d2   :  { %14789 = vmatmul.mubr.msk.bf16.gmra.mrb[48].mxu0 %vm696_vm3, %v24903_v29 }
 0x2d3   :  { %14792 = vmatprep.mubr.msk.bf16.mxu0 %vm696_vm3, %v17315_v31  ;;  %14361 = vmatmul.mubr.msk.bf16.gmra.mrb[16].mxu1 %vm696_vm3, %v24868_v45  ;;  %v24909_v45 = vld [vmem:[#allocation16_spill] sm:$0xff] }
 0x2d4   :  { %14364 = vmatprep.mubr.msk.bf16.mxu1 %vm696_vm3, %v24869_v11  ;;  %v3698_v11 = vsel %vm760_vm0, %v13132_v41, 0  ;;  %v16425_v41 = vld [vmem:[%s24211_s0 + $0x38] sm:$0xff]  }
 0x2da   :  { %14793 = vmatmul.mubr.msk.bf16.gmra.mrb[52].mxu0 %vm696_vm3, %v24904_v34 }
 0x2db   :  { %14796 = vmatprep.mubr.msk.bf16.mxu0 %vm696_vm3, %v17339_v55  ;;  %14365 = vmatmul.mubr.msk.bf16.gmra.mrb[20].mxu1 %vm696_vm3, %v24907_v63 }
 0x2dc   :  { %14368 = vmatprep.mubr.msk.bf16.mxu1 %vm696_vm3, %v24908_v39 }
 0x2e2   :  { %14797 = vmatmul.mubr.msk.bf16.gmra.mrb[56].mxu0 %vm696_vm3, %v24905_v47 }
 0x2e3   :  { %14800 = vmatprep.mubr.msk.bf16.mxu0 %vm696_vm3, %v24906_v50  ;;  %14369 = vmatmul.mubr.msk.bf16.gmra.mrb[24].mxu1 %vm696_vm3, %v24909_v45 }
 0x2e4   :  { %14372 = vmatprep.mubr.msk.bf16.mxu1 %vm696_vm3, %v24910_v2 }
 0x2ea   :  { %14801 = vmatmul.mubr.bf16.gmra.mrb[60].mxu0 %v24894_v38 }
 0x2eb   :  { %14806 = vmatprep.mubr.msk.bf16.mxu0 %vm696_vm3, %v16419_v3  ;;  %14373 = vmatmul.mubr.msk.bf16.gmra.mrb[28].mxu1 %vm696_vm3, %v24911_v9  ;;  %v24912_v3 = vld [vmem:[#allocation42_spill] sm:$0xff] }
 0x2ec   :  { %14376 = vmatprep.mubr.bf16.mxu1 %v24894_v38 }
 0x2f2   :  { %14807 = vmatmul.mubr.msk.bf16.vlgmr.msra.gmra.mrb[0].mxu0 %vm696_vm3, %v16420_v35 }
 0x2f3   :  { %14871 = vmatpush3.bf16.msra.mxu0 %v3698_v11  ;;  %14810 = vmatprep.mubr.msk.bf16.mxu0 %vm696_vm3, %v16421_v46 }
 0x2f4   :  { %14377 = vmatmul.mubr.msk.bf16.gmra.mrb[32].mxu1 %vm696_vm3, %v24875_v14  ;;  %v16426_v14 = vld [vmem:[%s24211_s0 + $0x40] sm:$0xff]  }
 0x2f5   :  { %14380 = vmatprep.mubr.msk.bf16.mxu1 %vm696_vm3, %v24876_v18 }
 0x2fa   :  { %14811 = vmatmul.mubr.msk.bf16.gmra.mrb[4].mxu0 %vm696_vm3, %v16422_v21 }
 0x2fb   :  { %14814 = vmatprep.mubr.msk.bf16.mxu0 %vm696_vm3, %v16423_v49 }
 0x2fc   :  { %14381 = vmatmul.mubr.msk.bf16.gmra.mrb[36].mxu1 %vm696_vm3, %v24877_v7 }
 0x2fd   :  { %14384 = vmatprep.mubr.msk.bf16.mxu1 %vm696_vm3, %v24878_v58 }
 0x302   :  { %14815 = vmatmul.mubr.msk.bf16.gmra.mrb[8].mxu0 %vm696_vm3, %v16424_v15 }
 0x303   :  { %14818 = vmatprep.mubr.msk.bf16.mxu0 %vm696_vm3, %v16425_v41 }
 0x304   :  { %14385 = vmatmul.mubr.msk.bf16.gmra.mrb[40].mxu1 %vm696_vm3, %v24879_v24 }
 0x305   :  { %14388 = vmatprep.mubr.msk.bf16.mxu1 %vm696_vm3, %v24880_v4 }
 0x30a   :  { %14819 = vmatmul.mubr.msk.bf16.gmra.mrb[12].mxu0 %vm696_vm3, %v16426_v14 }
 0x30b   :  { %14822 = vmatprep.mubr.msk.bf16.mxu0 %vm696_vm3, %v16427_v57 }
 0x30c   :  { %14389 = vmatmul.mubr.msk.bf16.gmra.mrb[44].mxu1 %vm696_vm3, %v24881_v42 }
 0x30d   :  { %14392 = vmatprep.mubr.msk.bf16.mxu1 %vm696_vm3, %v24882_v37 }
 0x312   :  { %14823 = vmatmul.mubr.msk.bf16.gmra.mrb[16].mxu0 %vm696_vm3, %v16428_v56 }
 0x313   :  { %14826 = vmatprep.mubr.msk.bf16.mxu0 %vm696_vm3, %v24908_v39 }
 0x314   :  { %14393 = vmatmul.mubr.msk.bf16.gmra.mrb[48].mxu1 %vm696_vm3, %v16872_v53 }
 0x315   :  { %14396 = vmatprep.mubr.msk.bf16.mxu1 %vm696_vm3, %v17093_v59 }
 0x31a   :  { %14827 = vmatmul.mubr.msk.bf16.gmra.mrb[20].mxu0 %vm696_vm3, %v24909_v45 }
 0x31b   :  { %14830 = vmatprep.mubr.msk.bf16.mxu0 %vm696_vm3, %v24910_v2 }
 0x31c   :  { %14397 = vmatmul.mubr.msk.bf16.gmra.mrb[52].mxu1 %vm696_vm3, %v24912_v3 }
 0x31d   :  { %14400 = vmatprep.mubr.msk.bf16.mxu1 %vm696_vm3, %v24913_v33 }
 0x322   :  { %14831 = vmatmul.mubr.msk.bf16.gmra.mrb[24].mxu0 %vm696_vm3, %v24911_v9 }
 0x323   :  { %14834 = vmatprep.mubr.msk.bf16.mxu0 %vm696_vm3, %v17247_v28  ;;  %v24917_v28 = vld [vmem:[#allocation41_spill] sm:$0xff] }
 0x324   :  { %14401 = vmatmul.mubr.msk.bf16.gmra.mrb[56].mxu1 %vm696_vm3, %v17142_v12 }
 0x325   :  { %14404 = vmatprep.mubr.msk.bf16.mxu1 %vm696_vm3, %v17154_v17 }
 0x32a   :  { %14835 = vmatmul.mubr.msk.bf16.gmra.mrb[28].mxu0 %vm696_vm3, %v13099_v13 }
 0x32b   :  { %14838 = vmatprep.mubr.msk.bf16.mxu0 %vm696_vm3, %v24876_v18 }
 0x32c   :  { %14405 = vmatmul.mubr.msk.bf16.gmra.mrb[60].mxu1 %vm696_vm3, %v17176_v0 }
 0x32d   :  { %14462 = vmatprep.mubr.msk.bf16.mxu1 %vm696_vm3, %v24902_v25 }
 0x332   :  { %14839 = vmatmul.mubr.msk.bf16.gmra.mrb[32].mxu0 %vm696_vm3, %v24877_v7 }
 0x333   :  { %14842 = vmatprep.mubr.msk.bf16.mxu0 %vm696_vm3, %v24878_v58 }
 0x334   :  { %14463 = vmatmul.mubr.msk.bf16.vlgmr.msra.gmra.mrb[52].mxu1 %vm696_vm3, %v24903_v29 }
 0x335   :  { %14466 = vmatprep.mubr.msk.bf16.mxu1 %vm696_vm3, %v17315_v31 }
 0x33a   :  { %14843 = vmatmul.mubr.msk.bf16.gmra.mrb[36].mxu0 %vm696_vm3, %v24879_v24 }
 0x33b   :  { %14846 = vmatprep.mubr.msk.bf16.mxu0 %vm696_vm3, %v24880_v4  ;;  %v24921_v4 = vld [vmem:[#allocation48_spill] sm:$0xff] }
 0x33c   :  { %14467 = vmatmul.mubr.msk.bf16.gmra.mrb[56].mxu1 %vm696_vm3, %v24904_v34 }
 0x33d   :  { %14470 = vmatprep.mubr.msk.bf16.mxu1 %vm696_vm3, %v17339_v55  ;;  %v24915_v55 = vld [vmem:[#allocation39_spill] sm:$0xff] }
 0x342   :  { %14847 = vmatmul.mubr.msk.bf16.gmra.mrb[40].mxu0 %vm696_vm3, %v24881_v42 }
 0x343   :  { %14850 = vmatprep.mubr.msk.bf16.mxu0 %vm696_vm3, %v24882_v37 }
 0x344   :  { %14471 = vmatmul.mubr.msk.bf16.gmra.mrb[60].mxu1 %vm696_vm3, %v24905_v47 }
 0x34a   :  { %14851 = vmatmul.mubr.msk.bf16.gmra.mrb[44].mxu0 %vm696_vm3, %v16872_v53  ;;  %v24914_v53 = vld [vmem:[#allocation38_spill] sm:$0xff] }
 0x34b   :  { %14854 = vmatprep.mubr.msk.bf16.mxu0 %vm696_vm3, %v17093_v59 }
 0x352   :  { %14855 = vmatmul.mubr.msk.bf16.gmra.mrb[48].mxu0 %vm696_vm3, %v24912_v3 }
 0x353   :  { %14858 = vmatprep.mubr.msk.bf16.mxu0 %vm696_vm3, %v24913_v33 }
 0x35a   :  { %14859 = vmatmul.mubr.msk.bf16.gmra.mrb[52].mxu0 %vm696_vm3, %v17142_v12 }
 0x35b   :  { %14862 = vmatprep.mubr.msk.bf16.mxu0 %vm696_vm3, %v17154_v17 }
 0x362   :  { %14863 = vmatmul.mubr.msk.bf16.gmra.mrb[56].mxu0 %vm696_vm3, %v17176_v0 }
 0x363   :  { %14866 = vmatprep.mubr.msk.bf16.mxu0 %vm696_vm3, %v17322_v27  ;;  %v24920_v27 = vld [vmem:[#allocation47_spill] sm:$0xff] }
 0x36a   :  { %14867 = vmatmul.mubr.msk.bf16.gmra.mrb[60].mxu0 %vm696_vm3, %v13099_v13 }
 0x36b   :  { %14872 = vmatprep.mubr.msk.bf16.mxu0 %vm696_vm3, %v16947_v61 }
 0x372   :  { %14873 = vmatmul.mubr.msk.bf16.vlgmr.msra.gmra.mrb[0].mxu0 %vm696_vm3, %v16963_v22 }
 0x373   :  { %14876 = vmatprep.mubr.msk.bf16.mxu0 %vm696_vm3, %v16968_v30 }
 0x377   :  { %v17766_v61 = vpop.f32.mrb[0].mxu1 }
 0x378   :  { %v17770_v22 = vpop.f32.mrb[1].mxu1 }
 0x379   :  { %v17772_v30 = vpop.f32.mrb[2].mxu1 }
 0x37a   :  { %14877 = vmatmul.mubr.msk.bf16.gmra.mrb[4].mxu0 %vm696_vm3, %v16977_v51  ;;  %v17774_v51 = vpop.f32.mrb[3].mxu1 }
 0x37b   :  { %14880 = vmatprep.mubr.msk.bf16.mxu0 %vm696_vm3, %v16982_v8 }
 0x380   :  { %v17778_v8 = vpop.f32.mrb[4].mxu1 }
 0x382   :  { %14881 = vmatmul.mubr.msk.bf16.gmra.mrb[8].mxu0 %vm696_vm3, %v16991_v26  ;;  %v17782_v26 = vpop.f32.mrb[5].mxu1 }
 0x383   :  { %14884 = vmatprep.mubr.msk.bf16.mxu0 %vm696_vm3, %v16996_v36  ;;  %v17784_v36 = vpop.f32.mrb[6].mxu1 }
 0x38a   :  { %14885 = vmatmul.mubr.msk.bf16.gmra.mrb[12].mxu0 %vm696_vm3, %v17005_v40  ;;  %v17786_v40 = vpop.f32.mrb[7].mxu1 }
 0x38b   :  { %14888 = vmatprep.mubr.msk.bf16.mxu0 %vm696_vm3, %v24914_v53 }
 0x392   :  { %14889 = vmatmul.mubr.msk.bf16.gmra.mrb[16].mxu0 %vm696_vm3, %v24915_v55 }
 0x393   :  { %14892 = vmatprep.mubr.msk.bf16.mxu0 %vm696_vm3, %v17024_v20  ;;  %v17790_v20 = vpop.f32.mrb[8].mxu1 }
 0x39a   :  { %14893 = vmatmul.mubr.msk.bf16.gmra.mrb[20].mxu0 %vm696_vm3, %v17033_v23  ;;  %v17794_v23 = vpop.f32.mrb[9].mxu1 }
 0x39b   :  { %14896 = vmatprep.mubr.msk.bf16.mxu0 %vm696_vm3, %v17038_v54  ;;  %v17796_v59 = vpop.f32.mrb[10].mxu1 }
 0x39c   :  { %v17798_v17 = vpop.f32.mrb[11].mxu1 }
 0x39e   :  { %v17801_v54 = vpop.f32.mrb[12].mxu1 }
 0x39f   :  { %v17805_v12 = vpop.f32.mrb[13].mxu1 }
 0x3a2   :  { %14897 = vmatmul.mubr.msk.bf16.gmra.mrb[24].mxu0 %vm696_vm3, %v17047_v48  ;;  %v17807_v48 = vpop.f32.mrb[14].mxu1 }
 0x3a3   :  { %14900 = vmatprep.mubr.msk.bf16.mxu0 %vm696_vm3, %v17471_v52  ;;  %v17809_v0 = vpop.f32.mrb[15].mxu1  ;;  %v24916_v52 = vld [vmem:[#allocation40_spill] sm:$0xff] }
 0x3a6   :  { %v17825_v37 = vpop.f32.mrb[16].mxu1 }
 0x3aa   :  { %14901 = vmatmul.mubr.bf16.gmra.mrb[28].mxu0 %v24894_v38 }
 0x3ab   :  { %14904 = vmatprep.mubr.msk.bf16.mxu0 %vm696_vm3, %v17060_v6  ;;  %v24918_v6 = vld [vmem:[#allocation45_spill] sm:$0xff] }
 0x3b2   :  { %14905 = vmatmul.mubr.msk.bf16.gmra.mrb[32].mxu0 %vm696_vm3, %v17069_v1  ;;  %v24919_v1 = vld [vmem:[#allocation46_spill] sm:$0xff] }
 0x3b3   :  { %14908 = vmatprep.mubr.msk.bf16.mxu0 %vm696_vm3, %v17074_v43  ;;  %v17829_v43 = vpop.f32.mrb[17].mxu1 }
 0x3ba   :  { %14909 = vmatmul.mubr.msk.bf16.gmra.mrb[36].mxu0 %vm696_vm3, %v17083_v60  ;;  %v17831_v60 = vpop.f32.mrb[18].mxu1 }
 0x3bb   :  { %14912 = vmatprep.mubr.msk.bf16.mxu0 %vm696_vm3, %v24916_v52  ;;  %v17833_v31 = vpop.f32.mrb[19].mxu1 }
 0x3bc   :  { %v17839_v18 = vpop.f32.mrb[20].mxu1 }
 0x3bd   :  { %v17841_v7 = vpop.f32.mrb[21].mxu1 }
 0x3be   :  { %v17843_v58 = vpop.f32.mrb[22].mxu1 }
 0x3bf   :  { %v17845_v24 = vpop.f32.mrb[23].mxu1 }
 0x3c0   :  { %v17851_v42 = vpop.f32.mrb[24].mxu1 }
 0x3c2   :  { %14913 = vmatmul.mubr.msk.bf16.gmra.mrb[40].mxu0 %vm696_vm3, %v24917_v28 }
 0x3c3   :  { %14916 = vmatprep.mubr.msk.bf16.mxu0 %vm696_vm3, %v24886_v32  ;;  %v17853_v32 = vpop.f32.mrb[25].mxu1 }
 0x3c4   :  { %v17855_v16 = vpop.f32.mrb[26].mxu1 }
 0x3ca   :  { %14917 = vmatmul.mubr.msk.bf16.gmra.mrb[44].mxu0 %vm696_vm3, %v24918_v6 }
 0x3cb   :  { %14920 = vmatprep.mubr.msk.bf16.mxu0 %vm696_vm3, %v24919_v1 }
 0x3d2   :  { %14921 = vmatmul.mubr.msk.bf16.gmra.mrb[48].mxu0 %vm696_vm3, %v24920_v27 }
 0x3d3   :  { %14924 = vmatprep.mubr.msk.bf16.mxu0 %vm696_vm3, %v17180_v19  ;;  %v17857_v19 = vpop.f32.mrb[27].mxu1 }
 0x3d4   :  { %v17863_v62 = vpop.f32.mrb[28].mxu1 }
 0x3da   :  { %14925 = vmatmul.mubr.msk.bf16.gmra.mrb[52].mxu0 %vm696_vm3, %v17194_v10  ;;  %v17865_v10 = vpop.f32.mrb[29].mxu1 }
 0x3db   :  { %14928 = vmatprep.mubr.msk.bf16.mxu0 %vm696_vm3, %v24921_v4  ;;  %v17867_v35 = vpop.f32.mrb[30].mxu1 }
 0x3dc   :  { %v17869_v46 = vpop.f32.mrb[31].mxu1 }
 0x3dd   :  { %v17872_v25 = vpop.f32.mrb[32].mxu1 }
 0x3de   :  { %v17874_v21 = vpop.f32.mrb[33].mxu1 }
 0x3df   :  { %v17876_v49 = vpop.f32.mrb[34].mxu1 }
 0x3e2   :  { %14929 = vmatmul.mubr.msk.bf16.gmra.mrb[56].mxu0 %vm696_vm3, %v17209_v44  ;;  %v17878_v44 = vpop.f32.mrb[35].mxu1 }
 0x3e3   :  { %14932 = vmatprep.mubr.msk.bf16.mxu0 %vm696_vm3, %v17511_v5  ;;  %v17880_v29 = vpop.f32.mrb[36].mxu1  ;;  %vm6960_vm3 = vsmask.f32 3328 }
 0x3e4   :  { %v17882_v5 = vpop.f32.mrb[37].mxu1  ;;  %vm21684_vm5 = vmand %vm6959_vm2, %vm6960_vm3 }
 0x3e5   :  { %v17884_v15 = vpop.f32.mrb[38].mxu1 }
 0x3e6   :  { %v17886_v34 = vpop.f32.mrb[39].mxu1 }
 0x3e7   :  { %v17888_v47 = vpop.f32.mrb[40].mxu1 }
 0x3e8   :  { %v17890_v50 = vpop.f32.mrb[41].mxu1 }
 0x3e9   :  { %v17892_v63 = vpop.f32.mrb[42].mxu1 }
 0x3ea   :  { %14933 = vmatmul.mubr.bf16.gmra.mrb[60].mxu0 %v24894_v38  ;;  %v17894_v39 = vpop.f32.mrb[43].mxu1 }
 0x3eb   :  { %v17896_v45 = vpop.f32.mrb[44].mxu1 }
 0x3ec   :  { %v17898_v11 = vpop.f32.mrb[45].mxu1 }
 0x3ed   :  { %v17900_v2 = vpop.f32.mrb[46].mxu1 }
 0x3ee   :  { %v17902_v9 = vpop.f32.mrb[47].mxu1 }
 0x3ef   :  { %v17904_v41 = vpop.f32.mrb[48].mxu1 }
 0x3f0   :  { %24922 = vst [vmem:[#allocation3_spill] sm:$0xff] %v17904_v41  ;;  %v17906_v14 = vpop.f32.mrb[49].mxu1 }
 0x3f1   :  { %24923 = vst [vmem:[#allocation4_spill] sm:$0xff] %v17906_v14  ;;  %v17908_v57 = vpop.f32.mrb[50].mxu1 }
 0x3f2   :  { %24924 = vst [vmem:[#allocation5_spill] sm:$0xff] %v17908_v57  ;;  %v17910_v56 = vpop.f32.mrb[51].mxu1 }
 0x3f3   :  { %24925 = vst [vmem:[#allocation6_spill] sm:$0xff] %v17910_v56 }
 0x407   :  { %v17912_v13 = vpop.f32.mrb[52].mxu1 }
 0x408   :  { %24926 = vst [vmem:[#allocation8_spill] sm:$0xff] %v17912_v13  ;;  %v17914_v3 = vpop.f32.mrb[53].mxu1 }
 0x409   :  { %24927 = vst [vmem:[#allocation9_spill] sm:$0xff] %v17914_v3  ;;  %v17916_v33 = vpop.f32.mrb[54].mxu1 }
 0x40a   :  { %24928 = vst [vmem:[#allocation10_spill] sm:$0xff] %v17916_v33  ;;  %v17918_v53 = vpop.f32.mrb[55].mxu1 }
 0x40b   :  { %24929 = vst [vmem:[#allocation11_spill] sm:$0xff] %v17918_v53 }
 0x40f   :  { %v17920_v55 = vpop.f32.mrb[56].mxu1 }
 0x410   :  { %24930 = vst [vmem:[#allocation12_spill] sm:$0xff] %v17920_v55  ;;  %v17922_v52 = vpop.f32.mrb[57].mxu1 }
 0x411   :  { %24931 = vst [vmem:[#allocation13_spill] sm:$0xff] %v17922_v52  ;;  %v17924_v28 = vpop.f32.mrb[58].mxu1 }
 0x412   :  { %24932 = vst [vmem:[#allocation19_spill] sm:$0xff] %v17924_v28  ;;  %v17926_v6 = vpop.f32.mrb[59].mxu1 }
 0x413   :  { %24933 = vst [vmem:[#allocation21_spill] sm:$0xff] %v17926_v6 }
 0x417   :  { %v17928_v1 = vpop.f32.mrb[60].mxu1 }
 0x418   :  { %24934 = vst [vmem:[#allocation22_spill] sm:$0xff] %v17928_v1  ;;  %v17930_v27 = vpop.f32.mrb[61].mxu1 }
 0x419   :  { %24935 = vst [vmem:[#allocation23_spill] sm:$0xff] %v17930_v27  ;;  %v17932_v4 = vpop.f32.mrb[62].mxu1 }
 0x41a   :  { %24936 = vst [vmem:[#allocation25_spill] sm:$0xff] %v17932_v4  ;;  %v17934_v38 = vpop.f32.mrb[63].mxu1 }
 0x41b   :  { %24937 = vst [vmem:[#allocation27_spill] sm:$0xff] %v17934_v38 }
 0x445   :  { %v14874_v3 = vpop.f32.mrb[0].mxu0 }
 0x446   :  { %v17937_v33 = vadd.f32 %v14874_v3, %v17766_v61  ;;  %v3734_v53 = vpop.f32.mrb[1].mxu0 }
 0x447   :  { %v17940_v55 = vadd.f32 %v3734_v53, %v17770_v22  ;;  %v14875_v52 = vpop.f32.mrb[2].mxu0 }
 0x448   :  { %24938 = vst [vmem:[#allocation29_spill] sm:$0xff] %v17937_v33  ;;  %v17943_v6 = vadd.f32 %v14875_v52, %v17772_v30  ;;  %v3737_v1 = vpop.f32.mrb[3].mxu0  ;;  %v4190_v61 = vmul.f32 %v17937_v33, %v17937_v33 }
 0x449   :  { %24939 = vst [vmem:[#allocation30_spill] sm:$0xff] %v17940_v55  ;;  %v4188_v27 = vmul.f32 %v17940_v55, %v17940_v55  ;;  %v17948_v4 = vadd.f32 %v3737_v1, %v17774_v51  ;;  %v4054_v3 = vsel %vm4053_vm8, %v17940_v55, 0.0  ;;  %v4057_v51 = vsel %vm4053_vm8, %v17937_v33, 0.0 }
 0x44a   :  { %v4191_v53 = vmul.f32 %v17943_v6, %v17943_v6  ;;  %v4059_v14 = vsel %vm4053_vm8, %v17943_v6, 0.0 }
 0x44b   :  { %24940 = vst [vmem:[#allocation43_spill] sm:$0xff] %v17948_v4  ;;  %v4055_v22 = vsel %vm4053_vm8, %v17948_v4, 0.0  ;;  %v4189_v30 = vmul.f32 %v17948_v4, %v17948_v4  ;;  %v4252_v1 = vsel %vm4053_vm8, %v4188_v27, 0.0  ;;  %v4255_v4 = vsel %vm4053_vm8, %v4190_v61, 0.0 }
 0x44c   :  { %v4056_v52 = vadd.f32 %v4055_v22, %v4054_v3  ;;  %v4257_v27 = vsel %vm4053_vm8, %v4191_v53, 0.0 }
 0x44d   :  { %v4253_v38 = vsel %vm4053_vm8, %v4189_v30, 0.0  ;;  %v14878_v28 = vpop.f32.mrb[4].mxu0 }
 0x44e   :  { %v4058_v13 = vadd.f32 %v4057_v51, %v4056_v52  ;;  %v4254_v55 = vadd.f32 %v4253_v38, %v4252_v1  ;;  %v17965_v56 = vadd.f32 %v14878_v28, %v17778_v8  ;;  %v3750_v57 = vpop.f32.mrb[5].mxu0 }
 0x44f   :  { %v17971_v3 = vadd.f32 %v3750_v57, %v17782_v26  ;;  %v14879_v22 = vpop.f32.mrb[6].mxu0 }
 0x450   :  { %v4256_v33 = vadd.f32 %v4255_v4, %v4254_v55  ;;  %v4060_v30 = vadd.f32 %v4059_v14, %v4058_v13  ;;  %v3753_v41 = vpop.f32.mrb[7].mxu0  ;;  %v17979_v28 = vadd.f32 %v14879_v22, %v17784_v36  ;;  %v4194_v13 = vmul.f32 %v17965_v56, %v17965_v56 }
 0x451   :  { %v4061_v38 = vsel %vm4053_vm8, %v17971_v3, 0.0  ;;  %v4192_v8 = vmul.f32 %v17971_v3, %v17971_v3  ;;  %v17982_v61 = vadd.f32 %v3753_v41, %v17786_v40  ;;  %v4065_v36 = vsel %vm4053_vm8, %v17965_v56, 0.0 }
 0x452   :  { %v4062_v26 = vadd.f32 %v4061_v38, %v4060_v30  ;;  %v4258_v57 = vadd.f32 %v4257_v27, %v4256_v33  ;;  %v4195_v41 = vmul.f32 %v17979_v28, %v17979_v28  ;;  %v4067_v27 = vsel %vm4053_vm8, %v17979_v28, 0.0 }
 0x453   :  { %v4259_v52 = vsel %vm4053_vm8, %v4192_v8, 0.0  ;;  %v4063_v14 = vsel %vm4053_vm8, %v17982_v61, 0.0  ;;  %v4193_v53 = vmul.f32 %v17982_v61, %v17982_v61 }
 0x454   :  { %v4260_v55 = vadd.f32 %v4259_v52, %v4258_v57  ;;  %v4064_v4 = vadd.f32 %v4063_v14, %v4062_v26  ;;  %v4263_v26 = vsel %vm4053_vm8, %v4194_v13, 0.0 }
 0x455   :  { %v14882_v40 = vpop.f32.mrb[8].mxu0  ;;  %v4261_v51 = vsel %vm4053_vm8, %v4193_v53, 0.0 }
 0x456   :  { %v4066_v33 = vadd.f32 %v4065_v36, %v4064_v4  ;;  %v17997_v1 = vadd.f32 %v14882_v40, %v17790_v20  ;;  %v3766_v22 = vpop.f32.mrb[9].mxu0  ;;  %v4262_v30 = vadd.f32 %v4261_v51, %v4260_v55 }
 0x457   :  { %v18002_v38 = vadd.f32 %v3766_v22, %v17794_v23  ;;  %v14883_v8 = vpop.f32.mrb[10].mxu0  ;;  %v4265_v23 = vsel %vm4053_vm8, %v4195_v41, 0.0 }
 0x458   :  { %v4068_v57 = vadd.f32 %v4067_v27, %v4066_v33  ;;  %v18006_v52 = vadd.f32 %v14883_v8, %v17796_v59  ;;  %v3769_v14 = vpop.f32.mrb[11].mxu0  ;;  %v4264_v4 = vadd.f32 %v4263_v26, %v4262_v30  ;;  %v4198_v51 = vmul.f32 %v17997_v1, %v17997_v1 }
 0x459   :  { %v4069_v20 = vsel %vm4053_vm8, %v18002_v38, 0.0  ;;  %v4196_v53 = vmul.f32 %v18002_v38, %v18002_v38  ;;  %v18013_v55 = vadd.f32 %v3769_v14, %v17798_v17  ;;  %v4073_v17 = vsel %vm4053_vm8, %v17997_v1, 0.0 }
 0x45a   :  { %v4070_v36 = vadd.f32 %v4069_v20, %v4068_v57  ;;  %v4266_v40 = vadd.f32 %v4265_v23, %v4264_v4  ;;  %v4199_v8 = vmul.f32 %v18006_v52, %v18006_v52  ;;  %v4075_v4 = vsel %vm4053_vm8, %v18006_v52, 0.0 }
 0x45b   :  { %v4267_v13 = vsel %vm4053_vm8, %v4196_v53, 0.0  ;;  %v4071_v59 = vsel %vm4053_vm8, %v18013_v55, 0.0  ;;  %v4197_v33 = vmul.f32 %v18013_v55, %v18013_v55 }
 0x45c   :  { %v4072_v22 = vadd.f32 %v4071_v59, %v4070_v36  ;;  %v4268_v27 = vadd.f32 %v4267_v13, %v4266_v40  ;;  %v4271_v36 = vsel %vm4053_vm8, %v4198_v51, 0.0 }
 0x45d   :  { %v4269_v41 = vsel %vm4053_vm8, %v4197_v33, 0.0  ;;  %v14886_v30 = vpop.f32.mrb[12].mxu0 }
 0x45e   :  { %v4074_v26 = vadd.f32 %v4073_v17, %v4072_v22  ;;  %v18029_v57 = vadd.f32 %v14886_v30, %v17801_v54  ;;  %v3782_v14 = vpop.f32.mrb[13].mxu0  ;;  %v4270_v20 = vadd.f32 %v4269_v41, %v4268_v27 }
 0x45f   :  { %v18034_v53 = vadd.f32 %v3782_v14, %v17805_v12  ;;  %v14887_v23 = vpop.f32.mrb[14].mxu0  ;;  %v4273_v12 = vsel %vm4053_vm8, %v4199_v8, 0.0 }
 0x460   :  { %v4076_v40 = vadd.f32 %v4075_v4, %v4074_v26  ;;  %v18038_v13 = vadd.f32 %v14887_v23, %v17807_v48  ;;  %v3785_v59 = vpop.f32.mrb[15].mxu0  ;;  %v4272_v33 = vadd.f32 %v4271_v36, %v4270_v20  ;;  %v4202_v26 = vmul.f32 %v18029_v57, %v18029_v57 }
 0x461   :  { %v4077_v54 = vsel %vm4053_vm8, %v18034_v53, 0.0  ;;  %v4200_v22 = vmul.f32 %v18034_v53, %v18034_v53  ;;  %v18045_v17 = vadd.f32 %v3785_v59, %v17809_v0  ;;  %v4081_v0 = vsel %vm4053_vm8, %v18029_v57, 0.0 }
 0x462   :  { %v4078_v27 = vadd.f32 %v4077_v54, %v4076_v40  ;;  %v4274_v41 = vadd.f32 %v4273_v12, %v4272_v33  ;;  %v4203_v23 = vmul.f32 %v18038_v13, %v18038_v13  ;;  %v4083_v33 = vsel %vm4053_vm8, %v18038_v13, 0.0 }
 0x463   :  { %v4275_v51 = vsel %vm4053_vm8, %v4200_v22, 0.0  ;;  %v4079_v48 = vsel %vm4053_vm8, %v18045_v17, 0.0  ;;  %v4201_v30 = vmul.f32 %v18045_v17, %v18045_v17 }
 0x464   :  { %v4080_v14 = vadd.f32 %v4079_v48, %v4078_v27  ;;  %v4276_v4 = vadd.f32 %v4275_v51, %v4274_v41  ;;  %v4279_v27 = vsel %vm4053_vm8, %v4202_v26, 0.0 }
 0x465   :  { %v4277_v8 = vsel %vm4053_vm8, %v4201_v30, 0.0  ;;  %v14890_v20 = vpop.f32.mrb[16].mxu0 }
 0x466   :  { %v4082_v36 = vadd.f32 %v4081_v0, %v4080_v14  ;;  %v18061_v40 = vadd.f32 %v14890_v20, %v17825_v37  ;;  %v3798_v59 = vpop.f32.mrb[17].mxu0  ;;  %v4278_v54 = vadd.f32 %v4277_v8, %v4276_v4 }
 0x467   :  { %v18066_v22 = vadd.f32 %v3798_v59, %v17829_v43  ;;  %v14891_v12 = vpop.f32.mrb[18].mxu0  ;;  %v4281_v43 = vsel %vm4053_vm8, %v4203_v23, 0.0 }
 0x468   :  { %v4084_v41 = vadd.f32 %v4083_v33, %v4082_v36  ;;  %v18070_v51 = vadd.f32 %v14891_v12, %v17831_v60  ;;  %v3801_v48 = vpop.f32.mrb[19].mxu0  ;;  %v4280_v30 = vadd.f32 %v4279_v27, %v4278_v54  ;;  %v4206_v36 = vmul.f32 %v18061_v40, %v18061_v40 }
 0x469   :  { %v4085_v37 = vsel %vm4053_vm8, %v18066_v22, 0.0  ;;  %v4204_v14 = vmul.f32 %v18066_v22, %v18066_v22  ;;  %v18077_v0 = vadd.f32 %v3801_v48, %v17833_v31  ;;  %v4089_v31 = vsel %vm4053_vm8, %v18061_v40, 0.0 }
 0x46a   :  { %v4086_v4 = vadd.f32 %v4085_v37, %v4084_v41  ;;  %v4282_v8 = vadd.f32 %v4281_v43, %v4280_v30  ;;  %v4207_v12 = vmul.f32 %v18070_v51, %v18070_v51  ;;  %v4091_v30 = vsel %vm4053_vm8, %v18070_v51, 0.0 }
 0x46b   :  { %v4283_v26 = vsel %vm4053_vm8, %v4204_v14, 0.0  ;;  %v4087_v60 = vsel %vm4053_vm8, %v18077_v0, 0.0  ;;  %v4205_v20 = vmul.f32 %v18077_v0, %v18077_v0 }
 0x46c   :  { %v4088_v59 = vadd.f32 %v4087_v60, %v4086_v4  ;;  %v4284_v33 = vadd.f32 %v4283_v26, %v4282_v8  ;;  %v4287_v4 = vsel %vm4053_vm8, %v4206_v36, 0.0 }
 0x46d   :  { %v4285_v23 = vsel %vm4053_vm8, %v4205_v20, 0.0  ;;  %v14894_v54 = vpop.f32.mrb[20].mxu0 }
 0x46e   :  { %v4090_v27 = vadd.f32 %v4089_v31, %v4088_v59  ;;  %v18093_v41 = vadd.f32 %v14894_v54, %v17839_v18  ;;  %v3814_v48 = vpop.f32.mrb[21].mxu0  ;;  %v4286_v37 = vadd.f32 %v4285_v23, %v4284_v33 }
 0x46f   :  { %v18098_v14 = vadd.f32 %v3814_v48, %v17841_v7  ;;  %v14895_v43 = vpop.f32.mrb[22].mxu0  ;;  %v4289_v7 = vsel %vm4053_vm8, %v4207_v12, 0.0 }
 0x470   :  { %v4092_v8 = vadd.f32 %v4091_v30, %v4090_v27  ;;  %v18102_v26 = vadd.f32 %v14895_v43, %v17843_v58  ;;  %v3817_v60 = vpop.f32.mrb[23].mxu0  ;;  %v4288_v20 = vadd.f32 %v4287_v4, %v4286_v37  ;;  %v4210_v27 = vmul.f32 %v18093_v41, %v18093_v41 }
 0x471   :  { %v4093_v18 = vsel %vm4053_vm8, %v18098_v14, 0.0  ;;  %v4208_v59 = vmul.f32 %v18098_v14, %v18098_v14  ;;  %v18109_v31 = vadd.f32 %v3817_v60, %v17845_v24  ;;  %v4097_v24 = vsel %vm4053_vm8, %v18093_v41, 0.0 }
 0x472   :  { %v4094_v33 = vadd.f32 %v4093_v18, %v4092_v8  ;;  %v4290_v23 = vadd.f32 %v4289_v7, %v4288_v20  ;;  %v4211_v43 = vmul.f32 %v18102_v26, %v18102_v26  ;;  %v4099_v20 = vsel %vm4053_vm8, %v18102_v26, 0.0 }
 0x473   :  { %v4291_v36 = vsel %vm4053_vm8, %v4208_v59, 0.0  ;;  %v4095_v58 = vsel %vm4053_vm8, %v18109_v31, 0.0  ;;  %v4209_v54 = vmul.f32 %v18109_v31, %v18109_v31 }
 0x474   :  { %v4096_v48 = vadd.f32 %v4095_v58, %v4094_v33  ;;  %v4292_v30 = vadd.f32 %v4291_v36, %v4290_v23  ;;  %v4295_v33 = vsel %vm4053_vm8, %v4210_v27, 0.0 }
 0x475   :  { %v4293_v12 = vsel %vm4053_vm8, %v4209_v54, 0.0  ;;  %v14898_v37 = vpop.f32.mrb[24].mxu0 }
 0x476   :  { %v4098_v4 = vadd.f32 %v4097_v24, %v4096_v48  ;;  %v18125_v8 = vadd.f32 %v14898_v37, %v17851_v42  ;;  %v3830_v60 = vpop.f32.mrb[25].mxu0  ;;  %v4294_v18 = vadd.f32 %v4293_v12, %v4292_v30 }
 0x477   :  { %v18130_v59 = vadd.f32 %v3830_v60, %v17853_v32  ;;  %v14899_v7 = vpop.f32.mrb[26].mxu0  ;;  %v4297_v32 = vsel %vm4053_vm8, %v4211_v43, 0.0 }
 0x478   :  { %v4100_v23 = vadd.f32 %v4099_v20, %v4098_v4  ;;  %v18134_v36 = vadd.f32 %v14899_v7, %v17855_v16  ;;  %v3833_v58 = vpop.f32.mrb[27].mxu0  ;;  %v4296_v54 = vadd.f32 %v4295_v33, %v4294_v18  ;;  %v4214_v4 = vmul.f32 %v18125_v8, %v18125_v8 }
 0x479   :  { %v4101_v42 = vsel %vm4053_vm8, %v18130_v59, 0.0  ;;  %v4212_v48 = vmul.f32 %v18130_v59, %v18130_v59  ;;  %v18141_v24 = vadd.f32 %v3833_v58, %v17857_v19  ;;  %v4105_v19 = vsel %vm4053_vm8, %v18125_v8, 0.0 }
 0x47a   :  { %v4102_v30 = vadd.f32 %v4101_v42, %v4100_v23  ;;  %v4298_v12 = vadd.f32 %v4297_v32, %v4296_v54  ;;  %v4215_v7 = vmul.f32 %v18134_v36, %v18134_v36  ;;  %v4107_v54 = vsel %vm4053_vm8, %v18134_v36, 0.0 }
 0x47b   :  { %v4299_v27 = vsel %vm4053_vm8, %v4212_v48, 0.0  ;;  %v4103_v16 = vsel %vm4053_vm8, %v18141_v24, 0.0  ;;  %v4213_v37 = vmul.f32 %v18141_v24, %v18141_v24 }
 0x47c   :  { %v4104_v60 = vadd.f32 %v4103_v16, %v4102_v30  ;;  %v4300_v20 = vadd.f32 %v4299_v27, %v4298_v12  ;;  %v4303_v30 = vsel %vm4053_vm8, %v4214_v4, 0.0 }
 0x47d   :  { %v4301_v43 = vsel %vm4053_vm8, %v4213_v37, 0.0  ;;  %v14902_v18 = vpop.f32.mrb[28].mxu0 }
 0x47e   :  { %v4106_v33 = vadd.f32 %v4105_v19, %v4104_v60  ;;  %v18157_v23 = vadd.f32 %v14902_v18, %v17863_v62  ;;  %v3846_v58 = vpop.f32.mrb[29].mxu0  ;;  %v4302_v42 = vadd.f32 %v4301_v43, %v4300_v20 }
 0x47f   :  { %v18162_v48 = vadd.f32 %v3846_v58, %v17865_v10  ;;  %v14903_v32 = vpop.f32.mrb[30].mxu0  ;;  %v4305_v10 = vsel %vm4053_vm8, %v4215_v7, 0.0 }
 0x480   :  { %v4108_v12 = vadd.f32 %v4107_v54, %v4106_v33  ;;  %v18166_v27 = vadd.f32 %v14903_v32, %v17867_v35  ;;  %v3849_v16 = vpop.f32.mrb[31].mxu0  ;;  %v4304_v37 = vadd.f32 %v4303_v30, %v4302_v42  ;;  %v4218_v33 = vmul.f32 %v18157_v23, %v18157_v23 }
 0x481   :  { %v4109_v62 = vsel %vm4053_vm8, %v18162_v48, 0.0  ;;  %v4216_v60 = vmul.f32 %v18162_v48, %v18162_v48  ;;  %v18173_v19 = vadd.f32 %v3849_v16, %v17869_v46  ;;  %v4113_v46 = vsel %vm4053_vm8, %v18157_v23, 0.0 }
 0x482   :  { %v4110_v20 = vadd.f32 %v4109_v62, %v4108_v12  ;;  %v4306_v43 = vadd.f32 %v4305_v10, %v4304_v37  ;;  %v4219_v32 = vmul.f32 %v18166_v27, %v18166_v27  ;;  %v4115_v37 = vsel %vm4053_vm8, %v18166_v27, 0.0 }
 0x483   :  { %v4307_v4 = vsel %vm4053_vm8, %v4216_v60, 0.0  ;;  %v4111_v35 = vsel %vm4053_vm8, %v18173_v19, 0.0  ;;  %v4217_v18 = vmul.f32 %v18173_v19, %v18173_v19 }
 0x484   :  { %v4112_v58 = vadd.f32 %v4111_v35, %v4110_v20  ;;  %v4308_v54 = vadd.f32 %v4307_v4, %v4306_v43  ;;  %v4311_v20 = vsel %vm4053_vm8, %v4218_v33, 0.0 }
 0x485   :  { %v4309_v7 = vsel %vm4053_vm8, %v4217_v18, 0.0  ;;  %v14906_v42 = vpop.f32.mrb[32].mxu0 }
 0x486   :  { %v4114_v30 = vadd.f32 %v4113_v46, %v4112_v58  ;;  %v18189_v12 = vadd.f32 %v14906_v42, %v17872_v25  ;;  %v3862_v16 = vpop.f32.mrb[33].mxu0  ;;  %v4310_v62 = vadd.f32 %v4309_v7, %v4308_v54 }
 0x487   :  { %v18194_v60 = vadd.f32 %v3862_v16, %v17874_v21  ;;  %v14907_v10 = vpop.f32.mrb[34].mxu0  ;;  %v4313_v21 = vsel %vm4053_vm8, %v4219_v32, 0.0 }
 0x488   :  { %v4116_v43 = vadd.f32 %v4115_v37, %v4114_v30  ;;  %v18198_v4 = vadd.f32 %v14907_v10, %v17876_v49  ;;  %v3865_v35 = vpop.f32.mrb[35].mxu0  ;;  %v4312_v18 = vadd.f32 %v4311_v20, %v4310_v62  ;;  %v4121_v30 = vsel %vm4053_vm8, %v18189_v12, 0.0 }
 0x489   :  { %v4117_v25 = vsel %vm4053_vm8, %v18194_v60, 0.0  ;;  %v4220_v58 = vmul.f32 %v18194_v60, %v18194_v60  ;;  %v18205_v46 = vadd.f32 %v3865_v35, %v17878_v44  ;;  %v4222_v16 = vmul.f32 %v18189_v12, %v18189_v12 }
 0x48a   :  { %v4118_v54 = vadd.f32 %v4117_v25, %v4116_v43  ;;  %v4314_v7 = vadd.f32 %v4313_v21, %v4312_v18  ;;  %v4223_v10 = vmul.f32 %v18198_v4, %v18198_v4  ;;  %v4123_v18 = vsel %vm4053_vm8, %v18198_v4, 0.0 }
 0x48b   :  { %v4315_v33 = vsel %vm4053_vm8, %v4220_v58, 0.0  ;;  %v4119_v49 = vsel %vm4053_vm8, %v18205_v46, 0.0  ;;  %v4221_v42 = vmul.f32 %v18205_v46, %v18205_v46 }
 0x48c   :  { %v4120_v44 = vadd.f32 %v4119_v49, %v4118_v54  ;;  %v4316_v37 = vadd.f32 %v4315_v33, %v4314_v7  ;;  %v4319_v54 = vsel %vm4053_vm8, %v4222_v16, 0.0 }
 0x48d   :  { %v4317_v32 = vsel %vm4053_vm8, %v4221_v42, 0.0  ;;  %v14910_v62 = vpop.f32.mrb[36].mxu0 }
 0x48e   :  { %v4122_v20 = vadd.f32 %v4121_v30, %v4120_v44  ;;  %v18221_v43 = vadd.f32 %v14910_v62, %v17880_v29  ;;  %v3878_v35 = vpop.f32.mrb[37].mxu0  ;;  %v4318_v25 = vadd.f32 %v4317_v32, %v4316_v37 }
 0x48f   :  { %v18226_v58 = vadd.f32 %v3878_v35, %v17882_v5  ;;  %v14911_v21 = vpop.f32.mrb[38].mxu0  ;;  %v4321_v5 = vsel %vm4053_vm8, %v4223_v10, 0.0 }
 0x490   :  { %v4124_v7 = vadd.f32 %v4123_v18, %v4122_v20  ;;  %v18230_v33 = vadd.f32 %v14911_v21, %v17884_v15  ;;  %v3881_v49 = vpop.f32.mrb[39].mxu0  ;;  %v4320_v42 = vadd.f32 %v4319_v54, %v4318_v25  ;;  %v4129_v20 = vsel %vm4053_vm8, %v18221_v43, 0.0 }
 0x491   :  { %v4125_v29 = vsel %vm4053_vm8, %v18226_v58, 0.0  ;;  %v4224_v30 = vmul.f32 %v18226_v58, %v18226_v58  ;;  %v18237_v44 = vadd.f32 %v3881_v49, %v17886_v34  ;;  %v4226_v35 = vmul.f32 %v18221_v43, %v18221_v43 }
 0x492   :  { %v4126_v37 = vadd.f32 %v4125_v29, %v4124_v7  ;;  %v4322_v32 = vadd.f32 %v4321_v5, %v4320_v42  ;;  %v4227_v21 = vmul.f32 %v18230_v33, %v18230_v33  ;;  %v4131_v42 = vsel %vm4053_vm8, %v18230_v33, 0.0 }
 0x493   :  { %v4323_v16 = vsel %vm4053_vm8, %v4224_v30, 0.0  ;;  %v4127_v15 = vsel %vm4053_vm8, %v18237_v44, 0.0  ;;  %v4225_v62 = vmul.f32 %v18237_v44, %v18237_v44 }
 0x494   :  { %v4128_v34 = vadd.f32 %v4127_v15, %v4126_v37  ;;  %v4324_v18 = vadd.f32 %v4323_v16, %v4322_v32  ;;  %v4327_v37 = vsel %vm4053_vm8, %v4226_v35, 0.0 }
 0x495   :  { %v4325_v10 = vsel %vm4053_vm8, %v4225_v62, 0.0  ;;  %v14914_v25 = vpop.f32.mrb[40].mxu0 }
 0x496   :  { %v4130_v54 = vadd.f32 %v4129_v20, %v4128_v34  ;;  %v18253_v7 = vadd.f32 %v14914_v25, %v17888_v47  ;;  %v3894_v49 = vpop.f32.mrb[41].mxu0  ;;  %v4326_v29 = vadd.f32 %v4325_v10, %v4324_v18 }
 0x497   :  { %v18258_v30 = vadd.f32 %v3894_v49, %v17890_v50  ;;  %v14915_v5 = vpop.f32.mrb[42].mxu0  ;;  %v4329_v50 = vsel %vm4053_vm8, %v4227_v21, 0.0 }
 0x498   :  { %24941 = vst [vmem:[#allocation20_spill] sm:$0xff] %v18253_v7  ;;  %v4132_v32 = vadd.f32 %v4131_v42, %v4130_v54  ;;  %v18262_v16 = vadd.f32 %v14915_v5, %v17892_v63  ;;  %v3897_v15 = vpop.f32.mrb[43].mxu0  ;;  %v4328_v62 = vadd.f32 %v4327_v37, %v4326_v29  ;;  %v4137_v54 = vsel %vm4053_vm8, %v18253_v7, 0.0 }
 0x499   :  { %v4133_v47 = vsel %vm4053_vm8, %v18258_v30, 0.0  ;;  %v4228_v20 = vmul.f32 %v18258_v30, %v18258_v30  ;;  %v18269_v34 = vadd.f32 %v3897_v15, %v17894_v39  ;;  %v4230_v49 = vmul.f32 %v18253_v7, %v18253_v7 }
 0x49a   :  { %24942 = vst [vmem:[#allocation24_spill] sm:$0xff] %v18262_v16  ;;  %v4134_v18 = vadd.f32 %v4133_v47, %v4132_v32  ;;  %v4330_v10 = vadd.f32 %v4329_v50, %v4328_v62  ;;  %v4231_v5 = vmul.f32 %v18262_v16, %v18262_v16  ;;  %v4139_v62 = vsel %vm4053_vm8, %v18262_v16, 0.0 }
 0x49b   :  { %24943 = vst [vmem:[#allocation32_spill] sm:$0xff] %v18269_v34  ;;  %v4331_v35 = vsel %vm4053_vm8, %v4228_v20, 0.0  ;;  %v4135_v63 = vsel %vm4053_vm8, %v18269_v34, 0.0  ;;  %v4229_v25 = vmul.f32 %v18269_v34, %v18269_v34 }
 0x49c   :  { %v4136_v39 = vadd.f32 %v4135_v63, %v4134_v18  ;;  %v4332_v42 = vadd.f32 %v4331_v35, %v4330_v10  ;;  %v4335_v18 = vsel %vm4053_vm8, %v4230_v49, 0.0 }
 0x49d   :  { %v4333_v21 = vsel %vm4053_vm8, %v4229_v25, 0.0  ;;  %v14918_v29 = vpop.f32.mrb[44].mxu0 }
 0x49e   :  { %v4138_v37 = vadd.f32 %v4137_v54, %v4136_v39  ;;  %v18285_v32 = vadd.f32 %v14918_v29, %v17896_v45  ;;  %v3910_v15 = vpop.f32.mrb[45].mxu0  ;;  %v4334_v47 = vadd.f32 %v4333_v21, %v4332_v42 }
 0x49f   :  { %v18290_v20 = vadd.f32 %v3910_v15, %v17898_v11  ;;  %v14919_v50 = vpop.f32.mrb[46].mxu0  ;;  %v4337_v11 = vsel %vm4053_vm8, %v4231_v5, 0.0 }
 0x4a0   :  { %24944 = vst [vmem:[#allocation33_spill] sm:$0xff] %v18285_v32  ;;  %v4140_v10 = vadd.f32 %v4139_v62, %v4138_v37  ;;  %v18294_v35 = vadd.f32 %v14919_v50, %v17900_v2  ;;  %v3913_v63 = vpop.f32.mrb[47].mxu0  ;;  %v4336_v25 = vadd.f32 %v4335_v18, %v4334_v47  ;;  %v4145_v37 = vsel %vm4053_vm8, %v18285_v32, 0.0 }
 0x4a1   :  { %24945 = vst [vmem:[#allocation34_spill] sm:$0xff] %v18290_v20  ;;  %v4141_v45 = vsel %vm4053_vm8, %v18290_v20, 0.0  ;;  %v4232_v54 = vmul.f32 %v18290_v20, %v18290_v20  ;;  %v18301_v39 = vadd.f32 %v3913_v63, %v17902_v9  ;;  %v4234_v15 = vmul.f32 %v18285_v32, %v18285_v32 }
 0x4a2   :  { %24946 = vst [vmem:[#allocation35_spill] sm:$0xff] %v18294_v35  ;;  %v4142_v42 = vadd.f32 %v4141_v45, %v4140_v10  ;;  %v4338_v21 = vadd.f32 %v4337_v11, %v4336_v25  ;;  %v4235_v50 = vmul.f32 %v18294_v35, %v18294_v35  ;;  %v24948_v10 = vld [vmem:[#allocation3_spill] sm:$0xff]  ;;  %v4147_v45 = vsel %vm4053_vm8, %v18294_v35, 0.0  ;;  %v24950_v11 = vld [vmem:[#allocation4_spill] sm:$0xff] }
 0x4a3   :  { %24947 = vst [vmem:[#allocation2_spill] sm:$0xff] %v18301_v39  ;;  %v4339_v49 = vsel %vm4053_vm8, %v4232_v54, 0.0  ;;  %v4143_v2 = vsel %vm4053_vm8, %v18301_v39, 0.0  ;;  %v4233_v29 = vmul.f32 %v18301_v39, %v18301_v39 }
 0x4a4   :  { %v4144_v9 = vadd.f32 %v4143_v2, %v4142_v42  ;;  %v4340_v62 = vadd.f32 %v4339_v49, %v4338_v21  ;;  %v4343_v21 = vsel %vm4053_vm8, %v4234_v15, 0.0  ;;  %v24952_v2 = vld [vmem:[#allocation5_spill] sm:$0xff] }
 0x4a5   :  { %v4341_v5 = vsel %vm4053_vm8, %v4233_v29, 0.0  ;;  %v14922_v47 = vpop.f32.mrb[48].mxu0 }
 0x4a6   :  { %v4146_v18 = vadd.f32 %v4145_v37, %v4144_v9  ;;  %v18317_v63 = vadd.f32 %v14922_v47, %v24948_v10  ;;  %v3926_v25 = vpop.f32.mrb[49].mxu0  ;;  %v4342_v54 = vadd.f32 %v4341_v5, %v4340_v62  ;;  %v24954_v10 = vld [vmem:[#allocation6_spill] sm:$0xff]  ;;  %v4345_v5 = vsel %vm4053_vm8, %v4235_v50, 0.0 }
 0x4a7   :  { %v18322_v39 = vadd.f32 %v3926_v25, %v24950_v11  ;;  %v14923_v42 = vpop.f32.mrb[50].mxu0 }
 0x4a8   :  { %24949 = vst [vmem:[#allocation36_spill] sm:$0xff] %v18317_v63  ;;  %v4148_v49 = vadd.f32 %v4147_v45, %v4146_v18  ;;  %v18326_v29 = vadd.f32 %v14923_v42, %v24952_v2  ;;  %v3929_v32 = vpop.f32.mrb[51].mxu0  ;;  %v4344_v37 = vadd.f32 %v4343_v21, %v4342_v54  ;;  %v4153_v54 = vsel %vm4053_vm8, %v18317_v63, 0.0 }
 0x4a9   :  { %24951 = vst [vmem:[#allocation37_spill] sm:$0xff] %v18322_v39  ;;  %v4149_v9 = vsel %vm4053_vm8, %v18322_v39, 0.0  ;;  %v4236_v47 = vmul.f32 %v18322_v39, %v18322_v39  ;;  %v18333_v62 = vadd.f32 %v3929_v32, %v24954_v10  ;;  %v4238_v42 = vmul.f32 %v18317_v63, %v18317_v63  ;;  %v24958_v39 = vld [vmem:[#allocation9_spill] sm:$0xff] }
 0x4aa   :  { %24953 = vst [vmem:[#allocation26_spill] sm:$0xff] %v18326_v29  ;;  %v4150_v25 = vadd.f32 %v4149_v9, %v4148_v49  ;;  %v4346_v11 = vadd.f32 %v4345_v5, %v4344_v37  ;;  %v4239_v2 = vmul.f32 %v18326_v29, %v18326_v29  ;;  %v24956_v9 = vld [vmem:[#allocation8_spill] sm:$0xff]  ;;  %v4155_v5 = vsel %vm4053_vm8, %v18326_v29, 0.0 }
 0x4ab   :  { %24955 = vst [vmem:[#allocation28_spill] sm:$0xff] %v18333_v62  ;;  %v4347_v15 = vsel %vm4053_vm8, %v4236_v47, 0.0  ;;  %v4151_v18 = vsel %vm4053_vm8, %v18333_v62, 0.0  ;;  %v4237_v45 = vmul.f32 %v18333_v62, %v18333_v62 }
 0x4ac   :  { %v4152_v32 = vadd.f32 %v4151_v18, %v4150_v25  ;;  %v4348_v21 = vadd.f32 %v4347_v15, %v4346_v11  ;;  %v4351_v11 = vsel %vm4053_vm8, %v4238_v42, 0.0  ;;  %v24960_v18 = vld [vmem:[#allocation10_spill] sm:$0xff] }
 0x4ad   :  { %v4349_v50 = vsel %vm4053_vm8, %v4237_v45, 0.0  ;;  %v14926_v49 = vpop.f32.mrb[52].mxu0 }
 0x4ae   :  { %v4154_v37 = vadd.f32 %v4153_v54, %v4152_v32  ;;  %v18349_v47 = vadd.f32 %v14926_v49, %v24956_v9  ;;  %v3942_v10 = vpop.f32.mrb[53].mxu0  ;;  %v4350_v62 = vadd.f32 %v4349_v50, %v4348_v21  ;;  %v24962_v9 = vld [vmem:[#allocation11_spill] sm:$0xff] }
 0x4af   :  { %v18354_v35 = vadd.f32 %v3942_v10, %v24958_v39  ;;  %v14927_v25 = vpop.f32.mrb[54].mxu0  ;;  %v4353_v39 = vsel %vm4053_vm8, %v4239_v2, 0.0 }
 0x4b0   :  { %24957 = vst [vmem:[#allocation31_spill] sm:$0xff] %v18349_v47  ;;  %v4156_v15 = vadd.f32 %v4155_v5, %v4154_v37  ;;  %v18358_v45 = vadd.f32 %v14927_v25, %v24960_v18  ;;  %v3945_v63 = vpop.f32.mrb[55].mxu0  ;;  %v4352_v54 = vadd.f32 %v4351_v11, %v4350_v62  ;;  %v4242_v5 = vmul.f32 %v18349_v47, %v18349_v47 }
 0x4b1   :  { %24959 = vst [vmem:[#allocation49_spill] sm:$0xff] %v18354_v35  ;;  %v4157_v32 = vsel %vm4053_vm8, %v18354_v35, 0.0  ;;  %v4240_v49 = vmul.f32 %v18354_v35, %v18354_v35  ;;  %v18365_v21 = vadd.f32 %v3945_v63, %v24962_v9  ;;  %v4161_v63 = vsel %vm4053_vm8, %v18349_v47, 0.0 }
 0x4b2   :  { %24961 = vst [vmem:[#allocation50_spill] sm:$0xff] %v18358_v45  ;;  %v4158_v50 = vadd.f32 %v4157_v32, %v4156_v15  ;;  %v4354_v10 = vadd.f32 %v4353_v39, %v4352_v54  ;;  %v4243_v18 = vmul.f32 %v18358_v45, %v18358_v45  ;;  %v24964_v32 = vld [vmem:[#allocation12_spill] sm:$0xff]  ;;  %v4163_v39 = vsel %vm4053_vm8, %v18358_v45, 0.0 }
 0x4b3   :  { %24963 = vst [vmem:[#allocation14_spill] sm:$0xff] %v18365_v21  ;;  %v4355_v42 = vsel %vm4053_vm8, %v4240_v49, 0.0  ;;  %v4159_v37 = vsel %vm4053_vm8, %v18365_v21, 0.0  ;;  %v4241_v62 = vmul.f32 %v18365_v21, %v18365_v21 }
 0x4b4   :  { %v4160_v25 = vadd.f32 %v4159_v37, %v4158_v50  ;;  %v4356_v11 = vadd.f32 %v4355_v42, %v4354_v10  ;;  %v24966_v50 = vld [vmem:[#allocation13_spill] sm:$0xff]  ;;  %v4359_v10 = vsel %vm4053_vm8, %v4242_v5, 0.0 }
 0x4b5   :  { %v4357_v2 = vsel %vm4053_vm8, %v4241_v62, 0.0  ;;  %v14930_v15 = vpop.f32.mrb[56].mxu0  ;;  %v24968_v62 = vld [vmem:[#allocation19_spill] sm:$0xff] }
 0x4b6   :  { %v4162_v54 = vadd.f32 %v4161_v63, %v4160_v25  ;;  %v18381_v49 = vadd.f32 %v14930_v15, %v24964_v32  ;;  %v3958_v9 = vpop.f32.mrb[57].mxu0  ;;  %v4358_v21 = vadd.f32 %v4357_v2, %v4356_v11  ;;  %v24970_v32 = vld [vmem:[#allocation21_spill] sm:$0xff]  ;;  %v4361_v2 = vsel %vm4053_vm8, %v4243_v18, 0.0 }
 0x4b7   :  { %v18386_v37 = vadd.f32 %v3958_v9, %v24966_v50  ;;  %v14931_v47 = vpop.f32.mrb[58].mxu0 }
 0x4b8   :  { %24965 = vst [vmem:[#allocation15_spill] sm:$0xff] %v18381_v49  ;;  %v4164_v42 = vadd.f32 %v4163_v39, %v4162_v54  ;;  %v18390_v35 = vadd.f32 %v14931_v47, %v24968_v62  ;;  %v3961_v29 = vpop.f32.mrb[59].mxu0  ;;  %v4360_v25 = vadd.f32 %v4359_v10, %v4358_v21  ;;  %v4246_v54 = vmul.f32 %v18381_v49, %v18381_v49 }
 0x4b9   :  { %24967 = vst [vmem:[#allocation16_spill] sm:$0xff] %v18386_v37  ;;  %v4165_v63 = vsel %vm4053_vm8, %v18386_v37, 0.0  ;;  %v4244_v15 = vmul.f32 %v18386_v37, %v18386_v37  ;;  %v18397_v11 = vadd.f32 %v3961_v29, %v24970_v32  ;;  %v4169_v29 = vsel %vm4053_vm8, %v18381_v49, 0.0 }
 0x4ba   :  { %24969 = vst [vmem:[#allocation17_spill] sm:$0xff] %v18390_v35  ;;  %v4166_v9 = vadd.f32 %v4165_v63, %v4164_v42  ;;  %v4362_v50 = vadd.f32 %v4361_v2, %v4360_v25  ;;  %v4247_v62 = vmul.f32 %v18390_v35, %v18390_v35  ;;  %v24972_v63 = vld [vmem:[#allocation22_spill] sm:$0xff]  ;;  %v4171_v2 = vsel %vm4053_vm8, %v18390_v35, 0.0 }
 0x4bb   :  { %24971 = vst [vmem:[#allocation18_spill] sm:$0xff] %v18397_v11  ;;  %v4363_v5 = vsel %vm4053_vm8, %v4244_v15, 0.0  ;;  %v4167_v47 = vsel %vm4053_vm8, %v18397_v11, 0.0  ;;  %v4245_v21 = vmul.f32 %v18397_v11, %v18397_v11 }
 0x4bc   :  { %v4168_v39 = vadd.f32 %v4167_v47, %v4166_v9  ;;  %v4364_v10 = vadd.f32 %v4363_v5, %v4362_v50  ;;  %v24974_v9 = vld [vmem:[#allocation23_spill] sm:$0xff]  ;;  %v4367_v50 = vsel %vm4053_vm8, %v4246_v54, 0.0 }
 0x4bd   :  { %v4365_v18 = vsel %vm4053_vm8, %v4245_v21, 0.0  ;;  %v14934_v42 = vpop.f32.mrb[60].mxu0  ;;  %v24976_v21 = vld [vmem:[#allocation25_spill] sm:$0xff] }
 0x4be   :  { %v4170_v25 = vadd.f32 %v4169_v29, %v4168_v39  ;;  %v18413_v15 = vadd.f32 %v14934_v42, %v24972_v63  ;;  %v3974_v32 = vpop.f32.mrb[61].mxu0  ;;  %v4366_v11 = vadd.f32 %v4365_v18, %v4364_v10  ;;  %v24977_v42 = vld [vmem:[#allocation27_spill] sm:$0xff]  ;;  %v4369_v10 = vsel %vm4053_vm8, %v4247_v62, 0.0 }
 0x4bf   :  { %v18418_v47 = vadd.f32 %v3974_v32, %v24974_v9  ;;  %v14935_v49 = vpop.f32.mrb[62].mxu0 }
 0x4c0   :  { %24973 = vst [vmem:[#allocation42_spill] sm:$0xff] %v18413_v15  ;;  %v4172_v5 = vadd.f32 %v4171_v2, %v4170_v25  ;;  %v15396_v37 = vadd.f32 %v14935_v49, %v24976_v21  ;;  %v3977_v45 = vpop.f32.mrb[63].mxu0  ;;  %v4368_v20 = vadd.f32 %v4367_v50, %v4366_v11  ;;  %v4250_v49 = vmul.f32 %v18413_v15, %v18413_v15 }
 0x4c1   :  { %24975 = vst [vmem:[#allocation44_spill] sm:$0xff] %v18418_v47  ;;  %v4173_v39 = vsel %vm4053_vm8, %v18418_v47, 0.0  ;;  %v4248_v29 = vmul.f32 %v18418_v47, %v18418_v47  ;;  %v15397_v63 = vadd.f32 %v3977_v45, %v24977_v42  ;;  %v4177_v2 = vsel %vm4053_vm8, %v18413_v15, 0.0 }
 0x4c2   :  { %v4174_v18 = vadd.f32 %v4173_v39, %v4172_v5  ;;  %v4370_v32 = vadd.f32 %v4369_v10, %v4368_v20  ;;  %v4251_v45 = vmul.f32 %v15396_v37, %v15396_v37  ;;  %v4179_v62 = vsel %vm4053_vm8, %v15396_v37, 0.0 }
 0x4c3   :  { %v4371_v9 = vsel %vm4053_vm8, %v4248_v29, 0.0  ;;  %v4175_v54 = vsel %vm4053_vm8, %v15397_v63, 0.0  ;;  %v4249_v25 = vmul.f32 %v15397_v63, %v15397_v63  ;;  %v4375_v5 = vsel %vm4053_vm8, %v4250_v49, 0.0 }
 0x4c4   :  { %v4176_v11 = vadd.f32 %v4175_v54, %v4174_v18  ;;  %v4372_v50 = vadd.f32 %v4371_v9, %v4370_v32  ;;  %v4377_v10 = vsel %vm4053_vm8, %v4251_v45, 0.0  ;;  %v4394_v45 = vlaneseq }
 0x4c5   :  { %v4373_v21 = vsel %vm4053_vm8, %v4249_v25, 0.0 }
 0x4c6   :  { %v4178_v42 = vadd.f32 %v4177_v2, %v4176_v11  ;;  %v4374_v20 = vadd.f32 %v4373_v21, %v4372_v50 }
 0x4c8   :  { %v4180_v39 = vadd.f32 %v4179_v62, %v4178_v42  ;;  %v4376_v29 = vadd.f32 %v4375_v5, %v4374_v20  ;;  %v18438_v20 = vshrl.u32 %v4394_v45, 7 }
 0x4ca   :  { %v4181_v47 = vrot.slane %v4180_v39, 4  ;;  %v4378_v35 = vadd.f32 %v4377_v10, %v4376_v29  ;;  %24978 = vst [vmem:[#allocation38_spill] sm:$0xff] %v18438_v20 }
 0x4cc   :  { %v4182_v18 = vadd.f32 %v4181_v47, %v4180_v39  ;;  %v4379_v54 = vrot.slane %v4378_v35, 4  ;;  %v16432_v47 = vmov 1983009808  }
 0x4cd   :  { %v4727_v5 = vunpack.c.l.s4 %v16432_v47 }
 0x4ce   :  { %v4183_v16 = vrot.slane %v4182_v18, 2  ;;  %v4380_v15 = vadd.f32 %v4379_v54, %v4378_v35  ;;  %v109_v35 = vld [vmem:[%s24213_s2] sm:$0x1] }
 0x4d0   :  { %v4184_v32 = vadd.f32 %v4183_v16, %v4182_v18  ;;  %v4381_v9 = vrot.slane %v4380_v15, 2  ;;  %v18444_v16 = vsub.s32 0, %v18438_v20  ;;  %v4728_v18 = vunpack.c.0.s8 %v4727_v5 }
 0x4d2   :  { %v4185_v25 = vrot.slane %v4184_v32, 1  ;;  %v4382_v7 = vadd.f32 %v4381_v9, %v4380_v15  ;;  %24979 = vst [vmem:[#allocation39_spill] sm:$0xff] %v18444_v16 }
 0x4d4   :  { %v4186_v11 = vadd.f32 %v4185_v25, %v4184_v32  ;;  %v4383_v2 = vrot.slane %v4382_v7, 1 }
 0x4d6   :  { %v4187_v34 = vmul.f32 0.001953125, %v4186_v11  ;;  %v4384_v50 = vadd.f32 %v4383_v2, %v4382_v7  ;;  %v110_v7 = vld [vmem:[%s24214_s3] sm:$0x1]  ;;  %v18458_v11 = vsub.s32 %v4728_v18, %v18438_v20 }
 0x4d7   :  { %v24981_v2 = vld [vmem:[#allocation30_spill] sm:$0xff] }
 0x4d8   :  { %v4386_v21 = vmul.f32 %v4187_v34, %v4187_v34  ;;  %v4385_v49 = vmul.f32 0.001953125, %v4384_v50  ;;  %24980 = vst [vmem:[#allocation40_spill] sm:$0xff] %v18458_v11 }
 0x4da   :  { %v4387_v42 = vsub.f32 %v4385_v49, %v4386_v21  ;;  %v24982_v49 = vld [vmem:[#allocation43_spill] sm:$0xff] }
 0x4dc   :  { %v4388_v62 = vadd.f32 1e-05, %v4387_v42 }
 0x4de   :  { %16407 = vrsqrt.f32 %v4388_v62 }
 0x4e8   :  { %v16408_v15 = vpop.eup %16407 }
 0x4e9   :  { %v4390_v39 = vmul.f32 %v16408_v15, %v109_v35 }
 0x4eb   :  { %v4391_v29 = vmul.f32 %v4390_v39, %v4187_v34  ;;  %v18450_v10 = vrot.slane %v4390_v39, %v18444_v16 }
 0x4ed   :  { %v4392_v54 = vsub.f32 %v110_v7, %v4391_v29  ;;  %v4460_v32 = vmul.f32 %v15397_v63, %v18450_v10  ;;  %v4462_v9 = vmul.f32 %v15396_v37, %v18450_v10  ;;  %v18462_v50 = vmul.f32 %v24981_v2, %v18450_v10  ;;  %v24983_v37 = vld [vmem:[#allocation29_spill] sm:$0xff] }
 0x4ee   :  { %v18468_v63 = vmul.f32 %v24982_v49, %v18450_v10  ;;  %v18472_v42 = vmul.f32 %v24983_v37, %v18450_v10  ;;  %v18476_v62 = vmul.f32 %v17943_v6, %v18450_v10  ;;  %v18480_v45 = vmul.f32 %v17971_v3, %v18450_v10 }
 0x4ef   :  { %v18455_v25 = vrot.slane %v4392_v54, %v18444_v16  ;;  %v18484_v35 = vmul.f32 %v17982_v61, %v18450_v10  ;;  %v18488_v15 = vmul.f32 %v17965_v56, %v18450_v10  ;;  %v18492_v39 = vmul.f32 %v17979_v28, %v18450_v10  ;;  %v24997_v16 = vld [vmem:[#allocation28_spill] sm:$0xff] }
 0x4f0   :  { %v18496_v6 = vmul.f32 %v18002_v38, %v18450_v10  ;;  %v18500_v3 = vmul.f32 %v18013_v55, %v18450_v10  ;;  %v18504_v61 = vmul.f32 %v17997_v1, %v18450_v10  ;;  %v18508_v56 = vmul.f32 %v18006_v52, %v18450_v10 }
 0x4f1   :  { %v4530_v34 = vadd.f32 %v18455_v25, %v4460_v32  ;;  %v4532_v21 = vadd.f32 %v18455_v25, %v4462_v9  ;;  %v18512_v28 = vmul.f32 %v18034_v53, %v18450_v10  ;;  %v18518_v55 = vmul.f32 %v18045_v17, %v18450_v10 }
 0x4f2   :  { %v18522_v1 = vmul.f32 %v18029_v57, %v18450_v10  ;;  %v18526_v52 = vmul.f32 %v18038_v13, %v18450_v10  ;;  %v18530_v53 = vmul.f32 %v18066_v22, %v18450_v10  ;;  %v18534_v18 = vmul.f32 %v18077_v0, %v18450_v10 }
 0x4f3   :  { %v4594_v47 = vmax.f32 %v4530_v34, 0.0  ;;  %v4596_v5 = vmax.f32 %v4532_v21, 0.0  ;;  %v18538_v17 = vmul.f32 %v18061_v40, %v18450_v10  ;;  %v18542_v57 = vmul.f32 %v18070_v51, %v18450_v10 }
 0x4f4   :  { %v18546_v13 = vmul.f32 %v18098_v14, %v18450_v10  ;;  %v18550_v22 = vmul.f32 %v18109_v31, %v18450_v10  ;;  %v18555_v32 = vmul.f32 %v18093_v41, %v18450_v10  ;;  %v18559_v40 = vmul.f32 %v18102_v26, %v18450_v10 }
 0x4f5   :  { %v4690_v7 = vsel %vm4053_vm8, %v4594_v47, -inf  ;;  %v4691_v38 = vsel %vm4053_vm8, %v4596_v5, -inf  ;;  %v18563_v51 = vmul.f32 %v18130_v59, %v18450_v10  ;;  %v18567_v14 = vmul.f32 %v18141_v24, %v18450_v10 }
 0x4f6   :  { %v4692_v29 = vmax.f32 %v4690_v7, %v4691_v38  ;;  %v18571_v31 = vmul.f32 %v18125_v8, %v18450_v10  ;;  %v18575_v41 = vmul.f32 %v18134_v36, %v18450_v10  ;;  %v18583_v59 = vmul.f32 %v18162_v48, %v18450_v10 }
 0x4f7   :  { %v18587_v34 = vmul.f32 %v18173_v19, %v18450_v10  ;;  %v18591_v8 = vmul.f32 %v18157_v23, %v18450_v10  ;;  %v18595_v36 = vmul.f32 %v18166_v27, %v18450_v10  ;;  %v18602_v48 = vmul.f32 %v18194_v60, %v18450_v10 }
 0x4f8   :  { %v5252_v54 = vcombine.high %v4692_v29, %v4692_v29  ;;  %v5259_v0 = vrot.slane %v4692_v29, %v18458_v11  ;;  %v18606_v19 = vmul.f32 %v18205_v46, %v18450_v10  ;;  %v18610_v27 = vmul.f32 %v18189_v12, %v18450_v10 }
 0x4f9   :  { %v18614_v5 = vmul.f32 %v18198_v4, %v18450_v10  ;;  %v18618_v7 = vmul.f32 %v18226_v58, %v18450_v10  ;;  %v18622_v60 = vmul.f32 %v18237_v44, %v18450_v10  ;;  %v18626_v46 = vmul.f32 %v18221_v43, %v18450_v10 }
 0x4fa   :  { %v18578_v9 = vrot.slane %v5252_v54, %v18458_v11  ;;  %v5267_v26 = vcombine.high %v5259_v0, %v5259_v0  ;;  %v6266_v2 = vsel %vm5397_vm9, %v5259_v0, -inf  ;;  %v18632_v4 = vmul.f32 %v18230_v33, %v18450_v10  ;;  %v24986_v54 = vld [vmem:[#allocation32_spill] sm:$0xff]  ;;  %v24989_v33 = vld [vmem:[#allocation34_spill] sm:$0xff] }
 0x4fb   :  { %v6267_v24 = vrot.slane %v6266_v2, 4  ;;  %v18636_v58 = vmul.f32 %v18258_v30, %v18450_v10  ;;  %v18640_v44 = vmul.f32 %v24986_v54, %v18450_v10  ;;  %v24987_v0 = vld [vmem:[#allocation20_spill] sm:$0xff]  ;;  %v24990_v30 = vld [vmem:[#allocation2_spill] sm:$0xff]  ;;  %v24993_v54 = vld [vmem:[#allocation35_spill] sm:$0xff] }
 0x4fc   :  { %24984 = vst [vmem:[#allocation41_spill] sm:$0xff] %v18578_v9  ;;  %v6273_v21 = vsel %vm5397_vm9, %v5267_v26, -inf  ;;  %v6280_v49 = vsel %vm5397_vm9, %v18578_v9, -inf  ;;  %v18644_v43 = vmul.f32 %v24987_v0, %v18450_v10  ;;  %v24988_v26 = vld [vmem:[#allocation24_spill] sm:$0xff]  ;;  %v18664_v0 = vmul.f32 %v24993_v54, %v18450_v10 }
 0x4fd   :  { %v6268_v37 = vmax.f32 %v6266_v2, %v6267_v24  ;;  %v6274_v23 = vrot.slane %v6273_v21, 4  ;;  %v6281_v47 = vrot.slane %v6280_v49, 4  ;;  %v18648_v2 = vmul.f32 %v24988_v26, %v18450_v10  ;;  %v24995_v26 = vld [vmem:[#allocation37_spill] sm:$0xff]  ;;  %v24999_v11 = vld [vmem:[#allocation36_spill] sm:$0xff] }
 0x4fe   :  { %24994 = vst [vmem:[#allocation47_spill] sm:$0xff] %v18664_v0  ;;  %v18668_v20 = vmul.f32 %v24995_v26, %v18450_v10  ;;  %v25002_v0 = vld [vmem:[#allocation49_spill] sm:$0xff] }
 0x4ff   :  { %v6269_v38 = vrot.slane %v6268_v37, 2  ;;  %v6275_v29 = vmax.f32 %v6273_v21, %v6274_v23  ;;  %v18628_v12 = vmax.f32 %v6280_v49, %v6281_v47  ;;  %v18652_v21 = vmul.f32 %v24989_v33, %v18450_v10  ;;  %v24991_v23 = vld [vmem:[#allocation33_spill] sm:$0xff] }
 0x500   :  { %v18656_v49 = vmul.f32 %v24990_v30, %v18450_v10  ;;  %v18660_v47 = vmul.f32 %v24991_v23, %v18450_v10  ;;  %24996 = vst [vmem:[#allocation48_spill] sm:$0xff] %v18668_v20  ;;  %v18672_v33 = vmul.f32 %v24997_v16, %v18450_v10  ;;  %v18676_v30 = vmul.f32 %v24999_v11, %v18450_v10  ;;  %v25003_v20 = vld [vmem:[#allocation14_spill] sm:$0xff]  ;;  %v25007_v23 = vld [vmem:[#allocation16_spill] sm:$0xff] }
 0x501   :  { %24985 = vst [vmem:[#allocation45_spill] sm:$0xff] %v18628_v12  ;;  %v6276_v24 = vrot.slane %v6275_v29, 2  ;;  %v18678_v9 = vmax.f32 %v6268_v37, %v6269_v38  ;;  %v18687_v26 = vmul.f32 %v25002_v0, %v18450_v10  ;;  %v18691_v16 = vmul.f32 %v25003_v20, %v18450_v10  ;;  %v25006_v37 = vld [vmem:[#allocation50_spill] sm:$0xff]  ;;  %v25010_v20 = vld [vmem:[#allocation15_spill] sm:$0xff] }
 0x502   :  { %24992 = vst [vmem:[#allocation46_spill] sm:$0xff] %v18660_v47  ;;  %24998 = vst [vmem:[#allocation3_spill] sm:$0xff] %v18672_v33  ;;  %v25001_v47 = vld [vmem:[#allocation26_spill] sm:$0xff]  ;;  %v25005_v33 = vld [vmem:[#allocation31_spill] sm:$0xff]  ;;  %v18699_v38 = vmul.f32 %v25006_v37, %v18450_v10  ;;  %v18717_v37 = vadd.f32 %v18455_v25, %v18468_v63  ;;  %v18737_v63 = vadd.f32 %v18455_v25, %v18484_v35 }
 0x503   :  { %25000 = vst [vmem:[#allocation4_spill] sm:$0xff] %v18678_v9  ;;  %v18683_v54 = vmul.f32 %v25001_v47, %v18450_v10  ;;  %25004 = vst [vmem:[#allocation5_spill] sm:$0xff] %v18691_v16  ;;  %v18695_v11 = vmul.f32 %v25005_v33, %v18450_v10  ;;  %v18703_v47 = vmul.f32 %v25007_v23, %v18450_v10  ;;  %v25009_v0 = vld [vmem:[#allocation18_spill] sm:$0xff] }
 0x504   :  { %v18705_v12 = vmax.f32 %v6275_v29, %v6276_v24  ;;  %v4456_v9 = vmul.f32 %v25009_v0, %v18450_v10  ;;  %v4457_v16 = vmul.f32 %v25010_v20, %v18450_v10  ;;  %v18713_v33 = vadd.f32 %v18455_v25, %v18462_v50  ;;  %v25011_v0 = vld [vmem:[#allocation17_spill] sm:$0xff]  ;;  %v25012_v20 = vld [vmem:[#allocation44_spill] sm:$0xff] }
 0x505   :  { %v18721_v23 = vadd.f32 %v18455_v25, %v18472_v42  ;;  %v18725_v29 = vadd.f32 %v18455_v25, %v18476_v62  ;;  %v18729_v24 = vadd.f32 %v18455_v25, %v18480_v45  ;;  %v4458_v50 = vmul.f32 %v25011_v0, %v18450_v10 }
 0x506   :  { %25008 = vst [vmem:[#allocation6_spill] sm:$0xff] %v18705_v12  ;;  %v4459_v12 = vmul.f32 %v25012_v20, %v18450_v10  ;;  %v18741_v42 = vadd.f32 %v18455_v25, %v18488_v15  ;;  %v18745_v62 = vadd.f32 %v18455_v25, %v18492_v39  ;;  %v18749_v45 = vadd.f32 %v18455_v25, %v18496_v6  ;;  %v25014_v20 = vld [vmem:[#allocation42_spill] sm:$0xff] }
 0x507   :  { %v18753_v0 = vadd.f32 %v18455_v25, %v18500_v3  ;;  %v18757_v35 = vadd.f32 %v18455_v25, %v18504_v61  ;;  %v4461_v15 = vmul.f32 %v25014_v20, %v18450_v10  ;;  %v18767_v39 = vadd.f32 %v18455_v25, %v18512_v28  ;;  %v25022_v20 = vld [vmem:[#allocation47_spill] sm:$0xff] }
 0x508   :  { %25013 = vst [vmem:[#allocation8_spill] sm:$0xff] %v18741_v42  ;;  %v18763_v42 = vadd.f32 %v18455_v25, %v18508_v56  ;;  %v18771_v6 = vadd.f32 %v18455_v25, %v18518_v55  ;;  %v18775_v3 = vadd.f32 %v18455_v25, %v18522_v1  ;;  %v18779_v61 = vadd.f32 %v18455_v25, %v18526_v52 }
 0x509   :  { %v18783_v10 = vadd.f32 %v18455_v25, %v18530_v53  ;;  %v18787_v56 = vadd.f32 %v18455_v25, %v18534_v18  ;;  %v18791_v28 = vadd.f32 %v18455_v25, %v18538_v17  ;;  %v18795_v55 = vadd.f32 %v18455_v25, %v18542_v57 }
 0x50a   :  { %v18799_v1 = vadd.f32 %v18455_v25, %v18546_v13  ;;  %v18803_v52 = vadd.f32 %v18455_v25, %v18550_v22  ;;  %v18807_v53 = vadd.f32 %v18455_v25, %v18555_v32  ;;  %v18811_v18 = vadd.f32 %v18455_v25, %v18559_v40 }
 0x50b   :  { %v18815_v17 = vadd.f32 %v18455_v25, %v18563_v51  ;;  %v18819_v57 = vadd.f32 %v18455_v25, %v18567_v14  ;;  %v18823_v13 = vadd.f32 %v18455_v25, %v18571_v31  ;;  %v18827_v22 = vadd.f32 %v18455_v25, %v18575_v41 }
 0x50c   :  { %v18831_v32 = vadd.f32 %v18455_v25, %v18583_v59  ;;  %v18835_v40 = vadd.f32 %v18455_v25, %v18587_v34  ;;  %v18839_v51 = vadd.f32 %v18455_v25, %v18591_v8  ;;  %v18843_v14 = vadd.f32 %v18455_v25, %v18595_v36 }
 0x50d   :  { %v18847_v31 = vadd.f32 %v18455_v25, %v18602_v48  ;;  %v18851_v41 = vadd.f32 %v18455_v25, %v18606_v19  ;;  %v18855_v59 = vadd.f32 %v18455_v25, %v18610_v27  ;;  %v18859_v34 = vadd.f32 %v18455_v25, %v18614_v5 }
 0x50e   :  { %v18863_v8 = vadd.f32 %v18455_v25, %v18618_v7  ;;  %v18867_v36 = vadd.f32 %v18455_v25, %v18622_v60  ;;  %v18871_v48 = vadd.f32 %v18455_v25, %v18626_v46  ;;  %v18875_v19 = vadd.f32 %v18455_v25, %v18632_v4 }
 0x50f   :  { %25015 = vst [vmem:[#allocation9_spill] sm:$0xff] %v18847_v31  ;;  %v18879_v27 = vadd.f32 %v18455_v25, %v18636_v58  ;;  %v18883_v5 = vadd.f32 %v18455_v25, %v18640_v44  ;;  %v18887_v7 = vadd.f32 %v18455_v25, %v18644_v43  ;;  %v18891_v60 = vadd.f32 %v18455_v25, %v18648_v2  ;;  %v25021_v58 = vld [vmem:[#allocation46_spill] sm:$0xff] }
 0x510   :  { %25016 = vst [vmem:[#allocation10_spill] sm:$0xff] %v18863_v8  ;;  %v18895_v46 = vadd.f32 %v18455_v25, %v18652_v21  ;;  %v18899_v4 = vadd.f32 %v18455_v25, %v18656_v49  ;;  %v18903_v44 = vadd.f32 %v18455_v25, %v25021_v58  ;;  %v18907_v43 = vadd.f32 %v18455_v25, %v25022_v20 }
 0x511   :  { %25017 = vst [vmem:[#allocation11_spill] sm:$0xff] %v18879_v27  ;;  %25018 = vst [vmem:[#allocation12_spill] sm:$0xff] %v18887_v7  ;;  %v25024_v7 = vld [vmem:[#allocation48_spill] sm:$0xff]  ;;  %v18919_v49 = vadd.f32 %v18455_v25, %v18676_v30  ;;  %v18923_v58 = vadd.f32 %v18455_v25, %v18683_v54  ;;  %v18927_v20 = vadd.f32 %v18455_v25, %v18687_v26 }
 0x512   :  { %25019 = vst [vmem:[#allocation13_spill] sm:$0xff] %v18891_v60  ;;  %25020 = vst [vmem:[#allocation19_spill] sm:$0xff] %v18899_v4  ;;  %v18911_v2 = vadd.f32 %v18455_v25, %v25024_v7  ;;  %v25026_v60 = vld [vmem:[#allocation3_spill] sm:$0xff]  ;;  %v18939_v30 = vadd.f32 %v18455_v25, %v18699_v38  ;;  %v18943_v54 = vadd.f32 %v18455_v25, %v18703_v47  ;;  %v4533_v38 = vmax.f32 %v18713_v33, 0.0 }
 0x513   :  { %25023 = vst [vmem:[#allocation21_spill] sm:$0xff] %v18907_v43  ;;  %v18915_v21 = vadd.f32 %v18455_v25, %v25026_v60  ;;  %25028 = vst [vmem:[#allocation25_spill] sm:$0xff] %v18923_v58  ;;  %v25029_v43 = vld [vmem:[#allocation5_spill] sm:$0xff]  ;;  %v18935_v60 = vadd.f32 %v18455_v25, %v18695_v11  ;;  %v18946_v58 = vadd.f32 %v18455_v25, %v4456_v9 }
 0x514   :  { %25025 = vst [vmem:[#allocation22_spill] sm:$0xff] %v18911_v2  ;;  %v18931_v7 = vadd.f32 %v18455_v25, %v25029_v43  ;;  %25032 = vst [vmem:[#allocation43_spill] sm:$0xff] %v18943_v54  ;;  %v18949_v26 = vadd.f32 %v18455_v25, %v4457_v16  ;;  %v18952_v43 = vadd.f32 %v18455_v25, %v4458_v50  ;;  %v4535_v54 = vmax.f32 %v18721_v23, 0.0  ;;  %v25036_v50 = vld [vmem:[#allocation8_spill] sm:$0xff] }
 0x515   :  { %25027 = vst [vmem:[#allocation23_spill] sm:$0xff] %v18915_v21  ;;  %25031 = vst [vmem:[#allocation30_spill] sm:$0xff] %v18935_v60  ;;  %v18955_v11 = vadd.f32 %v18455_v25, %v4459_v12  ;;  %v18958_v60 = vadd.f32 %v18455_v25, %v4461_v15  ;;  %v4597_v23 = vsel %vm4053_vm8, %v4533_v38, -inf  ;;  %v25047_v12 = vmax.f32 %v18725_v29, 0.0 }
 0x516   :  { %25030 = vst [vmem:[#allocation27_spill] sm:$0xff] %v18931_v7  ;;  %25033 = vst [vmem:[#allocation29_spill] sm:$0xff] %v18949_v26  ;;  %v25043_v8 = vmov %v18949_v26  ;;  %v25044_v2 = vmov %v18952_v43  ;;  %v4598_v9 = vsel %vm4053_vm8, %v4535_v54, -inf  ;;  %v25046_v26 = vmax.f32 %v18717_v37, 0.0 }
 0x517   :  { %25034 = vst [vmem:[#allocation32_spill] sm:$0xff] %v18952_v43  ;;  %25035 = vst [vmem:[#allocation20_spill] sm:$0xff] %v18955_v11  ;;  %v25045_v21 = vmov %v18955_v11  ;;  %v4595_v15 = vmax.f32 %v18958_v60, 0.0  ;;  %v19024_v7 = vmax.f32 %v4597_v23, %v4598_v9  ;;  %v4601_v11 = vsel %vm4053_vm8, %v25047_v12, -inf }
 0x518   :  { %v25037_v47 = vld [vmem:[#allocation12_spill] sm:$0xff]  ;;  %v4600_v43 = vsel %vm4053_vm8, %v25046_v26, -inf  ;;  %v25048_v25 = vmax.f32 %v18729_v24, 0.0  ;;  %v25049_v38 = vmax.f32 %v25036_v50, 0.0  ;;  %v25050_v9 = vmax.f32 %v18737_v63, 0.0 }
 0x519   :  { %v19035_v16 = vmax.f32 %v4600_v43, %v4601_v11  ;;  %v25051_v26 = vmax.f32 %v18745_v62, 0.0  ;;  %v25052_v24 = vmax.f32 %v18749_v45, 0.0  ;;  %v25053_v11 = vmax.f32 %v18757_v35, 0.0 }
 0x51a   :  { %v25040_v27 = vld [vmem:[#allocation25_spill] sm:$0xff]  ;;  %v4603_v33 = vsel %vm4053_vm8, %v25048_v25, -inf  ;;  %v4604_v54 = vsel %vm4053_vm8, %v25049_v38, -inf  ;;  %v4606_v37 = vsel %vm4053_vm8, %v25050_v9, -inf  ;;  %v25054_v63 = vmax.f32 %v18753_v0, 0.0 }
 0x51b   :  { %v25042_v4 = vld [vmem:[#allocation43_spill] sm:$0xff]  ;;  %v4607_v29 = vsel %vm4053_vm8, %v25051_v26, -inf  ;;  %v19046_v23 = vmax.f32 %v4603_v33, %v4604_v54  ;;  %v4609_v43 = vsel %vm4053_vm8, %v25052_v24, -inf  ;;  %v4610_v50 = vsel %vm4053_vm8, %v25053_v11, -inf }
 0x51c   :  { %v25041_v31 = vld [vmem:[#allocation30_spill] sm:$0xff]  ;;  %v19048_v12 = vmax.f32 %v4606_v37, %v4607_v29  ;;  %v19056_v25 = vmax.f32 %v4609_v43, %v4610_v50  ;;  %v4612_v62 = vsel %vm4053_vm8, %v25054_v63, -inf  ;;  %v25055_v38 = vmax.f32 %v18763_v42, 0.0 }
 0x51d   :  { %v25056_v54 = vmax.f32 %v18767_v39, 0.0  ;;  %v25057_v35 = vmax.f32 %v18775_v3, 0.0  ;;  %v25058_v26 = vmax.f32 %v18771_v6, 0.0  ;;  %v25059_v29 = vmax.f32 %v18779_v61, 0.0 }
 0x51e   :  { %v4613_v33 = vsel %vm4053_vm8, %v25055_v38, -inf  ;;  %v25060_v39 = vmax.f32 %v18783_v10, 0.0  ;;  %v25061_v3 = vmax.f32 %v18791_v28, 0.0  ;;  %v25062_v6 = vmax.f32 %v18787_v56, 0.0 }
 0x51f   :  { %v4615_v45 = vsel %vm4053_vm8, %v25056_v54, -inf  ;;  %v19067_v9 = vmax.f32 %v4612_v62, %v4613_v33  ;;  %v4616_v37 = vsel %vm4053_vm8, %v25057_v35, -inf  ;;  %v4618_v0 = vsel %vm4053_vm8, %v25058_v26, -inf }
 0x520   :  { %v4619_v42 = vsel %vm4053_vm8, %v25059_v29, -inf  ;;  %v19078_v24 = vmax.f32 %v4615_v45, %v4616_v37  ;;  %v4621_v11 = vsel %vm4053_vm8, %v25060_v39, -inf  ;;  %v4622_v50 = vsel %vm4053_vm8, %v25061_v3, -inf }
 0x521   :  { %v19080_v43 = vmax.f32 %v4618_v0, %v4619_v42  ;;  %v19088_v63 = vmax.f32 %v4621_v11, %v4622_v50  ;;  %v4624_v61 = vsel %vm4053_vm8, %v25062_v6, -inf  ;;  %v25063_v62 = vmax.f32 %v18795_v55, 0.0 }
 0x522   :  { %v25064_v33 = vmax.f32 %v18799_v1, 0.0  ;;  %v25065_v28 = vmax.f32 %v18807_v53, 0.0  ;;  %v25066_v35 = vmax.f32 %v18803_v52, 0.0  ;;  %v25067_v37 = vmax.f32 %v18811_v18, 0.0 }
 0x523   :  { %v4625_v38 = vsel %vm4053_vm8, %v25063_v62, -inf  ;;  %v25068_v1 = vmax.f32 %v18815_v17, 0.0  ;;  %v25069_v53 = vmax.f32 %v18823_v13, 0.0  ;;  %v25070_v52 = vmax.f32 %v18819_v57, 0.0 }
 0x524   :  { %v4627_v10 = vsel %vm4053_vm8, %v25064_v33, -inf  ;;  %v19099_v54 = vmax.f32 %v4624_v61, %v4625_v38  ;;  %v4628_v45 = vsel %vm4053_vm8, %v25065_v28, -inf  ;;  %v4630_v56 = vsel %vm4053_vm8, %v25066_v35, -inf }
 0x525   :  { %v4631_v55 = vsel %vm4053_vm8, %v25067_v37, -inf  ;;  %v19110_v26 = vmax.f32 %v4627_v10, %v4628_v45  ;;  %v4633_v29 = vsel %vm4053_vm8, %v25068_v1, -inf  ;;  %v4634_v42 = vsel %vm4053_vm8, %v25069_v53, -inf  ;;  %v25081_v1 = vld [vmem:[#allocation10_spill] sm:$0xff] }
 0x526   :  { %v19112_v0 = vmax.f32 %v4630_v56, %v4631_v55  ;;  %v19120_v39 = vmax.f32 %v4633_v29, %v4634_v42  ;;  %v4636_v18 = vsel %vm4053_vm8, %v25070_v52, -inf  ;;  %v25071_v11 = vmax.f32 %v18827_v22, 0.0 }
 0x527   :  { %v25072_v50 = vmax.f32 %v18831_v32, 0.0  ;;  %v25073_v13 = vmax.f32 %v18839_v51, 0.0  ;;  %v25074_v62 = vmax.f32 %v18835_v40, 0.0  ;;  %v25075_v38 = vmax.f32 %v18843_v14, 0.0  ;;  %v25076_v32 = vld [vmem:[#allocation9_spill] sm:$0xff] }
 0x528   :  { %v4637_v3 = vsel %vm4053_vm8, %v25071_v11, -inf  ;;  %v25077_v28 = vmax.f32 %v25076_v32, 0.0  ;;  %v25078_v51 = vmax.f32 %v18855_v59, 0.0  ;;  %v25079_v40 = vmax.f32 %v18851_v41, 0.0 }
 0x529   :  { %v4639_v17 = vsel %vm4053_vm8, %v25072_v50, -inf  ;;  %v19131_v6 = vmax.f32 %v4636_v18, %v4637_v3  ;;  %v4640_v61 = vsel %vm4053_vm8, %v25073_v13, -inf  ;;  %v4642_v57 = vsel %vm4053_vm8, %v25074_v62, -inf }
 0x52a   :  { %v4643_v22 = vsel %vm4053_vm8, %v25075_v38, -inf  ;;  %v19142_v33 = vmax.f32 %v4639_v17, %v4640_v61  ;;  %v4645_v45 = vsel %vm4053_vm8, %v25077_v28, -inf  ;;  %v4646_v35 = vsel %vm4053_vm8, %v25078_v51, -inf  ;;  %v25086_v17 = vld [vmem:[#allocation11_spill] sm:$0xff]  ;;  %v25090_v38 = vld [vmem:[#allocation13_spill] sm:$0xff] }
 0x52b   :  { %v19144_v10 = vmax.f32 %v4642_v57, %v4643_v22  ;;  %v19152_v56 = vmax.f32 %v4645_v45, %v4646_v35  ;;  %v4648_v14 = vsel %vm4053_vm8, %v25079_v40, -inf  ;;  %v25080_v37 = vmax.f32 %v18859_v34, 0.0  ;;  %v25094_v40 = vld [vmem:[#allocation19_spill] sm:$0xff] }
 0x52c   :  { %v25082_v29 = vmax.f32 %v25081_v1, 0.0  ;;  %v25083_v59 = vmax.f32 %v18871_v48, 0.0  ;;  %v25084_v18 = vmax.f32 %v18867_v36, 0.0  ;;  %v25085_v11 = vmax.f32 %v18875_v19, 0.0 }
 0x52d   :  { %v4649_v55 = vsel %vm4053_vm8, %v25080_v37, -inf  ;;  %v25087_v13 = vmax.f32 %v25086_v17, 0.0  ;;  %v25088_v48 = vmax.f32 %v25037_v47, 0.0  ;;  %v25089_v36 = vmax.f32 %v18883_v5, 0.0  ;;  %v25096_v37 = vld [vmem:[#allocation21_spill] sm:$0xff] }
 0x52e   :  { %v4651_v53 = vsel %vm4053_vm8, %v25082_v29, -inf  ;;  %v19163_v42 = vmax.f32 %v4648_v14, %v4649_v55  ;;  %v4652_v52 = vsel %vm4053_vm8, %v25083_v59, -inf  ;;  %v4654_v41 = vsel %vm4053_vm8, %v25084_v18, -inf }
 0x52f   :  { %v4655_v34 = vsel %vm4053_vm8, %v25085_v11, -inf  ;;  %v19174_v3 = vmax.f32 %v4651_v53, %v4652_v52  ;;  %v4657_v61 = vsel %vm4053_vm8, %v25087_v13, -inf  ;;  %v4658_v62 = vsel %vm4053_vm8, %v25088_v48, -inf  ;;  %v25101_v11 = vld [vmem:[#allocation23_spill] sm:$0xff] }
 0x530   :  { %v19176_v50 = vmax.f32 %v4654_v41, %v4655_v34  ;;  %v19184_v57 = vmax.f32 %v4657_v61, %v4658_v62  ;;  %v4660_v19 = vsel %vm4053_vm8, %v25089_v36, -inf  ;;  %v25091_v22 = vmax.f32 %v25090_v38, 0.0  ;;  %v25106_v38 = vld [vmem:[#allocation27_spill] sm:$0xff] }
 0x531   :  { %v25092_v28 = vmax.f32 %v18895_v46, 0.0  ;;  %v25093_v47 = vmax.f32 %v18903_v44, 0.0  ;;  %v25095_v14 = vmax.f32 %v25094_v40, 0.0  ;;  %v25097_v55 = vmax.f32 %v25096_v37, 0.0  ;;  %v25098_v46 = vld [vmem:[#allocation22_spill] sm:$0xff] }
 0x532   :  { %v4661_v32 = vsel %vm4053_vm8, %v25091_v22, -inf  ;;  %v25099_v59 = vmax.f32 %v25098_v46, 0.0  ;;  %v25100_v44 = vmax.f32 %v18919_v49, 0.0  ;;  %v25102_v34 = vmax.f32 %v25101_v11, 0.0  ;;  %v25114_v46 = vld [vmem:[#allocation4_spill] sm:$0xff] }
 0x533   :  { %v4663_v45 = vsel %vm4053_vm8, %v25092_v28, -inf  ;;  %v19195_v51 = vmax.f32 %v4660_v19, %v4661_v32  ;;  %v4664_v35 = vsel %vm4053_vm8, %v25093_v47, -inf  ;;  %v4666_v5 = vsel %vm4053_vm8, %v25095_v14, -inf }
 0x534   :  { %v4667_v1 = vsel %vm4053_vm8, %v25097_v55, -inf  ;;  %v19206_v29 = vmax.f32 %v4663_v45, %v4664_v35  ;;  %v4669_v52 = vsel %vm4053_vm8, %v25099_v59, -inf  ;;  %v4670_v18 = vsel %vm4053_vm8, %v25100_v44, -inf }
 0x535   :  { %v19208_v53 = vmax.f32 %v4666_v5, %v4667_v1  ;;  %v19216_v41 = vmax.f32 %v4669_v52, %v4670_v18  ;;  %v4672_v17 = vsel %vm4053_vm8, %v25102_v34, -inf  ;;  %v25103_v13 = vmax.f32 %v25040_v27, 0.0  ;;  %v25117_v34 = vld [vmem:[#allocation45_spill] sm:$0xff] }
 0x536   :  { %v25104_v48 = vmax.f32 %v18927_v20, 0.0  ;;  %v25105_v49 = vmax.f32 %v25041_v31, 0.0  ;;  %v25107_v22 = vmax.f32 %v25106_v38, 0.0  ;;  %v25108_v28 = vmax.f32 %v18939_v30, 0.0 }
 0x537   :  { %v4673_v61 = vsel %vm4053_vm8, %v25103_v13, -inf  ;;  %v25109_v20 = vmax.f32 %v25042_v4, 0.0  ;;  %v25110_v31 = vmax.f32 %v25043_v8, 0.0  ;;  %v25111_v5 = vmax.f32 %v18946_v58, 0.0  ;;  %v25115_v58 = vld [vmem:[#allocation41_spill] sm:$0xff] }
 0x538   :  { %v4675_v62 = vsel %vm4053_vm8, %v25104_v48, -inf  ;;  %v19227_v36 = vmax.f32 %v4672_v17, %v4673_v61  ;;  %v4676_v19 = vsel %vm4053_vm8, %v25105_v49, -inf  ;;  %v4678_v32 = vsel %vm4053_vm8, %v25107_v22, -inf  ;;  %v25121_v48 = vld [vmem:[#allocation40_spill] sm:$0xff] }
 0x539   :  { %v4679_v27 = vsel %vm4053_vm8, %v25108_v28, -inf  ;;  %v19238_v45 = vmax.f32 %v4675_v62, %v4676_v19  ;;  %v4681_v35 = vsel %vm4053_vm8, %v25109_v20, -inf  ;;  %v4682_v40 = vsel %vm4053_vm8, %v25110_v31, -inf }
 0x53a   :  { %v19240_v47 = vmax.f32 %v4678_v32, %v4679_v27  ;;  %v19248_v14 = vmax.f32 %v4681_v35, %v4682_v40  ;;  %v4684_v30 = vsel %vm4053_vm8, %v25111_v5, -inf  ;;  %v25112_v37 = vmax.f32 %v25044_v2, 0.0  ;;  %v25116_v2 = vld [vmem:[#allocation6_spill] sm:$0xff] }
 0x53b   :  { %v25113_v1 = vmax.f32 %v25045_v21, 0.0  ;;  %v6271_v59 = vrot.slane %v25114_v46, 1  ;;  %v4688_v8 = vsel %vm4053_vm8, %v4595_v15, -inf  ;;  %v5268_v18 = vcombine.high %v25115_v58, %v25115_v58 }
 0x53c   :  { %v4685_v55 = vsel %vm4053_vm8, %v25112_v37, -inf  ;;  %v6278_v11 = vrot.slane %v25116_v2, 1  ;;  %v25118_v17 = vrot.slane %v25117_v34, 2  ;;  %v4725_v13 = vcombine.high %v19024_v7, %v19024_v7 }
 0x53d   :  { %v4687_v4 = vsel %vm4053_vm8, %v25113_v1, -inf  ;;  %v19260_v52 = vmax.f32 %v4684_v30, %v4685_v55  ;;  %v19278_v61 = vmax.f32 %v25114_v46, %v6271_v59  ;;  %v4742_v60 = vcombine.high %v19035_v16, %v19035_v16 }
 0x53e   :  { %v19265_v44 = vmax.f32 %v4687_v4, %v4688_v8  ;;  %v19273_v21 = vmax.f32 %v25117_v34, %v25118_v17  ;;  %v4759_v15 = vcombine.high %v19046_v23, %v19046_v23  ;;  %v19286_v62 = vrot.slane %v19024_v7, %v25121_v48 }
 0x53f   :  { %25120 = vst [vmem:[#allocation34_spill] sm:$0xff] %v19278_v61  ;;  %v19290_v49 = vrot.slane %v19035_v16, %v25121_v48  ;;  %v19293_v19 = vsel %vm5397_vm9, %v5268_v18, -inf  ;;  %v4776_v38 = vcombine.high %v19048_v12, %v19048_v12  ;;  %v4793_v22 = vcombine.high %v19056_v25, %v19056_v25 }
 0x540   :  { %25119 = vst [vmem:[#allocation24_spill] sm:$0xff] %v19273_v21  ;;  %25122 = vst [vmem:[#allocation2_spill] sm:$0xff] %v19293_v19  ;;  %v19300_v32 = vmax.f32 %v25116_v2, %v6278_v11  ;;  %v19304_v7 = vrot.slane %v4725_v13, %v25121_v48  ;;  %v19308_v16 = vrot.slane %v19046_v23, %v25121_v48 }
 0x541   :  { %v19313_v20 = vrot.slane %v4742_v60, %v25121_v48  ;;  %v19316_v35 = vrot.slane %v4759_v15, %v25121_v48  ;;  %v4810_v31 = vcombine.high %v19067_v9, %v19067_v9  ;;  %v19326_v23 = vrot.slane %v19048_v12, %v25121_v48 }
 0x542   :  { %25123 = vst [vmem:[#allocation33_spill] sm:$0xff] %v19300_v32  ;;  %v4827_v30 = vcombine.high %v19078_v24, %v19078_v24  ;;  %v19331_v37 = vrot.slane %v4776_v38, %v25121_v48  ;;  %v19335_v55 = vrot.slane %v19056_v25, %v25121_v48  ;;  %v19338_v1 = vrot.slane %v4793_v22, %v25121_v48 }
 0x543   :  { %v4844_v4 = vcombine.high %v19080_v43, %v19080_v43  ;;  %v19348_v59 = vrot.slane %v19067_v9, %v25121_v48  ;;  %v4861_v25 = vcombine.high %v19088_v63, %v19088_v63  ;;  %v19357_v18 = vrot.slane %v4810_v31, %v25121_v48 }
 0x544   :  { %v19361_v2 = vrot.slane %v19078_v24, %v25121_v48  ;;  %v19366_v11 = vrot.slane %v4827_v30, %v25121_v48  ;;  %v19370_v34 = vrot.slane %v19080_v43, %v25121_v48  ;;  %v4878_v17 = vcombine.high %v19099_v54, %v19099_v54 }
 0x545   :  { %v19381_v15 = vrot.slane %v4844_v4, %v25121_v48  ;;  %v19387_v43 = vrot.slane %v19088_v63, %v25121_v48  ;;  %v19390_v22 = vrot.slane %v4861_v25, %v25121_v48  ;;  %v4895_v31 = vcombine.high %v19110_v26, %v19110_v26 }
 0x546   :  { %v19400_v27 = vrot.slane %v19099_v54, %v25121_v48  ;;  %v4912_v63 = vcombine.high %v19112_v0, %v19112_v0  ;;  %v19409_v38 = vrot.slane %v4878_v17, %v25121_v48  ;;  %v4929_v30 = vcombine.high %v19120_v39, %v19120_v39 }
 0x547   :  { %v19417_v54 = vrot.slane %v19110_v26, %v25121_v48  ;;  %v19421_v60 = vrot.slane %v19112_v0, %v25121_v48  ;;  %v4946_v28 = vcombine.high %v19131_v6, %v19131_v6  ;;  %v19430_v24 = vrot.slane %v4895_v31, %v25121_v48 }
 0x548   :  { %v4963_v26 = vcombine.high %v19142_v33, %v19142_v33  ;;  %v19437_v0 = vrot.slane %v4912_v63, %v25121_v48  ;;  %v19441_v13 = vrot.slane %v19120_v39, %v25121_v48  ;;  %v4980_v17 = vcombine.high %v19144_v10, %v19144_v10 }
 0x549   :  { %v19448_v25 = vrot.slane %v4929_v30, %v25121_v48  ;;  %v19452_v8 = vrot.slane %v19131_v6, %v25121_v48  ;;  %v4997_v63 = vcombine.high %v19152_v56, %v19152_v56  ;;  %v19461_v9 = vrot.slane %v4946_v28, %v25121_v48 }
 0x54a   :  { %v19465_v30 = vrot.slane %v19142_v33, %v25121_v48  ;;  %v19470_v31 = vrot.slane %v4963_v26, %v25121_v48  ;;  %v19474_v58 = vrot.slane %v19144_v10, %v25121_v48  ;;  %v5014_v4 = vcombine.high %v19163_v42, %v19163_v42 }
 0x54b   :  { %v19483_v39 = vrot.slane %v4980_v17, %v25121_v48  ;;  %v19487_v26 = vrot.slane %v19152_v56, %v25121_v48  ;;  %v19494_v46 = vrot.slane %v4997_v63, %v25121_v48  ;;  %v19498_v28 = vrot.slane %v19163_v42, %v25121_v48 }
 0x54c   :  { %v5031_v33 = vcombine.high %v19174_v3, %v19174_v3  ;;  %v5048_v10 = vcombine.high %v19176_v50, %v19176_v50  ;;  %v19513_v42 = vrot.slane %v5014_v4, %v25121_v48  ;;  %v5065_v17 = vcombine.high %v19184_v57, %v19184_v57 }
 0x54d   :  { %25124 = vst [vmem:[#allocation35_spill] sm:$0xff] %v19494_v46  ;;  %25125 = vst [vmem:[#allocation37_spill] sm:$0xff] %v19498_v28  ;;  %v19523_v12 = vrot.slane %v19174_v3, %v25121_v48  ;;  %v5082_v63 = vcombine.high %v19195_v51, %v19195_v51  ;;  %v5099_v40 = vcombine.high %v19206_v29, %v19206_v29 }
 0x54e   :  { %25126 = vst [vmem:[#allocation28_spill] sm:$0xff] %v19513_v42  ;;  %v5116_v56 = vcombine.high %v19208_v53, %v19208_v53  ;;  %v19536_v5 = vrot.slane %v5031_v33, %v25121_v48  ;;  %v19540_v3 = vrot.slane %v19176_v50, %v25121_v48  ;;  %v19543_v61 = vrot.slane %v5048_v10, %v25121_v48 }
 0x54f   :  { %25127 = vst [vmem:[#allocation36_spill] sm:$0xff] %v19523_v12  ;;  %v5133_v4 = vcombine.high %v19216_v41, %v19216_v41  ;;  %v19551_v19 = vrot.slane %v19184_v57, %v25121_v48  ;;  %v19554_v33 = vrot.slane %v5065_v17, %v25121_v48  ;;  %v19558_v50 = vrot.slane %v19195_v51, %v25121_v48 }
 0x550   :  { %25128 = vst [vmem:[#allocation26_spill] sm:$0xff] %v19536_v5  ;;  %25129 = vst [vmem:[#allocation49_spill] sm:$0xff] %v19540_v3  ;;  %v19563_v32 = vrot.slane %v5082_v63, %v25121_v48  ;;  %v19567_v6 = vrot.slane %v19206_v29, %v25121_v48  ;;  %v5150_v57 = vcombine.high %v19227_v36, %v19227_v36 }
 0x551   :  { %25130 = vst [vmem:[#allocation14_spill] sm:$0xff] %v19543_v61  ;;  %25131 = vst [vmem:[#allocation31_spill] sm:$0xff] %v19551_v19  ;;  %v19572_v17 = vrot.slane %v5099_v40, %v25121_v48  ;;  %v19576_v51 = vrot.slane %v19208_v53, %v25121_v48  ;;  %v19579_v21 = vrot.slane %v5116_v56, %v25121_v48  ;;  %v5398_v56 = vsel %vm5397_vm9, %v19286_v62, -inf }
 0x552   :  { %25132 = vst [vmem:[#allocation50_spill] sm:$0xff] %v19554_v33  ;;  %25133 = vst [vmem:[#allocation16_spill] sm:$0xff] %v19558_v50  ;;  %v19583_v63 = vrot.slane %v19216_v41, %v25121_v48  ;;  %v19592_v42 = vrot.slane %v5133_v4, %v25121_v48  ;;  %v19602_v29 = vrot.slane %v19227_v36, %v25121_v48  ;;  %v5399_v10 = vrot.slane %v5398_v56, 4 }
 0x553   :  { %25134 = vst [vmem:[#allocation18_spill] sm:$0xff] %v19563_v32  ;;  %25135 = vst [vmem:[#allocation15_spill] sm:$0xff] %v19567_v6  ;;  %v19609_v40 = vrot.slane %v5150_v57, %v25121_v48  ;;  %v5167_v53 = vcombine.high %v19238_v45, %v19238_v45  ;;  %v19625_v57 = vrot.slane %v19238_v45, %v25121_v48  ;;  %v5412_v41 = vsel %vm5397_vm9, %v19304_v7, -inf }
 0x554   :  { %25136 = vst [vmem:[#allocation17_spill] sm:$0xff] %v19572_v17  ;;  %25137 = vst [vmem:[#allocation44_spill] sm:$0xff] %v19576_v51  ;;  %v5184_v6 = vcombine.high %v19240_v47, %v19240_v47  ;;  %v5201_v36 = vcombine.high %v19248_v14, %v19248_v14  ;;  %v25144_v4 = vcombine.high %v19286_v62, %v19286_v62  ;;  %v5426_v45 = vsel %vm5397_vm9, %v19290_v49, -inf }
 0x555   :  { %25138 = vst [vmem:[#allocation42_spill] sm:$0xff] %v19579_v21  ;;  %25139 = vst [vmem:[#allocation46_spill] sm:$0xff] %v19583_v63  ;;  %v19642_v63 = vrot.slane %v5167_v53, %v25121_v48  ;;  %v5218_v21 = vcombine.high %v19260_v52, %v19260_v52  ;;  %v25146_v62 = vcombine.high %v19304_v7, %v19304_v7  ;;  %v5413_v32 = vrot.slane %v5412_v41, 4 }
 0x556   :  { %25140 = vst [vmem:[#allocation47_spill] sm:$0xff] %v19592_v42  ;;  %25141 = vst [vmem:[#allocation48_spill] sm:$0xff] %v19602_v29  ;;  %v5405_v42 = vsel %vm5397_vm9, %v25144_v4, -inf  ;;  %v5235_v29 = vcombine.high %v19265_v44, %v19265_v44  ;;  %v19658_v53 = vrot.slane %v19240_v47, %v25121_v48  ;;  %v19665_v17 = vrot.slane %v19248_v14, %v25121_v48 }
 0x557   :  { %25142 = vst [vmem:[#allocation3_spill] sm:$0xff] %v19609_v40  ;;  %25143 = vst [vmem:[#allocation5_spill] sm:$0xff] %v19625_v57  ;;  %v5406_v51 = vrot.slane %v5405_v42, 4  ;;  %v5419_v4 = vsel %vm5397_vm9, %v25146_v62, -inf  ;;  %v19661_v40 = vrot.slane %v5184_v6, %v25121_v48  ;;  %v19670_v62 = vrot.slane %v5201_v36, %v25121_v48 }
 0x558   :  { %25145 = vst [vmem:[#allocation8_spill] sm:$0xff] %v19642_v63  ;;  %25147 = vst [vmem:[#allocation12_spill] sm:$0xff] %v19658_v53  ;;  %v19674_v50 = vrot.slane %v19260_v52, %v25121_v48  ;;  %v5400_v47 = vmax.f32 %v5398_v56, %v5399_v10  ;;  %v19679_v33 = vrot.slane %v5218_v21, %v25121_v48  ;;  %v5420_v14 = vrot.slane %v5419_v4, 4 }
 0x559   :  { %25148 = vst [vmem:[#allocation25_spill] sm:$0xff] %v19661_v40  ;;  %25149 = vst [vmem:[#allocation30_spill] sm:$0xff] %v19665_v17  ;;  %v5427_v19 = vrot.slane %v5426_v45, 4  ;;  %v19683_v61 = vrot.slane %v19265_v44, %v25121_v48  ;;  %v19686_v36 = vrot.slane %v5235_v29, %v25121_v48  ;;  %v5407_v7 = vmax.f32 %v5405_v42, %v5406_v51 }
 0x55a   :  { %25150 = vst [vmem:[#allocation43_spill] sm:$0xff] %v19670_v62  ;;  %25151 = vst [vmem:[#allocation29_spill] sm:$0xff] %v19674_v50  ;;  %v25155_v52 = vcombine.high %v19290_v49, %v19290_v49  ;;  %v5414_v44 = vmax.f32 %v5412_v41, %v5413_v32  ;;  %v5401_v51 = vrot.slane %v5400_v47, 2  ;;  %v5440_v49 = vsel %vm5397_vm9, %v19313_v20, -inf }
 0x55b   :  { %25152 = vst [vmem:[#allocation32_spill] sm:$0xff] %v19679_v33  ;;  %25153 = vst [vmem:[#allocation20_spill] sm:$0xff] %v19683_v61  ;;  %v5428_v48 = vmax.f32 %v5426_v45, %v5427_v19  ;;  %v5454_v21 = vsel %vm5397_vm9, %v19308_v16, -inf  ;;  %v5408_v42 = vrot.slane %v5407_v7, 2  ;;  %v5441_v50 = vrot.slane %v5440_v49, 4 }
 0x55c   :  { %25154 = vst [vmem:[#allocation9_spill] sm:$0xff] %v19686_v36  ;;  %v5433_v10 = vsel %vm5397_vm9, %v25155_v52, -inf  ;;  %v5421_v52 = vmax.f32 %v5419_v4, %v5420_v14  ;;  %v5415_v29 = vrot.slane %v5414_v44, 2  ;;  %v5455_v62 = vrot.slane %v5454_v21, 4 }
 0x55d   :  { %v5434_v56 = vrot.slane %v5433_v10, 4  ;;  %v25156_v19 = vcombine.high %v19308_v16, %v19308_v16  ;;  %v5402_v4 = vmax.f32 %v5400_v47, %v5401_v51  ;;  %v5468_v6 = vsel %vm5397_vm9, %v19316_v35, -inf }
 0x55e   :  { %v25157_v32 = vcombine.high %v19316_v35, %v19316_v35  ;;  %v5422_v41 = vrot.slane %v5421_v52, 2  ;;  %v5429_v36 = vrot.slane %v5428_v48, 2  ;;  %v5456_v17 = vmax.f32 %v5454_v21, %v5455_v62 }
 0x55f   :  { %v5461_v45 = vsel %vm5397_vm9, %v25156_v19, -inf  ;;  %v5435_v33 = vmax.f32 %v5433_v10, %v5434_v56  ;;  %v5469_v40 = vrot.slane %v5468_v6, 4  ;;  %v5482_v16 = vsel %vm5397_vm9, %v19326_v23, -inf }
 0x560   :  { %v5462_v14 = vrot.slane %v5461_v45, 4  ;;  %v5475_v61 = vsel %vm5397_vm9, %v25157_v32, -inf  ;;  %v25158_v47 = vcombine.high %v19326_v23, %v19326_v23  ;;  %v5409_v19 = vmax.f32 %v5407_v7, %v5408_v42 }
 0x561   :  { %v5476_v53 = vrot.slane %v5475_v61, 4  ;;  %v5416_v63 = vmax.f32 %v5414_v44, %v5415_v29  ;;  %v19728_v57 = vmax.f32 %v5440_v49, %v5441_v50  ;;  %v25160_v35 = vcombine.high %v19313_v20, %v19313_v20 }
 0x562   :  { %v5489_v51 = vsel %vm5397_vm9, %v25158_v47, -inf  ;;  %v5463_v62 = vmax.f32 %v5461_v45, %v5462_v14  ;;  %v5483_v56 = vrot.slane %v5482_v16, 4  ;;  %v5496_v32 = vsel %vm5397_vm9, %v19331_v37, -inf }
 0x563   :  { %25159 = vst [vmem:[#allocation10_spill] sm:$0xff] %v19728_v57  ;;  %v19734_v10 = vsel %vm5397_vm9, %v25160_v35, -inf  ;;  %v5490_v21 = vrot.slane %v5489_v51, 4  ;;  %v5403_v3 = vrot.slane %v5402_v4, 1  ;;  %v19738_v23 = vmax.f32 %v5421_v52, %v5422_v41 }
 0x564   :  { %25161 = vst [vmem:[#allocation11_spill] sm:$0xff] %v19734_v10  ;;  %v5436_v47 = vrot.slane %v5435_v33, 2  ;;  %v25163_v50 = vcombine.high %v19331_v37, %v19331_v37  ;;  %v5430_v44 = vmax.f32 %v5428_v48, %v5429_v36  ;;  %v5457_v20 = vrot.slane %v5456_v17, 2 }
 0x565   :  { %25162 = vst [vmem:[#allocation13_spill] sm:$0xff] %v19738_v23  ;;  %v5470_v29 = vmax.f32 %v5468_v6, %v5469_v40  ;;  %v5477_v42 = vmax.f32 %v5475_v61, %v5476_v53  ;;  %v5410_v49 = vrot.slane %v5409_v19, 1  ;;  %v5417_v45 = vrot.slane %v5416_v63, 1 }
 0x566   :  { %v5503_v7 = vsel %vm5397_vm9, %v25163_v50, -inf  ;;  %v5497_v35 = vrot.slane %v5496_v32, 4  ;;  %v5464_v5 = vrot.slane %v5463_v62, 2  ;;  %v5484_v12 = vmax.f32 %v5482_v16, %v5483_v56 }
 0x567   :  { %v5491_v28 = vmax.f32 %v5489_v51, %v5490_v21  ;;  %v5504_v52 = vrot.slane %v5503_v7, 4  ;;  %v19745_v41 = vmax.f32 %v5402_v4, %v5403_v3  ;;  %v19748_v37 = vmax.f32 %v5435_v33, %v5436_v47 }
 0x568   :  { %v5431_v36 = vrot.slane %v5430_v44, 1  ;;  %v5458_v40 = vmax.f32 %v5456_v17, %v5457_v20  ;;  %v5471_v61 = vrot.slane %v5470_v29, 2  ;;  %v5478_v53 = vrot.slane %v5477_v42, 2 }
 0x569   :  { %25164 = vst [vmem:[#allocation19_spill] sm:$0xff] %v19748_v37  ;;  %v19751_v6 = vmax.f32 %v5409_v19, %v5410_v49  ;;  %v19753_v50 = vmax.f32 %v5416_v63, %v5417_v45  ;;  %v5498_v14 = vmax.f32 %v5496_v32, %v5497_v35  ;;  %v5510_v16 = vsel %vm5397_vm9, %v19335_v55, -inf }
 0x56a   :  { %v5465_v3 = vmax.f32 %v5463_v62, %v5464_v5  ;;  %v5485_v4 = vrot.slane %v5484_v12, 2  ;;  %v5492_v51 = vrot.slane %v5491_v28, 2  ;;  %v5505_v56 = vmax.f32 %v5503_v7, %v5504_v52 }
 0x56b   :  { %25165 = vst [vmem:[#allocation21_spill] sm:$0xff] %v19753_v50  ;;  %v5511_v33 = vrot.slane %v5510_v16, 4  ;;  %v25166_v21 = vcombine.high %v19335_v55, %v19335_v55  ;;  %v5524_v19 = vsel %vm5397_vm9, %v19338_v1, -inf  ;;  %v25167_v63 = vcombine.high %v19338_v1, %v19338_v1 }
 0x56c   :  { %v19767_v47 = vmax.f32 %v5430_v44, %v5431_v36  ;;  %v5459_v5 = vrot.slane %v5458_v40, 1  ;;  %v5472_v62 = vmax.f32 %v5470_v29, %v5471_v61  ;;  %v5479_v20 = vmax.f32 %v5477_v42, %v5478_v53 }
 0x56d   :  { %v5517_v17 = vsel %vm5397_vm9, %v25166_v21, -inf  ;;  %v5531_v32 = vsel %vm5397_vm9, %v25167_v63, -inf  ;;  %v5499_v7 = vrot.slane %v5498_v14, 2  ;;  %v5525_v45 = vrot.slane %v5524_v19, 4 }
 0x56e   :  { %25168 = vst [vmem:[#allocation22_spill] sm:$0xff] %v19767_v47  ;;  %v5518_v49 = vrot.slane %v5517_v17, 4  ;;  %v5538_v55 = vsel %vm5397_vm9, %v19348_v59, -inf  ;;  %v5466_v35 = vrot.slane %v5465_v3, 1  ;;  %v5532_v52 = vrot.slane %v5531_v32, 4 }
 0x56f   :  { %v5539_v21 = vrot.slane %v5538_v55, 4  ;;  %v25169_v48 = vcombine.high %v19348_v59, %v19348_v59  ;;  %v5486_v63 = vmax.f32 %v5484_v12, %v5485_v4  ;;  %v5493_v44 = vmax.f32 %v5491_v28, %v5492_v51 }
 0x570   :  { %v5506_v36 = vrot.slane %v5505_v56, 2  ;;  %v5512_v46 = vmax.f32 %v5510_v16, %v5511_v33  ;;  %v5519_v29 = vmax.f32 %v5517_v17, %v5518_v49  ;;  %v5526_v42 = vmax.f32 %v5524_v19, %v5525_v45 }
 0x571   :  { %v5545_v1 = vsel %vm5397_vm9, %v25169_v48, -inf  ;;  %v5552_v53 = vsel %vm5397_vm9, %v19357_v18, -inf  ;;  %v5473_v10 = vrot.slane %v5472_v62, 1  ;;  %v5480_v57 = vrot.slane %v5479_v20, 1 }
 0x572   :  { %v5546_v61 = vrot.slane %v5545_v1, 4  ;;  %v5500_v37 = vmax.f32 %v5498_v14, %v5499_v7  ;;  %v25170_v23 = vcombine.high %v19357_v18, %v19357_v18  ;;  %v19781_v47 = vmax.f32 %v5458_v40, %v5459_v5 }
 0x573   :  { %v5533_v12 = vmax.f32 %v5531_v32, %v5532_v52  ;;  %v5540_v28 = vmax.f32 %v5538_v55, %v5539_v21  ;;  %v5553_v48 = vrot.slane %v5552_v53, 4  ;;  %v5487_v16 = vrot.slane %v5486_v63, 1 }
 0x574   :  { %v5559_v59 = vsel %vm5397_vm9, %v25170_v23, -inf  ;;  %v5494_v4 = vrot.slane %v5493_v44, 1  ;;  %v5507_v51 = vmax.f32 %v5505_v56, %v5506_v36  ;;  %v5513_v33 = vrot.slane %v5512_v46, 2 }
 0x575   :  { %v5520_v17 = vrot.slane %v5519_v29, 2  ;;  %v5527_v19 = vrot.slane %v5526_v42, 2  ;;  %v5547_v49 = vmax.f32 %v5545_v1, %v5546_v61  ;;  %v5560_v45 = vrot.slane %v5559_v59, 4 }
 0x576   :  { %v19783_v50 = vmax.f32 %v5465_v3, %v5466_v35  ;;  %v19785_v14 = vmax.f32 %v5472_v62, %v5473_v10  ;;  %v19787_v18 = vmax.f32 %v5479_v20, %v5480_v57  ;;  %v5501_v23 = vrot.slane %v5500_v37, 1 }
 0x577   :  { %v5534_v40 = vrot.slane %v5533_v12, 2  ;;  %v5541_v5 = vrot.slane %v5540_v28, 2  ;;  %v5554_v32 = vmax.f32 %v5552_v53, %v5553_v48  ;;  %v5566_v7 = vsel %vm5397_vm9, %v19361_v2, -inf }
 0x578   :  { %25171 = vst [vmem:[#allocation23_spill] sm:$0xff] %v19785_v14  ;;  %25172 = vst [vmem:[#allocation27_spill] sm:$0xff] %v19787_v18  ;;  %v19791_v55 = vmax.f32 %v5486_v63, %v5487_v16  ;;  %v19793_v56 = vmax.f32 %v5493_v44, %v5494_v4  ;;  %v5508_v52 = vrot.slane %v5507_v51, 1  ;;  %v5514_v21 = vmax.f32 %v5512_v46, %v5513_v33 }
 0x579   :  { %v5521_v1 = vmax.f32 %v5519_v29, %v5520_v17  ;;  %v5528_v3 = vmax.f32 %v5526_v42, %v5527_v19  ;;  %v5548_v35 = vrot.slane %v5547_v49, 2  ;;  %v5561_v10 = vmax.f32 %v5559_v59, %v5560_v45 }
 0x57a   :  { %25173 = vst [vmem:[#allocation4_spill] sm:$0xff] %v19791_v55  ;;  %25174 = vst [vmem:[#allocation41_spill] sm:$0xff] %v19793_v56  ;;  %v5567_v62 = vrot.slane %v5566_v7, 4  ;;  %v25175_v57 = vcombine.high %v19361_v2, %v19361_v2  ;;  %v5580_v36 = vsel %vm5397_vm9, %v19366_v11, -inf  ;;  %v25176_v63 = vcombine.high %v19366_v11, %v19366_v11 }
 0x57b   :  { %v5535_v61 = vmax.f32 %v5533_v12, %v5534_v40  ;;  %v5542_v46 = vmax.f32 %v5540_v28, %v5541_v5  ;;  %v5555_v29 = vrot.slane %v5554_v32, 2  ;;  %v5581_v53 = vrot.slane %v5580_v36, 4 }
 0x57c   :  { %v5573_v20 = vsel %vm5397_vm9, %v25175_v57, -inf  ;;  %v5587_v44 = vsel %vm5397_vm9, %v25176_v63, -inf  ;;  %v5594_v48 = vsel %vm5397_vm9, %v19370_v34, -inf  ;;  %v25177_v2 = vcombine.high %v19370_v34, %v19370_v34 }
 0x57d   :  { %v5574_v42 = vrot.slane %v5573_v20, 4  ;;  %v5588_v59 = vrot.slane %v5587_v44, 4  ;;  %v5515_v4 = vrot.slane %v5514_v21, 1  ;;  %v5522_v33 = vrot.slane %v5521_v1, 1 }
 0x57e   :  { %v5601_v16 = vsel %vm5397_vm9, %v25177_v2, -inf  ;;  %v5549_v17 = vmax.f32 %v5547_v49, %v5548_v35  ;;  %v5562_v11 = vrot.slane %v5561_v10, 2  ;;  %v19811_v19 = vmax.f32 %v5500_v37, %v5501_v23 }
 0x57f   :  { %v5568_v12 = vmax.f32 %v5566_v7, %v5567_v62  ;;  %v5595_v28 = vrot.slane %v5594_v48, 4  ;;  %v5602_v45 = vrot.slane %v5601_v16, 4  ;;  %v19813_v40 = vmax.f32 %v5507_v51, %v5508_v52 }
 0x580   :  { %v5529_v5 = vrot.slane %v5528_v3, 1  ;;  %v5575_v57 = vmax.f32 %v5573_v20, %v5574_v42  ;;  %v5582_v63 = vmax.f32 %v5580_v36, %v5581_v53  ;;  %v5536_v56 = vrot.slane %v5535_v61, 1 }
 0x581   :  { %25178 = vst [vmem:[#allocation6_spill] sm:$0xff] %v19813_v40  ;;  %v5543_v55 = vrot.slane %v5542_v46, 1  ;;  %v5556_v18 = vmax.f32 %v5554_v32, %v5555_v29  ;;  %v5589_v34 = vmax.f32 %v5587_v44, %v5588_v59  ;;  %v19815_v14 = vmax.f32 %v5514_v21, %v5515_v4 }
 0x582   :  { %v19817_v2 = vmax.f32 %v5521_v1, %v5522_v33  ;;  %v5550_v49 = vrot.slane %v5549_v17, 1  ;;  %v5563_v35 = vmax.f32 %v5561_v10, %v5562_v11  ;;  %v5569_v37 = vrot.slane %v5568_v12, 2 }
 0x583   :  { %v5596_v23 = vmax.f32 %v5594_v48, %v5595_v28  ;;  %v5603_v7 = vmax.f32 %v5601_v16, %v5602_v45  ;;  %v5608_v51 = vsel %vm5397_vm9, %v19381_v15, -inf  ;;  %v19821_v52 = vmax.f32 %v5528_v3, %v5529_v5 }
 0x584   :  { %v5576_v62 = vrot.slane %v5575_v57, 2  ;;  %v5583_v20 = vrot.slane %v5582_v63, 2  ;;  %v5622_v32 = vsel %vm5397_vm9, %v19387_v43, -inf  ;;  %v19825_v36 = vmax.f32 %v5535_v61, %v5536_v56 }
 0x585   :  { %v19827_v21 = vmax.f32 %v5542_v46, %v5543_v55  ;;  %v5557_v1 = vrot.slane %v5556_v18, 1  ;;  %v5590_v44 = vrot.slane %v5589_v34, 2  ;;  %v19829_v10 = vmax.f32 %v5549_v17, %v5550_v49 }
 0x586   :  { %v5609_v29 = vrot.slane %v5608_v51, 4  ;;  %v5623_v42 = vrot.slane %v5622_v32, 4  ;;  %v25179_v53 = vcombine.high %v19387_v43, %v19387_v43  ;;  %v5564_v59 = vrot.slane %v5563_v35, 1 }
 0x587   :  { %v5570_v48 = vmax.f32 %v5568_v12, %v5569_v37  ;;  %v5597_v16 = vrot.slane %v5596_v23, 2  ;;  %v5604_v4 = vrot.slane %v5603_v7, 2  ;;  %v5577_v33 = vmax.f32 %v5575_v57, %v5576_v62 }
 0x588   :  { %v5629_v3 = vsel %vm5397_vm9, %v25179_v53, -inf  ;;  %v5584_v56 = vmax.f32 %v5582_v63, %v5583_v20  ;;  %v5636_v55 = vsel %vm5397_vm9, %v19390_v22, -inf  ;;  %v19837_v46 = vmax.f32 %v5556_v18, %v5557_v1 }
 0x589   :  { %v5630_v61 = vrot.slane %v5629_v3, 4  ;;  %v5591_v17 = vmax.f32 %v5589_v34, %v5590_v44  ;;  %v5637_v11 = vrot.slane %v5636_v55, 4  ;;  %v25180_v28 = vcombine.high %v19390_v22, %v19390_v22 }
 0x58a   :  { %v5610_v45 = vmax.f32 %v5608_v51, %v5609_v29  ;;  %v25181_v12 = vcombine.high %v19381_v15, %v19381_v15  ;;  %v5624_v57 = vmax.f32 %v5622_v32, %v5623_v42  ;;  %v19849_v49 = vmax.f32 %v5563_v35, %v5564_v59 }
 0x58b   :  { %v5643_v43 = vsel %vm5397_vm9, %v25180_v28, -inf  ;;  %v5571_v18 = vrot.slane %v5570_v48, 1  ;;  %v5598_v37 = vmax.f32 %v5596_v23, %v5597_v16  ;;  %v5605_v34 = vmax.f32 %v5603_v7, %v5604_v4 }
 0x58c   :  { %v19847_v5 = vsel %vm5397_vm9, %v25181_v12, -inf  ;;  %v5644_v63 = vrot.slane %v5643_v43, 4  ;;  %25183 = vst [vmem:[#allocation51_spill] sm:$0xff] %v19849_v49  ;;  %v5578_v62 = vrot.slane %v5577_v33, 1  ;;  %v5585_v20 = vrot.slane %v5584_v56, 1 }
 0x58d   :  { %25182 = vst [vmem:[#allocation45_spill] sm:$0xff] %v19847_v5  ;;  %v5631_v1 = vmax.f32 %v5629_v3, %v5630_v61  ;;  %v5650_v22 = vsel %vm5397_vm9, %v19400_v27, -inf  ;;  %v5592_v51 = vrot.slane %v5591_v17, 1  ;;  %v5638_v15 = vmax.f32 %v5636_v55, %v5637_v11 }
 0x58e   :  { %v25184_v29 = vcombine.high %v19400_v27, %v19400_v27  ;;  %v5611_v35 = vrot.slane %v5610_v45, 2  ;;  %v5625_v42 = vrot.slane %v5624_v57, 2  ;;  %v5645_v53 = vmax.f32 %v5643_v43, %v5644_v63 }
 0x58f   :  { %v5664_v23 = vsel %vm5397_vm9, %v19409_v38, -inf  ;;  %v19860_v7 = vmax.f32 %v5570_v48, %v5571_v18  ;;  %v5599_v3 = vrot.slane %v5598_v37, 1  ;;  %v5606_v59 = vrot.slane %v5605_v34, 1 }
 0x590   :  { %v5657_v32 = vsel %vm5397_vm9, %v25184_v29, -inf  ;;  %v5651_v16 = vrot.slane %v5650_v22, 4  ;;  %v19862_v4 = vmax.f32 %v5577_v33, %v5578_v62  ;;  %v19864_v61 = vmax.f32 %v5584_v56, %v5585_v20 }
 0x591   :  { %v5632_v55 = vrot.slane %v5631_v1, 2  ;;  %v5658_v11 = vrot.slane %v5657_v32, 4  ;;  %v19866_v27 = vmax.f32 %v5591_v17, %v5592_v51  ;;  %v5639_v28 = vrot.slane %v5638_v15, 2 }
 0x592   :  { %v5665_v12 = vrot.slane %v5664_v23, 4  ;;  %v5678_v43 = vsel %vm5397_vm9, %v19417_v54, -inf  ;;  %v19870_v63 = vmax.f32 %v5610_v45, %v5611_v35  ;;  %v5626_v48 = vmax.f32 %v5624_v57, %v5625_v42 }
 0x593   :  { %25185 = vst [vmem:[#allocation52_spill] sm:$0xff] %v19866_v27  ;;  %v5646_v18 = vrot.slane %v5645_v53, 2  ;;  %v5679_v29 = vrot.slane %v5678_v43, 4  ;;  %v19872_v44 = vmax.f32 %v5598_v37, %v5599_v3  ;;  %v19874_v33 = vmax.f32 %v5605_v34, %v5606_v59 }
 0x594   :  { %25186 = vst [vmem:[#allocation53_spill] sm:$0xff] %v19870_v63  ;;  %v5652_v56 = vmax.f32 %v5650_v22, %v5651_v16  ;;  %v25189_v62 = vcombine.high %v19417_v54, %v19417_v54  ;;  %v5633_v20 = vmax.f32 %v5631_v1, %v5632_v55  ;;  %v5659_v51 = vmax.f32 %v5657_v32, %v5658_v11 }
 0x595   :  { %25187 = vst [vmem:[#allocation54_spill] sm:$0xff] %v19872_v44  ;;  %25188 = vst [vmem:[#allocation55_spill] sm:$0xff] %v19874_v33  ;;  %v25190_v5 = vcombine.high %v19409_v38, %v19409_v38  ;;  %v5640_v35 = vmax.f32 %v5638_v15, %v5639_v28  ;;  %v5666_v37 = vmax.f32 %v5664_v23, %v5665_v12  ;;  %v5692_v34 = vsel %vm5397_vm9, %v19430_v24, -inf }
 0x596   :  { %v5685_v17 = vsel %vm5397_vm9, %v25189_v62, -inf  ;;  %v25192_v22 = vcombine.high %v19430_v24, %v19430_v24  ;;  %v5627_v42 = vrot.slane %v5626_v48, 1  ;;  %v5647_v1 = vmax.f32 %v5645_v53, %v5646_v18 }
 0x597   :  { %v19884_v45 = vsel %vm5397_vm9, %v25190_v5, -inf  ;;  %v5686_v57 = vrot.slane %v5685_v17, 4  ;;  %v5680_v32 = vmax.f32 %v5678_v43, %v5679_v29  ;;  %v5693_v3 = vrot.slane %v5692_v34, 4 }
 0x598   :  { %25191 = vst [vmem:[#allocation56_spill] sm:$0xff] %v19884_v45  ;;  %v5699_v54 = vsel %vm5397_vm9, %v25192_v22, -inf  ;;  %v5653_v59 = vrot.slane %v5652_v56, 2  ;;  %v5706_v5 = vsel %vm5397_vm9, %v19421_v60, -inf  ;;  %v25193_v15 = vcombine.high %v19421_v60, %v19421_v60 }
 0x599   :  { %v5700_v38 = vrot.slane %v5699_v54, 4  ;;  %v5634_v16 = vrot.slane %v5633_v20, 1  ;;  %v5660_v55 = vrot.slane %v5659_v51, 2  ;;  %v5687_v11 = vmax.f32 %v5685_v17, %v5686_v57 }
 0x59a   :  { %v5713_v23 = vsel %vm5397_vm9, %v25193_v15, -inf  ;;  %v5707_v24 = vrot.slane %v5706_v5, 4  ;;  %v5641_v12 = vrot.slane %v5640_v35, 1  ;;  %v5667_v53 = vrot.slane %v5666_v37, 2 }
 0x59b   :  { %v5714_v43 = vrot.slane %v5713_v23, 4  ;;  %v5681_v18 = vrot.slane %v5680_v32, 2  ;;  %v5694_v29 = vmax.f32 %v5692_v34, %v5693_v3  ;;  %v5701_v62 = vmax.f32 %v5699_v54, %v5700_v38 }
 0x59c   :  { %v5720_v22 = vsel %vm5397_vm9, %v19437_v0, -inf  ;;  %v19901_v33 = vmax.f32 %v5626_v48, %v5627_v42  ;;  %v5648_v60 = vrot.slane %v5647_v1, 1  ;;  %v5654_v49 = vmax.f32 %v5652_v56, %v5653_v59 }
 0x59d   :  { %v19904_v40 = vmax.f32 %v5633_v20, %v5634_v16  ;;  %v5661_v17 = vmax.f32 %v5659_v51, %v5660_v55  ;;  %v5688_v57 = vrot.slane %v5687_v11, 2  ;;  %v5708_v28 = vmax.f32 %v5706_v5, %v5707_v24 }
 0x59e   :  { %v19906_v63 = vmax.f32 %v5666_v37, %v5667_v53  ;;  %v5715_v44 = vmax.f32 %v5713_v23, %v5714_v43  ;;  %v5721_v27 = vrot.slane %v5720_v22, 4  ;;  %v5734_v34 = vsel %vm5397_vm9, %v19441_v13, -inf }
 0x59f   :  { %v19910_v54 = vmax.f32 %v5640_v35, %v5641_v12  ;;  %v5682_v48 = vmax.f32 %v5680_v32, %v5681_v18  ;;  %v5695_v42 = vrot.slane %v5694_v29, 2  ;;  %v5702_v3 = vrot.slane %v5701_v62, 2 }
 0x5a0   :  { %25194 = vst [vmem:[#allocation57_spill] sm:$0xff] %v19906_v63  ;;  %v19912_v56 = vmax.f32 %v5647_v1, %v5648_v60  ;;  %v5655_v59 = vrot.slane %v5654_v49, 1  ;;  %v5735_v20 = vrot.slane %v5734_v34, 4  ;;  %v25195_v51 = vcombine.high %v19441_v13, %v19441_v13 }
 0x5a1   :  { %v5662_v38 = vrot.slane %v5661_v17, 1  ;;  %v5689_v5 = vmax.f32 %v5687_v11, %v5688_v57  ;;  %v5709_v23 = vrot.slane %v5708_v28, 2  ;;  %v5716_v35 = vrot.slane %v5715_v44, 2 }
 0x5a2   :  { %v5741_v37 = vsel %vm5397_vm9, %v25195_v51, -inf  ;;  %v5722_v24 = vmax.f32 %v5720_v22, %v5721_v27  ;;  %v5748_v32 = vsel %vm5397_vm9, %v19448_v25, -inf  ;;  %v5683_v1 = vrot.slane %v5682_v48, 1 }
 0x5a3   :  { %v5742_v16 = vrot.slane %v5741_v37, 4  ;;  %v5696_v12 = vmax.f32 %v5694_v29, %v5695_v42  ;;  %v5703_v53 = vmax.f32 %v5701_v62, %v5702_v3  ;;  %v5749_v43 = vrot.slane %v5748_v32, 4 }
 0x5a4   :  { %v5736_v18 = vmax.f32 %v5734_v34, %v5735_v20  ;;  %v25196_v13 = vcombine.high %v19448_v25, %v19448_v25  ;;  %v5762_v57 = vsel %vm5397_vm9, %v19452_v8, -inf  ;;  %v5690_v51 = vrot.slane %v5689_v5, 1 }
 0x5a5   :  { %v5743_v60 = vmax.f32 %v5741_v37, %v5742_v16  ;;  %v5710_v15 = vmax.f32 %v5708_v28, %v5709_v23  ;;  %v25197_v27 = vcombine.high %v19437_v0, %v19437_v0  ;;  %v19933_v62 = vmax.f32 %v5654_v49, %v5655_v59 }
 0x5a6   :  { %v5755_v11 = vsel %vm5397_vm9, %v25196_v13, -inf  ;;  %v19935_v34 = vmax.f32 %v5661_v17, %v5662_v38  ;;  %v5717_v42 = vmax.f32 %v5715_v44, %v5716_v35  ;;  %v5723_v25 = vrot.slane %v5722_v24, 2 }
 0x5a7   :  { %v19931_v22 = vsel %vm5397_vm9, %v25197_v27, -inf  ;;  %v5756_v29 = vrot.slane %v5755_v11, 4  ;;  %v5697_v3 = vrot.slane %v5696_v12, 1  ;;  %v5704_v20 = vrot.slane %v5703_v53, 1 }
 0x5a8   :  { %25198 = vst [vmem:[#allocation58_spill] sm:$0xff] %v19931_v22  ;;  %25199 = vst [vmem:[#allocation59_spill] sm:$0xff] %v19935_v34  ;;  %v5750_v37 = vmax.f32 %v5748_v32, %v5749_v43  ;;  %v5763_v16 = vrot.slane %v5762_v57, 4  ;;  %v19937_v13 = vmax.f32 %v5682_v48, %v5683_v1  ;;  %v5737_v23 = vrot.slane %v5736_v18, 2 }
 0x5a9   :  { %v5744_v0 = vrot.slane %v5743_v60, 2  ;;  %v19940_v55 = vmax.f32 %v5689_v5, %v5690_v51  ;;  %v5711_v27 = vrot.slane %v5710_v15, 1  ;;  %v5757_v45 = vmax.f32 %v5755_v11, %v5756_v29 }
 0x5aa   :  { %v25200_v49 = vcombine.high %v19452_v8, %v19452_v8  ;;  %v5718_v17 = vrot.slane %v5717_v42, 1  ;;  %v19946_v59 = vmax.f32 %v5722_v24, %v5723_v25  ;;  %v5776_v48 = vsel %vm5397_vm9, %v19461_v9, -inf }
 0x5ab   :  { %v5790_v38 = vsel %vm5397_vm9, %v19465_v30, -inf  ;;  %v19952_v35 = vmax.f32 %v5696_v12, %v5697_v3  ;;  %v19954_v5 = vmax.f32 %v5703_v53, %v5704_v20  ;;  %v5751_v32 = vrot.slane %v5750_v37, 2 }
 0x5ac   :  { %v5769_v44 = vsel %vm5397_vm9, %v25200_v49, -inf  ;;  %25201 = vst [vmem:[#allocation60_spill] sm:$0xff] %v19946_v59  ;;  %v5764_v1 = vmax.f32 %v5762_v57, %v5763_v16  ;;  %v5738_v43 = vmax.f32 %v5736_v18, %v5737_v23  ;;  %v5745_v11 = vmax.f32 %v5743_v60, %v5744_v0 }
 0x5ad   :  { %25202 = vst [vmem:[#allocation61_spill] sm:$0xff] %v19952_v35  ;;  %25203 = vst [vmem:[#allocation62_spill] sm:$0xff] %v19954_v5  ;;  %v5770_v8 = vrot.slane %v5769_v44, 4  ;;  %v25204_v51 = vcombine.high %v19465_v30, %v19465_v30  ;;  %v19960_v29 = vmax.f32 %v5710_v15, %v5711_v27  ;;  %v5758_v25 = vrot.slane %v5757_v45, 2 }
 0x5ae   :  { %v5777_v49 = vrot.slane %v5776_v48, 4  ;;  %v5791_v28 = vrot.slane %v5790_v38, 4  ;;  %v19962_v22 = vmax.f32 %v5717_v42, %v5718_v17  ;;  %v5804_v18 = vsel %vm5397_vm9, %v19470_v31, -inf }
 0x5af   :  { %v5797_v24 = vsel %vm5397_vm9, %v25204_v51, -inf  ;;  %25205 = vst [vmem:[#allocation63_spill] sm:$0xff] %v19960_v29  ;;  %v5752_v60 = vmax.f32 %v5750_v37, %v5751_v32  ;;  %v5765_v57 = vrot.slane %v5764_v1, 2  ;;  %v25207_v30 = vcombine.high %v19461_v9, %v19461_v9 }
 0x5b0   :  { %25206 = vst [vmem:[#allocation64_spill] sm:$0xff] %v19962_v22  ;;  %v5798_v53 = vrot.slane %v5797_v24, 4  ;;  %v5805_v15 = vrot.slane %v5804_v18, 4  ;;  %v5739_v20 = vrot.slane %v5738_v43, 1  ;;  %v5746_v16 = vrot.slane %v5745_v11, 1 }
 0x5b1   :  { %v19971_v3 = vsel %vm5397_vm9, %v25207_v30, -inf  ;;  %v5771_v23 = vmax.f32 %v5769_v44, %v5770_v8  ;;  %v25209_v42 = vcombine.high %v19470_v31, %v19470_v31  ;;  %v5759_v27 = vmax.f32 %v5757_v45, %v5758_v25 }
 0x5b2   :  { %25208 = vst [vmem:[#allocation65_spill] sm:$0xff] %v19971_v3  ;;  %v5778_v17 = vmax.f32 %v5776_v48, %v5777_v49  ;;  %v5792_v51 = vmax.f32 %v5790_v38, %v5791_v28  ;;  %v5799_v32 = vmax.f32 %v5797_v24, %v5798_v53  ;;  %v5818_v9 = vsel %vm5397_vm9, %v19474_v58, -inf  ;;  %v25215_v3 = vld [vmem:[#allocation35_spill] sm:$0xff] }
 0x5b3   :  { %v5811_v0 = vsel %vm5397_vm9, %v25209_v42, -inf  ;;  %v25210_v30 = vcombine.high %v19474_v58, %v19474_v58  ;;  %v5832_v44 = vsel %vm5397_vm9, %v19483_v39, -inf  ;;  %v5753_v8 = vrot.slane %v5752_v60, 1 }
 0x5b4   :  { %v5812_v37 = vrot.slane %v5811_v0, 4  ;;  %v5766_v31 = vmax.f32 %v5764_v1, %v5765_v57  ;;  %v5806_v22 = vmax.f32 %v5804_v18, %v5805_v15  ;;  %v5772_v45 = vrot.slane %v5771_v23, 2 }
 0x5b5   :  { %v5825_v12 = vsel %vm5397_vm9, %v25210_v30, -inf  ;;  %v5819_v48 = vrot.slane %v5818_v9, 4  ;;  %v5833_v38 = vrot.slane %v5832_v44, 4  ;;  %v19985_v24 = vmax.f32 %v5738_v43, %v5739_v20 }
 0x5b6   :  { %v5813_v42 = vmax.f32 %v5811_v0, %v5812_v37  ;;  %v5826_v28 = vrot.slane %v5825_v12, 4  ;;  %v19987_v25 = vmax.f32 %v5745_v11, %v5746_v16  ;;  %v5793_v58 = vrot.slane %v5792_v51, 2 }
 0x5b7   :  { %25211 = vst [vmem:[#allocation66_spill] sm:$0xff] %v19985_v24  ;;  %v5760_v53 = vrot.slane %v5759_v27, 1  ;;  %v5779_v30 = vrot.slane %v5778_v17, 2  ;;  %v5800_v59 = vrot.slane %v5799_v32, 2  ;;  %v5820_v34 = vmax.f32 %v5818_v9, %v5819_v48 }
 0x5b8   :  { %25212 = vst [vmem:[#allocation67_spill] sm:$0xff] %v19987_v25  ;;  %v19990_v63 = vmax.f32 %v5752_v60, %v5753_v8  ;;  %v5807_v1 = vrot.slane %v5806_v22, 2  ;;  %v5814_v18 = vrot.slane %v5813_v42, 2  ;;  %v5846_v57 = vsel %vm5397_vm9, %v19487_v26, -inf }
 0x5b9   :  { %v5767_v15 = vrot.slane %v5766_v31, 1  ;;  %v5773_v0 = vmax.f32 %v5771_v23, %v5772_v45  ;;  %v5827_v43 = vmax.f32 %v5825_v12, %v5826_v28  ;;  %v5834_v20 = vmax.f32 %v5832_v44, %v5833_v38 }
 0x5ba   :  { %25213 = vst [vmem:[#allocation68_spill] sm:$0xff] %v19990_v63  ;;  %v5794_v11 = vmax.f32 %v5792_v51, %v5793_v58  ;;  %v5847_v16 = vrot.slane %v5846_v57, 4  ;;  %v25214_v37 = vcombine.high %v19487_v26, %v19487_v26  ;;  %v5860_v60 = vsel %vm5397_vm9, %v25215_v3, -inf  ;;  %v16083_v51 = vld [vmem:[%s24212_s4 + $0x20] sm:$0xff]  }
 0x5bb   :  { %v20000_v9 = vmax.f32 %v5759_v27, %v5760_v53  ;;  %v20002_v8 = vmax.f32 %v5778_v17, %v5779_v30  ;;  %v5801_v48 = vmax.f32 %v5799_v32, %v5800_v59  ;;  %v5821_v63 = vrot.slane %v5820_v34, 2  ;;  %14936 = vmatprep.subr.bf16.mxu1 %v16083_v51 }
 0x5bc   :  { %v5853_v49 = vsel %vm5397_vm9, %v25214_v37, -inf  ;;  %v5808_v25 = vmax.f32 %v5806_v22, %v5807_v1  ;;  %v5815_v23 = vmax.f32 %v5813_v42, %v5814_v18  ;;  %v5861_v44 = vrot.slane %v5860_v60, 4  ;;  %v25220_v22 = vld [vmem:[#allocation37_spill] sm:$0xff]  ;;  %14937 = vmatpush3.bf16.msra.mxu1 %v16083_v51 }
 0x5bd   :  { %25216 = vst [vmem:[#allocation35_spill] sm:$0xff] %v20000_v9  ;;  %25217 = vst [vmem:[#allocation69_spill] sm:$0xff] %v20002_v8  ;;  %v5854_v12 = vrot.slane %v5853_v49, 4  ;;  %v20007_v26 = vmax.f32 %v5766_v31, %v5767_v15  ;;  %v5774_v45 = vrot.slane %v5773_v0, 1  ;;  %v5828_v28 = vrot.slane %v5827_v43, 2 }
 0x5be   :  { %v5835_v38 = vrot.slane %v5834_v20, 2  ;;  %v5795_v58 = vrot.slane %v5794_v11, 1  ;;  %v5848_v27 = vmax.f32 %v5846_v57, %v5847_v16  ;;  %v25219_v17 = vcombine.high %v25215_v3, %v25215_v3 }
 0x5bf   :  { %25218 = vst [vmem:[#allocation70_spill] sm:$0xff] %v20007_v26  ;;  %v5874_v32 = vsel %vm5397_vm9, %v25220_v22, -inf  ;;  %v5822_v42 = vmax.f32 %v5820_v34, %v5821_v63  ;;  %v25221_v53 = vcombine.high %v19483_v39, %v19483_v39  ;;  %v5855_v30 = vmax.f32 %v5853_v49, %v5854_v12  ;;  %v25231_v49 = vld [vmem:[#allocation28_spill] sm:$0xff] }
 0x5c0   :  { %v5867_v59 = vsel %vm5397_vm9, %v25219_v17, -inf  ;;  %v5875_v1 = vrot.slane %v5874_v32, 4  ;;  %v5802_v18 = vrot.slane %v5801_v48, 1  ;;  %v5809_v57 = vrot.slane %v5808_v25, 1 }
 0x5c1   :  { %v20019_v31 = vsel %vm5397_vm9, %v25221_v53, -inf  ;;  %v5816_v15 = vrot.slane %v5815_v23, 1  ;;  %v5862_v3 = vmax.f32 %v5860_v60, %v5861_v44  ;;  %v5829_v37 = vmax.f32 %v5827_v43, %v5828_v28  ;;  %v16084_v43 = vld [vmem:[%s24212_s4 + $0x28] sm:$0xff]   ;;  %v25236_v28 = vld [vmem:[#allocation49_spill] sm:$0xff] }
 0x5c2   :  { %25222 = vst [vmem:[#allocation37_spill] sm:$0xff] %v20019_v31  ;;  %v20022_v17 = vmax.f32 %v5834_v20, %v5835_v38  ;;  %v5868_v26 = vrot.slane %v5867_v59, 4  ;;  %v20024_v63 = vmax.f32 %v5773_v0, %v5774_v45  ;;  %v20026_v34 = vmax.f32 %v5794_v11, %v5795_v58  ;;  %v25230_v58 = vld [vmem:[#allocation36_spill] sm:$0xff]  ;;  %14938 = vmatprep.subr.bf16.mxu1 %v16084_v43 }
 0x5c3   :  { %v5849_v39 = vrot.slane %v5848_v27, 2  ;;  %v5876_v53 = vmax.f32 %v5874_v32, %v5875_v1  ;;  %v5823_v9 = vrot.slane %v5822_v42, 1  ;;  %v5856_v12 = vrot.slane %v5855_v30, 2  ;;  %14939 = vmatpush3.bf16.msra.mxu1 %v16084_v43  ;;  %v25234_v43 = vld [vmem:[#allocation26_spill] sm:$0xff] }
 0x5c4   :  { %25223 = vst [vmem:[#allocation71_spill] sm:$0xff] %v20022_v17  ;;  %25224 = vst [vmem:[#allocation72_spill] sm:$0xff] %v20024_v63  ;;  %v25226_v51 = vcombine.high %v25220_v22, %v25220_v22  ;;  %v20036_v20 = vmax.f32 %v5801_v48, %v5802_v18  ;;  %v20038_v0 = vmax.f32 %v5808_v25, %v5809_v57  ;;  %v5863_v44 = vrot.slane %v5862_v3, 2 }
 0x5c5   :  { %25225 = vst [vmem:[#allocation73_spill] sm:$0xff] %v20026_v34  ;;  %v20040_v11 = vmax.f32 %v5815_v23, %v5816_v15  ;;  %v5830_v45 = vrot.slane %v5829_v37, 1  ;;  %v5869_v38 = vmax.f32 %v5867_v59, %v5868_v26  ;;  %v5902_v22 = vsel %vm5397_vm9, %v25230_v58, -inf  ;;  %v16085_v59 = vld [vmem:[%s24212_s4 + $0x30] sm:$0xff]  }
 0x5c6   :  { %v5881_v60 = vsel %vm5397_vm9, %v25226_v51, -inf  ;;  %25227 = vst [vmem:[#allocation74_spill] sm:$0xff] %v20036_v20  ;;  %25228 = vst [vmem:[#allocation75_spill] sm:$0xff] %v20038_v0  ;;  %v5850_v32 = vmax.f32 %v5848_v27, %v5849_v39  ;;  %v5877_v1 = vrot.slane %v5876_v53, 2  ;;  %v5888_v48 = vsel %vm5397_vm9, %v25231_v49, -inf  ;;  %v16086_v27 = vld [vmem:[%s24212_s4 + $0x38] sm:$0xff]   ;;  %14940 = vmatprep.subr.bf16.mxu1 %v16085_v59 }
 0x5c7   :  { %25229 = vst [vmem:[#allocation76_spill] sm:$0xff] %v20040_v11  ;;  %v5882_v51 = vrot.slane %v5881_v60, 4  ;;  %v20047_v25 = vmax.f32 %v5822_v42, %v5823_v9  ;;  %v5857_v23 = vmax.f32 %v5855_v30, %v5856_v12  ;;  %v5903_v18 = vrot.slane %v5902_v22, 4  ;;  %14941 = vmatpush3.bf16.msra.mxu1 %v16085_v59 }
 0x5c8   :  { %v25233_v57 = vcombine.high %v25230_v58, %v25230_v58  ;;  %v5864_v15 = vmax.f32 %v5862_v3, %v5863_v44  ;;  %v5916_v9 = vsel %vm5397_vm9, %v25234_v43, -inf  ;;  %v25235_v42 = vcombine.high %v25234_v43, %v25234_v43  ;;  %14942 = vmatprep.subr.bf16.mxu1 %v16086_v27 }
 0x5c9   :  { %25232 = vst [vmem:[#allocation36_spill] sm:$0xff] %v20047_v25  ;;  %v5870_v12 = vrot.slane %v5869_v38, 2  ;;  %v5889_v58 = vrot.slane %v5888_v48, 4  ;;  %v5930_v16 = vsel %vm5397_vm9, %v25236_v28, -inf  ;;  %v5851_v31 = vrot.slane %v5850_v32, 1 }
 0x5ca   :  { %v5909_v26 = vsel %vm5397_vm9, %v25233_v57, -inf  ;;  %v5923_v30 = vsel %vm5397_vm9, %v25235_v42, -inf  ;;  %v5917_v57 = vrot.slane %v5916_v9, 4  ;;  %v5878_v17 = vmax.f32 %v5876_v53, %v5877_v1 }
 0x5cb   :  { %v5910_v39 = vrot.slane %v5909_v26, 4  ;;  %v5883_v63 = vmax.f32 %v5881_v60, %v5882_v51  ;;  %v5924_v3 = vrot.slane %v5923_v30, 4  ;;  %v20067_v44 = vmax.f32 %v5829_v37, %v5830_v45  ;;  %v25243_v51 = vld [vmem:[#allocation14_spill] sm:$0xff]  ;;  %14943 = vmatpush3.bf16.msra.mxu1 %v16086_v27 }
 0x5cc   :  { %v5858_v8 = vrot.slane %v5857_v23, 1  ;;  %v25238_v43 = vcombine.high %v25231_v49, %v25231_v49  ;;  %v5904_v25 = vmax.f32 %v5902_v22, %v5903_v18  ;;  %v5865_v11 = vrot.slane %v5864_v15, 1 }
 0x5cd   :  { %25237 = vst [vmem:[#allocation28_spill] sm:$0xff] %v20067_v44  ;;  %v5911_v0 = vmax.f32 %v5909_v26, %v5910_v39  ;;  %v5931_v20 = vrot.slane %v5930_v16, 4  ;;  %v25240_v53 = vcombine.high %v25236_v28, %v25236_v28  ;;  %v20079_v1 = vmax.f32 %v5869_v38, %v5870_v12 }
 0x5ce   :  { %v20073_v42 = vsel %vm5397_vm9, %v25238_v43, -inf  ;;  %v20081_v37 = vmax.f32 %v5888_v48, %v5889_v58  ;;  %v5918_v45 = vmax.f32 %v5916_v9, %v5917_v57  ;;  %v5944_v49 = vsel %vm5397_vm9, %v25243_v51, -inf  ;;  %v25246_v58 = vld [vmem:[#allocation31_spill] sm:$0xff] }
 0x5cf   :  { %25239 = vst [vmem:[#allocation26_spill] sm:$0xff] %v20073_v42  ;;  %v5937_v60 = vsel %vm5397_vm9, %v25240_v53, -inf  ;;  %25241 = vst [vmem:[#allocation49_spill] sm:$0xff] %v20079_v1  ;;  %v20085_v59 = vmax.f32 %v5850_v32, %v5851_v31  ;;  %v5879_v22 = vrot.slane %v5878_v17, 1  ;;  %v5884_v18 = vrot.slane %v5883_v63, 2  ;;  %v25253_v31 = vld [vmem:[#allocation50_spill] sm:$0xff] }
 0x5d0   :  { %25242 = vst [vmem:[#allocation77_spill] sm:$0xff] %v20081_v37  ;;  %v5925_v43 = vmax.f32 %v5923_v30, %v5924_v3  ;;  %v20087_v26 = vmax.f32 %v5857_v23, %v5858_v8  ;;  %v5905_v39 = vrot.slane %v5904_v25, 2  ;;  %v5938_v53 = vrot.slane %v5937_v60, 4 }
 0x5d1   :  { %25244 = vst [vmem:[#allocation14_spill] sm:$0xff] %v20085_v59  ;;  %v5912_v38 = vrot.slane %v5911_v0, 2  ;;  %v5932_v12 = vmax.f32 %v5930_v16, %v5931_v20  ;;  %v5945_v48 = vrot.slane %v5944_v49, 4  ;;  %v5958_v9 = vsel %vm5397_vm9, %v25246_v58, -inf }
 0x5d2   :  { %25245 = vst [vmem:[#allocation78_spill] sm:$0xff] %v20087_v26  ;;  %v20092_v57 = vmax.f32 %v5864_v15, %v5865_v11  ;;  %v5919_v30 = vrot.slane %v5918_v45, 2  ;;  %v20096_v27 = vmax.f32 %v5878_v17, %v5879_v22  ;;  %v20098_v8 = vmax.f32 %v5883_v63, %v5884_v18 }
 0x5d3   :  { %v5926_v23 = vrot.slane %v5925_v43, 2  ;;  %v5959_v3 = vrot.slane %v5958_v9, 4  ;;  %v5906_v28 = vmax.f32 %v5904_v25, %v5905_v39  ;;  %v5939_v44 = vmax.f32 %v5937_v60, %v5938_v53  ;;  %v25255_v39 = vld [vmem:[#allocation16_spill] sm:$0xff] }
 0x5d4   :  { %25247 = vst [vmem:[#allocation31_spill] sm:$0xff] %v20092_v57  ;;  %25248 = vst [vmem:[#allocation79_spill] sm:$0xff] %v20096_v27  ;;  %v25250_v16 = vcombine.high %v25243_v51, %v25243_v51  ;;  %v25252_v11 = vcombine.high %v25246_v58, %v25246_v58  ;;  %v5913_v32 = vmax.f32 %v5911_v0, %v5912_v38  ;;  %v5933_v17 = vrot.slane %v5932_v12, 2  ;;  %v25258_v57 = vld [vmem:[#allocation15_spill] sm:$0xff] }
 0x5d5   :  { %25249 = vst [vmem:[#allocation80_spill] sm:$0xff] %v20098_v8  ;;  %v5946_v22 = vmax.f32 %v5944_v49, %v5945_v48  ;;  %v5920_v18 = vmax.f32 %v5918_v45, %v5919_v30  ;;  %v5972_v25 = vsel %vm5397_vm9, %v25253_v31, -inf  ;;  %v25254_v60 = vcombine.high %v25253_v31, %v25253_v31 }
 0x5d6   :  { %v20104_v20 = vsel %vm5397_vm9, %v25250_v16, -inf  ;;  %v5965_v15 = vsel %vm5397_vm9, %v25252_v11, -inf  ;;  %v5986_v53 = vsel %vm5397_vm9, %v25255_v39, -inf  ;;  %v5927_v16 = vmax.f32 %v5925_v43, %v5926_v23  ;;  %v16087_v43 = vld [vmem:[%s24212_s4] sm:$0xff]  }
 0x5d7   :  { %25251 = vst [vmem:[#allocation81_spill] sm:$0xff] %v20104_v20  ;;  %v5966_v63 = vrot.slane %v5965_v15, 4  ;;  %v5979_v51 = vsel %vm5397_vm9, %v25254_v60, -inf  ;;  %v5960_v58 = vmax.f32 %v5958_v9, %v5959_v3  ;;  %v5973_v42 = vrot.slane %v5972_v25, 4  ;;  %v25257_v60 = vld [vmem:[#allocation18_spill] sm:$0xff]  ;;  %14960 = vmatprep.subr.bf16.mxu1 %v16087_v43 }
 0x5d8   :  { %v5980_v11 = vrot.slane %v5979_v51, 4  ;;  %v5987_v38 = vrot.slane %v5986_v53, 4  ;;  %v25256_v45 = vcombine.high %v25255_v39, %v25255_v39  ;;  %v5907_v30 = vrot.slane %v5906_v28, 1 }
 0x5d9   :  { %v5967_v49 = vmax.f32 %v5965_v15, %v5966_v63  ;;  %v5914_v31 = vrot.slane %v5913_v32, 1  ;;  %v5940_v37 = vrot.slane %v5939_v44, 2  ;;  %v6000_v8 = vsel %vm5397_vm9, %v25257_v60, -inf }
 0x5da   :  { %v5993_v48 = vsel %vm5397_vm9, %v25256_v45, -inf  ;;  %v5934_v9 = vmax.f32 %v5932_v12, %v5933_v17  ;;  %v5974_v23 = vmax.f32 %v5972_v25, %v5973_v42  ;;  %v5981_v3 = vmax.f32 %v5979_v51, %v5980_v11 }
 0x5db   :  { %v5994_v15 = vrot.slane %v5993_v48, 4  ;;  %v5921_v63 = vrot.slane %v5920_v18, 1  ;;  %v5928_v0 = vrot.slane %v5927_v16, 1  ;;  %v5947_v20 = vrot.slane %v5946_v22, 2 }
 0x5dc   :  { %v5961_v39 = vrot.slane %v5960_v58, 2  ;;  %v5968_v45 = vrot.slane %v5967_v49, 2  ;;  %v5988_v1 = vmax.f32 %v5986_v53, %v5987_v38  ;;  %v6001_v27 = vrot.slane %v6000_v8, 4 }
 0x5dd   :  { %v6014_v26 = vsel %vm5397_vm9, %v25258_v57, -inf  ;;  %v20130_v59 = vmax.f32 %v5906_v28, %v5907_v30  ;;  %v20132_v34 = vmax.f32 %v5913_v32, %v5914_v31  ;;  %v5941_v24 = vmax.f32 %v5939_v44, %v5940_v37 }
 0x5de   :  { %v5995_v12 = vmax.f32 %v5993_v48, %v5994_v15  ;;  %v5935_v42 = vrot.slane %v5934_v9, 1  ;;  %v5975_v17 = vrot.slane %v5974_v23, 2  ;;  %v5982_v25 = vrot.slane %v5981_v3, 2  ;;  %v25265_v15 = vld [vmem:[#allocation17_spill] sm:$0xff] }
 0x5df   :  { %25259 = vst [vmem:[#allocation50_spill] sm:$0xff] %v20130_v59  ;;  %25260 = vst [vmem:[#allocation16_spill] sm:$0xff] %v20132_v34  ;;  %v6015_v51 = vrot.slane %v6014_v26, 4  ;;  %v20134_v11 = vmax.f32 %v5920_v18, %v5921_v63  ;;  %v20136_v29 = vmax.f32 %v5927_v16, %v5928_v0  ;;  %v20138_v43 = vmax.f32 %v5946_v22, %v5947_v20 }
 0x5e0   :  { %v25264_v53 = vcombine.high %v25258_v57, %v25258_v57  ;;  %v5962_v38 = vmax.f32 %v5960_v58, %v5961_v39  ;;  %v5969_v32 = vmax.f32 %v5967_v49, %v5968_v45  ;;  %v5989_v30 = vrot.slane %v5988_v1, 2  ;;  %v25268_v49 = vld [vmem:[#allocation44_spill] sm:$0xff] }
 0x5e1   :  { %25261 = vst [vmem:[#allocation18_spill] sm:$0xff] %v20134_v11  ;;  %25262 = vst [vmem:[#allocation15_spill] sm:$0xff] %v20136_v29  ;;  %v6002_v44 = vmax.f32 %v6000_v8, %v6001_v27  ;;  %v5996_v37 = vrot.slane %v5995_v12, 2  ;;  %v6016_v48 = vmax.f32 %v6014_v26, %v6015_v51  ;;  %v6028_v18 = vsel %vm5397_vm9, %v25265_v15, -inf }
 0x5e2   :  { %25263 = vst [vmem:[#allocation82_spill] sm:$0xff] %v20138_v43  ;;  %v6021_v28 = vsel %vm5397_vm9, %v25264_v53, -inf  ;;  %v20146_v63 = vmax.f32 %v5934_v9, %v5935_v42  ;;  %v5942_v16 = vrot.slane %v5941_v24, 1  ;;  %v5976_v20 = vmax.f32 %v5974_v23, %v5975_v17 }
 0x5e3   :  { %v6022_v31 = vrot.slane %v6021_v28, 4  ;;  %v5983_v22 = vmax.f32 %v5981_v3, %v5982_v25  ;;  %v6029_v29 = vrot.slane %v6028_v18, 4  ;;  %v25267_v57 = vcombine.high %v25265_v15, %v25265_v15 }
 0x5e4   :  { %25266 = vst [vmem:[#allocation17_spill] sm:$0xff] %v20146_v63  ;;  %v6042_v27 = vsel %vm5397_vm9, %v25268_v49, -inf  ;;  %v5963_v26 = vrot.slane %v5962_v38, 1  ;;  %v5990_v8 = vmax.f32 %v5988_v1, %v5989_v30  ;;  %v6003_v39 = vrot.slane %v6002_v44, 2 }
 0x5e5   :  { %v6023_v0 = vmax.f32 %v6021_v28, %v6022_v31  ;;  %v6035_v58 = vsel %vm5397_vm9, %v25267_v57, -inf  ;;  %v25269_v9 = vcombine.high %v25257_v60, %v25257_v60  ;;  %v5970_v3 = vrot.slane %v5969_v32, 1 }
 0x5e6   :  { %v5997_v42 = vmax.f32 %v5995_v12, %v5996_v37  ;;  %v6017_v17 = vrot.slane %v6016_v48, 2  ;;  %v20161_v25 = vmax.f32 %v5941_v24, %v5942_v16  ;;  %v5977_v51 = vrot.slane %v5976_v20, 1 }
 0x5e7   :  { %v20158_v45 = vsel %vm5397_vm9, %v25269_v9, -inf  ;;  %v6036_v53 = vrot.slane %v6035_v58, 4  ;;  %v6043_v28 = vrot.slane %v6042_v27, 4  ;;  %v5984_v31 = vrot.slane %v5983_v22, 1 }
 0x5e8   :  { %25270 = vst [vmem:[#allocation44_spill] sm:$0xff] %v20158_v45  ;;  %25271 = vst [vmem:[#allocation83_spill] sm:$0xff] %v20161_v25  ;;  %v6024_v30 = vrot.slane %v6023_v0, 2  ;;  %v6030_v15 = vmax.f32 %v6028_v18, %v6029_v29  ;;  %v20164_v57 = vmax.f32 %v5962_v38, %v5963_v26  ;;  %v5991_v60 = vrot.slane %v5990_v8, 1  ;;  %v25276_v25 = vld [vmem:[#allocation42_spill] sm:$0xff] }
 0x5e9   :  { %v20166_v9 = vmax.f32 %v6002_v44, %v6003_v39  ;;  %v25274_v23 = vcombine.high %v25268_v49, %v25268_v49  ;;  %v20172_v24 = vmax.f32 %v5969_v32, %v5970_v3  ;;  %v5998_v37 = vrot.slane %v5997_v42, 1  ;;  %v25278_v18 = vld [vmem:[#allocation46_spill] sm:$0xff] }
 0x5ea   :  { %25272 = vst [vmem:[#allocation84_spill] sm:$0xff] %v20164_v57  ;;  %v6018_v16 = vmax.f32 %v6016_v48, %v6017_v17  ;;  %v6056_v43 = vsel %vm5397_vm9, %v25276_v25, -inf  ;;  %v20176_v1 = vmax.f32 %v5976_v20, %v5977_v51  ;;  %v6037_v29 = vmax.f32 %v6035_v58, %v6036_v53 }
 0x5eb   :  { %25273 = vst [vmem:[#allocation85_spill] sm:$0xff] %v20166_v9  ;;  %v6049_v12 = vsel %vm5397_vm9, %v25274_v23, -inf  ;;  %25275 = vst [vmem:[#allocation86_spill] sm:$0xff] %v20172_v24  ;;  %v6044_v38 = vmax.f32 %v6042_v27, %v6043_v28  ;;  %v6070_v44 = vsel %vm5397_vm9, %v25278_v18, -inf  ;;  %v20180_v26 = vmax.f32 %v5983_v22, %v5984_v31  ;;  %v25285_v28 = vld [vmem:[#allocation47_spill] sm:$0xff] }
 0x5ec   :  { %25277 = vst [vmem:[#allocation42_spill] sm:$0xff] %v20176_v1  ;;  %v6025_v39 = vmax.f32 %v6023_v0, %v6024_v30  ;;  %v6031_v49 = vrot.slane %v6030_v15, 2  ;;  %v6050_v45 = vrot.slane %v6049_v12, 4  ;;  %v20182_v23 = vmax.f32 %v5990_v8, %v5991_v60 }
 0x5ed   :  { %25279 = vst [vmem:[#allocation46_spill] sm:$0xff] %v20180_v26  ;;  %v6057_v48 = vrot.slane %v6056_v43, 4  ;;  %v25281_v3 = vcombine.high %v25278_v18, %v25278_v18  ;;  %v20189_v58 = vmax.f32 %v5997_v42, %v5998_v37  ;;  %v6019_v27 = vrot.slane %v6018_v16, 1 }
 0x5ee   :  { %25280 = vst [vmem:[#allocation87_spill] sm:$0xff] %v20182_v23  ;;  %v6071_v17 = vrot.slane %v6070_v44, 4  ;;  %v6038_v22 = vrot.slane %v6037_v29, 2  ;;  %v6045_v53 = vrot.slane %v6044_v38, 2  ;;  %v25283_v0 = vcombine.high %v25276_v25, %v25276_v25 }
 0x5ef   :  { %v6077_v20 = vsel %vm5397_vm9, %v25281_v3, -inf  ;;  %25282 = vst [vmem:[#allocation88_spill] sm:$0xff] %v20189_v58  ;;  %v6084_v31 = vsel %vm5397_vm9, %v25285_v28, -inf  ;;  %v6026_v30 = vrot.slane %v6025_v39, 1  ;;  %v6032_v60 = vmax.f32 %v6030_v15, %v6031_v49  ;;  %v25287_v58 = vld [vmem:[#allocation48_spill] sm:$0xff] }
 0x5f0   :  { %v6078_v51 = vrot.slane %v6077_v20, 4  ;;  %v20195_v8 = vsel %vm5397_vm9, %v25283_v0, -inf  ;;  %v6051_v18 = vmax.f32 %v6049_v12, %v6050_v45  ;;  %v6085_v3 = vrot.slane %v6084_v31, 4 }
 0x5f1   :  { %25284 = vst [vmem:[#allocation89_spill] sm:$0xff] %v20195_v8  ;;  %v6058_v42 = vmax.f32 %v6056_v43, %v6057_v48  ;;  %v25286_v37 = vcombine.high %v25285_v28, %v25285_v28  ;;  %v6098_v9 = vsel %vm5397_vm9, %v25287_v58, -inf  ;;  %v25288_v25 = vcombine.high %v25287_v58, %v25287_v58  ;;  %v25290_v58 = vld [vmem:[#allocation3_spill] sm:$0xff] }
 0x5f2   :  { %v6072_v23 = vmax.f32 %v6070_v44, %v6071_v17  ;;  %v6079_v26 = vmax.f32 %v6077_v20, %v6078_v51  ;;  %v6086_v1 = vmax.f32 %v6084_v31, %v6085_v3  ;;  %v6039_v45 = vmax.f32 %v6037_v29, %v6038_v22 }
 0x5f3   :  { %v6091_v32 = vsel %vm5397_vm9, %v25286_v37, -inf  ;;  %v6105_v0 = vsel %vm5397_vm9, %v25288_v25, -inf  ;;  %v6046_v12 = vmax.f32 %v6044_v38, %v6045_v53  ;;  %v6099_v43 = vrot.slane %v6098_v9, 4 }
 0x5f4   :  { %v6092_v15 = vrot.slane %v6091_v32, 4  ;;  %v6106_v49 = vrot.slane %v6105_v0, 4  ;;  %v20209_v48 = vmax.f32 %v6018_v16, %v6019_v27  ;;  %v6033_v28 = vrot.slane %v6032_v60, 1  ;;  %v25292_v16 = vld [vmem:[#allocation5_spill] sm:$0xff] }
 0x5f5   :  { %v6052_v37 = vrot.slane %v6051_v18, 2  ;;  %v6059_v57 = vrot.slane %v6058_v42, 2  ;;  %v6100_v11 = vmax.f32 %v6098_v9, %v6099_v43  ;;  %v6112_v25 = vsel %vm5397_vm9, %v25290_v58, -inf }
 0x5f6   :  { %25289 = vst [vmem:[#allocation47_spill] sm:$0xff] %v20209_v48  ;;  %v6093_v63 = vmax.f32 %v6091_v32, %v6092_v15  ;;  %v20214_v44 = vmax.f32 %v6025_v39, %v6026_v30  ;;  %v6073_v20 = vrot.slane %v6072_v23, 2  ;;  %v6080_v17 = vrot.slane %v6079_v26, 2 }
 0x5f7   :  { %v6087_v29 = vrot.slane %v6086_v1, 2  ;;  %v6040_v38 = vrot.slane %v6039_v45, 1  ;;  %v6047_v51 = vrot.slane %v6046_v12, 1  ;;  %v6107_v22 = vmax.f32 %v6105_v0, %v6106_v49 }
 0x5f8   :  { %25291 = vst [vmem:[#allocation48_spill] sm:$0xff] %v20214_v44  ;;  %v6126_v27 = vsel %vm5397_vm9, %v25292_v16, -inf  ;;  %v20218_v53 = vmax.f32 %v6032_v60, %v6033_v28  ;;  %v6053_v31 = vmax.f32 %v6051_v18, %v6052_v37  ;;  %v6113_v3 = vrot.slane %v6112_v25, 4  ;;  %v25297_v18 = vld [vmem:[#allocation8_spill] sm:$0xff] }
 0x5f9   :  { %v6127_v32 = vrot.slane %v6126_v27, 4  ;;  %v20220_v9 = vmax.f32 %v6058_v42, %v6059_v57  ;;  %v6094_v15 = vrot.slane %v6093_v63, 2  ;;  %v6101_v43 = vrot.slane %v6100_v11, 2 }
 0x5fa   :  { %25293 = vst [vmem:[#allocation3_spill] sm:$0xff] %v20218_v53  ;;  %v25295_v39 = vcombine.high %v25292_v16, %v25292_v16  ;;  %v6074_v24 = vmax.f32 %v6072_v23, %v6073_v20  ;;  %v6081_v8 = vmax.f32 %v6079_v26, %v6080_v17  ;;  %v6088_v0 = vmax.f32 %v6086_v1, %v6087_v29 }
 0x5fb   :  { %25294 = vst [vmem:[#allocation5_spill] sm:$0xff] %v20220_v9  ;;  %v20226_v44 = vmax.f32 %v6039_v45, %v6040_v38  ;;  %v6108_v60 = vrot.slane %v6107_v22, 2  ;;  %v6128_v28 = vmax.f32 %v6126_v27, %v6127_v32  ;;  %v6140_v37 = vsel %vm5397_vm9, %v25297_v18, -inf }
 0x5fc   :  { %v6133_v30 = vsel %vm5397_vm9, %v25295_v39, -inf  ;;  %v6054_v57 = vrot.slane %v6053_v31, 1  ;;  %v6114_v42 = vmax.f32 %v6112_v25, %v6113_v3  ;;  %v25298_v53 = vcombine.high %v25290_v58, %v25290_v58 }
 0x5fd   :  { %v6134_v49 = vrot.slane %v6133_v30, 4  ;;  %25296 = vst [vmem:[#allocation90_spill] sm:$0xff] %v20226_v44  ;;  %v6141_v39 = vrot.slane %v6140_v37, 4  ;;  %v6095_v23 = vmax.f32 %v6093_v63, %v6094_v15  ;;  %v6102_v26 = vmax.f32 %v6100_v11, %v6101_v43 }
 0x5fe   :  { %v20234_v16 = vsel %vm5397_vm9, %v25298_v53, -inf  ;;  %v25300_v45 = vcombine.high %v25297_v18, %v25297_v18  ;;  %v6075_v17 = vrot.slane %v6074_v24, 1  ;;  %v6082_v29 = vrot.slane %v6081_v8, 1  ;;  %v25303_v18 = vld [vmem:[#allocation12_spill] sm:$0xff] }
 0x5ff   :  { %25299 = vst [vmem:[#allocation8_spill] sm:$0xff] %v20234_v16  ;;  %v6135_v1 = vmax.f32 %v6133_v30, %v6134_v49  ;;  %v6089_v38 = vrot.slane %v6088_v0, 1  ;;  %v6142_v27 = vmax.f32 %v6140_v37, %v6141_v39  ;;  %v20240_v25 = vmax.f32 %v6046_v12, %v6047_v51  ;;  %v25308_v39 = vld [vmem:[#allocation25_spill] sm:$0xff] }
 0x600   :  { %v6147_v20 = vsel %vm5397_vm9, %v25300_v45, -inf  ;;  %v6109_v3 = vmax.f32 %v6107_v22, %v6108_v60  ;;  %v6129_v53 = vrot.slane %v6128_v28, 2  ;;  %v20243_v32 = vmax.f32 %v6053_v31, %v6054_v57 }
 0x601   :  { %25301 = vst [vmem:[#allocation91_spill] sm:$0xff] %v20240_v25  ;;  %v6115_v63 = vrot.slane %v6114_v42, 2  ;;  %v6148_v15 = vrot.slane %v6147_v20, 4  ;;  %v6096_v43 = vrot.slane %v6095_v23, 1  ;;  %v6103_v30 = vrot.slane %v6102_v26, 1 }
 0x602   :  { %25302 = vst [vmem:[#allocation92_spill] sm:$0xff] %v20243_v32  ;;  %v6136_v49 = vrot.slane %v6135_v1, 2  ;;  %v6154_v45 = vsel %vm5397_vm9, %v25303_v18, -inf  ;;  %v20248_v44 = vmax.f32 %v6074_v24, %v6075_v17  ;;  %v20250_v12 = vmax.f32 %v6081_v8, %v6082_v29  ;;  %v25310_v17 = vld [vmem:[#allocation30_spill] sm:$0xff] }
 0x603   :  { %v20252_v51 = vmax.f32 %v6088_v0, %v6089_v38  ;;  %v6143_v22 = vrot.slane %v6142_v27, 2  ;;  %v6110_v60 = vrot.slane %v6109_v3, 1  ;;  %v6130_v31 = vmax.f32 %v6128_v28, %v6129_v53 }
 0x604   :  { %25304 = vst [vmem:[#allocation12_spill] sm:$0xff] %v20248_v44  ;;  %25305 = vst [vmem:[#allocation93_spill] sm:$0xff] %v20250_v12  ;;  %v25307_v37 = vcombine.high %v25303_v18, %v25303_v18  ;;  %v6168_v11 = vsel %vm5397_vm9, %v25308_v39, -inf  ;;  %v20260_v58 = vmax.f32 %v6114_v42, %v6115_v63  ;;  %v6149_v32 = vmax.f32 %v6147_v20, %v6148_v15  ;;  %v25317_v15 = vld [vmem:[#allocation43_spill] sm:$0xff] }
 0x605   :  { %25306 = vst [vmem:[#allocation94_spill] sm:$0xff] %v20252_v51  ;;  %v6155_v24 = vrot.slane %v6154_v45, 4  ;;  %v6182_v8 = vsel %vm5397_vm9, %v25310_v17, -inf  ;;  %v20264_v0 = vmax.f32 %v6095_v23, %v6096_v43  ;;  %v20266_v29 = vmax.f32 %v6102_v26, %v6103_v30 }
 0x606   :  { %v6161_v57 = vsel %vm5397_vm9, %v25307_v37, -inf  ;;  %25309 = vst [vmem:[#allocation25_spill] sm:$0xff] %v20260_v58  ;;  %v6137_v28 = vmax.f32 %v6135_v1, %v6136_v49  ;;  %v25313_v38 = vcombine.high %v25310_v17, %v25310_v17  ;;  %v6144_v18 = vmax.f32 %v6142_v27, %v6143_v22 }
 0x607   :  { %25311 = vst [vmem:[#allocation30_spill] sm:$0xff] %v20264_v0  ;;  %25312 = vst [vmem:[#allocation95_spill] sm:$0xff] %v20266_v29  ;;  %v6162_v37 = vrot.slane %v6161_v57, 4  ;;  %v6169_v16 = vrot.slane %v6168_v11, 4  ;;  %v25314_v42 = vcombine.high %v25308_v39, %v25308_v39  ;;  %v20278_v63 = vmax.f32 %v6109_v3, %v6110_v60 }
 0x608   :  { %v6189_v53 = vsel %vm5397_vm9, %v25313_v38, -inf  ;;  %v6131_v23 = vrot.slane %v6130_v31, 1  ;;  %v6183_v26 = vrot.slane %v6182_v8, 4  ;;  %v6196_v1 = vsel %vm5397_vm9, %v25317_v15, -inf }
 0x609   :  { %v20276_v20 = vsel %vm5397_vm9, %v25314_v42, -inf  ;;  %25316 = vst [vmem:[#allocation97_spill] sm:$0xff] %v20278_v63  ;;  %v6150_v43 = vrot.slane %v6149_v32, 2  ;;  %v6156_v30 = vmax.f32 %v6154_v45, %v6155_v24  ;;  %v6190_v49 = vrot.slane %v6189_v53, 4  ;;  %v25320_v45 = vld [vmem:[#allocation29_spill] sm:$0xff] }
 0x60a   :  { %25315 = vst [vmem:[#allocation96_spill] sm:$0xff] %v20276_v20  ;;  %v6197_v17 = vrot.slane %v6196_v1, 4  ;;  %v6138_v22 = vrot.slane %v6137_v28, 1  ;;  %v25318_v39 = vcombine.high %v25317_v15, %v25317_v15  ;;  %v6145_v60 = vrot.slane %v6144_v18, 1 }
 0x60b   :  { %v6163_v42 = vmax.f32 %v6161_v57, %v6162_v37  ;;  %v6170_v63 = vmax.f32 %v6168_v11, %v6169_v16  ;;  %v20288_v29 = vmax.f32 %v6130_v31, %v6131_v23  ;;  %v6184_v0 = vmax.f32 %v6182_v8, %v6183_v26  ;;  %v25322_v16 = vld [vmem:[#allocation32_spill] sm:$0xff] }
 0x60c   :  { %v6203_v3 = vsel %vm5397_vm9, %v25318_v39, -inf  ;;  %v6210_v24 = vsel %vm5397_vm9, %v25320_v45, -inf  ;;  %v25321_v27 = vcombine.high %v25320_v45, %v25320_v45  ;;  %v6151_v20 = vmax.f32 %v6149_v32, %v6150_v43 }
 0x60d   :  { %v6204_v9 = vrot.slane %v6203_v3, 4  ;;  %25319 = vst [vmem:[#allocation43_spill] sm:$0xff] %v20288_v29  ;;  %v6157_v58 = vrot.slane %v6156_v30, 2  ;;  %v6191_v15 = vmax.f32 %v6189_v53, %v6190_v49  ;;  %v6198_v51 = vmax.f32 %v6196_v1, %v6197_v17  ;;  %v25325_v1 = vld [vmem:[#allocation20_spill] sm:$0xff] }
 0x60e   :  { %v6217_v38 = vsel %vm5397_vm9, %v25321_v27, -inf  ;;  %v6211_v12 = vrot.slane %v6210_v24, 4  ;;  %v6224_v11 = vsel %vm5397_vm9, %v25322_v16, -inf  ;;  %v20298_v31 = vmax.f32 %v6137_v28, %v6138_v22 }
 0x60f   :  { %v6205_v39 = vmax.f32 %v6203_v3, %v6204_v9  ;;  %v6218_v57 = vrot.slane %v6217_v38, 4  ;;  %v20300_v8 = vmax.f32 %v6144_v18, %v6145_v60  ;;  %v6164_v37 = vrot.slane %v6163_v42, 2 }
 0x610   :  { %25323 = vst [vmem:[#allocation29_spill] sm:$0xff] %v20298_v31  ;;  %v6171_v23 = vrot.slane %v6170_v63, 2  ;;  %v6185_v26 = vrot.slane %v6184_v0, 2  ;;  %v6212_v45 = vmax.f32 %v6210_v24, %v6211_v12  ;;  %v6225_v27 = vrot.slane %v6224_v11, 4  ;;  %v25327_v12 = vld [vmem:[#allocation9_spill] sm:$0xff] }
 0x611   :  { %25324 = vst [vmem:[#allocation32_spill] sm:$0xff] %v20300_v8  ;;  %v6219_v29 = vmax.f32 %v6217_v38, %v6218_v57  ;;  %v6152_v32 = vrot.slane %v6151_v20, 1  ;;  %v6158_v43 = vmax.f32 %v6156_v30, %v6157_v58  ;;  %v6192_v53 = vrot.slane %v6191_v15, 2 }
 0x612   :  { %v6238_v9 = vsel %vm5397_vm9, %v25325_v1, -inf  ;;  %v6199_v49 = vrot.slane %v6198_v51, 2  ;;  %v6206_v17 = vrot.slane %v6205_v39, 2  ;;  %v6213_v3 = vrot.slane %v6212_v45, 2 }
 0x613   :  { %v6239_v44 = vrot.slane %v6238_v9, 4  ;;  %v6165_v28 = vmax.f32 %v6163_v42, %v6164_v37  ;;  %v6220_v22 = vrot.slane %v6219_v29, 2  ;;  %v25326_v18 = vcombine.high %v25325_v1, %v25325_v1 }
 0x614   :  { %v6252_v38 = vsel %vm5397_vm9, %v25327_v12, -inf  ;;  %v20310_v24 = vmax.f32 %v6170_v63, %v6171_v23  ;;  %v6186_v58 = vmax.f32 %v6184_v0, %v6185_v26  ;;  %v6226_v30 = vmax.f32 %v6224_v11, %v6225_v27 }
 0x615   :  { %v6245_v60 = vsel %vm5397_vm9, %v25326_v18, -inf  ;;  %v6240_v57 = vmax.f32 %v6238_v9, %v6239_v44  ;;  %v6193_v8 = vmax.f32 %v6191_v15, %v6192_v53  ;;  %v6253_v25 = vrot.slane %v6252_v38, 4 }
 0x616   :  { %25328 = vst [vmem:[#allocation20_spill] sm:$0xff] %v20310_v24  ;;  %v6246_v31 = vrot.slane %v6245_v60, 4  ;;  %v25329_v42 = vcombine.high %v25327_v12, %v25327_v12  ;;  %v6200_v48 = vmax.f32 %v6198_v51, %v6199_v49  ;;  %v6207_v1 = vmax.f32 %v6205_v39, %v6206_v17 }
 0x617   :  { %v6214_v34 = vmax.f32 %v6212_v45, %v6213_v3  ;;  %v6241_v18 = vrot.slane %v6240_v57, 2  ;;  %v6221_v59 = vmax.f32 %v6219_v29, %v6220_v22  ;;  %v6254_v35 = vmax.f32 %v6252_v38, %v6253_v25 }
 0x618   :  { %v6259_v37 = vsel %vm5397_vm9, %v25329_v42, -inf  ;;  %v6247_v5 = vmax.f32 %v6245_v60, %v6246_v31  ;;  %v20316_v23 = vmax.f32 %v6151_v20, %v6152_v32  ;;  %v6159_v0 = vrot.slane %v6158_v43, 1  ;;  %v25387_v24 = vld [vmem:[#allocation32_spill] sm:$0xff] }
 0x619   :  { %v6260_v63 = vrot.slane %v6259_v37, 4  ;;  %v6166_v44 = vrot.slane %v6165_v28, 1  ;;  %v6227_v15 = vrot.slane %v6226_v30, 2  ;;  %v6187_v11 = vrot.slane %v6186_v58, 1 }
 0x61a   :  { %v6248_v26 = vrot.slane %v6247_v5, 2  ;;  %v6255_v27 = vrot.slane %v6254_v35, 2  ;;  %v6194_v9 = vrot.slane %v6193_v8, 1  ;;  %v6201_v12 = vrot.slane %v6200_v48, 1 }
 0x61b   :  { %v6261_v53 = vmax.f32 %v6259_v37, %v6260_v63  ;;  %v25330_v51 = vcombine.high %v25322_v16, %v25322_v16  ;;  %v6242_v29 = vmax.f32 %v6240_v57, %v6241_v18  ;;  %v6208_v25 = vrot.slane %v6207_v1, 1  ;;  %v25347_v16 = vld [vmem:[#allocation54_spill] sm:$0xff] }
 0x61c   :  { %v6215_v31 = vrot.slane %v6214_v34, 1  ;;  %v6222_v20 = vrot.slane %v6221_v59, 1  ;;  %v20325_v49 = vmax.f32 %v6226_v30, %v6227_v15  ;;  %v6249_v17 = vmax.f32 %v6247_v5, %v6248_v26  ;;  %v25339_v26 = vld [vmem:[#allocation23_spill] sm:$0xff] }
 0x61d   :  { %v20322_v39 = vsel %vm5397_vm9, %v25330_v51, -inf  ;;  %v6262_v45 = vrot.slane %v6261_v53, 2  ;;  %v6256_v3 = vmax.f32 %v6254_v35, %v6255_v27  ;;  %v20327_v22 = vmax.f32 %v6158_v43, %v6159_v0  ;;  %v25346_v43 = vld [vmem:[#allocation52_spill] sm:$0xff]  ;;  %v25351_v51 = vld [vmem:[#allocation66_spill] sm:$0xff]  ;;  %v25356_v0 = vld [vmem:[#allocation73_spill] sm:$0xff] }
 0x61e   :  { %25331 = vst [vmem:[#allocation9_spill] sm:$0xff] %v20322_v39  ;;  %25332 = vst [vmem:[#allocation98_spill] sm:$0xff] %v20325_v49  ;;  %v20329_v60 = vmax.f32 %v6165_v28, %v6166_v44  ;;  %v20331_v38 = vmax.f32 %v6186_v58, %v6187_v11  ;;  %v20334_v42 = vmax.f32 %v6193_v8, %v6194_v9  ;;  %v6243_v37 = vrot.slane %v6242_v29, 1  ;;  %v25352_v9 = vld [vmem:[#allocation67_spill] sm:$0xff]  ;;  %v25353_v27 = vld [vmem:[#allocation68_spill] sm:$0xff] }
 0x61f   :  { %v20336_v57 = vmax.f32 %v6200_v48, %v6201_v12  ;;  %v6263_v18 = vmax.f32 %v6261_v53, %v6262_v45  ;;  %v20338_v63 = vmax.f32 %v6207_v1, %v6208_v25  ;;  %v20340_v30 = vmax.f32 %v6214_v34, %v6215_v31  ;;  %v25336_v48 = vld [vmem:[#allocation21_spill] sm:$0xff]  ;;  %v25340_v53 = vld [vmem:[#allocation27_spill] sm:$0xff]  ;;  %v25341_v12 = vld [vmem:[#allocation4_spill] sm:$0xff] }
 0x620   :  { %25333 = vst [vmem:[#allocation99_spill] sm:$0xff] %v20329_v60  ;;  %v20342_v5 = vmax.f32 %v6221_v59, %v6222_v20  ;;  %v6250_v28 = vrot.slane %v6249_v17, 1  ;;  %v6257_v58 = vrot.slane %v6256_v3, 1  ;;  %v20357_v15 = vmax.f32 %v6242_v29, %v6243_v37  ;;  %v25342_v25 = vld [vmem:[#allocation41_spill] sm:$0xff]  ;;  %v25349_v29 = vld [vmem:[#allocation62_spill] sm:$0xff]  ;;  %v25350_v31 = vld [vmem:[#allocation63_spill] sm:$0xff] }
 0x621   :  { %25334 = vst [vmem:[#allocation100_spill] sm:$0xff] %v20336_v57  ;;  %v6264_v11 = vrot.slane %v6263_v18, 1  ;;  %v25354_v59 = vld [vmem:[#allocation35_spill] sm:$0xff]  ;;  %v25355_v34 = vld [vmem:[#allocation70_spill] sm:$0xff]  ;;  %v25380_v44 = vld [vmem:[#allocation12_spill] sm:$0xff]  ;;  %v25390_v32 = vpack.c.bf16 %v19751_v6, %v19751_v6  ;;  %v25392_v1 = vpack.c.bf16 %v25336_v48, %v25336_v48  ;;  %v25397_v6 = vpack.c.bf16 %v25339_v26, %v25339_v26 }
 0x622   :  { %25335 = vst [vmem:[#allocation101_spill] sm:$0xff] %v20342_v5  ;;  %25338 = vst [vmem:[#allocation21_spill] sm:$0xff] %v20357_v15  ;;  %v20371_v45 = vmax.f32 %v6249_v17, %v6250_v28  ;;  %v20373_v37 = vmax.f32 %v6256_v3, %v6257_v58  ;;  %v25348_v28 = vld [vmem:[#allocation61_spill] sm:$0xff]  ;;  %v25382_v35 = vld [vmem:[#allocation94_spill] sm:$0xff]  ;;  %v25393_v17 = vpack.c.bf16 %v19781_v47, %v19781_v47 }
 0x623   :  { %v20387_v3 = vmax.f32 %v6263_v18, %v6264_v11  ;;  %v25381_v8 = vld [vmem:[#allocation93_spill] sm:$0xff]  ;;  %v25383_v5 = vld [vmem:[#allocation30_spill] sm:$0xff]  ;;  %v25384_v60 = vld [vmem:[#allocation95_spill] sm:$0xff]  ;;  %v25388_v11 = vpack.c.bf16 %v19745_v41, %v19745_v41  ;;  %v20523_v58 = vunpack.c.l.b16 %v25390_v32  ;;  %v20528_v20 = vunpack.c.l.b16 %v25392_v1 }
 0x624   :  { %25343 = vst [vmem:[#allocation23_spill] sm:$0xff] %v20371_v45  ;;  %25344 = vst [vmem:[#allocation27_spill] sm:$0xff] %v20373_v37  ;;  %v25385_v39 = vld [vmem:[#allocation43_spill] sm:$0xff]  ;;  %v25386_v49 = vld [vmem:[#allocation29_spill] sm:$0xff]  ;;  %v20533_v37 = vunpack.c.l.b16 %v25393_v17  ;;  %v25395_v41 = vpack.c.bf16 %v19783_v50, %v19783_v50  ;;  %v20543_v32 = vunpack.c.l.b16 %v25397_v6  ;;  %v25399_v48 = vpack.c.bf16 %v25340_v53, %v25340_v53 }
 0x625   :  { %25345 = vst [vmem:[#allocation4_spill] sm:$0xff] %v20387_v3  ;;  %v20518_v57 = vunpack.c.l.b16 %v25388_v11  ;;  %25391 = vst [vmem:[#allocation52_spill] sm:$0xff] %v20523_v58  ;;  %v25400_v47 = vpack.c.bf16 %v25341_v12, %v25341_v12  ;;  %v25402_v50 = vpack.c.bf16 %v25342_v25, %v25342_v25  ;;  %v25404_v26 = vpack.c.bf16 %v19811_v19, %v19811_v19  ;;  %v25459_v18 = vld [vmem:[#allocation74_spill] sm:$0xff]  ;;  %v25468_v15 = vld [vmem:[#allocation31_spill] sm:$0xff] }
 0x626   :  { %25394 = vst [vmem:[#allocation54_spill] sm:$0xff] %v20533_v37  ;;  %v20538_v11 = vunpack.c.l.b16 %v25395_v41  ;;  %25398 = vst [vmem:[#allocation62_spill] sm:$0xff] %v20543_v32  ;;  %v20548_v1 = vunpack.c.l.b16 %v25399_v48  ;;  %v25406_v53 = vpack.c.bf16 %v19815_v14, %v19815_v14  ;;  %v25408_v12 = vpack.c.bf16 %v19817_v2, %v19817_v2  ;;  %v25462_v3 = vld [vmem:[#allocation14_spill] sm:$0xff] }
 0x627   :  { %25389 = vst [vmem:[#allocation41_spill] sm:$0xff] %v20518_v57  ;;  %v20553_v17 = vunpack.c.l.b16 %v25400_v47  ;;  %v20558_v41 = vunpack.c.l.b16 %v25402_v50  ;;  %v20563_v6 = vunpack.c.l.b16 %v25404_v26  ;;  %v25410_v25 = vpack.c.bf16 %v19821_v52, %v19821_v52  ;;  %v25465_v45 = vld [vmem:[#allocation78_spill] sm:$0xff] }
 0x628   :  { %25396 = vst [vmem:[#allocation61_spill] sm:$0xff] %v20538_v11  ;;  %v20568_v48 = vunpack.c.l.b16 %v25406_v53  ;;  %v20573_v47 = vunpack.c.l.b16 %v25408_v12  ;;  %v25412_v19 = vpack.c.bf16 %v19825_v36, %v19825_v36  ;;  %v25414_v14 = vpack.c.bf16 %v19827_v21, %v19827_v21 }
 0x629   :  { %25401 = vst [vmem:[#allocation63_spill] sm:$0xff] %v20553_v17  ;;  %25403 = vst [vmem:[#allocation66_spill] sm:$0xff] %v20558_v41  ;;  %v20578_v50 = vunpack.c.l.b16 %v25410_v25  ;;  %v25416_v2 = vpack.c.bf16 %v19829_v10, %v19829_v10  ;;  %v25418_v52 = vpack.c.bf16 %v19837_v46, %v19837_v46  ;;  %v25420_v36 = vpack.c.bf16 %v19860_v7, %v19860_v7 }
 0x62a   :  { %25405 = vst [vmem:[#allocation67_spill] sm:$0xff] %v20563_v6  ;;  %25407 = vst [vmem:[#allocation68_spill] sm:$0xff] %v20568_v48  ;;  %v20583_v26 = vunpack.c.l.b16 %v25412_v19  ;;  %v20588_v53 = vunpack.c.l.b16 %v25414_v14  ;;  %v25422_v21 = vpack.c.bf16 %v19862_v4, %v19862_v4  ;;  %v25424_v10 = vpack.c.bf16 %v19864_v61, %v19864_v61 }
 0x62b   :  { %25409 = vst [vmem:[#allocation35_spill] sm:$0xff] %v20573_v47  ;;  %25411 = vst [vmem:[#allocation70_spill] sm:$0xff] %v20578_v50  ;;  %v20593_v12 = vunpack.c.l.b16 %v25416_v2  ;;  %v20598_v25 = vunpack.c.l.b16 %v25418_v52  ;;  %v20603_v19 = vunpack.c.l.b16 %v25420_v36  ;;  %v25426_v46 = vpack.c.bf16 %v25346_v43, %v25346_v43 }
 0x62c   :  { %25413 = vst [vmem:[#allocation73_spill] sm:$0xff] %v20583_v26  ;;  %25415 = vst [vmem:[#allocation12_spill] sm:$0xff] %v20588_v53  ;;  %v20608_v14 = vunpack.c.l.b16 %v25422_v21  ;;  %v20613_v2 = vunpack.c.l.b16 %v25424_v10  ;;  %v25427_v7 = vpack.c.bf16 %v25347_v16, %v25347_v16  ;;  %v25429_v4 = vpack.c.bf16 %v19901_v33, %v19901_v33 }
 0x62d   :  { %25417 = vst [vmem:[#allocation93_spill] sm:$0xff] %v20593_v12  ;;  %25419 = vst [vmem:[#allocation94_spill] sm:$0xff] %v20598_v25  ;;  %v20618_v52 = vunpack.c.l.b16 %v25426_v46  ;;  %v25431_v61 = vpack.c.bf16 %v19904_v40, %v19904_v40  ;;  %v25433_v43 = vpack.c.bf16 %v19910_v54, %v19910_v54  ;;  %v25434_v16 = vpack.c.bf16 %v19912_v56, %v19912_v56 }
 0x62e   :  { %25421 = vst [vmem:[#allocation30_spill] sm:$0xff] %v20603_v19  ;;  %25423 = vst [vmem:[#allocation95_spill] sm:$0xff] %v20608_v14  ;;  %v20623_v36 = vunpack.c.l.b16 %v25427_v7  ;;  %v20628_v21 = vunpack.c.l.b16 %v25429_v4  ;;  %v25436_v33 = vpack.c.bf16 %v19933_v62, %v19933_v62  ;;  %v25438_v40 = vpack.c.bf16 %v19937_v13, %v19937_v13 }
 0x62f   :  { %25425 = vst [vmem:[#allocation43_spill] sm:$0xff] %v20613_v2  ;;  %v20633_v10 = vunpack.c.l.b16 %v25431_v61  ;;  %v20638_v46 = vunpack.c.l.b16 %v25433_v43  ;;  %v20643_v7 = vunpack.c.l.b16 %v25434_v16  ;;  %v25440_v54 = vpack.c.bf16 %v19940_v55, %v19940_v55 }
 0x630   :  { %25428 = vst [vmem:[#allocation29_spill] sm:$0xff] %v20623_v36  ;;  %25430 = vst [vmem:[#allocation32_spill] sm:$0xff] %v20628_v21  ;;  %v20648_v4 = vunpack.c.l.b16 %v25436_v33  ;;  %v20653_v61 = vunpack.c.l.b16 %v25438_v40  ;;  %v25441_v56 = vpack.c.bf16 %v25348_v28, %v25348_v28  ;;  %v25443_v62 = vpack.c.bf16 %v25349_v29, %v25349_v29 }
 0x631   :  { %25432 = vst [vmem:[#allocation102_spill] sm:$0xff] %v20633_v10  ;;  %25435 = vst [vmem:[#allocation103_spill] sm:$0xff] %v20643_v7  ;;  %v20658_v43 = vunpack.c.l.b16 %v25440_v54  ;;  %v25445_v13 = vpack.c.bf16 %v25350_v31, %v25350_v31  ;;  %v25447_v55 = vpack.c.bf16 %v25351_v51, %v25351_v51  ;;  %v25449_v28 = vpack.c.bf16 %v25352_v9, %v25352_v9 }
 0x632   :  { %25437 = vst [vmem:[#allocation104_spill] sm:$0xff] %v20648_v4  ;;  %25439 = vst [vmem:[#allocation105_spill] sm:$0xff] %v20653_v61  ;;  %v20663_v16 = vunpack.c.l.b16 %v25441_v56  ;;  %v20668_v33 = vunpack.c.l.b16 %v25443_v62  ;;  %v25451_v29 = vpack.c.bf16 %v25353_v27, %v25353_v27  ;;  %v25453_v31 = vpack.c.bf16 %v25354_v59, %v25354_v59 }
 0x633   :  { %v20673_v40 = vunpack.c.l.b16 %v25445_v13  ;;  %v20678_v54 = vunpack.c.l.b16 %v25447_v55  ;;  %v20683_v56 = vunpack.c.l.b16 %v25449_v28  ;;  %v25455_v51 = vpack.c.bf16 %v25355_v34, %v25355_v34 }
 0x634   :  { %25442 = vst [vmem:[#allocation106_spill] sm:$0xff] %v20663_v16  ;;  %25444 = vst [vmem:[#allocation107_spill] sm:$0xff] %v20668_v33  ;;  %v20688_v62 = vunpack.c.l.b16 %v25451_v29  ;;  %v20693_v13 = vunpack.c.l.b16 %v25453_v31  ;;  %v25457_v9 = vpack.c.bf16 %v25356_v0, %v25356_v0  ;;  %v25460_v27 = vpack.c.bf16 %v25459_v18, %v25459_v18 }
 0x635   :  { %25446 = vst [vmem:[#allocation108_spill] sm:$0xff] %v20673_v40  ;;  %25448 = vst [vmem:[#allocation109_spill] sm:$0xff] %v20678_v54  ;;  %v20698_v55 = vunpack.c.l.b16 %v25455_v51  ;;  %v25463_v59 = vpack.c.bf16 %v25462_v3, %v25462_v3  ;;  %v25466_v34 = vpack.c.bf16 %v25465_v45, %v25465_v45  ;;  %v25469_v0 = vpack.c.bf16 %v25468_v15, %v25468_v15 }
 0x636   :  { %25450 = vst [vmem:[#allocation110_spill] sm:$0xff] %v20683_v56  ;;  %25452 = vst [vmem:[#allocation111_spill] sm:$0xff] %v20688_v62  ;;  %v20703_v28 = vunpack.c.l.b16 %v25457_v9  ;;  %v20708_v29 = vunpack.c.l.b16 %v25460_v27 }
 0x637   :  { %25454 = vst [vmem:[#allocation112_spill] sm:$0xff] %v20693_v13  ;;  %25456 = vst [vmem:[#allocation113_spill] sm:$0xff] %v20698_v55  ;;  %v20713_v31 = vunpack.c.l.b16 %v25463_v59  ;;  %v20718_v51 = vunpack.c.l.b16 %v25466_v34  ;;  %v20723_v9 = vunpack.c.l.b16 %v25469_v0 }
 0x638   :  { %25458 = vst [vmem:[#allocation114_spill] sm:$0xff] %v20703_v28  ;;  %25461 = vst [vmem:[#allocation74_spill] sm:$0xff] %v20708_v29  ;;  %v25471_v28 = vld [vmem:[#allocation50_spill] sm:$0xff]  ;;  %v25474_v29 = vld [vmem:[#allocation16_spill] sm:$0xff] }
 0x639   :  { %25464 = vst [vmem:[#allocation14_spill] sm:$0xff] %v20713_v31  ;;  %25467 = vst [vmem:[#allocation78_spill] sm:$0xff] %v20718_v51  ;;  %v25472_v18 = vpack.c.bf16 %v25471_v28, %v25471_v28  ;;  %v25475_v3 = vpack.c.bf16 %v25474_v29, %v25474_v29  ;;  %v25477_v31 = vld [vmem:[#allocation18_spill] sm:$0xff]  ;;  %v25480_v51 = vld [vmem:[#allocation15_spill] sm:$0xff] }
 0x63a   :  { %25470 = vst [vmem:[#allocation31_spill] sm:$0xff] %v20723_v9  ;;  %v25478_v45 = vpack.c.bf16 %v25477_v31, %v25477_v31  ;;  %v25481_v15 = vpack.c.bf16 %v25480_v51, %v25480_v51  ;;  %v25483_v9 = vld [vmem:[#allocation17_spill] sm:$0xff] }
 0x63b   :  { %v20728_v27 = vunpack.c.l.b16 %v25472_v18  ;;  %v20733_v59 = vunpack.c.l.b16 %v25475_v3  ;;  %v25484_v28 = vpack.c.bf16 %v25483_v9, %v25483_v9 }
 0x63c   :  { %v20738_v34 = vunpack.c.l.b16 %v25478_v45  ;;  %v20743_v0 = vunpack.c.l.b16 %v25481_v15 }
 0x63d   :  { %25473 = vst [vmem:[#allocation50_spill] sm:$0xff] %v20728_v27  ;;  %25476 = vst [vmem:[#allocation16_spill] sm:$0xff] %v20733_v59  ;;  %v20748_v18 = vunpack.c.l.b16 %v25484_v28  ;;  %v25486_v27 = vld [vmem:[#allocation84_spill] sm:$0xff]  ;;  %v25489_v59 = vld [vmem:[#allocation86_spill] sm:$0xff] }
 0x63e   :  { %25479 = vst [vmem:[#allocation18_spill] sm:$0xff] %v20738_v34  ;;  %25482 = vst [vmem:[#allocation15_spill] sm:$0xff] %v20743_v0  ;;  %v25487_v29 = vpack.c.bf16 %v25486_v27, %v25486_v27  ;;  %v25490_v31 = vpack.c.bf16 %v25489_v59, %v25489_v59  ;;  %v25492_v34 = vld [vmem:[#allocation42_spill] sm:$0xff] }
 0x63f   :  { %25485 = vst [vmem:[#allocation17_spill] sm:$0xff] %v20748_v18  ;;  %v25493_v51 = vpack.c.bf16 %v25492_v34, %v25492_v34  ;;  %v25495_v0 = vld [vmem:[#allocation46_spill] sm:$0xff]  ;;  %v25498_v18 = vld [vmem:[#allocation87_spill] sm:$0xff] }
 0x640   :  { %v20753_v3 = vunpack.c.l.b16 %v25487_v29  ;;  %v20758_v45 = vunpack.c.l.b16 %v25490_v31  ;;  %v25496_v9 = vpack.c.bf16 %v25495_v0, %v25495_v0  ;;  %v25499_v27 = vpack.c.bf16 %v25498_v18, %v25498_v18 }
 0x641   :  { %v20763_v15 = vunpack.c.l.b16 %v25493_v51 }
 0x642   :  { %25488 = vst [vmem:[#allocation84_spill] sm:$0xff] %v20753_v3  ;;  %25491 = vst [vmem:[#allocation86_spill] sm:$0xff] %v20758_v45  ;;  %v20768_v28 = vunpack.c.l.b16 %v25496_v9  ;;  %v20773_v29 = vunpack.c.l.b16 %v25499_v27  ;;  %v25501_v3 = vld [vmem:[#allocation47_spill] sm:$0xff]  ;;  %v25504_v45 = vld [vmem:[#allocation48_spill] sm:$0xff] }
 0x643   :  { %25494 = vst [vmem:[#allocation42_spill] sm:$0xff] %v20763_v15  ;;  %v25502_v59 = vpack.c.bf16 %v25501_v3, %v25501_v3  ;;  %v25505_v34 = vpack.c.bf16 %v25504_v45, %v25504_v45  ;;  %v25507_v15 = vld [vmem:[#allocation3_spill] sm:$0xff]  ;;  %v25516_v45 = vpack.c.bf16 %v25380_v44, %v25380_v44  ;;  %v25524_v44 = vpack.c.bf16 %v25384_v60, %v25384_v60 }
 0x644   :  { %25497 = vst [vmem:[#allocation46_spill] sm:$0xff] %v20768_v28  ;;  %25500 = vst [vmem:[#allocation87_spill] sm:$0xff] %v20773_v29  ;;  %v25508_v0 = vpack.c.bf16 %v25507_v15, %v25507_v15  ;;  %v25510_v28 = vld [vmem:[#allocation90_spill] sm:$0xff]  ;;  %v25513_v29 = vld [vmem:[#allocation91_spill] sm:$0xff]  ;;  %v25518_v15 = vpack.c.bf16 %v25381_v8, %v25381_v8  ;;  %v25526_v8 = vpack.c.bf16 %v25385_v39, %v25385_v39 }
 0x645   :  { %v20778_v31 = vunpack.c.l.b16 %v25502_v59  ;;  %v20783_v51 = vunpack.c.l.b16 %v25505_v34  ;;  %v25511_v18 = vpack.c.bf16 %v25510_v28, %v25510_v28  ;;  %v25514_v3 = vpack.c.bf16 %v25513_v29, %v25513_v29 }
 0x646   :  { %v20788_v9 = vunpack.c.l.b16 %v25508_v0  ;;  %v20803_v34 = vunpack.c.l.b16 %v25516_v45  ;;  %v20808_v0 = vunpack.c.l.b16 %v25518_v15  ;;  %v25520_v28 = vpack.c.bf16 %v25382_v35, %v25382_v35 }
 0x647   :  { %25503 = vst [vmem:[#allocation47_spill] sm:$0xff] %v20778_v31  ;;  %25506 = vst [vmem:[#allocation48_spill] sm:$0xff] %v20783_v51  ;;  %v20793_v27 = vunpack.c.l.b16 %v25511_v18  ;;  %v20798_v59 = vunpack.c.l.b16 %v25514_v3  ;;  %v25522_v29 = vpack.c.bf16 %v25383_v5, %v25383_v5  ;;  %v20823_v45 = vunpack.c.l.b16 %v25524_v44 }
 0x648   :  { %25509 = vst [vmem:[#allocation3_spill] sm:$0xff] %v20788_v9  ;;  %25517 = vst [vmem:[#allocation115_spill] sm:$0xff] %v20803_v34  ;;  %v20813_v18 = vunpack.c.l.b16 %v25520_v28  ;;  %v20828_v15 = vunpack.c.l.b16 %v25526_v8  ;;  %v25528_v35 = vpack.c.bf16 %v25386_v49, %v25386_v49  ;;  %v25530_v5 = vpack.c.bf16 %v25387_v24, %v25387_v24 }
 0x649   :  { %25512 = vst [vmem:[#allocation90_spill] sm:$0xff] %v20793_v27  ;;  %25515 = vst [vmem:[#allocation91_spill] sm:$0xff] %v20798_v59  ;;  %v20818_v3 = vunpack.c.l.b16 %v25522_v29  ;;  %v25532_v60 = vpack.c.bf16 %v20316_v23, %v20316_v23  ;;  %v6993_v39 = vsel %vm6830_vm10, %v20538_v11, %v20533_v37  ;;  %v7000_v49 = vsel %vm6830_vm10, %v20573_v47, %v20568_v48 }
 0x64a   :  { %25519 = vst [vmem:[#allocation116_spill] sm:$0xff] %v20808_v0  ;;  %25521 = vst [vmem:[#allocation117_spill] sm:$0xff] %v20813_v18  ;;  %v20833_v28 = vunpack.c.l.b16 %v25528_v35  ;;  %v20838_v29 = vunpack.c.l.b16 %v25530_v5  ;;  %v25534_v8 = vpack.c.bf16 %v20327_v22, %v20327_v22  ;;  %v25536_v24 = vpack.c.bf16 %v20331_v38, %v20331_v38 }
 0x64b   :  { %25523 = vst [vmem:[#allocation118_spill] sm:$0xff] %v20818_v3  ;;  %25525 = vst [vmem:[#allocation119_spill] sm:$0xff] %v20823_v45  ;;  %v20843_v44 = vunpack.c.l.b16 %v25532_v60  ;;  %v25538_v23 = vpack.c.bf16 %v20334_v42, %v20334_v42  ;;  %v25543_v22 = vpack.c.bf16 %v20338_v63, %v20338_v63  ;;  %v25545_v38 = vpack.c.bf16 %v20340_v30, %v20340_v30 }
 0x64c   :  { %25527 = vst [vmem:[#allocation120_spill] sm:$0xff] %v20828_v15  ;;  %25529 = vst [vmem:[#allocation121_spill] sm:$0xff] %v20833_v28  ;;  %v20854_v35 = vunpack.c.l.b16 %v25534_v8  ;;  %v20859_v5 = vunpack.c.l.b16 %v25536_v24  ;;  %v20884_v42 = vsel %vm6648_vm11, %v20538_v11, %v20533_v37  ;;  %v6994_v63 = vsel %vm6648_vm11, %v20543_v32, %v6993_v39  ;;  %v25552_v11 = vld [vmem:[#allocation10_spill] sm:$0xff] }
 0x64d   :  { %25531 = vst [vmem:[#allocation122_spill] sm:$0xff] %v20838_v29  ;;  %25533 = vst [vmem:[#allocation123_spill] sm:$0xff] %v20843_v44  ;;  %v20864_v60 = vunpack.c.l.b16 %v25538_v23  ;;  %v25540_v44 = vld [vmem:[#allocation100_spill] sm:$0xff]  ;;  %v20874_v8 = vunpack.c.l.b16 %v25543_v22  ;;  %v20879_v24 = vunpack.c.l.b16 %v25545_v38  ;;  %v25547_v23 = vld [vmem:[#allocation13_spill] sm:$0xff] }
 0x64e   :  { %25535 = vst [vmem:[#allocation124_spill] sm:$0xff] %v20854_v35  ;;  %25537 = vst [vmem:[#allocation125_spill] sm:$0xff] %v20859_v5  ;;  %v25541_v29 = vpack.c.bf16 %v25540_v44, %v25540_v44  ;;  %v7001_v44 = vsel %vm6648_vm11, %v20578_v50, %v7000_v49  ;;  %v25548_v30 = vrot.slane %v25547_v23, 1  ;;  %v25549_v38 = vld [vmem:[#allocation19_spill] sm:$0xff]  ;;  %v25553_v35 = vrot.slane %v25552_v11, 2 }
 0x64f   :  { %25539 = vst [vmem:[#allocation126_spill] sm:$0xff] %v20864_v60  ;;  %25544 = vst [vmem:[#allocation127_spill] sm:$0xff] %v20874_v8  ;;  %v25550_v8 = vmov 0   ;;  %v25556_v60 = vld [vmem:[#allocation22_spill] sm:$0xff] }
 0x650   :  { %v20869_v28 = vunpack.c.l.b16 %v25541_v29  ;;  %25546 = vst [vmem:[#allocation128_spill] sm:$0xff] %v20879_v24  ;;  %v20889_v29 = vsel %vm6648_vm11, %v20573_v47, %v20568_v48  ;;  %v5425_v22 = vmax.f32 %v25547_v23, %v25548_v30  ;;  %v5438_v24 = vrot.slane %v25549_v38, 1  ;;  %v25554_v47 = vld [vmem:[#allocation11_spill] sm:$0xff] }
 0x651   :  { %v20900_v37 = vunpack.c.l.b16 %v25550_v8  ;;  %v5444_v48 = vmax.f32 %v25552_v11, %v25553_v35  ;;  %v25557_v49 = vpack.c.bf16 %v25556_v60, %v25556_v60 }
 0x652   :  { %25542 = vst [vmem:[#allocation100_spill] sm:$0xff] %v20869_v28  ;;  %v25555_v28 = vrot.slane %v25554_v47, 4  ;;  %v5439_v23 = vmax.f32 %v25549_v38, %v5438_v24  ;;  %v6297_v30 = vpack.c.bf16 %v5425_v22, %v5425_v22  ;;  %v25559_v22 = vld [vmem:[#allocation51_spill] sm:$0xff] }
 0x653   :  { %25551 = vst [vmem:[#allocation13_spill] sm:$0xff] %v20900_v37  ;;  %v20911_v5 = vunpack.c.l.b16 %v25557_v49  ;;  %v5445_v8 = vrot.slane %v5444_v48, 1  ;;  %v6317_v38 = vpack.c.bf16 %v25559_v22, %v25559_v22 }
 0x654   :  { %v5449_v39 = vmax.f32 %v25554_v47, %v25555_v28  ;;  %v6299_v45 = vpack.c.bf16 %v5439_v23, %v5439_v23  ;;  %v20914_v11 = vunpack.c.l.b16 %v6297_v30  ;;  %v6986_v47 = vsel %vm6830_vm10, %v20523_v58, %v20518_v57  ;;  %v25558_v28 = vld [vmem:[#allocation6_spill] sm:$0xff] }
 0x655   :  { %v6309_v35 = vpack.c.bf16 %v25558_v28, %v25558_v28  ;;  %v5446_v60 = vmax.f32 %v5444_v48, %v5445_v8  ;;  %v6987_v24 = vsel %vm6648_vm11, %v20528_v20, %v6986_v47  ;;  %v6995_v58 = vsel %vm6650_vm12, %v20548_v1, %v6994_v63  ;;  %v25562_v47 = vld [vmem:[#allocation53_spill] sm:$0xff] }
 0x656   :  { %v5450_v15 = vrot.slane %v5449_v39, 2  ;;  %v20925_v3 = vunpack.c.l.b16 %v6299_v45  ;;  %v6988_v23 = vsel %vm6650_vm12, %v20914_v11, %v6987_v24  ;;  %v6996_v45 = vsel %vm6652_vm13, %v20553_v17, %v6995_v58 }
 0x657   :  { %v20929_v30 = vunpack.c.l.b16 %v6309_v35  ;;  %v6300_v28 = vpack.c.bf16 %v5446_v60, %v5446_v60  ;;  %v6989_v48 = vsel %vm6652_vm13, %v20911_v5, %v6988_v23  ;;  %v25563_v35 = vrot.slane %v25562_v47, 1 }
 0x658   :  { %v5451_v49 = vmax.f32 %v5449_v39, %v5450_v15  ;;  %v20935_v15 = vunpack.c.l.b16 %v6317_v38  ;;  %v6990_v8 = vsel %vm6654_vm14, %v20925_v3, %v6989_v48  ;;  %v7002_v39 = vsel %vm6650_vm12, %v20583_v26, %v7001_v44  ;;  %v25564_v44 = vld [vmem:[#allocation45_spill] sm:$0xff] }
 0x659   :  { %25560 = vst [vmem:[#allocation19_spill] sm:$0xff] %v20929_v30  ;;  %v5614_v63 = vmax.f32 %v25562_v47, %v25563_v35  ;;  %v20946_v60 = vunpack.c.l.b16 %v6300_v28  ;;  %v6997_v22 = vsel %vm6654_vm14, %v20558_v41, %v6996_v45  ;;  %v7003_v38 = vsel %vm6652_vm13, %v20588_v53, %v7002_v39  ;;  %v25566_v47 = vld [vmem:[#allocation57_spill] sm:$0xff] }
 0x65a   :  { %v5452_v57 = vrot.slane %v5451_v49, 1  ;;  %25561 = vst [vmem:[#allocation10_spill] sm:$0xff] %v20935_v15  ;;  %v6998_v23 = vsel %vm6656_vm15, %v20563_v6, %v6997_v22  ;;  %v7004_v58 = vsel %vm6654_vm14, %v20593_v12, %v7003_v38  ;;  %v25565_v48 = vrot.slane %v25564_v44, 4  ;;  %v25574_v12 = vld [vmem:[#allocation59_spill] sm:$0xff] }
 0x65b   :  { %v6991_v45 = vsel %vm6656_vm15, %v20946_v60, %v6990_v8  ;;  %v20966_v39 = vsel %vm6658_vm1, %v20929_v30, %v6998_v23  ;;  %v7005_v35 = vsel %vm6656_vm15, %v20598_v25, %v7004_v58  ;;  %v6324_v30 = vpack.c.bf16 %v5614_v63, %v5614_v63 }
 0x65c   :  { %v5453_v24 = vmax.f32 %v5451_v49, %v5452_v57  ;;  %v5617_v26 = vmax.f32 %v25564_v44, %v25565_v48  ;;  %v25567_v57 = vrot.slane %v25566_v47, 1  ;;  %25568 = vst [vmem:[#allocation11_spill] sm:$0xff] %v20966_v39  ;;  %v20972_v22 = vsel %vm6658_vm1, %v20935_v15, %v7005_v35  ;;  %v25570_v44 = vld [vmem:[#allocation56_spill] sm:$0xff] }
 0x65d   :  { %25569 = vst [vmem:[#allocation22_spill] sm:$0xff] %v20972_v22  ;;  %v25571_v48 = vrot.slane %v25570_v44, 4  ;;  %v7094_v23 = vpack.c.b16 %v20972_v22, %v20966_v39  ;;  %v6331_v58 = vpack.c.bf16 %v25574_v12, %v25574_v12  ;;  %v7007_v63 = vsel %vm6830_vm10, %v20608_v14, %v20603_v19 }
 0x65e   :  { %v5670_v49 = vmax.f32 %v25566_v47, %v25567_v57  ;;  %v6301_v28 = vpack.c.bf16 %v5453_v24, %v5453_v24  ;;  %v5618_v38 = vrot.slane %v5617_v26, 2  ;;  %v25572_v24 = vld [vmem:[#allocation55_spill] sm:$0xff] }
 0x65f   :  { %v5673_v47 = vmax.f32 %v25570_v44, %v25571_v48  ;;  %v6323_v57 = vpack.c.bf16 %v25572_v24, %v25572_v24  ;;  %v20991_v48 = vunpack.c.l.b16 %v6324_v30  ;;  %v7008_v24 = vsel %vm6648_vm11, %v20613_v2, %v7007_v63 }
 0x660   :  { %v20979_v8 = vunpack.c.l.b16 %v6301_v28  ;;  %v5619_v25 = vmax.f32 %v5617_v26, %v5618_v38  ;;  %v6332_v15 = vpack.c.bf16 %v5670_v49, %v5670_v49  ;;  %v20993_v28 = vunpack.c.l.b16 %v6331_v58 }
 0x661   :  { %v5674_v35 = vrot.slane %v5673_v47, 2  ;;  %v20985_v6 = vunpack.c.l.b16 %v6323_v57  ;;  %25577 = vst [vmem:[#allocation45_spill] sm:$0xff] %v20991_v48  ;;  %v7014_v30 = vsel %vm6830_vm10, %v20633_v10, %v20628_v21  ;;  %v25580_v57 = vld [vmem:[#allocation60_spill] sm:$0xff]  ;;  %v7009_v63 = vsel %vm6650_vm12, %v20618_v52, %v7008_v24 }
 0x662   :  { %25573 = vst [vmem:[#allocation6_spill] sm:$0xff] %v20979_v8  ;;  %v20989_v44 = vsel %vm6658_vm1, %v20979_v8, %v6991_v45  ;;  %25578 = vst [vmem:[#allocation57_spill] sm:$0xff] %v20993_v28  ;;  %v5620_v26 = vrot.slane %v5619_v25, 1  ;;  %v21000_v49 = vunpack.c.l.b16 %v6332_v15  ;;  %v16088_v45 = vld [vmem:[%s24212_s4 + $0x8] sm:$0xff]   ;;  %v25581_v58 = vrot.slane %v25580_v57, 1 }
 0x663   :  { %25575 = vst [vmem:[#allocation51_spill] sm:$0xff] %v20985_v6  ;;  %25576 = vst [vmem:[#allocation53_spill] sm:$0xff] %v20989_v44  ;;  %v7093_v12 = vpack.c.b16 %v20989_v44, %v20900_v37  ;;  %v5675_v38 = vmax.f32 %v5673_v47, %v5674_v35  ;;  %v25582_v44 = vld [vmem:[#allocation58_spill] sm:$0xff]  ;;  %v7015_v2 = vsel %vm6648_vm11, %v20638_v46, %v7014_v30 }
 0x664   :  { %25579 = vst [vmem:[#allocation56_spill] sm:$0xff] %v21000_v49  ;;  %v5726_v39 = vmax.f32 %v25580_v57, %v25581_v58  ;;  %v25583_v8 = vrot.slane %v25582_v44, 4  ;;  %v5621_v47 = vmax.f32 %v5619_v25, %v5620_v26  ;;  %v7010_v10 = vsel %vm6652_vm13, %v20623_v36, %v7009_v63 }
 0x665   :  { %14944 = vmatprep.mubr.msk.bf16.mxu1 %vm4053_vm8, %v7093_v12  ;;  %v5676_v35 = vrot.slane %v5675_v38, 1  ;;  %v7016_v57 = vsel %vm6650_vm12, %v20643_v7, %v7015_v2  ;;  %v16429_v12 = vld [vmem:[%s24212_s4] sm:$0xff]  }
 0x666   :  { %v5729_v15 = vmax.f32 %v25582_v44, %v25583_v8  ;;  %14945 = vmatmul.mubr.msk.bf16.vlgmr.msra.gmra.mrb[64].mxu1 %vm4053_vm8, %v7094_v23  ;;  %v25584_v8 = vld [vmem:[#allocation69_spill] sm:$0xff]  ;;  %v6325_v24 = vpack.c.bf16 %v5621_v47, %v5621_v47  ;;  %v7011_v23 = vsel %vm6654_vm14, %v20985_v6, %v7010_v10  ;;  %v7017_v30 = vsel %vm6652_vm13, %v20648_v4, %v7016_v57  ;;  %v25589_v57 = vld [vmem:[#allocation64_spill] sm:$0xff] }
 0x667   :  { %v25585_v44 = vrot.slane %v25584_v8, 1  ;;  %14961 = vmatpush3.bf16.msra.mxu1 %v16429_v12  ;;  %v5677_v26 = vmax.f32 %v5675_v38, %v5676_v35  ;;  %v7012_v2 = vsel %vm6656_vm15, %v20991_v48, %v7011_v23  ;;  %v7018_v63 = vsel %vm6654_vm14, %v20993_v28, %v7017_v30  ;;  %v16089_v38 = vld [vmem:[%s24212_s4 + $0x10] sm:$0xff]  }
 0x668   :  { %v5730_v58 = vrot.slane %v5729_v15, 2  ;;  %14962 = vmatprep.subr.bf16.mxu1 %v16088_v45  ;;  %v21046_v47 = vunpack.c.l.b16 %v6325_v24  ;;  %v7019_v35 = vsel %vm6656_vm15, %v21000_v49, %v7018_v63  ;;  %v6339_v23 = vpack.c.bf16 %v25589_v57, %v25589_v57 }
 0x669   :  { %v5782_v25 = vmax.f32 %v25584_v8, %v25585_v44  ;;  %v25586_v44 = vld [vmem:[#allocation65_spill] sm:$0xff]  ;;  %v6333_v10 = vpack.c.bf16 %v5677_v26, %v5677_v26 }
 0x66a   :  { %v5731_v8 = vmax.f32 %v5729_v15, %v5730_v58  ;;  %v25587_v36 = vrot.slane %v25586_v44, 4  ;;  %25588 = vst [vmem:[#allocation55_spill] sm:$0xff] %v21046_v47  ;;  %v6340_v15 = vpack.c.bf16 %v5726_v39, %v5726_v39  ;;  %v25590_v58 = vld [vmem:[#allocation72_spill] sm:$0xff]  ;;  %v21063_v24 = vsel %vm6658_vm1, %v21046_v47, %v7012_v2  ;;  %v25605_v47 = vld [vmem:[#allocation26_spill] sm:$0xff] }
 0x66b   :  { %v6347_v28 = vpack.c.bf16 %v25590_v58, %v25590_v58  ;;  %v21059_v26 = vunpack.c.l.b16 %v6333_v10  ;;  %25592 = vst [vmem:[#allocation60_spill] sm:$0xff] %v21063_v24  ;;  %v6348_v63 = vpack.c.bf16 %v5782_v25, %v5782_v25  ;;  %14963 = vmatpush3.bf16.msra.mxu1 %v16088_v45  ;;  %v21068_v39 = vsel %vm6650_vm12, %v20578_v50, %v20889_v29 }
 0x66c   :  { %v5785_v12 = vmax.f32 %v25586_v44, %v25587_v36  ;;  %v5732_v30 = vrot.slane %v5731_v8, 1  ;;  %v21057_v36 = vsel %vm6650_vm12, %v20543_v32, %v20884_v42  ;;  %14964 = vmatprep.subr.bf16.mxu1 %v16089_v38  ;;  %v16090_v42 = vld [vmem:[%s24212_s4 + $0x18] sm:$0xff]   ;;  %v21079_v45 = vunpack.c.l.b16 %v6339_v23  ;;  %v25600_v44 = vld [vmem:[#allocation80_spill] sm:$0xff] }
 0x66d   :  { %25591 = vst [vmem:[#allocation59_spill] sm:$0xff] %v21059_v26  ;;  %v21077_v2 = vsel %vm6658_vm1, %v21059_v26, %v7019_v35  ;;  %v21081_v25 = vunpack.c.l.b16 %v6340_v15  ;;  %v21083_v29 = vunpack.c.l.b16 %v6347_v28  ;;  %v7028_v35 = vsel %vm6830_vm10, %v20683_v56, %v20678_v54  ;;  %v25598_v23 = vld [vmem:[#allocation49_spill] sm:$0xff]  ;;  %v21109_v26 = vld [vmem:[%s24212_s4 + $0x40] sm:$0xff]  }
 0x66e   :  { %v5786_v48 = vrot.slane %v5785_v12, 2  ;;  %v5733_v57 = vmax.f32 %v5731_v8, %v5732_v30  ;;  %25593 = vst [vmem:[#allocation58_spill] sm:$0xff] %v21077_v2  ;;  %25594 = vst [vmem:[#allocation69_spill] sm:$0xff] %v21079_v45  ;;  %v7095_v10 = vpack.c.b16 %v21077_v2, %v21063_v24  ;;  %v7021_v30 = vsel %vm6830_vm10, %v20658_v43, %v20653_v61 }
 0x66f   :  { %25595 = vst [vmem:[#allocation65_spill] sm:$0xff] %v21081_v25  ;;  %25596 = vst [vmem:[#allocation64_spill] sm:$0xff] %v21083_v29  ;;  %v25599_v15 = vrot.slane %v25598_v23, 1  ;;  %v5886_v22 = vrot.slane %v25600_v44, 1  ;;  %14965 = vmatpush3.bf16.msra.mxu1 %v16089_v38  ;;  %v7022_v24 = vsel %vm6648_vm11, %v20663_v16, %v7021_v30  ;;  %v7029_v2 = vsel %vm6648_vm11, %v20688_v62, %v7028_v35 }
 0x670   :  { %v5787_v58 = vmax.f32 %v5785_v12, %v5786_v48  ;;  %v6341_v48 = vpack.c.bf16 %v5733_v57, %v5733_v57  ;;  %v21087_v12 = vunpack.c.l.b16 %v6348_v63  ;;  %14948 = vmatprep.mubr.msk.bf16.mxu1 %vm4053_vm8, %v7095_v10  ;;  %14966 = vmatprep.subr.bf16.mxu1 %v16090_v42  ;;  %25602 = vst [vmem:[#allocation80_spill] sm:$0xff] %v21109_v26  ;;  %v25606_v50 = vrot.slane %v25605_v47, 4 }
 0x671   :  { %v5873_v28 = vmax.f32 %v25598_v23, %v25599_v15  ;;  %v7023_v38 = vsel %vm6650_vm12, %v20668_v33, %v7022_v24  ;;  %v5887_v10 = vmax.f32 %v25600_v44, %v5886_v22 }
 0x672   :  { %v5788_v8 = vrot.slane %v5787_v58, 1  ;;  %25597 = vst [vmem:[#allocation72_spill] sm:$0xff] %v21087_v12  ;;  %v21100_v63 = vunpack.c.l.b16 %v6341_v48  ;;  %v7024_v35 = vsel %vm6652_vm13, %v20673_v40, %v7023_v38  ;;  %v5897_v24 = vmax.f32 %v25605_v47, %v25606_v50 }
 0x673   :  { %v6361_v32 = vpack.c.bf16 %v5873_v28, %v5873_v28  ;;  %14967 = vmatpush3.bf16.msra.mxu1 %v16090_v42 }
 0x674   :  { %v5789_v57 = vmax.f32 %v5787_v58, %v5788_v8  ;;  %25601 = vst [vmem:[#allocation49_spill] sm:$0xff] %v21100_v63  ;;  %v7030_v58 = vsel %vm6650_vm12, %v20693_v13, %v7029_v2  ;;  %v25603_v8 = vld [vmem:[#allocation77_spill] sm:$0xff]  ;;  %v7025_v2 = vsel %vm6654_vm14, %v21079_v45, %v7024_v35  ;;  %14984 = vmatprep.subr.bf16.mxu1 %v21109_v26  ;;  %v25615_v26 = vld [vmem:[#allocation78_spill] sm:$0xff] }
 0x675   :  { %v25604_v48 = vrot.slane %v25603_v8, 2  ;;  %v7031_v15 = vsel %vm6652_vm13, %v20698_v55, %v7030_v58  ;;  %v7026_v38 = vsel %vm6656_vm15, %v21081_v25, %v7025_v2  ;;  %v21141_v35 = vunpack.c.l.b16 %v6361_v32  ;;  %v25628_v55 = vld [vmem:[#allocation88_spill] sm:$0xff] }
 0x676   :  { %v6349_v23 = vpack.c.bf16 %v5789_v57, %v5789_v57  ;;  %v7032_v22 = vsel %vm6654_vm14, %v21083_v29, %v7031_v15  ;;  %v21139_v50 = vsel %vm6658_vm1, %v21100_v63, %v7026_v38 }
 0x677   :  { %v5892_v30 = vmax.f32 %v25603_v8, %v25604_v48  ;;  %v7033_v58 = vsel %vm6656_vm15, %v21087_v12, %v7032_v22  ;;  %v5898_v8 = vrot.slane %v5897_v24, 2  ;;  %25608 = vst [vmem:[#allocation26_spill] sm:$0xff] %v21139_v50  ;;  %v6363_v48 = vpack.c.bf16 %v5887_v10, %v5887_v10  ;;  %25609 = vst [vmem:[#allocation129_spill] sm:$0xff] %v21141_v35  ;;  %v25614_v22 = vld [vmem:[#allocation14_spill] sm:$0xff] }
 0x678   :  { %v21130_v57 = vunpack.c.l.b16 %v6349_v23  ;;  %v25611_v23 = vld [vmem:[#allocation79_spill] sm:$0xff]  ;;  %v7035_v12 = vsel %vm6830_vm10, %v25615_v26, %v25614_v22 }
 0x679   :  { %v5893_v44 = vrot.slane %v5892_v30, 1  ;;  %v5899_v28 = vmax.f32 %v5897_v24, %v5898_v8  ;;  %v25612_v15 = vpack.c.bf16 %v25611_v23, %v25611_v23  ;;  %v21157_v32 = vunpack.c.l.b16 %v6363_v48  ;;  %v25618_v8 = vld [vmem:[#allocation82_spill] sm:$0xff] }
 0x67a   :  { %25607 = vst [vmem:[#allocation77_spill] sm:$0xff] %v21130_v57  ;;  %v21145_v42 = vsel %vm6658_vm1, %v21130_v57, %v7033_v58  ;;  %v25619_v23 = vrot.slane %v25618_v8, 1  ;;  %v25620_v57 = vld [vmem:[#allocation81_spill] sm:$0xff] }
 0x67b   :  { %v5894_v47 = vmax.f32 %v5892_v30, %v5893_v44  ;;  %25610 = vst [vmem:[#allocation130_spill] sm:$0xff] %v21145_v42  ;;  %v21150_v2 = vunpack.c.l.b16 %v25612_v15  ;;  %v7096_v30 = vpack.c.b16 %v21145_v42, %v21139_v50  ;;  %25616 = vst [vmem:[#allocation131_spill] sm:$0xff] %v21157_v32  ;;  %v25617_v44 = vld [vmem:[#allocation31_spill] sm:$0xff]  ;;  %v5900_v58 = vrot.slane %v5899_v28, 1 }
 0x67c   :  { %v7036_v38 = vsel %vm6648_vm11, %v25617_v44, %v7035_v12  ;;  %v5950_v15 = vmax.f32 %v25618_v8, %v25619_v23  ;;  %v25621_v63 = vrot.slane %v25620_v57, 4  ;;  %v25623_v12 = vld [vmem:[#allocation85_spill] sm:$0xff] }
 0x67d   :  { %25613 = vst [vmem:[#allocation79_spill] sm:$0xff] %v21150_v2  ;;  %v6364_v10 = vpack.c.bf16 %v5894_v47, %v5894_v47  ;;  %v7037_v24 = vsel %vm6650_vm12, %v21141_v35, %v7036_v38  ;;  %14949 = vmatmul.mubr.msk.bf16.gmra.mrb[68].mxu1 %vm4053_vm8, %v7096_v30  ;;  %v25624_v42 = vrot.slane %v25623_v12, 1  ;;  %v25625_v38 = vld [vmem:[#allocation44_spill] sm:$0xff]  ;;  %v5901_v8 = vmax.f32 %v5899_v28, %v5900_v58 }
 0x67e   :  { %v5953_v29 = vmax.f32 %v25620_v57, %v25621_v63  ;;  %v7038_v48 = vsel %vm6652_vm13, %v21150_v2, %v7037_v24  ;;  %v25626_v35 = vrot.slane %v25625_v38, 4  ;;  %v25627_v57 = vld [vmem:[#allocation83_spill] sm:$0xff]  ;;  %v6372_v2 = vpack.c.bf16 %v5950_v15, %v5950_v15 }
 0x67f   :  { %v21170_v47 = vunpack.c.l.b16 %v6364_v10  ;;  %v6006_v50 = vmax.f32 %v25623_v12, %v25624_v42  ;;  %v7039_v23 = vsel %vm6654_vm14, %v21157_v32, %v7038_v48  ;;  %v6371_v30 = vpack.c.bf16 %v25627_v57, %v25627_v57  ;;  %v25633_v57 = vld [vmem:[#allocation16_spill] sm:$0xff] }
 0x680   :  { %v6009_v44 = vmax.f32 %v25625_v38, %v25626_v35  ;;  %v5954_v63 = vrot.slane %v5953_v29, 2  ;;  %v6379_v42 = vpack.c.bf16 %v25628_v55, %v25628_v55  ;;  %v6365_v12 = vpack.c.bf16 %v5901_v8, %v5901_v8  ;;  %v25632_v38 = vld [vmem:[#allocation50_spill] sm:$0xff]  ;;  %v25637_v8 = vld [vmem:[#allocation15_spill] sm:$0xff] }
 0x681   :  { %25622 = vst [vmem:[#allocation82_spill] sm:$0xff] %v21170_v47  ;;  %v7040_v10 = vsel %vm6656_vm15, %v21170_v47, %v7039_v23  ;;  %v6380_v22 = vpack.c.bf16 %v6006_v50, %v6006_v50  ;;  %v21188_v35 = vunpack.c.l.b16 %v6371_v30  ;;  %v21190_v58 = vunpack.c.l.b16 %v6372_v2  ;;  %v25636_v55 = vld [vmem:[#allocation18_spill] sm:$0xff]  ;;  %v25638_v2 = vld [vmem:[#allocation84_spill] sm:$0xff] }
 0x682   :  { %v6010_v24 = vrot.slane %v6009_v44, 2  ;;  %v5955_v26 = vmax.f32 %v5953_v29, %v5954_v63  ;;  %v21192_v48 = vunpack.c.l.b16 %v6379_v42  ;;  %v7042_v32 = vsel %vm6830_vm10, %v25633_v57, %v25632_v38  ;;  %v25639_v63 = vld [vmem:[#allocation86_spill] sm:$0xff]  ;;  %v25643_v38 = vld [vmem:[#allocation17_spill] sm:$0xff] }
 0x683   :  { %25629 = vst [vmem:[#allocation81_spill] sm:$0xff] %v21188_v35  ;;  %25630 = vst [vmem:[#allocation85_spill] sm:$0xff] %v21190_v58  ;;  %v21197_v23 = vunpack.c.l.b16 %v6365_v12  ;;  %v21199_v47 = vunpack.c.l.b16 %v6380_v22  ;;  %v7043_v29 = vsel %vm6648_vm11, %v25636_v55, %v7042_v32  ;;  %v7049_v30 = vsel %vm6830_vm10, %v25639_v63, %v25638_v2  ;;  %v25644_v55 = vld [vmem:[#allocation42_spill] sm:$0xff] }
 0x684   :  { %v6011_v28 = vmax.f32 %v6009_v44, %v6010_v24  ;;  %25631 = vst [vmem:[#allocation44_spill] sm:$0xff] %v21192_v48  ;;  %v5956_v15 = vrot.slane %v5955_v26, 1  ;;  %v7044_v44 = vsel %vm6650_vm12, %v25637_v8, %v7043_v29  ;;  %v25640_v24 = vld [vmem:[#allocation5_spill] sm:$0xff]  ;;  %v7050_v13 = vsel %vm6648_vm11, %v25644_v55, %v7049_v30  ;;  %v25645_v2 = vld [vmem:[#allocation46_spill] sm:$0xff] }
 0x685   :  { %25634 = vst [vmem:[#allocation83_spill] sm:$0xff] %v21197_v23  ;;  %25635 = vst [vmem:[#allocation88_spill] sm:$0xff] %v21199_v47  ;;  %v25641_v42 = vrot.slane %v25640_v24, 1  ;;  %v21213_v12 = vsel %vm6658_vm1, %v21197_v23, %v7040_v10  ;;  %v7045_v32 = vsel %vm6652_vm13, %v25643_v38, %v7044_v44  ;;  %v25646_v10 = vld [vmem:[#allocation87_spill] sm:$0xff]  ;;  %v25647_v44 = vld [vmem:[#allocation89_spill] sm:$0xff] }
 0x686   :  { %v6012_v50 = vrot.slane %v6011_v28, 1  ;;  %25642 = vst [vmem:[#allocation5_spill] sm:$0xff] %v21213_v12  ;;  %v5957_v22 = vmax.f32 %v5955_v26, %v5956_v15  ;;  %v7097_v29 = vpack.c.b16 %v21213_v12, %v20900_v37  ;;  %v7046_v63 = vsel %vm6654_vm14, %v21188_v35, %v7045_v32  ;;  %v25649_v32 = vld [vmem:[#allocation25_spill] sm:$0xff] }
 0x687   :  { %v6062_v57 = vmax.f32 %v25640_v24, %v25641_v42  ;;  %v7051_v24 = vsel %vm6650_vm12, %v25645_v2, %v7050_v13  ;;  %v7047_v26 = vsel %vm6656_vm15, %v21190_v58, %v7046_v63  ;;  %v25648_v23 = vrot.slane %v25647_v44, 4 }
 0x688   :  { %v6013_v8 = vmax.f32 %v6011_v28, %v6012_v50  ;;  %v6373_v42 = vpack.c.bf16 %v5957_v22, %v5957_v22  ;;  %v7052_v15 = vsel %vm6652_vm13, %v25646_v10, %v7051_v24  ;;  %14952 = vmatprep.mubr.msk.bf16.mxu1 %vm4053_vm8, %v7097_v29  ;;  %v25650_v37 = vrot.slane %v25649_v32, 1  ;;  %v25651_v22 = vld [vmem:[#allocation8_spill] sm:$0xff]  ;;  %v25656_v10 = vld [vmem:[#allocation97_spill] sm:$0xff] }
 0x689   :  { %v6065_v30 = vmax.f32 %v25647_v44, %v25648_v23  ;;  %v7053_v50 = vsel %vm6654_vm14, %v21192_v48, %v7052_v15  ;;  %v25652_v12 = vrot.slane %v25651_v22, 4  ;;  %v25654_v44 = vld [vmem:[#allocation92_spill] sm:$0xff]  ;;  %v6388_v48 = vpack.c.bf16 %v6062_v57, %v6062_v57 }
 0x68a   :  { %v6381_v28 = vpack.c.bf16 %v6013_v8, %v6013_v8  ;;  %v6118_v13 = vmax.f32 %v25649_v32, %v25650_v37  ;;  %v21241_v58 = vunpack.c.l.b16 %v6373_v42  ;;  %v7054_v24 = vsel %vm6656_vm15, %v21199_v47, %v7053_v50 }
 0x68b   :  { %v6121_v63 = vmax.f32 %v25651_v22, %v25652_v12  ;;  %v6066_v23 = vrot.slane %v6065_v30, 2  ;;  %v6387_v8 = vpack.c.bf16 %v25654_v44, %v25654_v44  ;;  %v6395_v37 = vpack.c.bf16 %v25656_v10, %v25656_v10 }
 0x68c   :  { %25653 = vst [vmem:[#allocation89_spill] sm:$0xff] %v21241_v58  ;;  %v21247_v29 = vunpack.c.l.b16 %v6381_v28  ;;  %v21253_v32 = vsel %vm6658_vm1, %v21241_v58, %v7047_v26  ;;  %v6396_v42 = vpack.c.bf16 %v6118_v13, %v6118_v13  ;;  %v21261_v28 = vunpack.c.l.b16 %v6388_v48  ;;  %v25667_v58 = vld [vmem:[#allocation118_spill] sm:$0xff] }
 0x68d   :  { %v6122_v15 = vrot.slane %v6121_v63, 2  ;;  %25657 = vst [vmem:[#allocation8_spill] sm:$0xff] %v21253_v32  ;;  %v6067_v12 = vmax.f32 %v6065_v30, %v6066_v23  ;;  %v21255_v22 = vunpack.c.l.b16 %v6387_v8  ;;  %v21263_v47 = vunpack.c.l.b16 %v6395_v37 }
 0x68e   :  { %25655 = vst [vmem:[#allocation25_spill] sm:$0xff] %v21247_v29  ;;  %v21259_v50 = vsel %vm6658_vm1, %v21247_v29, %v7054_v24  ;;  %25660 = vst [vmem:[#allocation132_spill] sm:$0xff] %v21261_v28  ;;  %v21267_v2 = vunpack.c.l.b16 %v6396_v42  ;;  %v7056_v26 = vsel %vm6830_vm10, %v20783_v51, %v20778_v31  ;;  %v7063_v48 = vsel %vm6830_vm10, %v20808_v0, %v20803_v34  ;;  %v25665_v42 = vld [vmem:[#allocation96_spill] sm:$0xff] }
 0x68f   :  { %25658 = vst [vmem:[#allocation92_spill] sm:$0xff] %v21255_v22  ;;  %25659 = vst [vmem:[#allocation97_spill] sm:$0xff] %v21259_v50  ;;  %v6123_v44 = vmax.f32 %v6121_v63, %v6122_v15  ;;  %v7098_v57 = vpack.c.b16 %v21259_v50, %v21253_v32  ;;  %v6068_v10 = vrot.slane %v6067_v12, 1  ;;  %v7057_v13 = vsel %vm6648_vm11, %v20788_v9, %v7056_v26  ;;  %v25663_v63 = vld [vmem:[#allocation20_spill] sm:$0xff] }
 0x690   :  { %25661 = vst [vmem:[#allocation133_spill] sm:$0xff] %v21263_v47  ;;  %25662 = vst [vmem:[#allocation134_spill] sm:$0xff] %v21267_v2  ;;  %v25664_v24 = vrot.slane %v25663_v63, 1  ;;  %v7058_v15 = vsel %vm6650_vm12, %v20793_v27, %v7057_v13  ;;  %v7064_v37 = vsel %vm6648_vm11, %v20813_v18, %v7063_v48  ;;  %v25666_v50 = vrot.slane %v25665_v42, 4  ;;  %v25670_v48 = vld [vmem:[#allocation119_spill] sm:$0xff] }
 0x691   :  { %v6124_v30 = vrot.slane %v6123_v44, 1  ;;  %14953 = vmatmul.mubr.msk.bf16.gmra.mrb[72].mxu1 %vm4053_vm8, %v7098_v57  ;;  %v6069_v8 = vmax.f32 %v6067_v12, %v6068_v10  ;;  %v7059_v29 = vsel %vm6652_vm13, %v20798_v59, %v7058_v15  ;;  %v25671_v15 = vld [vmem:[#allocation9_spill] sm:$0xff] }
 0x692   :  { %v6174_v23 = vmax.f32 %v25663_v63, %v25664_v24  ;;  %v6177_v26 = vmax.f32 %v25665_v42, %v25666_v50  ;;  %v7065_v63 = vsel %vm6650_vm12, %v25667_v58, %v7064_v37  ;;  %v25668_v24 = vld [vmem:[#allocation98_spill] sm:$0xff]  ;;  %v7060_v13 = vsel %vm6654_vm14, %v21255_v22, %v7059_v29 }
 0x693   :  { %v6125_v32 = vmax.f32 %v6123_v44, %v6124_v30  ;;  %v25669_v57 = vrot.slane %v25668_v24, 1  ;;  %v6389_v10 = vpack.c.bf16 %v6069_v8, %v6069_v8  ;;  %v7066_v18 = vsel %vm6652_vm13, %v25670_v48, %v7065_v63 }
 0x694   :  { %v6178_v27 = vrot.slane %v6177_v26, 2  ;;  %v7061_v44 = vsel %vm6656_vm15, %v21261_v28, %v7060_v13  ;;  %v7067_v30 = vsel %vm6654_vm14, %v21263_v47, %v7066_v18  ;;  %v25672_v37 = vrot.slane %v25671_v15, 4  ;;  %v25676_v28 = vld [vmem:[#allocation101_spill] sm:$0xff] }
 0x695   :  { %v6230_v12 = vmax.f32 %v25668_v24, %v25669_v57  ;;  %v6397_v50 = vpack.c.bf16 %v6125_v32, %v6125_v32  ;;  %v21306_v24 = vunpack.c.l.b16 %v6389_v10  ;;  %v7068_v29 = vsel %vm6656_vm15, %v21267_v2, %v7067_v30  ;;  %v25674_v57 = vld [vmem:[#allocation99_spill] sm:$0xff]  ;;  %v25685_v2 = vld [vmem:[#allocation122_spill] sm:$0xff] }
 0x696   :  { %v6233_v42 = vmax.f32 %v25671_v15, %v25672_v37  ;;  %v6179_v8 = vmax.f32 %v6177_v26, %v6178_v27  ;;  %v6403_v63 = vpack.c.bf16 %v25674_v57, %v25674_v57  ;;  %v6404_v13 = vpack.c.bf16 %v6174_v23, %v6174_v23 }
 0x697   :  { %25673 = vst [vmem:[#allocation20_spill] sm:$0xff] %v21306_v24  ;;  %v21312_v32 = vunpack.c.l.b16 %v6397_v50  ;;  %v6411_v18 = vpack.c.bf16 %v25676_v28, %v25676_v28  ;;  %v21318_v47 = vsel %vm6658_vm1, %v21306_v24, %v7061_v44  ;;  %v6412_v15 = vpack.c.bf16 %v6230_v12, %v6230_v12  ;;  %v25683_v44 = vld [vmem:[#allocation120_spill] sm:$0xff]  ;;  %v25684_v24 = vld [vmem:[#allocation121_spill] sm:$0xff] }
 0x698   :  { %v6234_v48 = vrot.slane %v6233_v42, 2  ;;  %25677 = vst [vmem:[#allocation98_spill] sm:$0xff] %v21318_v47  ;;  %v6180_v10 = vrot.slane %v6179_v8, 1  ;;  %v21320_v37 = vunpack.c.l.b16 %v6403_v63  ;;  %v21326_v50 = vunpack.c.l.b16 %v6404_v13  ;;  %v25688_v13 = vld [vmem:[#allocation41_spill] sm:$0xff] }
 0x699   :  { %25675 = vst [vmem:[#allocation96_spill] sm:$0xff] %v21312_v32  ;;  %v21324_v27 = vsel %vm6658_vm1, %v21312_v32, %v7068_v29  ;;  %v21328_v30 = vunpack.c.l.b16 %v6411_v18  ;;  %v21332_v57 = vunpack.c.l.b16 %v6412_v15  ;;  %v7070_v12 = vsel %vm6830_vm10, %v25684_v24, %v25683_v44  ;;  %v25686_v32 = vld [vmem:[#allocation125_spill] sm:$0xff]  ;;  %v25689_v18 = vld [vmem:[#allocation52_spill] sm:$0xff] }
 0x69a   :  { %25678 = vst [vmem:[#allocation9_spill] sm:$0xff] %v21320_v37  ;;  %25679 = vst [vmem:[#allocation99_spill] sm:$0xff] %v21324_v27  ;;  %v6235_v26 = vmax.f32 %v6233_v42, %v6234_v48  ;;  %v7099_v28 = vpack.c.b16 %v21324_v27, %v21318_v47  ;;  %v6181_v23 = vmax.f32 %v6179_v8, %v6180_v10  ;;  %v25687_v48 = vld [vmem:[#allocation126_spill] sm:$0xff]  ;;  %v25690_v10 = vld [vmem:[#allocation123_spill] sm:$0xff] }
 0x69b   :  { %25680 = vst [vmem:[#allocation101_spill] sm:$0xff] %v21326_v50  ;;  %25681 = vst [vmem:[#allocation135_spill] sm:$0xff] %v21328_v30  ;;  %v7071_v29 = vsel %vm6648_vm11, %v25685_v2, %v7070_v12  ;;  %v7077_v42 = vsel %vm6830_vm10, %v25687_v48, %v25686_v32  ;;  %v6649_v58 = vsel %vm6648_vm11, %v25689_v18, %v25688_v13  ;;  %v25691_v27 = vld [vmem:[#allocation100_spill] sm:$0xff]  ;;  %v25693_v32 = vld [vmem:[#allocation127_spill] sm:$0xff] }
 0x69c   :  { %25682 = vst [vmem:[#allocation136_spill] sm:$0xff] %v21332_v57  ;;  %v6236_v63 = vrot.slane %v6235_v26, 1  ;;  %14956 = vmatprep.mubr.msk.bf16.mxu1 %vm4053_vm8, %v7099_v28  ;;  %v6405_v8 = vpack.c.bf16 %v6181_v23, %v6181_v23  ;;  %v7072_v15 = vsel %vm6650_vm12, %v25690_v10, %v7071_v29  ;;  %v7078_v47 = vsel %vm6648_vm11, %v25691_v27, %v7077_v42  ;;  %v25692_v24 = vld [vmem:[#allocation124_spill] sm:$0xff] }
 0x69d   :  { %v6651_v12 = vsel %vm6650_vm12, %v20528_v20, %v6649_v58  ;;  %v7073_v48 = vsel %vm6652_vm13, %v25692_v24, %v7072_v15  ;;  %v7079_v44 = vsel %vm6650_vm12, %v25693_v32, %v7078_v47  ;;  %v25695_v13 = vld [vmem:[#allocation128_spill] sm:$0xff] }
 0x69e   :  { %v6237_v2 = vmax.f32 %v6235_v26, %v6236_v63  ;;  %v6653_v28 = vsel %vm6652_vm13, %v20914_v11, %v6651_v12  ;;  %v21358_v23 = vunpack.c.l.b16 %v6405_v8  ;;  %v7074_v29 = vsel %vm6654_vm14, %v21320_v37, %v7073_v48 }
 0x69f   :  { %v7080_v42 = vsel %vm6652_vm13, %v25695_v13, %v7079_v44  ;;  %v6655_v58 = vsel %vm6654_vm14, %v20911_v5, %v6653_v28  ;;  %v7075_v63 = vsel %vm6656_vm15, %v21326_v50, %v7074_v29 }
 0x6a0   :  { %25694 = vst [vmem:[#allocation41_spill] sm:$0xff] %v21358_v23  ;;  %v6413_v26 = vpack.c.bf16 %v6237_v2, %v6237_v2  ;;  %v7081_v47 = vsel %vm6654_vm14, %v21328_v30, %v7080_v42  ;;  %v6657_v8 = vsel %vm6656_vm15, %v20925_v3, %v6655_v58  ;;  %v21374_v15 = vsel %vm6658_vm1, %v21358_v23, %v7075_v63  ;;  %v25698_v42 = vld [vmem:[#allocation73_spill] sm:$0xff] }
 0x6a1   :  { %25696 = vst [vmem:[#allocation52_spill] sm:$0xff] %v21374_v15  ;;  %v7082_v44 = vsel %vm6656_vm15, %v21332_v57, %v7081_v47  ;;  %v6659_v48 = vsel %vm6658_vm1, %v20946_v60, %v6657_v8  ;;  %v6662_v2 = vsel %vm6652_vm13, %v20548_v1, %v21057_v36  ;;  %v6668_v58 = vsel %vm6652_vm13, %v25698_v42, %v21068_v39 }
 0x6a2   :  { %v21383_v12 = vunpack.c.l.b16 %v6413_v26  ;;  %v6750_v28 = vpack.c.b16 %v6659_v48, %v6659_v48  ;;  %v6663_v29 = vsel %vm6654_vm14, %v20553_v17, %v6662_v2  ;;  %v6669_v47 = vsel %vm6654_vm14, %v20588_v53, %v6668_v58  ;;  %v25699_v26 = vld [vmem:[#allocation102_spill] sm:$0xff]  ;;  %v25704_v58 = vld [vmem:[#allocation93_spill] sm:$0xff] }
 0x6a3   :  { %v6664_v63 = vsel %vm6656_vm15, %v20558_v41, %v6663_v29  ;;  %v6672_v36 = vsel %vm6648_vm11, %v20608_v14, %v20603_v19  ;;  %v6678_v8 = vsel %vm6648_vm11, %v25699_v26, %v20628_v21  ;;  %v25703_v29 = vld [vmem:[#allocation67_spill] sm:$0xff]  ;;  %v6670_v53 = vsel %vm6656_vm15, %v25704_v58, %v6669_v47  ;;  %v25706_v26 = vld [vmem:[#allocation94_spill] sm:$0xff]  ;;  %v16218_v2 = vld [vmem:[%s24218_s10 + $0x10] ss:$8 sps:$4 sm:$0xff]  }
 0x6a4   :  { %25697 = vst [vmem:[#allocation137_spill] sm:$0xff] %v21383_v12  ;;  %v21402_v48 = vsel %vm6658_vm1, %v21383_v12, %v7082_v44  ;;  %v21406_v39 = vsel %vm16543_vm4, 0, %v6750_v28  ;;  %v6665_v23 = vsel %vm6658_vm1, %v25703_v29, %v6664_v63  ;;  %v25705_v14 = vmov 0   ;;  %v25707_v41 = vld [vmem:[#allocation43_spill] sm:$0xff] }
 0x6a5   :  { %25700 = vst [vmem:[#allocation138_spill] sm:$0xff] %v21402_v48  ;;  %25702 = vst [vmem:[#allocation7_spill] sm:$0xff] %v21406_v39  ;;  %v7100_v19 = vpack.c.b16 %v21402_v48, %v21374_v15  ;;  %v13183_v21 = vcombine.low %v25705_v14, %v21406_v39  ;;  %v6671_v44 = vsel %vm6658_vm1, %v25706_v26, %v6670_v53 }
 0x6a6   :  { %v6751_v12 = vpack.c.b16 %v6665_v23, %v6665_v23  ;;  %v6752_v42 = vpack.c.b16 %v6671_v44, %v6671_v44  ;;  %v6673_v28 = vsel %vm6650_vm12, %v25707_v41, %v6672_v36  ;;  %v6679_v63 = vsel %vm6650_vm12, %v20638_v46, %v6678_v8 }
 0x6a7   :  { %v6684_v47 = vsel %vm6648_vm11, %v20658_v43, %v20653_v61  ;;  %14957 = vmatmul.mubr.msk.bf16.gmra.mrb[76].mxu1 %vm4053_vm8, %v7100_v19  ;;  %v6674_v53 = vsel %vm6652_vm13, %v20618_v52, %v6673_v28  ;;  %v6680_v23 = vsel %vm6652_vm13, %v20643_v7, %v6679_v63  ;;  %v25710_v19 = vld [vmem:[#allocation29_spill] sm:$0xff] }
 0x6a8   :  { %v21428_v48 = vsel %vm16543_vm4, 0, %v6751_v12  ;;  %v6685_v36 = vsel %vm6650_vm12, %v20663_v16, %v6684_v47  ;;  %14968 = vmatprep.mubr.msk.bf16.mxu1 %vm4053_vm8, %v13183_v21  ;;  %v21439_v8 = vsel %vm16543_vm4, 0, %v6752_v42  ;;  %v6675_v44 = vsel %vm6654_vm14, %v25710_v19, %v6674_v53  ;;  %v25712_v47 = vld [vmem:[#allocation57_spill] sm:$0xff] }
 0x6a9   :  { %25708 = vst [vmem:[#allocation43_spill] sm:$0xff] %v21428_v48  ;;  %25709 = vst [vmem:[#allocation139_spill] sm:$0xff] %v21439_v8  ;;  %v6681_v12 = vsel %vm6654_vm14, %v20648_v4, %v6680_v23  ;;  %v6686_v28 = vsel %vm6652_vm13, %v20668_v33, %v6685_v36  ;;  %v21449_v63 = vcombine.low %v21428_v48, %v21439_v8  ;;  %v25713_v53 = vld [vmem:[#allocation45_spill] sm:$0xff]  ;;  %v25714_v48 = vld [vmem:[#allocation112_spill] sm:$0xff] }
 0x6aa   :  { %v6676_v21 = vsel %vm6656_vm15, %v20985_v6, %v6675_v44  ;;  %v6682_v42 = vsel %vm6656_vm15, %v25712_v47, %v6681_v12  ;;  %v6687_v61 = vsel %vm6654_vm14, %v20673_v40, %v6686_v28  ;;  %v6690_v8 = vsel %vm6648_vm11, %v20683_v56, %v20678_v54  ;;  %v25718_v33 = vld [vmem:[#allocation16_spill] sm:$0xff] }
 0x6ab   :  { %25711 = vst [vmem:[#allocation29_spill] sm:$0xff] %v21449_v63  ;;  %v6677_v15 = vsel %vm6658_vm1, %v25713_v53, %v6676_v21  ;;  %v6683_v23 = vsel %vm6658_vm1, %v21000_v49, %v6682_v42  ;;  %v6688_v36 = vsel %vm6656_vm15, %v21079_v45, %v6687_v61  ;;  %v6691_v28 = vsel %vm6650_vm12, %v20688_v62, %v6690_v8  ;;  %v25715_v42 = vld [vmem:[#allocation14_spill] sm:$0xff]  ;;  %v16092_v8 = vld [vmem:[%s24212_s4 + $0x48] sm:$0xff]   ;;  %v25728_v47 = vld [vmem:[#allocation64_spill] sm:$0xff] }
 0x6ac   :  { %v6753_v44 = vpack.c.b16 %v6677_v15, %v6677_v15  ;;  %v6754_v39 = vpack.c.b16 %v6683_v23, %v6683_v23  ;;  %v6689_v12 = vsel %vm6658_vm1, %v21081_v25, %v6688_v36  ;;  %v6692_v21 = vsel %vm6652_vm13, %v25714_v48, %v6691_v28  ;;  %v25716_v49 = vld [vmem:[#allocation78_spill] sm:$0xff]  ;;  %v25721_v36 = vld [vmem:[#allocation113_spill] sm:$0xff]  ;;  %v25722_v28 = vld [vmem:[#allocation31_spill] sm:$0xff] }
 0x6ad   :  { %v6755_v40 = vpack.c.b16 %v6689_v12, %v6689_v12  ;;  %v6702_v61 = vsel %vm6648_vm11, %v25716_v49, %v25715_v42  ;;  %v25717_v45 = vld [vmem:[#allocation50_spill] sm:$0xff]  ;;  %v6693_v12 = vsel %vm6654_vm14, %v25721_v36, %v6692_v21  ;;  %v25723_v49 = vld [vmem:[#allocation61_spill] sm:$0xff] }
 0x6ae   :  { %v6708_v54 = vsel %vm6648_vm11, %v25718_v33, %v25717_v45  ;;  %v21480_v15 = vsel %vm16543_vm4, 0, %v6753_v44  ;;  %v21484_v23 = vsel %vm16543_vm4, 0, %v6754_v39  ;;  %v6703_v42 = vsel %vm6650_vm12, %v25722_v28, %v6702_v61  ;;  %v25724_v45 = vld [vmem:[#allocation62_spill] sm:$0xff]  ;;  %v25725_v44 = vld [vmem:[#allocation35_spill] sm:$0xff]  ;;  %v25729_v61 = vld [vmem:[#allocation72_spill] sm:$0xff] }
 0x6af   :  { %25719 = vst [vmem:[#allocation14_spill] sm:$0xff] %v21480_v15  ;;  %25720 = vst [vmem:[#allocation140_spill] sm:$0xff] %v21484_v23  ;;  %v21496_v33 = vsel %vm6830_vm10, %v25724_v45, %v25723_v49  ;;  %v25726_v25 = vld [vmem:[#allocation70_spill] sm:$0xff]  ;;  %v21505_v48 = vcombine.low %v21480_v15, %v21484_v23  ;;  %v6694_v21 = vsel %vm6656_vm15, %v25728_v47, %v6693_v12  ;;  %14969 = vmatmul.mubr.msk.bf16.vlgmr.msra.gmra.mrb[64].mxu1 %vm4053_vm8, %v21449_v63  ;;  %v25730_v45 = vld [vmem:[#allocation129_spill] sm:$0xff] }
 0x6b0   :  { %v21501_v39 = vsel %vm6830_vm10, %v25726_v25, %v25725_v44  ;;  %v6695_v28 = vsel %vm6658_vm1, %v25729_v61, %v6694_v21  ;;  %v6704_v49 = vsel %vm6652_vm13, %v25730_v45, %v6703_v42  ;;  %v25731_v36 = vld [vmem:[#allocation18_spill] sm:$0xff]  ;;  %v25732_v44 = vld [vmem:[#allocation84_spill] sm:$0xff]  ;;  %v21525_v63 = vsel %vm16543_vm4, 0, %v6755_v40  ;;  %v25736_v21 = vld [vmem:[#allocation79_spill] sm:$0xff] }
 0x6b1   :  { %25727 = vst [vmem:[#allocation141_spill] sm:$0xff] %v21505_v48  ;;  %v6709_v25 = vsel %vm6650_vm12, %v25731_v36, %v6708_v54  ;;  %v25733_v62 = vld [vmem:[#allocation86_spill] sm:$0xff]  ;;  %v25734_v15 = vld [vmem:[#allocation80_spill] sm:$0xff]  ;;  %14972 = vmatprep.mubr.msk.bf16.mxu1 %vm4053_vm8, %v21505_v48  ;;  %v6756_v12 = vpack.c.b16 %v6695_v28, %v6695_v28  ;;  %v6705_v42 = vsel %vm6654_vm14, %v25736_v21, %v6704_v49  ;;  %v25737_v45 = vld [vmem:[#allocation15_spill] sm:$0xff] }
 0x6b2   :  { %v6714_v23 = vsel %vm6648_vm11, %v25733_v62, %v25732_v44  ;;  %14985 = vmatpush3.bf16.msra.mxu1 %v25734_v15  ;;  %25735 = vst [vmem:[#allocation80_spill] sm:$0xff] %v21525_v63  ;;  %v6710_v54 = vsel %vm6652_vm13, %v25737_v45, %v6709_v25  ;;  %v25738_v36 = vld [vmem:[#allocation131_spill] sm:$0xff]  ;;  %v16093_v15 = vld [vmem:[%s24212_s4 + $0x50] sm:$0xff]   ;;  %v6720_v49 = vsel %vm6648_vm11, %v20783_v51, %v20778_v31  ;;  %v25740_v48 = vld [vmem:[#allocation82_spill] sm:$0xff] }
 0x6b3   :  { %14986 = vmatprep.subr.bf16.mxu1 %v16092_v8  ;;  %v6706_v44 = vsel %vm6656_vm15, %v25738_v36, %v6705_v42  ;;  %v6711_v28 = vsel %vm6654_vm14, %v25643_v38, %v6710_v54  ;;  %v6715_v40 = vsel %vm6650_vm12, %v25644_v55, %v6714_v23  ;;  %v21545_v25 = vsel %vm16543_vm4, 0, %v6756_v12  ;;  %v25741_v36 = vld [vmem:[#allocation46_spill] sm:$0xff]  ;;  %v25743_v38 = vld [vmem:[#allocation85_spill] sm:$0xff]  ;;  %v25744_v51 = vld [vmem:[#allocation87_spill] sm:$0xff] }
 0x6b4   :  { %25739 = vst [vmem:[#allocation79_spill] sm:$0xff] %v21545_v25  ;;  %v6707_v42 = vsel %vm6658_vm1, %v25740_v48, %v6706_v44  ;;  %v6712_v62 = vsel %vm6656_vm15, %v21188_v35, %v6711_v28  ;;  %v6716_v54 = vsel %vm6652_vm13, %v25741_v36, %v6715_v40  ;;  %v21555_v23 = vcombine.low %v21525_v63, %v21545_v25  ;;  %v25745_v45 = vld [vmem:[#allocation44_spill] sm:$0xff] }
 0x6b5   :  { %v6758_v55 = vpack.c.b16 %v6707_v42, %v6707_v42  ;;  %v6713_v31 = vsel %vm6658_vm1, %v25743_v38, %v6712_v62  ;;  %v6717_v12 = vsel %vm6654_vm14, %v25744_v51, %v6716_v54  ;;  %v6721_v28 = vsel %vm6650_vm12, %v20788_v9, %v6720_v49  ;;  %v25747_v62 = vld [vmem:[#allocation88_spill] sm:$0xff]  ;;  %v16094_v49 = vld [vmem:[%s24212_s4 + $0x58] sm:$0xff]  }
 0x6b6   :  { %25742 = vst [vmem:[#allocation142_spill] sm:$0xff] %v21555_v23  ;;  %14987 = vmatpush3.bf16.msra.mxu1 %v16092_v8  ;;  %v6718_v44 = vsel %vm6656_vm15, %v25745_v45, %v6717_v12  ;;  %v6759_v48 = vpack.c.b16 %v6713_v31, %v6713_v31  ;;  %v6726_v40 = vsel %vm6648_vm11, %v20808_v0, %v20803_v34  ;;  %v25748_v8 = vld [vmem:[#allocation90_spill] sm:$0xff]  ;;  %v25749_v12 = vld [vmem:[#allocation117_spill] sm:$0xff] }
 0x6b7   :  { %v21570_v42 = vsel %vm16543_vm4, 0, %v6758_v55  ;;  %14988 = vmatprep.subr.bf16.mxu1 %v16093_v15  ;;  %v6719_v54 = vsel %vm6658_vm1, %v25747_v62, %v6718_v44  ;;  %v6722_v63 = vsel %vm6652_vm13, %v25748_v8, %v6721_v28  ;;  %v6727_v31 = vsel %vm6650_vm12, %v25749_v12, %v6726_v40  ;;  %14973 = vmatmul.mubr.msk.bf16.gmra.mrb[68].mxu1 %vm4053_vm8, %v21555_v23  ;;  %v25751_v40 = vld [vmem:[#allocation118_spill] sm:$0xff]  ;;  %v25752_v12 = vld [vmem:[#allocation120_spill] sm:$0xff]  ;;  %v25753_v0 = vld [vmem:[#allocation121_spill] sm:$0xff] }
 0x6b8   :  { %25746 = vst [vmem:[#allocation143_spill] sm:$0xff] %v21570_v42  ;;  %v13187_v34 = vcombine.low %v25705_v14, %v21570_v42  ;;  %v6760_v55 = vpack.c.b16 %v6719_v54, %v6719_v54  ;;  %v21585_v25 = vsel %vm16543_vm4, 0, %v6759_v48  ;;  %v6723_v44 = vsel %vm6654_vm14, %v20798_v59, %v6722_v63  ;;  %v25754_v42 = vld [vmem:[#allocation125_spill] sm:$0xff]  ;;  %v25755_v8 = vld [vmem:[#allocation126_spill] sm:$0xff]  ;;  %v25757_v23 = vld [vmem:[#allocation132_spill] sm:$0xff] }
 0x6b9   :  { %25750 = vst [vmem:[#allocation144_spill] sm:$0xff] %v21585_v25  ;;  %v6724_v28 = vsel %vm6656_vm15, %v21255_v22, %v6723_v44  ;;  %v6728_v62 = vsel %vm6652_vm13, %v25751_v40, %v6727_v31  ;;  %v6732_v54 = vsel %vm6648_vm11, %v25753_v0, %v25752_v12  ;;  %v6738_v48 = vsel %vm6648_vm11, %v25755_v8, %v25754_v42  ;;  %v25758_v22 = vld [vmem:[#allocation119_spill] sm:$0xff]  ;;  %v25759_v40 = vld [vmem:[#allocation122_spill] sm:$0xff]  ;;  %v25761_v42 = vld [vmem:[#allocation133_spill] sm:$0xff] }
 0x6ba   :  { %14976 = vmatprep.mubr.msk.bf16.mxu1 %vm4053_vm8, %v13187_v34  ;;  %v21604_v63 = vsel %vm16543_vm4, 0, %v6760_v55  ;;  %14989 = vmatpush3.bf16.msra.mxu1 %v16093_v15  ;;  %v6725_v44 = vsel %vm6658_vm1, %v25757_v23, %v6724_v28  ;;  %v6729_v31 = vsel %vm6654_vm14, %v25758_v22, %v6728_v62  ;;  %v6733_v12 = vsel %vm6650_vm12, %v25759_v40, %v6732_v54  ;;  %v21623_v55 = vld [vmem:[%s24212_s4 + $0x60] sm:$0xff]  }
 0x6bb   :  { %25756 = vst [vmem:[#allocation145_spill] sm:$0xff] %v21604_v63  ;;  %v21614_v0 = vcombine.low %v21585_v25, %v21604_v63  ;;  %v6730_v34 = vsel %vm6656_vm15, %v25761_v42, %v6729_v31  ;;  %v6761_v8 = vpack.c.b16 %v6725_v44, %v6725_v44  ;;  %14990 = vmatprep.subr.bf16.mxu1 %v16094_v49  ;;  %v25762_v62 = vld [vmem:[#allocation134_spill] sm:$0xff] }
 0x6bc   :  { %v6734_v15 = vsel %vm6652_vm13, %v25690_v10, %v6733_v12  ;;  %v6731_v28 = vsel %vm6658_vm1, %v25762_v62, %v6730_v34  ;;  %v6739_v63 = vsel %vm6650_vm12, %v25691_v27, %v6738_v48  ;;  %v6831_v44 = vsel %vm6830_vm10, %v20528_v20, %v25689_v18 }
 0x6bd   :  { %25760 = vst [vmem:[#allocation146_spill] sm:$0xff] %v21614_v0  ;;  %v6735_v54 = vsel %vm6654_vm14, %v25692_v24, %v6734_v15  ;;  %v6762_v31 = vpack.c.b16 %v6731_v28, %v6731_v28  ;;  %v21636_v12 = vsel %vm16543_vm4, 0, %v6761_v8  ;;  %v6740_v34 = vsel %vm6652_vm13, %v25693_v32, %v6739_v63 }
 0x6be   :  { %v6736_v25 = vsel %vm6656_vm15, %v21320_v37, %v6735_v54  ;;  %v6741_v48 = vsel %vm6654_vm14, %v25695_v13, %v6740_v34  ;;  %14991 = vmatpush3.bf16.msra.mxu1 %v16094_v49  ;;  %v6832_v20 = vsel %vm6648_vm11, %v20914_v11, %v6831_v44  ;;  %v6838_v54 = vsel %vm6648_vm11, %v20548_v1, %v21496_v33 }
 0x6bf   :  { %v6737_v15 = vsel %vm6658_vm1, %v21326_v50, %v6736_v25  ;;  %v21650_v18 = vsel %vm16543_vm4, 0, %v6762_v31  ;;  %v6742_v8 = vsel %vm6656_vm15, %v21328_v30, %v6741_v48  ;;  %v6833_v63 = vsel %vm6650_vm12, %v20911_v5, %v6832_v20  ;;  %15008 = vmatprep.subr.bf16.mxu1 %v21623_v55  ;;  %14977 = vmatmul.mubr.msk.bf16.gmra.mrb[72].mxu1 %vm4053_vm8, %v21614_v0  ;;  %v25767_v48 = vld [vmem:[#allocation66_spill] sm:$0xff] }
 0x6c0   :  { %v6763_v28 = vpack.c.b16 %v6737_v15, %v6737_v15  ;;  %v21659_v25 = vcombine.low %v21636_v12, %v21650_v18  ;;  %v6743_v11 = vsel %vm6658_vm1, %v21332_v57, %v6742_v8  ;;  %v6834_v49 = vsel %vm6652_vm13, %v20925_v3, %v6833_v63  ;;  %v25764_v3 = vld [vmem:[#allocation6_spill] sm:$0xff] }
 0x6c1   :  { %v6764_v5 = vpack.c.b16 %v6743_v11, %v6743_v11  ;;  %v6835_v31 = vsel %vm6654_vm14, %v20946_v60, %v6834_v49  ;;  %v6839_v34 = vsel %vm6650_vm12, %v20553_v17, %v6838_v54  ;;  %v25768_v60 = vld [vmem:[#allocation73_spill] sm:$0xff]  ;;  %v25780_v17 = vld [vmem:[#allocation56_spill] sm:$0xff] }
 0x6c2   :  { %25763 = vst [vmem:[#allocation147_spill] sm:$0xff] %v21659_v25  ;;  %v21672_v44 = vsel %vm16543_vm4, 0, %v6763_v28  ;;  %14980 = vmatprep.mubr.msk.bf16.mxu1 %vm4053_vm8, %v21659_v25  ;;  %v6836_v33 = vsel %vm6656_vm15, %v25764_v3, %v6835_v31  ;;  %v6840_v20 = vsel %vm6652_vm13, %v25767_v48, %v6839_v34  ;;  %v6844_v8 = vsel %vm6648_vm11, %v25768_v60, %v21501_v39  ;;  %v25769_v28 = vld [vmem:[#allocation95_spill] sm:$0xff]  ;;  %v25770_v31 = vld [vmem:[#allocation12_spill] sm:$0xff] }
 0x6c3   :  { %v6849_v63 = vsel %vm6830_vm10, %v25707_v41, %v25769_v28  ;;  %v21698_v11 = vsel %vm16543_vm4, 0, %v6764_v5  ;;  %v6927_v49 = vpack.c.b16 %v6836_v33, %v6836_v33  ;;  %v6841_v54 = vsel %vm6654_vm14, %v25703_v29, %v6840_v20  ;;  %v25772_v39 = vld [vmem:[#allocation19_spill] sm:$0xff] }
 0x6c4   :  { %v6845_v3 = vsel %vm6650_vm12, %v25770_v31, %v6844_v8  ;;  %v21706_v34 = vcombine.low %v21672_v44, %v21698_v11  ;;  %v6842_v25 = vsel %vm6656_vm15, %v25772_v39, %v6841_v54  ;;  %v6850_v5 = vsel %vm6648_vm11, %v20618_v52, %v6849_v63  ;;  %v25773_v39 = vld [vmem:[#allocation10_spill] sm:$0xff] }
 0x6c5   :  { %v6846_v0 = vsel %vm6652_vm13, %v25704_v58, %v6845_v3  ;;  %v21716_v33 = vsel %vm21684_vm5, %v6927_v49, 0  ;;  %v6928_v8 = vpack.c.b16 %v6842_v25, %v6842_v25  ;;  %v6851_v29 = vsel %vm6650_vm12, %v25710_v19, %v6850_v5  ;;  %v25774_v58 = vld [vmem:[#allocation102_spill] sm:$0xff] }
 0x6c6   :  { %25771 = vst [vmem:[#allocation6_spill] sm:$0xff] %v21706_v34  ;;  %v6847_v20 = vsel %vm6654_vm14, %v25706_v26, %v6846_v0  ;;  %v13211_v54 = vcombine.low %v25705_v14, %v21716_v33  ;;  %v6852_v63 = vsel %vm6652_vm13, %v20985_v6, %v6851_v29  ;;  %v6855_v49 = vsel %vm6830_vm10, %v20638_v46, %v25774_v58  ;;  %v25775_v26 = vld [vmem:[#allocation55_spill] sm:$0xff] }
 0x6c7   :  { %v6848_v3 = vsel %vm6656_vm15, %v25773_v39, %v6847_v20  ;;  %v21733_v0 = vsel %vm21684_vm5, %v6928_v8, 0  ;;  %v6853_v25 = vsel %vm6654_vm14, %v25713_v53, %v6852_v63  ;;  %v6856_v5 = vsel %vm6648_vm11, %v20643_v7, %v6855_v49  ;;  %v25776_v39 = vld [vmem:[#allocation111_spill] sm:$0xff]  ;;  %14981 = vmatmul.mubr.msk.bf16.gmra.mrb[76].mxu1 %vm4053_vm8, %v21706_v34  ;;  %v25777_v49 = vld [vmem:[#allocation57_spill] sm:$0xff] }
 0x6c8   :  { %v6929_v48 = vpack.c.b16 %v6848_v3, %v6848_v3  ;;  %v6854_v20 = vsel %vm6656_vm15, %v25775_v26, %v6853_v25  ;;  %v6857_v29 = vsel %vm6650_vm12, %v20648_v4, %v6856_v5  ;;  %v6861_v3 = vsel %vm6830_vm10, %v20663_v16, %v20658_v43  ;;  %v25778_v5 = vld [vmem:[#allocation107_spill] sm:$0xff]  ;;  %14992 = vmatprep.mubr.msk.bf16.mxu1 %vm4053_vm8, %v13211_v54  ;;  %v25782_v16 = vld [vmem:[#allocation112_spill] sm:$0xff]  ;;  %v25784_v54 = vld [vmem:[#allocation69_spill] sm:$0xff] }
 0x6c9   :  { %v6867_v8 = vsel %vm6830_vm10, %v25776_v39, %v20683_v56  ;;  %v6858_v25 = vsel %vm6652_vm13, %v25777_v49, %v6857_v29  ;;  %v6930_v53 = vpack.c.b16 %v6854_v20, %v6854_v20  ;;  %v6862_v6 = vsel %vm6648_vm11, %v25778_v5, %v6861_v3  ;;  %v25781_v39 = vld [vmem:[#allocation108_spill] sm:$0xff]  ;;  %v25783_v29 = vld [vmem:[#allocation59_spill] sm:$0xff]  ;;  %v25785_v5 = vld [vmem:[#allocation113_spill] sm:$0xff] }
 0x6ca   :  { %v21753_v63 = vsel %vm21684_vm5, %v6929_v48, 0  ;;  %v6859_v34 = vsel %vm6654_vm14, %v25780_v17, %v6858_v25  ;;  %v6863_v48 = vsel %vm6650_vm12, %v25781_v39, %v6862_v6  ;;  %v6868_v26 = vsel %vm6648_vm11, %v25782_v16, %v6867_v8  ;;  %v25786_v17 = vld [vmem:[#allocation65_spill] sm:$0xff]  ;;  %v25851_v4 = vld [vmem:[#allocation139_spill] sm:$0xff] }
 0x6cb   :  { %v21762_v31 = vcombine.low %v21733_v0, %v21753_v63  ;;  %v6860_v20 = vsel %vm6656_vm15, %v25783_v29, %v6859_v34  ;;  %v21774_v3 = vsel %vm21684_vm5, %v6930_v53, 0  ;;  %v6864_v49 = vsel %vm6652_vm13, %v25784_v54, %v6863_v48  ;;  %v25787_v39 = vld [vmem:[#allocation49_spill] sm:$0xff]  ;;  %v25788_v48 = vld [vmem:[#allocation78_spill] sm:$0xff]  ;;  %v25789_v54 = vld [vmem:[#allocation31_spill] sm:$0xff] }
 0x6cc   :  { %v6869_v7 = vsel %vm6650_vm12, %v25785_v5, %v6868_v26  ;;  %v6931_v25 = vpack.c.b16 %v6860_v20, %v6860_v20  ;;  %v6865_v8 = vsel %vm6654_vm14, %v25786_v17, %v6864_v49  ;;  %v6879_v26 = vsel %vm6830_vm10, %v25789_v54, %v25788_v48  ;;  %v25790_v20 = vld [vmem:[#allocation16_spill] sm:$0xff]  ;;  %v25791_v5 = vld [vmem:[#allocation18_spill] sm:$0xff]  ;;  %v25792_v17 = vld [vmem:[#allocation77_spill] sm:$0xff] }
 0x6cd   :  { %25779 = vst [vmem:[#allocation73_spill] sm:$0xff] %v21762_v31  ;;  %v6870_v34 = vsel %vm6652_vm13, %v25728_v47, %v6869_v7  ;;  %v6866_v53 = vsel %vm6656_vm15, %v25787_v39, %v6865_v8  ;;  %v6885_v6 = vsel %vm6830_vm10, %v25791_v5, %v25790_v20  ;;  %v25793_v8 = vld [vmem:[#allocation129_spill] sm:$0xff]  ;;  %v16096_v54 = vld [vmem:[%s24212_s4 + $0x68] sm:$0xff]   ;;  %v25798_v20 = vld [vmem:[#allocation86_spill] sm:$0xff] }
 0x6ce   :  { %v6871_v16 = vsel %vm6654_vm14, %v25729_v61, %v6870_v34  ;;  %v21798_v49 = vsel %vm21684_vm5, %v6931_v25, 0  ;;  %v6932_v47 = vpack.c.b16 %v6866_v53, %v6866_v53  ;;  %v6880_v39 = vsel %vm6648_vm11, %v25793_v8, %v6879_v26  ;;  %v25795_v5 = vld [vmem:[#allocation15_spill] sm:$0xff]  ;;  %v25797_v8 = vld [vmem:[#allocation17_spill] sm:$0xff]  ;;  %v25799_v29 = vld [vmem:[#allocation42_spill] sm:$0xff] }
 0x6cf   :  { %v6872_v7 = vsel %vm6656_vm15, %v25792_v17, %v6871_v16  ;;  %v21806_v34 = vcombine.low %v21774_v3, %v21798_v49  ;;  %v6881_v25 = vsel %vm6650_vm12, %v25736_v21, %v6880_v39  ;;  %v6886_v61 = vsel %vm6648_vm11, %v25795_v5, %v6885_v6  ;;  %v25796_v53 = vld [vmem:[#allocation131_spill] sm:$0xff]  ;;  %14993 = vmatmul.mubr.msk.bf16.vlgmr.msra.gmra.mrb[64].mxu1 %vm4053_vm8, %v21762_v31  ;;  %v25800_v39 = vld [vmem:[#allocation82_spill] sm:$0xff]  ;;  %v25803_v5 = vld [vmem:[#allocation76_spill] sm:$0xff] }
 0x6d0   :  { %v6933_v48 = vpack.c.b16 %v6872_v7, %v6872_v7  ;;  %v21817_v16 = vsel %vm21684_vm5, %v6932_v47, 0  ;;  %v6882_v26 = vsel %vm6652_vm13, %v25796_v53, %v6881_v25  ;;  %v6887_v17 = vsel %vm6650_vm12, %v25797_v8, %v6886_v61  ;;  %v25801_v25 = vld [vmem:[#allocation75_spill] sm:$0xff]  ;;  %15009 = vmatpush3.bf16.msra.mxu1 %v21623_v55 }
 0x6d1   :  { %25794 = vst [vmem:[#allocation95_spill] sm:$0xff] %v21806_v34  ;;  %v6891_v7 = vsel %vm6830_vm10, %v25799_v29, %v25798_v20  ;;  %v6883_v47 = vsel %vm6654_vm14, %v25800_v39, %v6882_v26  ;;  %v6888_v6 = vsel %vm6652_vm13, %v21188_v35, %v6887_v17  ;;  %v25802_v53 = vpack.c.bf16 %v25801_v25, %v25801_v25  ;;  %v16097_v39 = vld [vmem:[%s24212_s4 + $0x70] sm:$0xff]   ;;  %v25813_v35 = vld [vmem:[#allocation118_spill] sm:$0xff]  ;;  %v25849_v20 = vld [vmem:[#allocation7_spill] sm:$0xff] }
 0x6d2   :  { %v21830_v21 = vsel %vm21684_vm5, %v6933_v48, 0  ;;  %v6892_v61 = vsel %vm6648_vm11, %v25741_v36, %v6891_v7  ;;  %v25804_v31 = vpack.c.bf16 %v25803_v5, %v25803_v5  ;;  %14996 = vmatprep.mubr.msk.bf16.mxu1 %vm4053_vm8, %v21806_v34  ;;  %v25805_v48 = vld [vmem:[#allocation83_spill] sm:$0xff]  ;;  %v6889_v26 = vsel %vm6654_vm14, %v25743_v38, %v6888_v6  ;;  %15010 = vmatprep.subr.bf16.mxu1 %v16096_v54  ;;  %v25806_v5 = vld [vmem:[#allocation89_spill] sm:$0xff]  ;;  %v25807_v25 = vld [vmem:[#allocation48_spill] sm:$0xff] }
 0x6d3   :  { %v21841_v8 = vunpack.c.l.b16 %v25802_v53  ;;  %v6884_v17 = vsel %vm6656_vm15, %v25805_v48, %v6883_v47  ;;  %v6893_v55 = vsel %vm6650_vm12, %v25744_v51, %v6892_v61  ;;  %v6897_v53 = vsel %vm6830_vm10, %v20788_v9, %v25807_v25  ;;  %v25809_v48 = vld [vmem:[#allocation90_spill] sm:$0xff]  ;;  %v25810_v34 = vld [vmem:[#allocation116_spill] sm:$0xff]  ;;  %v25811_v38 = vld [vmem:[#allocation117_spill] sm:$0xff] }
 0x6d4   :  { %v21846_v29 = vunpack.c.l.b16 %v25804_v31  ;;  %v6935_v7 = vpack.c.b16 %v6884_v17, %v6884_v17  ;;  %v6890_v31 = vsel %vm6656_vm15, %v25806_v5, %v6889_v26  ;;  %v21867_v47 = vcombine.low %v21817_v16, %v21830_v21  ;;  %v25812_v5 = vld [vmem:[#allocation88_spill] sm:$0xff]  ;;  %15011 = vmatpush3.bf16.msra.mxu1 %v16096_v54  ;;  %v16098_v54 = vld [vmem:[%s24212_s4 + $0x78] sm:$0xff]  }
 0x6d5   :  { %v6894_v6 = vsel %vm6652_vm13, %v25745_v45, %v6893_v55  ;;  %v6898_v17 = vsel %vm6648_vm11, %v25809_v48, %v6897_v53  ;;  %v6903_v26 = vsel %vm6830_vm10, %v25811_v38, %v25810_v34  ;;  %v25814_v48 = vld [vmem:[#allocation25_spill] sm:$0xff]  ;;  %v6936_v38 = vpack.c.b16 %v6890_v31, %v6890_v31  ;;  %v25815_v34 = vld [vmem:[#allocation92_spill] sm:$0xff]  ;;  %15012 = vmatprep.subr.bf16.mxu1 %v16097_v39 }
 0x6d6   :  { %25808 = vst [vmem:[#allocation102_spill] sm:$0xff] %v21867_v47  ;;  %v21878_v61 = vsel %vm21684_vm5, %v6935_v7, 0  ;;  %v6895_v9 = vsel %vm6654_vm14, %v25812_v5, %v6894_v6  ;;  %v6899_v51 = vsel %vm6650_vm12, %v20798_v59, %v6898_v17  ;;  %v6904_v55 = vsel %vm6648_vm11, %v25813_v35, %v6903_v26  ;;  %v25816_v26 = vld [vmem:[#allocation121_spill] sm:$0xff]  ;;  %v25817_v31 = vld [vmem:[#allocation20_spill] sm:$0xff]  ;;  %v25823_v5 = vld [vmem:[#allocation23_spill] sm:$0xff] }
 0x6d7   :  { %v13215_v53 = vcombine.low %v25705_v14, %v21878_v61  ;;  %v6896_v45 = vsel %vm6656_vm15, %v25814_v48, %v6895_v9  ;;  %v6900_v7 = vsel %vm6652_vm13, %v25815_v34, %v6899_v51  ;;  %v6905_v17 = vsel %vm6650_vm12, %v25758_v22, %v6904_v55  ;;  %14997 = vmatmul.mubr.msk.bf16.gmra.mrb[68].mxu1 %vm4053_vm8, %v21867_v47  ;;  %v25825_v47 = vld [vmem:[#allocation96_spill] sm:$0xff] }
 0x6d8   :  { %v6937_v25 = vpack.c.b16 %v6896_v45, %v6896_v45  ;;  %v6901_v6 = vsel %vm6654_vm14, %v25757_v23, %v6900_v7  ;;  %v6909_v9 = vsel %vm6830_vm10, %v25759_v40, %v25816_v26  ;;  %v6906_v51 = vsel %vm6652_vm13, %v25761_v42, %v6905_v17  ;;  %v25818_v7 = vld [vmem:[#allocation126_spill] sm:$0xff]  ;;  %v25819_v23 = vld [vmem:[#allocation36_spill] sm:$0xff]  ;;  %15013 = vmatpush3.bf16.msra.mxu1 %v16097_v39 }
 0x6d9   :  { %v6902_v48 = vsel %vm6656_vm15, %v25817_v31, %v6901_v6  ;;  %v6910_v45 = vsel %vm6648_vm11, %v25690_v10, %v6909_v9  ;;  %v6915_v55 = vsel %vm6830_vm10, %v25691_v27, %v25818_v7  ;;  %v25820_v34 = vpack.c.bf16 %v25819_v23, %v25819_v23  ;;  %v25821_v9 = vld [vmem:[#allocation21_spill] sm:$0xff]  ;;  %15000 = vmatprep.mubr.msk.bf16.mxu1 %vm4053_vm8, %v13215_v53  ;;  %v21948_v39 = vld [vmem:[%s24212_s4 + $0x80] sm:$0xff]  }
 0x6da   :  { %v6907_v6 = vsel %vm6654_vm14, %v25762_v62, %v6906_v51  ;;  %v6938_v31 = vpack.c.b16 %v6902_v48, %v6902_v48  ;;  %v6911_v17 = vsel %vm6650_vm12, %v25692_v24, %v6910_v45  ;;  %v25822_v42 = vpack.c.bf16 %v25821_v9, %v25821_v9  ;;  %15014 = vmatprep.subr.bf16.mxu1 %v16098_v54 }
 0x6db   :  { %v21914_v22 = vunpack.c.l.b16 %v25820_v34  ;;  %v25824_v23 = vpack.c.bf16 %v25823_v5, %v25823_v5  ;;  %v6908_v51 = vsel %vm6656_vm15, %v25825_v47, %v6907_v6  ;;  %v6912_v48 = vsel %vm6652_vm13, %v21320_v37, %v6911_v17  ;;  %v25826_v6 = vld [vmem:[#allocation41_spill] sm:$0xff] }
 0x6dc   :  { %v21925_v59 = vunpack.c.l.b16 %v25822_v42  ;;  %v21939_v45 = vsel %vm21684_vm5, %v6936_v38, 0  ;;  %v6939_v42 = vpack.c.b16 %v6908_v51, %v6908_v51  ;;  %v6913_v5 = vsel %vm6654_vm14, %v21326_v50, %v6912_v48  ;;  %15015 = vmatpush3.bf16.msra.mxu1 %v16098_v54 }
 0x6dd   :  { %v21930_v34 = vunpack.c.l.b16 %v25824_v23  ;;  %v6916_v9 = vsel %vm6648_vm11, %v25693_v32, %v6915_v55  ;;  %v21952_v53 = vsel %vm21684_vm5, %v6937_v25, 0  ;;  %v21956_v38 = vsel %vm21684_vm5, %v6938_v31, 0  ;;  %v25827_v25 = vld [vmem:[#allocation71_spill] sm:$0xff]  ;;  %15032 = vmatprep.subr.bf16.mxu1 %v21948_v39 }
 0x6de   :  { %v6914_v17 = vsel %vm6656_vm15, %v25826_v6, %v6913_v5  ;;  %v6917_v23 = vsel %vm6650_vm12, %v25695_v13, %v6916_v9  ;;  %v21964_v55 = vsel %vm21684_vm5, %v6939_v42, 0  ;;  %v25828_v47 = vrot.slane %v25827_v25, 1  ;;  %v25829_v31 = vld [vmem:[#allocation27_spill] sm:$0xff]  ;;  %v25831_v9 = vld [vmem:[#allocation28_spill] sm:$0xff]  ;;  %v25832_v6 = vld [vmem:[#allocation114_spill] sm:$0xff] }
 0x6df   :  { %v6918_v51 = vsel %vm6652_vm13, %v21328_v30, %v6917_v23  ;;  %v6940_v48 = vpack.c.b16 %v6914_v17, %v6914_v17  ;;  %v25830_v62 = vpack.c.bf16 %v25829_v31, %v25829_v31  ;;  %v6355_v42 = vpack.c.bf16 %v25831_v9, %v25831_v9  ;;  %v25833_v13 = vld [vmem:[#allocation74_spill] sm:$0xff]  ;;  %v25837_v30 = vld [vmem:[#allocation4_spill] sm:$0xff] }
 0x6e0   :  { %v5838_v50 = vmax.f32 %v25827_v25, %v25828_v47  ;;  %v6919_v5 = vsel %vm6654_vm14, %v21332_v57, %v6918_v51  ;;  %v6696_v17 = vsel %vm6648_vm11, %v25833_v13, %v25832_v6  ;;  %v21985_v23 = vcombine.low %v21939_v45, %v21952_v53  ;;  %v25835_v47 = vld [vmem:[#allocation137_spill] sm:$0xff] }
 0x6e1   :  { %v21974_v37 = vunpack.c.l.b16 %v25830_v62  ;;  %v6920_v25 = vsel %vm6656_vm15, %v25835_v47, %v6919_v5  ;;  %v6697_v54 = vsel %vm6650_vm12, %v21841_v8, %v6696_v17  ;;  %v21994_v51 = vcombine.low %v21956_v38, %v21964_v55  ;;  %v25842_v47 = vld [vmem:[#allocation2_spill] sm:$0xff] }
 0x6e2   :  { %25834 = vst [vmem:[#allocation78_spill] sm:$0xff] %v21985_v23  ;;  %v6356_v62 = vpack.c.bf16 %v5838_v50, %v5838_v50  ;;  %v6941_v31 = vpack.c.b16 %v6920_v25, %v6920_v25  ;;  %v21996_v9 = vunpack.c.l.b16 %v6355_v42  ;;  %v6698_v57 = vsel %vm6652_vm13, %v21846_v29, %v6697_v54  ;;  %15001 = vmatmul.mubr.msk.bf16.gmra.mrb[72].mxu1 %vm4053_vm8, %v21985_v23  ;;  %v25839_v25 = vld [vmem:[#allocation24_spill] sm:$0xff]  ;;  %v25841_v23 = vld [vmem:[#allocation33_spill] sm:$0xff] }
 0x6e3   :  { %25836 = vst [vmem:[#allocation31_spill] sm:$0xff] %v21994_v51  ;;  %v25838_v24 = vpack.c.bf16 %v25837_v30, %v25837_v30  ;;  %v22009_v50 = vsel %vm21684_vm5, %v6940_v48, 0  ;;  %v6699_v42 = vsel %vm6654_vm14, %v21914_v22, %v6698_v57  ;;  %15004 = vmatprep.mubr.msk.bf16.mxu1 %vm4053_vm8, %v21994_v51  ;;  %v25840_v54 = vrot.slane %v25839_v25, 1  ;;  %v25843_v57 = vld [vmem:[#allocation34_spill] sm:$0xff] }
 0x6e4   :  { %v22011_v17 = vunpack.c.l.b16 %v6356_v62  ;;  %v22019_v30 = vsel %vm21684_vm5, %v6941_v31, 0  ;;  %v6419_v62 = vpack.c.bf16 %v25841_v23, %v25841_v23  ;;  %v6288_v32 = vrot.slane %v25842_v47, 4 }
 0x6e5   :  { %v22003_v5 = vunpack.c.l.b16 %v25838_v24  ;;  %v6700_v24 = vsel %vm6656_vm15, %v21996_v9, %v6699_v42  ;;  %v6286_v48 = vmax.f32 %v25839_v25, %v25840_v54  ;;  %v25844_v10 = vpack.c.bf16 %v25843_v57, %v25843_v57  ;;  %v25845_v57 = vld [vmem:[#allocation37_spill] sm:$0xff] }
 0x6e6   :  { %v6701_v31 = vsel %vm6658_vm1, %v22011_v17, %v6700_v24  ;;  %v6744_v42 = vsel %vm6648_vm11, %v21930_v34, %v21925_v59  ;;  %v22041_v25 = vcombine.low %v22009_v50, %v22019_v30  ;;  %v22045_v27 = vunpack.c.l.b16 %v6419_v62 }
 0x6e7   :  { %v22032_v51 = vunpack.c.l.b16 %v25844_v10  ;;  %v6757_v54 = vpack.c.b16 %v6701_v31, %v6701_v31  ;;  %v6420_v23 = vpack.c.bf16 %v6286_v48, %v6286_v48  ;;  %v6745_v35 = vsel %vm6650_vm12, %v21974_v37, %v6744_v42  ;;  %v25847_v42 = vld [vmem:[#allocation79_spill] sm:$0xff] }
 0x6e8   :  { %v6746_v10 = vsel %vm6652_vm13, %v22003_v5, %v6745_v35  ;;  %v25846_v24 = vrot.slane %v25845_v57, 4  ;;  %v7824_v7 = vsel %vm6830_vm10, %v25833_v13, %v25832_v6  ;;  %v8438_v15 = vrot.slane %v21841_v8, 6 }
 0x6e9   :  { %v22057_v31 = vsel %vm16543_vm4, 0, %v6757_v54  ;;  %v22059_v48 = vunpack.c.l.b16 %v6420_v23  ;;  %v6747_v62 = vsel %vm6654_vm14, %v22032_v51, %v6746_v10  ;;  %v7825_v35 = vsel %vm6648_vm11, %v21841_v8, %v7824_v7  ;;  %v25848_v54 = vld [vmem:[#allocation43_spill] sm:$0xff]  ;;  %v25850_v7 = vld [vmem:[#allocation14_spill] sm:$0xff] }
 0x6ea   :  { %v5841_v40 = vmax.f32 %v25845_v57, %v25846_v24  ;;  %v6748_v57 = vsel %vm6656_vm15, %v22045_v27, %v6747_v62  ;;  %v7826_v36 = vsel %vm6650_vm12, %v21846_v29, %v7825_v35  ;;  %v13239_v23 = vcombine.low %v25849_v20, %v25848_v54  ;;  %15005 = vmatmul.mubr.msk.bf16.gmra.mrb[76].mxu1 %vm4053_vm8, %v22041_v25 }
 0x6eb   :  { %v6749_v14 = vsel %vm6658_vm1, %v22059_v48, %v6748_v57  ;;  %v7827_v10 = vsel %vm6652_vm13, %v21914_v22, %v7826_v36  ;;  %v13240_v56 = vcombine.low %v25851_v4, %v25850_v7  ;;  %v6289_v57 = vmax.f32 %v25842_v47, %v6288_v32 }
 0x6ec   :  { %v5842_v24 = vrot.slane %v5841_v40, 2  ;;  %v6765_v62 = vpack.c.b16 %v6749_v14, %v6749_v14  ;;  %v7828_v35 = vsel %vm6654_vm14, %v21996_v9, %v7827_v10  ;;  %15016 = vmatprep.mubr.msk.bf16.mxu1 %vm4053_vm8, %v13239_v23  ;;  %v7831_v36 = vsel %vm6830_vm10, %v21930_v34, %v21925_v59 }
 0x6ed   :  { %v7829_v20 = vsel %vm6656_vm15, %v22011_v17, %v7828_v35  ;;  %v6290_v47 = vrot.slane %v6289_v57, 2  ;;  %v6873_v10 = vsel %vm6830_vm10, %v21841_v8, %v25833_v13 }
 0x6ee   :  { %v5843_v26 = vmax.f32 %v5841_v40, %v5842_v24  ;;  %v22094_v14 = vsel %vm16543_vm4, 0, %v6765_v62  ;;  %v7832_v24 = vsel %vm6648_vm11, %v21974_v37, %v7831_v36  ;;  %v6874_v35 = vsel %vm6648_vm11, %v21846_v29, %v6873_v10  ;;  %v25852_v10 = vld [vmem:[#allocation80_spill] sm:$0xff] }
 0x6ef   :  { %v7833_v23 = vsel %vm6650_vm12, %v22003_v5, %v7832_v24  ;;  %v6291_v54 = vmax.f32 %v6289_v57, %v6290_v47  ;;  %v6875_v24 = vsel %vm6650_vm12, %v21914_v22, %v6874_v35 }
 0x6f0   :  { %v5844_v40 = vrot.slane %v5843_v26, 1  ;;  %v7834_v62 = vsel %vm6652_vm13, %v22032_v51, %v7833_v23  ;;  %v6876_v57 = vsel %vm6652_vm13, %v21996_v9, %v6875_v24 }
 0x6f1   :  { %v7835_v4 = vsel %vm6654_vm14, %v22045_v27, %v7834_v62  ;;  %v25853_v62 = vld [vmem:[#allocation140_spill] sm:$0xff]  ;;  %v6292_v36 = vrot.slane %v6291_v54, 1  ;;  %v6877_v32 = vsel %vm6654_vm14, %v22011_v17, %v6876_v57 }
 0x6f2   :  { %v5845_v7 = vmax.f32 %v5843_v26, %v5844_v40  ;;  %v16100_v26 = vld [vmem:[%s24212_s4 + $0x88] sm:$0xff]   ;;  %v7836_v23 = vsel %vm6656_vm15, %v22059_v48, %v7835_v4  ;;  %v13241_v35 = vcombine.low %v25853_v62, %v25852_v10  ;;  %15017 = vmatmul.mubr.msk.bf16.vlgmr.msra.gmra.mrb[64].mxu1 %vm4053_vm8, %v13240_v56  ;;  %v16101_v57 = vld [vmem:[%s24212_s4 + $0x90] sm:$0xff]  }
 0x6f3   :  { %15033 = vmatpush3.bf16.msra.mxu1 %v21948_v39  ;;  %v6293_v47 = vmax.f32 %v6291_v54, %v6292_v36 }
 0x6f4   :  { %v6357_v40 = vpack.c.bf16 %v5845_v7, %v5845_v7  ;;  %v6921_v7 = vsel %vm6830_vm10, %v21974_v37, %v21930_v34  ;;  %15020 = vmatprep.mubr.msk.bf16.mxu1 %vm4053_vm8, %v13241_v35  ;;  %15034 = vmatprep.subr.bf16.mxu1 %v16100_v26 }
 0x6f5   :  { %v6922_v24 = vsel %vm6648_vm11, %v22003_v5, %v6921_v7  ;;  %v6421_v7 = vpack.c.bf16 %v6293_v47, %v6293_v47  ;;  %v25854_v47 = vld [vmem:[#allocation144_spill] sm:$0xff] }
 0x6f6   :  { %v6821_v4 = vunpack.c.l.b16 %v6357_v40  ;;  %v6923_v10 = vsel %vm6650_vm12, %v22032_v51, %v6922_v24  ;;  %v25855_v24 = vld [vmem:[#allocation143_spill] sm:$0xff] }
 0x6f7   :  { %v6924_v40 = vsel %vm6652_vm13, %v22045_v27, %v6923_v10  ;;  %15035 = vmatpush3.bf16.msra.mxu1 %v16100_v26  ;;  %v22151_v36 = vunpack.c.l.b16 %v6421_v7  ;;  %v13243_v10 = vcombine.low %v25855_v24, %v25854_v47  ;;  %v8436_v24 = vrot.slane %v25833_v13, 7 }
 0x6f8   :  { %v7830_v62 = vsel %vm6658_vm1, %v6821_v4, %v7829_v20  ;;  %v6878_v56 = vsel %vm6656_vm15, %v6821_v4, %v6877_v32  ;;  %v6925_v54 = vsel %vm6654_vm14, %v22059_v48, %v6924_v40  ;;  %15036 = vmatprep.subr.bf16.mxu1 %v16101_v57  ;;  %v16102_v20 = vld [vmem:[%s24212_s4 + $0x98] sm:$0xff]   ;;  %v25856_v40 = vcombine.low %v25847_v42, %v22057_v31 }
 0x6f9   :  { %v6934_v39 = vpack.c.b16 %v6878_v56, %v6878_v56  ;;  %v22166_v26 = vsel %vm6658_vm1, %v22151_v36, %v7836_v23  ;;  %v6926_v56 = vsel %vm6656_vm15, %v22151_v36, %v6925_v54  ;;  %v25857_v42 = vld [vmem:[#allocation145_spill] sm:$0xff] }
 0x6fa   :  { %15021 = vmatmul.mubr.msk.bf16.gmra.mrb[68].mxu1 %vm4053_vm8, %v25856_v40  ;;  %v6942_v7 = vpack.c.b16 %v6926_v56, %v6926_v56  ;;  %v13244_v47 = vcombine.low %v25857_v42, %v21636_v12  ;;  %v25858_v56 = vld [vmem:[#allocation53_spill] sm:$0xff]  ;;  %v25859_v40 = vld [vmem:[#allocation11_spill] sm:$0xff]  ;;  %v8437_v12 = vsel %vm6830_vm10, %v8436_v24, %v25832_v6  ;;  %v8446_v42 = vrot.slane %v22011_v17, 2  ;;  %v25861_v24 = vld [vmem:[#allocation58_spill] sm:$0xff] }
 0x6fb   :  { %v22155_v35 = vsel %vm21684_vm5, %v6934_v39, 0  ;;  %15024 = vmatprep.mubr.msk.bf16.mxu1 %vm4053_vm8, %v13243_v10  ;;  %15037 = vmatpush3.bf16.msra.mxu1 %v16101_v57  ;;  %v16103_v39 = vld [vmem:[%s24212_s4 + $0xa0] sm:$0xff]   ;;  %v13245_v57 = vcombine.low %v21650_v18, %v21672_v44  ;;  %v8440_v10 = vrot.slane %v21846_v29, 5  ;;  %v8439_v18 = vsel %vm6648_vm11, %v8438_v15, %v8437_v12  ;;  %v16105_v17 = vld [vmem:[%s24212_s4 + $0xb0] sm:$0xff]   ;;  %v16106_v12 = vld [vmem:[%s24212_s4 + $0xb8] sm:$0xff]  }
 0x6fc   :  { %v13290_v32 = vcombine.low %v21830_v21, %v22155_v35  ;;  %15038 = vmatprep.subr.bf16.mxu1 %v16102_v20  ;;  %v22180_v23 = vsel %vm21684_vm5, %v6942_v7, 0  ;;  %v25860_v7 = vcombine.low %v21698_v11, %v22094_v14  ;;  %v8442_v44 = vrot.slane %v21914_v22, 4  ;;  %v16104_v22 = vld [vmem:[%s24212_s4 + $0xa8] sm:$0xff]   ;;  %v25862_v15 = vld [vmem:[#allocation26_spill] sm:$0xff]  ;;  %v25880_v21 = vld [vmem:[#allocation61_spill] sm:$0xff] }
 0x6fd   :  { %v13294_v54 = vcombine.low %v22019_v30, %v22180_v23  ;;  %v8441_v13 = vsel %vm6650_vm12, %v8440_v10, %v8439_v18  ;;  %v8444_v29 = vrot.slane %v21996_v9, 3  ;;  %v7840_v10 = vpack.c.b16 %v25862_v15, %v25861_v24  ;;  %v25863_v9 = vld [vmem:[#allocation60_spill] sm:$0xff] }
 0x6fe   :  { %v8443_v8 = vsel %vm6652_vm13, %v8442_v44, %v8441_v13  ;;  %v25868_v18 = vld [vmem:[#allocation8_spill] sm:$0xff]  ;;  %v25870_v13 = vld [vmem:[#allocation98_spill] sm:$0xff] }
 0x6ff   :  { %15039 = vmatpush3.bf16.msra.mxu1 %v16102_v20  ;;  %v7838_v20 = vpack.c.b16 %v25859_v40, %v25858_v56  ;;  %v8445_v6 = vsel %vm6654_vm14, %v8444_v29, %v8443_v8  ;;  %v25864_v56 = vld [vmem:[#allocation22_spill] sm:$0xff]  ;;  %v25871_v8 = vld [vmem:[#allocation99_spill] sm:$0xff] }
 0x700   :  { %15056 = vmatprep.subr.bf16.mxu1 %v16103_v39  ;;  %v8447_v11 = vsel %vm6656_vm15, %v8446_v42, %v8445_v6  ;;  %v25865_v40 = vpack.c.b16 %v25863_v9, %v25864_v56  ;;  %v25872_v42 = vld [vmem:[#allocation52_spill] sm:$0xff]  ;;  %v25873_v9 = vld [vmem:[#allocation138_spill] sm:$0xff] }
 0x701   :  { %v7844_v6 = vpack.c.b16 %v25872_v42, %v25871_v8  ;;  %v7845_v56 = vpack.c.b16 %v22166_v26, %v25873_v9  ;;  %v8356_v42 = vrot.slane %v20548_v1, 5  ;;  %v25891_v9 = vld [vmem:[#allocation141_spill] sm:$0xff]  ;;  %v25892_v1 = vld [vmem:[#allocation103_spill] sm:$0xff] }
 0x702   :  { %15025 = vmatmul.mubr.msk.bf16.gmra.mrb[72].mxu1 %vm4053_vm8, %v13244_v47  ;;  %v8448_v47 = vrot.slane %v6821_v4, 1  ;;  %v25866_v4 = vld [vmem:[#allocation130_spill] sm:$0xff] }
 0x703   :  { %15028 = vmatprep.mubr.msk.bf16.mxu1 %vm4053_vm8, %v13245_v57 }
 0x704   :  { %v22211_v57 = vsel %vm6658_vm1, %v8448_v47, %v8447_v11  ;;  %v8548_v47 = vrot.slane %v21930_v34, 7  ;;  %v8550_v11 = vrot.slane %v21974_v37, 6  ;;  %v8558_v37 = vrot.slane %v22059_v48, 2 }
 0x705   :  { %v25875_v48 = vcombine.low %v21753_v63, %v21774_v3  ;;  %v25877_v63 = vcombine.low %v21878_v61, %v21939_v45  ;;  %v16111_v3 = vld [vmem:[%s24212_s4 + $0xe0] sm:$0xff]   ;;  %v8352_v61 = vrot.slane %v25880_v21, 7  ;;  %v8380_v45 = vrot.slane %v25769_v28, 7 }
 0x706   :  { %v8549_v24 = vsel %vm6830_vm10, %v8548_v47, %v21925_v59  ;;  %v8560_v59 = vrot.slane %v22151_v36, 1  ;;  %v16110_v36 = vld [vmem:[%s24212_s4 + $0xd8] sm:$0xff]   ;;  %v8370_v47 = vrot.slane %v25768_v60, 5  ;;  %v25894_v60 = vld [vmem:[#allocation59_spill] sm:$0xff] }
 0x707   :  { %v8551_v15 = vsel %vm6648_vm11, %v8550_v11, %v8549_v24  ;;  %v8384_v11 = vrot.slane %v20618_v52, 5  ;;  %v25895_v52 = vld [vmem:[#allocation142_spill] sm:$0xff] }
 0x70a   :  { %15029 = vmatmul.mubr.msk.bf16.gmra.mrb[76].mxu1 %vm4053_vm8, %v25860_v7  ;;  %v25867_v7 = vld [vmem:[#allocation5_spill] sm:$0xff] }
 0x70b   :  { %15040 = vmatprep.mubr.msk.bf16.mxu1 %vm4053_vm8, %v7838_v20  ;;  %v7841_v20 = vpack.c.b16 %v7830_v62, %v25866_v4  ;;  %v7842_v44 = vpack.c.b16 %v25868_v18, %v25867_v7  ;;  %v25869_v62 = vld [vmem:[#allocation97_spill] sm:$0xff]  ;;  %v25884_v7 = vld [vmem:[#allocation54_spill] sm:$0xff] }
 0x70c   :  { %v7843_v29 = vpack.c.b16 %v25870_v13, %v25869_v62  ;;  %v8353_v30 = vsel %vm6830_vm10, %v8352_v61, %v25884_v7  ;;  %v25885_v18 = vld [vmem:[#allocation70_spill] sm:$0xff]  ;;  %v25887_v62 = vld [vmem:[#allocation68_spill] sm:$0xff]  ;;  %v25901_v61 = vld [vmem:[#allocation109_spill] sm:$0xff] }
 0x712   :  { %15041 = vmatmul.mubr.msk.bf16.vlgmr.msra.gmra.mrb[64].mxu1 %vm4053_vm8, %v25865_v40 }
 0x713   :  { %15057 = vmatpush3.bf16.msra.mxu1 %v16103_v39  ;;  %15044 = vmatprep.mubr.msk.bf16.mxu1 %vm4053_vm8, %v7840_v10  ;;  %v16107_v39 = vld [vmem:[%s24212_s4 + $0xc0] sm:$0xff]   ;;  %v8554_v10 = vrot.slane %v22032_v51, 4  ;;  %v25874_v51 = vcombine.low %v21716_v33, %v21733_v0  ;;  %v25876_v33 = vcombine.low %v21798_v49, %v21817_v16  ;;  %v16109_v0 = vld [vmem:[%s24212_s4 + $0xd0] sm:$0xff]   ;;  %v25878_v49 = vcombine.low %v21952_v53, %v21956_v38  ;;  %v25882_v53 = vld [vmem:[#allocation35_spill] sm:$0xff] }
 0x714   :  { %15058 = vmatprep.subr.bf16.mxu1 %v16104_v22  ;;  %v25879_v16 = vcombine.low %v21964_v55, %v22009_v50  ;;  %v8366_v38 = vrot.slane %v25882_v53, 7  ;;  %v8382_v50 = vrot.slane %v25707_v41, 6  ;;  %v16112_v41 = vld [vmem:[%s24212_s4 + $0xe8] sm:$0xff]  }
 0x716   :  { %v8367_v13 = vsel %vm6830_vm10, %v8366_v38, %v25887_v62 }
 0x717   :  { %15059 = vmatpush3.bf16.msra.mxu1 %v16104_v22  ;;  %v8552_v22 = vrot.slane %v22003_v5, 5 }
 0x718   :  { %15060 = vmatprep.subr.bf16.mxu1 %v16105_v17 }
 0x719   :  { %v8553_v40 = vsel %vm6650_vm12, %v8552_v22, %v8551_v15  ;;  %v25889_v22 = vld [vmem:[#allocation110_spill] sm:$0xff] }
 0x71a   :  { %15045 = vmatmul.mubr.msk.bf16.gmra.mrb[68].mxu1 %vm4053_vm8, %v7841_v20  ;;  %v8555_v34 = vsel %vm6652_vm13, %v8554_v10, %v8553_v40  ;;  %v8394_v20 = vrot.slane %v25774_v58, 7  ;;  %v25888_v58 = vld [vmem:[#allocation32_spill] sm:$0xff]  ;;  %v8422_v24 = vrot.slane %v25889_v22, 7  ;;  %v8398_v40 = vrot.slane %v25892_v1, 5  ;;  %v25910_v22 = vld [vmem:[#allocation94_spill] sm:$0xff] }
 0x71b   :  { %15048 = vmatprep.mubr.msk.bf16.mxu1 %vm4053_vm8, %v7842_v44  ;;  %15061 = vmatpush3.bf16.msra.mxu1 %v16105_v17  ;;  %v8556_v17 = vrot.slane %v22045_v27, 3  ;;  %v16108_v27 = vld [vmem:[%s24212_s4 + $0xc8] sm:$0xff]   ;;  %v8396_v44 = vrot.slane %v20638_v46, 6 }
 0x71c   :  { %15062 = vmatprep.subr.bf16.mxu1 %v16106_v12  ;;  %v8395_v8 = vsel %vm6830_vm10, %v8394_v20, %v25888_v58  ;;  %v25903_v20 = vld [vmem:[#allocation107_spill] sm:$0xff] }
 0x71d   :  { %v8557_v5 = vsel %vm6654_vm14, %v8556_v17, %v8555_v34  ;;  %v25893_v17 = vld [vmem:[#allocation55_spill] sm:$0xff] }
 0x71e   :  { %v8559_v26 = vsel %vm6656_vm15, %v8558_v37, %v8557_v5  ;;  %v8392_v34 = vrot.slane %v25893_v17, 1  ;;  %v8406_v37 = vrot.slane %v25894_v60, 1  ;;  %v25896_v5 = vld [vmem:[#allocation106_spill] sm:$0xff]  ;;  %v25907_v58 = vld [vmem:[#allocation19_spill] sm:$0xff] }
 0x71f   :  { %15063 = vmatpush3.bf16.msra.mxu1 %v16106_v12  ;;  %v22265_v4 = vsel %vm6658_vm1, %v8560_v59, %v8559_v26  ;;  %v25883_v12 = vld [vmem:[#allocation62_spill] sm:$0xff]  ;;  %v8410_v59 = vrot.slane %v25896_v5, 6  ;;  %v25914_v5 = vld [vmem:[#allocation45_spill] sm:$0xff] }
 0x720   :  { %15080 = vmatprep.subr.bf16.mxu1 %v16107_v39  ;;  %v8354_v55 = vrot.slane %v25883_v12, 6  ;;  %v8412_v12 = vrot.slane %v25903_v20, 5  ;;  %v25926_v17 = vld [vmem:[#allocation18_spill] sm:$0xff] }
 0x722   :  { %15049 = vmatmul.mubr.msk.bf16.gmra.mrb[72].mxu1 %vm4053_vm8, %v7843_v29  ;;  %v8386_v29 = vrot.slane %v25710_v19, 4  ;;  %v8355_v46 = vsel %vm6648_vm11, %v8354_v55, %v8353_v30  ;;  %v25890_v19 = vld [vmem:[#allocation104_spill] sm:$0xff] }
 0x723   :  { %15052 = vmatprep.mubr.msk.bf16.mxu1 %vm4053_vm8, %v7844_v6  ;;  %v8408_v6 = vrot.slane %v20658_v43, 7  ;;  %v8400_v15 = vrot.slane %v25890_v19, 4  ;;  %v8397_v43 = vsel %vm6648_vm11, %v8396_v44, %v8395_v8  ;;  %v25906_v44 = vld [vmem:[#allocation67_spill] sm:$0xff]  ;;  %v8364_v8 = vrot.slane %v25907_v58, 1  ;;  %v25911_v19 = vld [vmem:[#allocation57_spill] sm:$0xff] }
 0x724   :  { %v8399_v38 = vsel %vm6650_vm12, %v8398_v40, %v8397_v43  ;;  %v25913_v40 = vld [vmem:[#allocation108_spill] sm:$0xff] }
 0x72a   :  { %15053 = vmatmul.mubr.msk.bf16.gmra.mrb[76].mxu1 %vm4053_vm8, %v7845_v56 }
 0x72b   :  { %15064 = vmatprep.mubr.msk.bf16.mxu1 %vm4053_vm8, %v25874_v51  ;;  %v25897_v51 = vmov 0  }
 0x72c   :  { %v13315_v26 = vcombine.low %v22057_v31, %v25897_v51  ;;  %v8423_v31 = vsel %vm6830_vm10, %v8422_v24, %v25901_v61  ;;  %v8376_v24 = vrot.slane %v25910_v22, 2 }
 0x732   :  { %15065 = vmatmul.mubr.msk.bf16.vlgmr.msra.gmra.mrb[64].mxu1 %vm4053_vm8, %v25875_v48  ;;  %v8357_v48 = vsel %vm6650_vm12, %v8356_v42, %v8355_v46 }
 0x733   :  { %15081 = vmatpush3.bf16.msra.mxu1 %v16107_v39  ;;  %15068 = vmatprep.mubr.msk.bf16.mxu1 %vm4053_vm8, %v25876_v33  ;;  %v25886_v39 = vld [vmem:[#allocation30_spill] sm:$0xff]  ;;  %v25898_v33 = vld [vmem:[#allocation105_spill] sm:$0xff] }
 0x734   :  { %15082 = vmatprep.subr.bf16.mxu1 %v16108_v27  ;;  %v8381_v28 = vsel %vm6830_vm10, %v8380_v45, %v25886_v39  ;;  %v22363_v45 = vcombine.low %v22094_v14, %v25897_v51  ;;  %v16114_v14 = vld [vmem:[%s24212_s4 + $0xf8] sm:$0xff]   ;;  %v8362_v39 = vrot.slane %v25906_v44, 2 }
 0x735   :  { %v8383_v10 = vsel %vm6648_vm11, %v8382_v50, %v8381_v28  ;;  %v25904_v50 = vld [vmem:[#allocation66_spill] sm:$0xff] }
 0x736   :  { %v8385_v21 = vsel %vm6650_vm12, %v8384_v11, %v8383_v10  ;;  %v8360_v7 = vrot.slane %v25904_v50, 3  ;;  %v8402_v10 = vrot.slane %v25911_v19, 3  ;;  %v25928_v19 = vld [vmem:[#allocation50_spill] sm:$0xff] }
 0x737   :  { %15083 = vmatpush3.bf16.msra.mxu1 %v16108_v27  ;;  %v16113_v27 = vld [vmem:[%s24212_s4 + $0xf0] sm:$0xff]   ;;  %v8387_v62 = vsel %vm6652_vm13, %v8386_v29, %v8385_v21 }
 0x738   :  { %15084 = vmatprep.subr.bf16.mxu1 %v16109_v0 }
 0x73a   :  { %15069 = vmatmul.mubr.msk.bf16.gmra.mrb[68].mxu1 %vm4053_vm8, %v13290_v32  ;;  %v25881_v32 = vld [vmem:[#allocation29_spill] sm:$0xff] }
 0x73b   :  { %15072 = vmatprep.mubr.msk.bf16.mxu1 %vm4053_vm8, %v25877_v63  ;;  %15085 = vmatpush3.bf16.msra.mxu1 %v16109_v0  ;;  %v8409_v0 = vsel %vm6830_vm10, %v8408_v6, %v25898_v33  ;;  %v25909_v6 = vld [vmem:[#allocation51_spill] sm:$0xff]  ;;  %v25916_v33 = vld [vmem:[#allocation13_spill] sm:$0xff] }
 0x73c   :  { %15086 = vmatprep.subr.bf16.mxu1 %v16110_v36  ;;  %v8411_v30 = vsel %vm6648_vm11, %v8410_v59, %v8409_v0  ;;  %v8388_v46 = vrot.slane %v25909_v6, 3  ;;  %v8390_v59 = vrot.slane %v25914_v5, 2  ;;  %v8450_v0 = vrot.slane %v25916_v33, 7  ;;  %v25925_v6 = vld [vmem:[#allocation72_spill] sm:$0xff]  ;;  %v25932_v5 = vld [vmem:[#allocation77_spill] sm:$0xff] }
 0x73d   :  { %v8413_v29 = vsel %vm6650_vm12, %v8412_v12, %v8411_v30  ;;  %v25920_v12 = vld [vmem:[#allocation64_spill] sm:$0xff]  ;;  %v24778_v50 = vrot.slane %v25916_v33, 6 }
 0x73e   :  { %v8389_v1 = vsel %vm6654_vm14, %v8388_v46, %v8387_v62  ;;  %v8451_v44 = vsel %vm6830_vm10, %v8450_v0, %v25916_v33  ;;  %v8432_v46 = vrot.slane %v25925_v6, 2 }
 0x73f   :  { %15087 = vmatpush3.bf16.msra.mxu1 %v16110_v36  ;;  %v25899_v36 = vld [vmem:[#allocation111_spill] sm:$0xff] }
 0x740   :  { %15104 = vmatprep.subr.bf16.mxu1 %v16111_v3  ;;  %v8424_v63 = vrot.slane %v25899_v36, 6 }
 0x742   :  { %15073 = vmatmul.mubr.msk.bf16.gmra.mrb[72].mxu1 %vm4053_vm8, %v25878_v49 }
 0x743   :  { %15076 = vmatprep.mubr.msk.bf16.mxu1 %vm4053_vm8, %v25879_v16 }
 0x74a   :  { %15077 = vmatmul.mubr.msk.bf16.gmra.mrb[76].mxu1 %vm4053_vm8, %v13294_v54  ;;  %v8368_v54 = vrot.slane %v25885_v18, 6  ;;  %v25905_v18 = vld [vmem:[#allocation112_spill] sm:$0xff] }
 0x74b   :  { %15088 = vmatprep.mubr.msk.bf16.mxu1 %vm4053_vm8, %v25881_v32  ;;  %v25902_v32 = vld [vmem:[#allocation12_spill] sm:$0xff] }
 0x74c   :  { %v8369_v56 = vsel %vm6648_vm11, %v8368_v54, %v8367_v13  ;;  %v8372_v53 = vrot.slane %v25902_v32, 4  ;;  %v8426_v54 = vrot.slane %v25905_v18, 5  ;;  %v8425_v13 = vsel %vm6648_vm11, %v8424_v63, %v8423_v31  ;;  %v25917_v63 = vld [vmem:[#allocation10_spill] sm:$0xff]  ;;  %v25919_v32 = vld [vmem:[#allocation69_spill] sm:$0xff] }
 0x74d   :  { %v8371_v16 = vsel %vm6650_vm12, %v8370_v47, %v8369_v56  ;;  %v8401_v47 = vsel %vm6652_vm13, %v8400_v15, %v8399_v38  ;;  %v8414_v15 = vrot.slane %v25913_v40, 4  ;;  %v8391_v31 = vsel %vm6656_vm15, %v8390_v59, %v8389_v1  ;;  %v25931_v40 = vld [vmem:[#allocation84_spill] sm:$0xff] }
 0x74e   :  { %v8373_v28 = vsel %vm6652_vm13, %v8372_v53, %v8371_v16  ;;  %v8427_v43 = vsel %vm6650_vm12, %v8426_v54, %v8425_v13  ;;  %v8416_v53 = vrot.slane %v25919_v32, 3  ;;  %v22425_v62 = vsel %vm6658_vm1, %v8392_v34, %v8391_v31  ;;  %v25923_v13 = vld [vmem:[#allocation65_spill] sm:$0xff]  ;;  %v25927_v34 = vld [vmem:[#allocation6_spill] sm:$0xff]  ;;  %v25937_v32 = vld [vmem:[#allocation116_spill] sm:$0xff] }
 0x74f   :  { %v8415_v21 = vsel %vm6652_vm13, %v8414_v15, %v8413_v29  ;;  %v8418_v58 = vrot.slane %v25923_v13, 2  ;;  %v8434_v59 = vrot.slane %v25932_v5, 1  ;;  %v25944_v13 = vld [vmem:[#allocation87_spill] sm:$0xff]  ;;  %v25954_v5 = vld [vmem:[#allocation90_spill] sm:$0xff] }
 0x750   :  { %v8417_v54 = vsel %vm6654_vm14, %v8416_v53, %v8415_v21  ;;  %v8506_v53 = vrot.slane %v25937_v32, 7  ;;  %v22511_v32 = vrot.slane %v25916_v33, 1 }
 0x751   :  { %v8419_v22 = vsel %vm6656_vm15, %v8418_v58, %v8417_v54  ;;  %v8484_v58 = vrot.slane %v25944_v13, 4 }
 0x752   :  { %15089 = vmatmul.mubr.msk.bf16.vlgmr.msra.gmra.mrb[64].mxu1 %vm4053_vm8, %v25891_v9  ;;  %v25912_v9 = vld [vmem:[#allocation146_spill] sm:$0xff]  ;;  %25958 = vst [vmem:[#allocation75_spill] sm:$0xff] %v22511_v32 }
 0x753   :  { %15105 = vmatpush3.bf16.msra.mxu1 %v16111_v3  ;;  %15092 = vmatprep.mubr.msk.bf16.mxu1 %vm4053_vm8, %v25895_v52  ;;  %v25900_v3 = vld [vmem:[#allocation63_spill] sm:$0xff]  ;;  %v22397_v52 = vld [vmem:[%s24212_s4 + $0x100] sm:$0xff]  }
 0x754   :  { %15106 = vmatprep.subr.bf16.mxu1 %v16112_v41  ;;  %v8358_v49 = vrot.slane %v25900_v3, 4  ;;  %v8378_v3 = vrot.slane %v25917_v63, 1 }
 0x756   :  { %v8359_v55 = vsel %vm6652_vm13, %v8358_v49, %v8357_v48  ;;  %v25915_v48 = vld [vmem:[#allocation113_spill] sm:$0xff]  ;;  %v25918_v49 = vld [vmem:[#allocation56_spill] sm:$0xff] }
 0x757   :  { %15107 = vmatpush3.bf16.msra.mxu1 %v16112_v41  ;;  %v25908_v41 = vld [vmem:[#allocation93_spill] sm:$0xff]  ;;  %v8361_v11 = vsel %vm6654_vm14, %v8360_v7, %v8359_v55  ;;  %v8404_v16 = vrot.slane %v25918_v49, 2  ;;  %v8430_v55 = vrot.slane %v25920_v12, 3  ;;  %v25921_v7 = vld [vmem:[#allocation16_spill] sm:$0xff] }
 0x758   :  { %15108 = vmatprep.subr.bf16.mxu1 %v16113_v27  ;;  %v8374_v42 = vrot.slane %v25908_v41, 3  ;;  %v8363_v36 = vsel %vm6656_vm15, %v8362_v39, %v8361_v11  ;;  %v8464_v30 = vrot.slane %v25921_v7, 7  ;;  %v25922_v39 = vld [vmem:[#allocation86_spill] sm:$0xff]  ;;  %v25924_v41 = vld [vmem:[#allocation147_spill] sm:$0xff]  ;;  %v8466_v11 = vrot.slane %v25926_v17, 6  ;;  %v25940_v12 = vld [vmem:[#allocation121_spill] sm:$0xff] }
 0x759   :  { %v8365_v18 = vsel %vm6658_vm1, %v8364_v8, %v8363_v36  ;;  %v25941_v7 = vld [vmem:[#allocation126_spill] sm:$0xff] }
 0x75a   :  { %15093 = vmatmul.mubr.msk.bf16.gmra.mrb[68].mxu1 %vm4053_vm8, %v13315_v26  ;;  %v8375_v56 = vsel %vm6654_vm14, %v8374_v42, %v8373_v28  ;;  %v8403_v26 = vsel %vm6654_vm14, %v8402_v10, %v8401_v47  ;;  %v8478_v28 = vrot.slane %v25922_v39, 7  ;;  %v24777_v47 = vrot.slane %v25916_v33, 5 }
 0x75b   :  { %15096 = vmatprep.mubr.msk.bf16.mxu1 %vm4053_vm8, %v25912_v9  ;;  %15109 = vmatpush3.bf16.msra.mxu1 %v16113_v27  ;;  %v8428_v27 = vrot.slane %v25915_v48, 4  ;;  %v8377_v61 = vsel %vm6656_vm15, %v8376_v24, %v8375_v56  ;;  %v8405_v20 = vsel %vm6656_vm15, %v8404_v16, %v8403_v26  ;;  %v8453_v24 = vsel %vm6648_vm11, %v24778_v50, %v8451_v44  ;;  %v25930_v9 = vld [vmem:[#allocation49_spill] sm:$0xff]  ;;  %v25934_v48 = vld [vmem:[#allocation15_spill] sm:$0xff] }
 0x75c   :  { %15110 = vmatprep.subr.bf16.mxu1 %v16114_v14  ;;  %v22434_v42 = vsel %vm6658_vm1, %v8406_v37, %v8405_v20  ;;  %v8465_v60 = vsel %vm6830_vm10, %v8464_v30, %v25928_v19  ;;  %v25929_v37 = vld [vmem:[#allocation42_spill] sm:$0xff]  ;;  %v8420_v56 = vrot.slane %v25930_v9, 1  ;;  %v8479_v15 = vsel %vm6830_vm10, %v8478_v28, %v25931_v40  ;;  %v25942_v44 = vld [vmem:[#allocation17_spill] sm:$0xff]  ;;  %v25950_v19 = vld [vmem:[#allocation100_spill] sm:$0xff] }
 0x75d   :  { %v8429_v38 = vsel %vm6652_vm13, %v8428_v27, %v8427_v43  ;;  %v8480_v10 = vrot.slane %v25929_v37, 6  ;;  %v8563_v43 = vpack.c.b16 %v22434_v42, %v22425_v62  ;;  %v22456_v26 = vrot.slane %v25916_v33, 4  ;;  %v25943_v28 = vld [vmem:[#allocation81_spill] sm:$0xff]  ;;  %v25953_v40 = vld [vmem:[#allocation44_spill] sm:$0xff] }
 0x75e   :  { %v8431_v8 = vsel %vm6654_vm14, %v8430_v55, %v8429_v38  ;;  %v8468_v27 = vrot.slane %v25934_v48, 5  ;;  %v8421_v0 = vsel %vm6658_vm1, %v8420_v56, %v8419_v22  ;;  %v8455_v36 = vsel %vm6650_vm12, %v24777_v47, %v8453_v24  ;;  %v25946_v42 = vld [vmem:[#allocation117_spill] sm:$0xff]  ;;  %v25949_v22 = vld [vmem:[#allocation122_spill] sm:$0xff] }
 0x75f   :  { %15111 = vmatpush3.bf16.msra.mxu1 %v16114_v14  ;;  %v8379_v14 = vsel %vm6658_vm1, %v8378_v3, %v8377_v61  ;;  %v8433_v1 = vsel %vm6656_vm15, %v8432_v46, %v8431_v8  ;;  %25933 = vst [vmem:[#allocation129_spill] sm:$0xff] %v22456_v26  ;;  %v8467_v63 = vsel %vm6648_vm11, %v8466_v11, %v8465_v60  ;;  %v25935_v3 = vld [vmem:[#allocation46_spill] sm:$0xff]  ;;  %v25936_v61 = vld [vmem:[#allocation48_spill] sm:$0xff]  ;;  %v22470_v38 = vrot.slane %v25916_v33, 3  ;;  %v25945_v8 = vld [vmem:[#allocation3_spill] sm:$0xff] }
 0x760   :  { %15128 = vmatprep.subr.bf16.mxu1 %v22397_v52  ;;  %v8562_v29 = vpack.c.b16 %v8379_v14, %v8365_v18  ;;  %v8482_v49 = vrot.slane %v25935_v3, 5  ;;  %v8435_v16 = vsel %vm6658_vm1, %v8434_v59, %v8433_v1  ;;  %v8481_v21 = vsel %vm6648_vm11, %v8480_v10, %v8479_v15  ;;  %v25947_v46 = vld [vmem:[#allocation47_spill] sm:$0xff]  ;;  %v25951_v10 = vld [vmem:[#allocation120_spill] sm:$0xff]  ;;  %v25952_v56 = vld [vmem:[#allocation125_spill] sm:$0xff] }
 0x761   :  { %v8492_v31 = vrot.slane %v25936_v61, 7  ;;  %25938 = vst [vmem:[#allocation131_spill] sm:$0xff] %v22470_v38  ;;  %v22473_v20 = vrot.slane %v25916_v33, 2  ;;  %v8520_v55 = vrot.slane %v25940_v12, 7  ;;  %v8534_v30 = vrot.slane %v25941_v7, 7  ;;  %v25948_v11 = vld [vmem:[#allocation115_spill] sm:$0xff] }
 0x762   :  { %15097 = vmatmul.mubr.msk.bf16.gmra.mrb[72].mxu1 %vm4053_vm8, %v25924_v41  ;;  %v8457_v18 = vsel %vm6652_vm13, %v22456_v26, %v8455_v36  ;;  %v8469_v54 = vsel %vm6650_vm12, %v8468_v27, %v8467_v63  ;;  %v8470_v39 = vrot.slane %v25942_v44, 4  ;;  %v8472_v14 = vrot.slane %v25943_v28, 3  ;;  %v25955_v48 = vld [vmem:[#allocation118_spill] sm:$0xff]  ;;  %v25956_v3 = vld [vmem:[#allocation123_spill] sm:$0xff] }
 0x763   :  { %15100 = vmatprep.mubr.msk.bf16.mxu1 %vm4053_vm8, %v25927_v34  ;;  %25939 = vst [vmem:[#allocation82_spill] sm:$0xff] %v22473_v20  ;;  %v8483_v62 = vsel %vm6650_vm12, %v8482_v49, %v8481_v21  ;;  %v8494_v41 = vrot.slane %v25945_v8, 6  ;;  %v8508_v6 = vrot.slane %v25946_v42, 6  ;;  %v8493_v17 = vsel %vm6830_vm10, %v8492_v31, %v25947_v46  ;;  %v25957_v21 = vld [vmem:[#allocation127_spill] sm:$0xff] }
 0x764   :  { %v8507_v34 = vsel %vm6830_vm10, %v8506_v53, %v25948_v11  ;;  %v8522_v24 = vrot.slane %v25949_v22, 6  ;;  %v8459_v60 = vsel %vm6654_vm14, %v22470_v38, %v8457_v18  ;;  %v8471_v37 = vsel %vm6652_vm13, %v8470_v39, %v8469_v54  ;;  %v25960_v54 = vld [vmem:[#allocation89_spill] sm:$0xff]  ;;  %v25964_v11 = vld [vmem:[#allocation124_spill] sm:$0xff] }
 0x765   :  { %v8521_v9 = vsel %vm6830_vm10, %v8520_v55, %v25951_v10  ;;  %v8485_v1 = vsel %vm6652_vm13, %v8484_v58, %v8483_v62  ;;  %v8486_v15 = vrot.slane %v25953_v40, 3  ;;  %v8496_v59 = vrot.slane %v25954_v5, 5  ;;  %v16116_v55 = vld [vmem:[%s24212_s4 + $0x108] sm:$0xff]   ;;  %v25965_v22 = vld [vmem:[#allocation128_spill] sm:$0xff] }
 0x766   :  { %v8510_v27 = vrot.slane %v25955_v48, 5  ;;  %v8495_v36 = vsel %vm6648_vm11, %v8494_v41, %v8493_v17  ;;  %v8509_v63 = vsel %vm6648_vm11, %v8508_v6, %v8507_v34  ;;  %v8524_v49 = vrot.slane %v25956_v3, 5  ;;  %v25962_v58 = vld [vmem:[#allocation91_spill] sm:$0xff]  ;;  %v25967_v10 = vld [vmem:[#allocation92_spill] sm:$0xff] }
 0x767   :  { %v8538_v61 = vrot.slane %v25957_v21, 5  ;;  %v8564_v31 = vpack.c.b16 %v8435_v16, %v8421_v0  ;;  %v8523_v53 = vsel %vm6648_vm11, %v8522_v24, %v8521_v9  ;;  %v8473_v7 = vsel %vm6654_vm14, %v8472_v14, %v8471_v37  ;;  %v25961_v16 = vld [vmem:[#allocation88_spill] sm:$0xff]  ;;  %v25963_v14 = vld [vmem:[#allocation119_spill] sm:$0xff] }
 0x768   :  { %v8476_v44 = vrot.slane %v25960_v54, 1  ;;  %v8487_v39 = vsel %vm6654_vm14, %v8486_v15, %v8485_v1  ;;  %v8461_v0 = vsel %vm6656_vm15, %v22473_v20, %v8459_v60  ;;  %v8488_v28 = vrot.slane %v25961_v16, 2  ;;  %v25971_v21 = vld [vmem:[#allocation132_spill] sm:$0xff] }
 0x769   :  { %v8497_v62 = vsel %vm6650_vm12, %v8496_v59, %v8495_v36  ;;  %v8511_v13 = vsel %vm6650_vm12, %v8510_v27, %v8509_v63  ;;  %v8498_v8 = vrot.slane %v25962_v58, 4  ;;  %v8512_v41 = vrot.slane %v25963_v14, 4  ;;  %v25969_v59 = vld [vmem:[#allocation9_spill] sm:$0xff]  ;;  %v25970_v27 = vld [vmem:[#allocation135_spill] sm:$0xff]  ;;  %v25974_v54 = vld [vmem:[#allocation136_spill] sm:$0xff] }
 0x76a   :  { %15101 = vmatmul.mubr.msk.bf16.gmra.mrb[76].mxu1 %vm4053_vm8, %v22363_v45  ;;  %v8536_v45 = vrot.slane %v25950_v19, 6  ;;  %v8525_v42 = vsel %vm6650_vm12, %v8524_v49, %v8523_v53  ;;  %v8489_v17 = vsel %vm6656_vm15, %v8488_v28, %v8487_v39  ;;  %v8526_v34 = vrot.slane %v25964_v11, 4  ;;  %v25966_v19 = vld [vmem:[#allocation25_spill] sm:$0xff]  ;;  %v25975_v16 = vld [vmem:[#allocation20_spill] sm:$0xff] }
 0x76b   :  { %15112 = vmatprep.mubr.msk.bf16.mxu1 %vm4053_vm8, %v8562_v29  ;;  %v8535_v29 = vsel %vm6830_vm10, %v8534_v30, %v25952_v56  ;;  %v25959_v30 = vld [vmem:[#allocation85_spill] sm:$0xff]  ;;  %v8463_v24 = vsel %vm6658_vm1, %v22511_v32, %v8461_v0  ;;  %v8499_v60 = vsel %vm6652_vm13, %v8498_v8, %v8497_v62  ;;  %v8513_v37 = vsel %vm6652_vm13, %v8512_v41, %v8511_v13  ;;  %v25976_v62 = vld [vmem:[#allocation96_spill] sm:$0xff] }
 0x76c   :  { %v8537_v12 = vsel %vm6648_vm11, %v8536_v45, %v8535_v29  ;;  %v8474_v18 = vrot.slane %v25959_v30, 2  ;;  %v8490_v45 = vrot.slane %v25966_v19, 1  ;;  %v8500_v9 = vrot.slane %v25967_v10, 3  ;;  %v25968_v56 = vld [vmem:[#allocation133_spill] sm:$0xff]  ;;  %v25982_v10 = vld [vmem:[#allocation78_spill] sm:$0xff] }
 0x76d   :  { %v8539_v6 = vsel %vm6650_vm12, %v8538_v61, %v8537_v12  ;;  %v8514_v29 = vrot.slane %v25968_v56, 3  ;;  %v8527_v1 = vsel %vm6652_vm13, %v8526_v34, %v8525_v42  ;;  %v8528_v48 = vrot.slane %v25969_v59, 3  ;;  %v16118_v30 = vld [vmem:[%s24212_s4 + $0x118] sm:$0xff]   ;;  %v16123_v56 = vld [vmem:[%s24215_s7 + $0x60] sm:$0xff]  }
 0x76e   :  { %v8475_v46 = vsel %vm6656_vm15, %v8474_v18, %v8473_v7  ;;  %v8491_v5 = vsel %vm6658_vm1, %v8490_v45, %v8489_v17  ;;  %v8542_v36 = vrot.slane %v25970_v27, 3  ;;  %v8565_v63 = vpack.c.b16 %v8463_v24, %v22211_v57  ;;  %v25973_v57 = vld [vmem:[#allocation101_spill] sm:$0xff] }
 0x76f   :  { %v8477_v15 = vsel %vm6658_vm1, %v8476_v44, %v8475_v46  ;;  %v8501_v3 = vsel %vm6654_vm14, %v8500_v9, %v8499_v60  ;;  %v8515_v49 = vsel %vm6654_vm14, %v8514_v29, %v8513_v37  ;;  %v8502_v61 = vrot.slane %v25971_v21, 2  ;;  %v25977_v14 = vld [vmem:[#allocation41_spill] sm:$0xff]  ;;  %v25981_v60 = vld [vmem:[#allocation102_spill] sm:$0xff]  ;;  %v16120_v9 = vld [vmem:[%s24215_s7 + $0x48] sm:$0xff]  }
 0x770   :  { %v8529_v12 = vsel %vm6654_vm14, %v8528_v48, %v8527_v1  ;;  %v8566_v18 = vpack.c.b16 %v8491_v5, %v8477_v15  ;;  %v8544_v44 = vrot.slane %v25974_v54, 2  ;;  %v8504_v28 = vrot.slane %v25975_v16, 1  ;;  %v25978_v42 = vld [vmem:[#allocation137_spill] sm:$0xff]  ;;  %v16124_v29 = vld [vmem:[%s24215_s7 + $0x68] sm:$0xff]   ;;  %v16125_v1 = vld [vmem:[%s24215_s7 + $0x70] sm:$0xff]  }
 0x771   :  { %v8503_v39 = vsel %vm6656_vm15, %v8502_v61, %v8501_v3  ;;  %v8518_v13 = vrot.slane %v25976_v62, 1  ;;  %v8532_v41 = vrot.slane %v25977_v14, 1  ;;  %v8569_v19 = vpack.c.b16 %v8463_v24, %v22265_v4  ;;  %v25979_v45 = vld [vmem:[#allocation73_spill] sm:$0xff]  ;;  %v25983_v4 = vld [vmem:[#allocation31_spill] sm:$0xff]  ;;  %v16127_v3 = vld [vmem:[%s24215_s7] sm:$0xff]  }
 0x772   :  { %15113 = vmatmul.mubr.msk.bf16.vlgmr.msra.gmra.mrb[64].mxu1 %vm4053_vm8, %v8563_v43  ;;  %v8540_v43 = vrot.slane %v25965_v22, 4  ;;  %v8505_v46 = vsel %vm6658_vm1, %v8504_v28, %v8503_v39  ;;  %v13357_v37 = vcombine.low %v22155_v35, %v25897_v51  ;;  %v13358_v24 = vcombine.low %v22180_v23, %v25897_v51  ;;  %v16119_v35 = vld [vmem:[%s24215_s7 + $0x40] sm:$0xff]   ;;  %v16122_v23 = vld [vmem:[%s24215_s7 + $0x58] sm:$0xff]  }
 0x773   :  { %15129 = vmatpush3.bf16.msra.mxu1 %v22397_v52  ;;  %15116 = vmatprep.mubr.msk.bf16.mxu1 %vm4053_vm8, %v8564_v31  ;;  %v16117_v52 = vld [vmem:[%s24212_s4 + $0x110] sm:$0xff]   ;;  %v25972_v31 = vld [vmem:[#allocation134_spill] sm:$0xff] }
 0x774   :  { %15130 = vmatprep.subr.bf16.mxu1 %v16116_v55  ;;  %v8541_v40 = vsel %vm6652_vm13, %v8540_v43, %v8539_v6  ;;  %v8516_v53 = vrot.slane %v25972_v31, 2  ;;  %v8546_v6 = vrot.slane %v25978_v42, 1 }
 0x775   :  { %v8543_v7 = vsel %vm6654_vm14, %v8542_v36, %v8541_v40  ;;  %v16126_v40 = vld [vmem:[%s24215_s7 + $0x78] sm:$0xff]  }
 0x776   :  { %v8517_v0 = vsel %vm6656_vm15, %v8516_v53, %v8515_v49  ;;  %v8545_v8 = vsel %vm6656_vm15, %v8544_v44, %v8543_v7 }
 0x777   :  { %15131 = vmatpush3.bf16.msra.mxu1 %v16116_v55  ;;  %v8530_v55 = vrot.slane %v25973_v57, 2  ;;  %v8519_v17 = vsel %vm6658_vm1, %v8518_v13, %v8517_v0  ;;  %v8547_v34 = vsel %vm6658_vm1, %v8546_v6, %v8545_v8 }
 0x778   :  { %15132 = vmatprep.subr.bf16.mxu1 %v16117_v52  ;;  %v8567_v22 = vpack.c.b16 %v8519_v17, %v8505_v46 }
 0x779   :  { %v8531_v58 = vsel %vm6656_vm15, %v8530_v55, %v8529_v12 }
 0x77a   :  { %15117 = vmatmul.mubr.msk.bf16.gmra.mrb[68].mxu1 %vm4053_vm8, %v8565_v63  ;;  %v8533_v11 = vsel %vm6658_vm1, %v8532_v41, %v8531_v58 }
 0x77b   :  { %15120 = vmatprep.mubr.msk.bf16.mxu1 %vm4053_vm8, %v8566_v18  ;;  %15133 = vmatpush3.bf16.msra.mxu1 %v16117_v52  ;;  %v8568_v43 = vpack.c.b16 %v8547_v34, %v8533_v11  ;;  %v25980_v52 = vld [vmem:[#allocation95_spill] sm:$0xff] }
 0x77c   :  { %15134 = vmatprep.subr.bf16.mxu1 %v16118_v30 }
 0x77f   :  { %15135 = vmatpush3.bf16.msra.mxu1 %v16118_v30 }
 0x780   :  { %15152 = vmatprep.subr.bf16.mxu1 %v16119_v35 }
 0x782   :  { %15121 = vmatmul.mubr.msk.bf16.gmra.mrb[72].mxu1 %vm4053_vm8, %v8567_v22 }
 0x783   :  { %15124 = vmatprep.mubr.msk.bf16.mxu1 %vm4053_vm8, %v8568_v43 }
 0x78a   :  { %15125 = vmatmul.mubr.msk.bf16.gmra.mrb[76].mxu1 %vm4053_vm8, %v8569_v19 }
 0x78b   :  { %15136 = vmatprep.mubr.msk.bf16.mxu1 %vm4053_vm8, %v25979_v45 }
 0x792   :  { %15137 = vmatmul.mubr.msk.bf16.vlgmr.msra.gmra.mrb[64].mxu1 %vm4053_vm8, %v25980_v52 }
 0x793   :  { %15140 = vmatprep.mubr.msk.bf16.mxu1 %vm4053_vm8, %v25981_v60  ;;  %15153 = vmatpush3.bf16.msra.mxu1 %v16119_v35 }
 0x794   :  { %15154 = vmatprep.subr.bf16.mxu1 %v16120_v9 }
 0x797   :  { %15155 = vmatpush3.bf16.msra.mxu1 %v16120_v9 }
 0x79a   :  { %15141 = vmatmul.mubr.msk.bf16.gmra.mrb[68].mxu1 %vm4053_vm8, %v13357_v37 }
 0x79b   :  { %15144 = vmatprep.mubr.msk.bf16.mxu1 %vm4053_vm8, %v25982_v10 }
 0x7a2   :  { %15145 = vmatmul.mubr.msk.bf16.gmra.mrb[72].mxu1 %vm4053_vm8, %v25983_v4 }
 0x7a3   :  { %15148 = vmatprep.mubr.msk.bf16.mxu1 %vm4053_vm8, %v22041_v25  ;;  %v16121_v25 = vld [vmem:[%s24215_s7 + $0x50] sm:$0xff]  }
 0x7a4   :  { %15156 = vmatprep.subr.bf16.mxu1 %v16121_v25 }
 0x7a5   :  { %15157 = vmatpush3.bf16.msra.mxu1 %v16121_v25 }
 0x7a6   :  { %15158 = vmatprep.subr.bf16.mxu1 %v16122_v23 }
 0x7a9   :  { %15159 = vmatpush3.bf16.msra.mxu1 %v16122_v23 }
 0x7aa   :  { %15149 = vmatmul.mubr.msk.bf16.gmra.mrb[76].mxu1 %vm4053_vm8, %v13358_v24  ;;  %15160 = vmatprep.subr.bf16.mxu1 %v16123_v56 }
 0x7ad   :  { %15161 = vmatpush3.bf16.msra.mxu1 %v16123_v56 }
 0x7ae   :  { %15162 = vmatprep.subr.bf16.mxu1 %v16124_v29 }
 0x7b1   :  { %15163 = vmatpush3.bf16.msra.mxu1 %v16124_v29 }
 0x7b2   :  { %15164 = vmatprep.subr.bf16.mxu1 %v16125_v1 }
 0x7b5   :  { %15165 = vmatpush3.bf16.msra.mxu1 %v16125_v1 }
 0x7b6   :  { %15166 = vmatprep.subr.bf16.mxu1 %v16126_v40 }
 0x7b9   :  { %15167 = vmatpush3.bf16.msra.mxu1 %v16126_v40 }
 0x7ba   :  { %15172 = vmatprep.subr.bf16.mxu1 %v16127_v3 }
 0x865   :  { %v22626_v15 = vpop.f32.mrb[64].mxu1 }
 0x866   :  { %v22628_v5 = vpop.f32.mrb[65].mxu1  ;;  %v8909_v49 = vmul.f32 %v22626_v15, %v22626_v15 }
 0x867   :  { %v22630_v59 = vpop.f32.mrb[66].mxu1  ;;  %v8907_v27 = vmul.f32 %v22628_v5, %v22628_v5 }
 0x868   :  { %v22632_v48 = vpop.f32.mrb[67].mxu1  ;;  %v8910_v31 = vmul.f32 %v22630_v59, %v22630_v59 }
 0x869   :  { %v8885_v36 = vadd.f32 %v22632_v48, %v22628_v5  ;;  %v8908_v63 = vmul.f32 %v22632_v48, %v22632_v48 }
 0x86b   :  { %v8886_v21 = vadd.f32 %v22626_v15, %v8885_v36  ;;  %v8923_v61 = vadd.f32 %v8908_v63, %v8907_v27 }
 0x86d   :  { %v8924_v53 = vadd.f32 %v8923_v61, %v8909_v49  ;;  %v22648_v12 = vpop.f32.mrb[68].mxu1  ;;  %v8887_v7 = vadd.f32 %v22630_v59, %v8886_v21 }
 0x86e   :  { %v22651_v30 = vpop.f32.mrb[69].mxu1  ;;  %v8913_v28 = vmul.f32 %v22648_v12, %v22648_v12 }
 0x86f   :  { %v8888_v18 = vadd.f32 %v8887_v7, %v22651_v30  ;;  %v8911_v57 = vmul.f32 %v22651_v30, %v22651_v30  ;;  %v8925_v55 = vadd.f32 %v8924_v53, %v8910_v31  ;;  %v22656_v54 = vpop.f32.mrb[70].mxu1 }
 0x870   :  { %v22658_v44 = vpop.f32.mrb[71].mxu1  ;;  %v8914_v58 = vmul.f32 %v22656_v54, %v22656_v54 }
 0x871   :  { %v8926_v39 = vadd.f32 %v8925_v55, %v8911_v57  ;;  %v8889_v0 = vadd.f32 %v8888_v18, %v22658_v44  ;;  %v8912_v16 = vmul.f32 %v22658_v44, %v22658_v44 }
 0x873   :  { %v8890_v62 = vadd.f32 %v22648_v12, %v8889_v0  ;;  %v8927_v13 = vadd.f32 %v8926_v39, %v8912_v16 }
 0x875   :  { %v8928_v8 = vadd.f32 %v8927_v13, %v8913_v28  ;;  %v22668_v14 = vpop.f32.mrb[72].mxu1  ;;  %v8891_v41 = vadd.f32 %v22656_v54, %v8890_v62 }
 0x876   :  { %v22671_v42 = vpop.f32.mrb[73].mxu1  ;;  %v8917_v45 = vmul.f32 %v22668_v14, %v22668_v14 }
 0x877   :  { %v8892_v6 = vadd.f32 %v8891_v41, %v22671_v42  ;;  %v8915_v46 = vmul.f32 %v22671_v42, %v22671_v42  ;;  %v8929_v17 = vadd.f32 %v8928_v8, %v8914_v58  ;;  %v22676_v11 = vpop.f32.mrb[74].mxu1 }
 0x878   :  { %v22678_v34 = vpop.f32.mrb[75].mxu1  ;;  %v8918_v37 = vmul.f32 %v22676_v11, %v22676_v11 }
 0x879   :  { %v8930_v22 = vadd.f32 %v8929_v17, %v8915_v46  ;;  %v8893_v43 = vadd.f32 %v8892_v6, %v22678_v34  ;;  %v8916_v19 = vmul.f32 %v22678_v34, %v22678_v34 }
 0x87b   :  { %v8894_v52 = vadd.f32 %v22668_v14, %v8893_v43  ;;  %v8931_v60 = vadd.f32 %v8930_v22, %v8916_v19  ;;  %v6422_v22 = vld [vmem:[%s24216_s5] sm:$0x1] }
 0x87d   :  { %v8932_v10 = vadd.f32 %v8931_v60, %v8917_v45  ;;  %v22688_v4 = vpop.f32.mrb[76].mxu1  ;;  %v8895_v24 = vadd.f32 %v22676_v11, %v8894_v52  ;;  %v6423_v45 = vld [vmem:[%s24217_s6] sm:$0x1]  ;;  %v25984_v60 = vld [vmem:[#allocation39_spill] sm:$0xff] }
 0x87e   :  { %v8854_v35 = vpop.f32.mrb[77].mxu1  ;;  %v8921_v36 = vmul.f32 %v22688_v4, %v22688_v4 }
 0x87f   :  { %v8896_v9 = vadd.f32 %v8895_v24, %v8854_v35  ;;  %v8919_v25 = vmul.f32 %v8854_v35, %v8854_v35  ;;  %v8933_v23 = vadd.f32 %v8932_v10, %v8918_v37  ;;  %v22691_v56 = vpop.f32.mrb[78].mxu1 }
 0x880   :  { %v8857_v29 = vpop.f32.mrb[79].mxu1  ;;  %v8922_v49 = vmul.f32 %v22691_v56, %v22691_v56 }
 0x881   :  { %v8934_v1 = vadd.f32 %v8933_v23, %v8919_v25  ;;  %v8897_v40 = vadd.f32 %v8896_v9, %v8857_v29  ;;  %v8920_v27 = vmul.f32 %v8857_v29, %v8857_v29 }
 0x883   :  { %v8898_v63 = vadd.f32 %v22688_v4, %v8897_v40  ;;  %v8935_v3 = vadd.f32 %v8934_v1, %v8920_v27 }
 0x885   :  { %v8899_v21 = vadd.f32 %v22691_v56, %v8898_v63  ;;  %v8936_v61 = vadd.f32 %v8935_v3, %v8921_v36 }
 0x887   :  { %v8900_v31 = vrot.slane %v8899_v21, 4  ;;  %v8937_v53 = vadd.f32 %v8936_v61, %v8922_v49 }
 0x889   :  { %v8901_v7 = vadd.f32 %v8900_v31, %v8899_v21  ;;  %v8938_v18 = vrot.slane %v8937_v53, 4 }
 0x88b   :  { %v8902_v57 = vrot.slane %v8901_v7, 2  ;;  %v8939_v55 = vadd.f32 %v8938_v18, %v8937_v53 }
 0x88d   :  { %v8903_v39 = vadd.f32 %v8902_v57, %v8901_v7  ;;  %v8940_v0 = vrot.slane %v8939_v55, 2 }
 0x88f   :  { %v8904_v16 = vrot.slane %v8903_v39, 1  ;;  %v8941_v28 = vadd.f32 %v8940_v0, %v8939_v55 }
 0x891   :  { %v8905_v62 = vadd.f32 %v8904_v16, %v8903_v39  ;;  %v8942_v13 = vrot.slane %v8941_v28, 1 }
 0x893   :  { %v8906_v58 = vmul.f32 0.0078125, %v8905_v62  ;;  %v8943_v8 = vadd.f32 %v8942_v13, %v8941_v28 }
 0x895   :  { %v8944_v41 = vmul.f32 0.0078125, %v8943_v8  ;;  %v8945_v6 = vmul.f32 %v8906_v58, %v8906_v58  ;;  %v25985_v8 = vld [vmem:[#allocation40_spill] sm:$0xff] }
 0x897   :  { %v8946_v46 = vsub.f32 %v8944_v41, %v8945_v6 }
 0x899   :  { %v8947_v17 = vadd.f32 1e-05, %v8946_v46 }
 0x89b   :  { %16409 = vrsqrt.f32 %v8947_v17 }
 0x8a5   :  { %v16410_v43 = vpop.eup %16409 }
 0x8a6   :  { %v8949_v19 = vmul.f32 %v16410_v43, %v6422_v22 }
 0x8a8   :  { %v8950_v52 = vmul.f32 %v8949_v19, %v8906_v58  ;;  %v22706_v37 = vrot.slane %v8949_v19, %v25984_v60 }
 0x8aa   :  { %v8951_v10 = vsub.f32 %v6423_v45, %v8950_v52  ;;  %v8970_v24 = vmul.f32 %v22706_v37, %v8854_v35  ;;  %v8971_v9 = vmul.f32 %v22706_v37, %v8857_v29  ;;  %v8958_v25 = vmul.f32 %v22706_v37, %v22628_v5 }
 0x8ab   :  { %v8959_v23 = vmul.f32 %v22706_v37, %v22632_v48  ;;  %v8960_v1 = vmul.f32 %v22626_v15, %v22706_v37  ;;  %v8961_v40 = vmul.f32 %v22630_v59, %v22706_v37  ;;  %v8962_v35 = vmul.f32 %v22706_v37, %v22651_v30 }
 0x8ac   :  { %v22719_v27 = vrot.slane %v8951_v10, %v25984_v60  ;;  %v8963_v29 = vmul.f32 %v22706_v37, %v22658_v44  ;;  %v8964_v5 = vmul.f32 %v22648_v12, %v22706_v37  ;;  %v8965_v48 = vmul.f32 %v22656_v54, %v22706_v37 }
 0x8ad   :  { %v8966_v15 = vmul.f32 %v22706_v37, %v22671_v42  ;;  %v8967_v59 = vmul.f32 %v22706_v37, %v22678_v34  ;;  %v22735_v36 = vmul.f32 %v22668_v14, %v22706_v37  ;;  %v22749_v13 = vmul.f32 %v22676_v11, %v22706_v37 }
 0x8ae   :  { %v8992_v30 = vadd.f32 %v22719_v27, %v8970_v24  ;;  %v8993_v44 = vadd.f32 %v22719_v27, %v8971_v9  ;;  %v8980_v63 = vadd.f32 %v22719_v27, %v8958_v25  ;;  %v8981_v12 = vadd.f32 %v22719_v27, %v8959_v23 }
 0x8af   :  { %v8982_v54 = vadd.f32 %v22719_v27, %v8960_v1  ;;  %v8983_v3 = vadd.f32 %v22719_v27, %v8961_v40  ;;  %v8984_v42 = vadd.f32 %v22719_v27, %v8962_v35  ;;  %v8985_v34 = vadd.f32 %v22719_v27, %v8963_v29 }
 0x8b0   :  { %v9008_v49 = vmax.f32 %v8992_v30, 0.0  ;;  %v9009_v21 = vmax.f32 %v8993_v44, 0.0  ;;  %v8986_v14 = vadd.f32 %v22719_v27, %v8964_v5  ;;  %v8987_v61 = vadd.f32 %v22719_v27, %v8965_v48 }
 0x8b1   :  { %v8996_v31 = vmax.f32 %v8980_v63, 0.0  ;;  %v8997_v53 = vmax.f32 %v8981_v12, 0.0  ;;  %v8998_v7 = vmax.f32 %v8982_v54, 0.0  ;;  %v8999_v18 = vmax.f32 %v8983_v3, 0.0 }
 0x8b2   :  { %v9018_v57 = vmax.f32 %v9008_v49, %v9009_v21  ;;  %v9000_v55 = vmax.f32 %v8984_v42, 0.0  ;;  %v9001_v39 = vmax.f32 %v8985_v34, 0.0  ;;  %v9002_v0 = vmax.f32 %v8986_v14, 0.0 }
 0x8b3   :  { %v9003_v16 = vmax.f32 %v8987_v61, 0.0  ;;  %v9012_v28 = vmax.f32 %v8996_v31, %v8997_v53  ;;  %v9013_v62 = vmax.f32 %v8998_v7, %v8999_v18  ;;  %v22753_v46 = vadd.f32 %v22719_v27, %v8966_v15 }
 0x8b4   :  { %v9130_v58 = vcombine.high %v9018_v57, %v9018_v57  ;;  %v9137_v41 = vrot.slane %v9018_v57, %v25985_v8  ;;  %v9014_v6 = vmax.f32 %v9000_v55, %v9001_v39  ;;  %v22765_v23 = vadd.f32 %v22719_v27, %v8967_v59 }
 0x8b5   :  { %v22755_v17 = vmax.f32 %v9002_v0, %v9003_v16  ;;  %v9028_v22 = vcombine.high %v9012_v28, %v9012_v28  ;;  %v9035_v43 = vrot.slane %v9012_v28, %v25985_v8  ;;  %v9045_v19 = vcombine.high %v9013_v62, %v9013_v62 }
 0x8b6   :  { %v9144_v45 = vrot.slane %v9130_v58, %v25985_v8  ;;  %v9145_v52 = vcombine.high %v9137_v41, %v9137_v41  ;;  %v9364_v10 = vsel %vm760_vm0, %v9137_v41, -inf  ;;  %v22761_v11 = vrot.slane %v9013_v62, %v25985_v8 }
 0x8b7   :  { %v9365_v24 = vrot.slane %v9364_v10, 4  ;;  %v9042_v9 = vrot.slane %v9028_v22, %v25985_v8  ;;  %v9043_v25 = vcombine.high %v9035_v43, %v9035_v43  ;;  %v22770_v29 = vrot.slane %v9045_v19, %v25985_v8 }
 0x8b8   :  { %v9146_v1 = vcombine.high %v9144_v45, %v9144_v45  ;;  %v9371_v40 = vsel %vm760_vm0, %v9145_v52, -inf  ;;  %v9378_v35 = vsel %vm760_vm0, %v9144_v45, -inf  ;;  %v9060_v30 = vcombine.high %v22761_v11, %v22761_v11 }
 0x8b9   :  { %v9366_v5 = vmax.f32 %v9364_v10, %v9365_v24  ;;  %v9372_v48 = vrot.slane %v9371_v40, 4  ;;  %v9379_v15 = vrot.slane %v9378_v35, 4  ;;  %v9044_v63 = vcombine.high %v9042_v9, %v9042_v9 }
 0x8ba   :  { %v9385_v44 = vsel %vm760_vm0, %v9146_v1, -inf  ;;  %v9062_v12 = vcombine.high %v9014_v6, %v9014_v6  ;;  %v22776_v59 = vrot.slane %v9014_v6, %v25985_v8  ;;  %v9061_v49 = vcombine.high %v22770_v29, %v22770_v29 }
 0x8bb   :  { %v9367_v54 = vrot.slane %v9366_v5, 2  ;;  %v9373_v3 = vmax.f32 %v9371_v40, %v9372_v48  ;;  %v9380_v42 = vmax.f32 %v9378_v35, %v9379_v15  ;;  %v9386_v34 = vrot.slane %v9385_v44, 4 }
 0x8bc   :  { %v22781_v21 = vrot.slane %v9062_v12, %v25985_v8  ;;  %v9077_v14 = vcombine.high %v22776_v59, %v22776_v59  ;;  %v22791_v55 = vrot.slane %v22755_v17, %v25985_v8  ;;  %v9196_v39 = vsel %vm760_vm0, %v9035_v43, -inf }
 0x8bd   :  { %v9368_v31 = vmax.f32 %v9366_v5, %v9367_v54  ;;  %v9374_v53 = vrot.slane %v9373_v3, 2  ;;  %v9381_v7 = vrot.slane %v9380_v42, 2  ;;  %v9387_v18 = vmax.f32 %v9385_v44, %v9386_v34 }
 0x8be   :  { %v9078_v57 = vcombine.high %v22781_v21, %v22781_v21  ;;  %v9203_v0 = vsel %vm760_vm0, %v9043_v25, -inf  ;;  %v9197_v41 = vrot.slane %v9196_v39, 4  ;;  %v9210_v22 = vsel %vm760_vm0, %v9042_v9, -inf }
 0x8bf   :  { %v9369_v16 = vrot.slane %v9368_v31, 1  ;;  %v9375_v28 = vmax.f32 %v9373_v3, %v9374_v53  ;;  %v9382_v62 = vmax.f32 %v9380_v42, %v9381_v7  ;;  %v9388_v58 = vrot.slane %v9387_v18, 2 }
 0x8c0   :  { %v9204_v6 = vrot.slane %v9203_v0, 4  ;;  %v9217_v19 = vsel %vm760_vm0, %v9044_v63, -inf  ;;  %v9198_v1 = vmax.f32 %v9196_v39, %v9197_v41  ;;  %v9211_v35 = vrot.slane %v9210_v22, 4 }
 0x8c1   :  { %v9370_v45 = vmax.f32 %v9368_v31, %v9369_v16  ;;  %v9376_v52 = vrot.slane %v9375_v28, 1  ;;  %v9383_v10 = vrot.slane %v9382_v62, 1  ;;  %v9389_v24 = vmax.f32 %v9387_v18, %v9388_v58 }
 0x8c2   :  { %v9205_v40 = vmax.f32 %v9203_v0, %v9204_v6  ;;  %v9218_v43 = vrot.slane %v9217_v19, 4  ;;  %v9199_v44 = vrot.slane %v9198_v1, 2  ;;  %v9212_v54 = vmax.f32 %v9210_v22, %v9211_v35 }
 0x8c3   :  { %v9377_v5 = vmax.f32 %v9375_v28, %v9376_v52  ;;  %v9384_v25 = vmax.f32 %v9382_v62, %v9383_v10  ;;  %v9390_v48 = vrot.slane %v9389_v24, 1  ;;  %v9444_v15 = vpack.c.bf16 %v9370_v45, %v9370_v45 }
 0x8c4   :  { %v9206_v12 = vrot.slane %v9205_v40, 2  ;;  %v9219_v3 = vmax.f32 %v9217_v19, %v9218_v43  ;;  %v9200_v31 = vmax.f32 %v9198_v1, %v9199_v44  ;;  %v9213_v7 = vrot.slane %v9212_v54, 2 }
 0x8c5   :  { %v22797_v42 = vmax.f32 %v9389_v24, %v9390_v48  ;;  %v9445_v9 = vpack.c.bf16 %v9377_v5, %v9377_v5  ;;  %v9446_v63 = vpack.c.bf16 %v9384_v25, %v9384_v25  ;;  %v22799_v34 = vunpack.c.l.b16 %v9444_v15 }
 0x8c6   :  { %v9207_v53 = vmax.f32 %v9205_v40, %v9206_v12  ;;  %v9220_v18 = vrot.slane %v9219_v3, 2  ;;  %v9224_v28 = vsel %vm760_vm0, %v22761_v11, -inf  ;;  %v9201_v62 = vrot.slane %v9200_v31, 1 }
 0x8c7   :  { %v9447_v39 = vpack.c.bf16 %v22797_v42, %v22797_v42  ;;  %v22803_v0 = vunpack.c.l.b16 %v9445_v9  ;;  %v22805_v16 = vunpack.c.l.b16 %v9446_v63  ;;  %v9214_v41 = vmax.f32 %v9212_v54, %v9213_v7 }
 0x8c8   :  { %v9208_v58 = vrot.slane %v9207_v53, 1  ;;  %v9221_v6 = vmax.f32 %v9219_v3, %v9220_v18  ;;  %v9225_v22 = vrot.slane %v9224_v28, 4  ;;  %v9231_v19 = vsel %vm760_vm0, %v9060_v30, -inf }
 0x8c9   :  { %v9238_v45 = vsel %vm760_vm0, %v22770_v29, -inf  ;;  %v9245_v52 = vsel %vm760_vm0, %v9061_v49, -inf  ;;  %v22813_v10 = vmax.f32 %v9200_v31, %v9201_v62  ;;  %v9215_v1 = vrot.slane %v9214_v41, 1 }
 0x8ca   :  { %v22815_v24 = vmax.f32 %v9207_v53, %v9208_v58  ;;  %v9222_v40 = vrot.slane %v9221_v6, 1  ;;  %v9226_v35 = vmax.f32 %v9224_v28, %v9225_v22  ;;  %v9232_v11 = vrot.slane %v9231_v19, 4 }
 0x8cb   :  { %v9239_v43 = vrot.slane %v9238_v45, 4  ;;  %v9246_v5 = vrot.slane %v9245_v52, 4  ;;  %v22817_v25 = vmax.f32 %v9214_v41, %v9215_v1  ;;  %v9252_v30 = vsel %vm760_vm0, %v22776_v59, -inf }
 0x8cc   :  { %v22819_v48 = vmax.f32 %v9221_v6, %v9222_v40  ;;  %v9259_v29 = vsel %vm760_vm0, %v9077_v14, -inf  ;;  %v9227_v49 = vrot.slane %v9226_v35, 2  ;;  %v9233_v15 = vmax.f32 %v9231_v19, %v9232_v11 }
 0x8cd   :  { %v9240_v44 = vmax.f32 %v9238_v45, %v9239_v43  ;;  %v9247_v12 = vmax.f32 %v9245_v52, %v9246_v5  ;;  %v9253_v54 = vrot.slane %v9252_v30, 4  ;;  %v9260_v3 = vrot.slane %v9259_v29, 4 }
 0x8ce   :  { %v9266_v9 = vsel %vm760_vm0, %v22781_v21, -inf  ;;  %v9273_v63 = vsel %vm760_vm0, %v9078_v57, -inf  ;;  %v9228_v31 = vmax.f32 %v9226_v35, %v9227_v49  ;;  %v9234_v53 = vrot.slane %v9233_v15, 2 }
 0x8cf   :  { %v9241_v7 = vrot.slane %v9240_v44, 2  ;;  %v9248_v59 = vrot.slane %v9247_v12, 2  ;;  %v9254_v18 = vmax.f32 %v9252_v30, %v9253_v54  ;;  %v9261_v14 = vmax.f32 %v9259_v29, %v9260_v3 }
 0x8d0   :  { %v9267_v28 = vrot.slane %v9266_v9, 4  ;;  %v9274_v62 = vrot.slane %v9273_v63, 4  ;;  %v9229_v58 = vrot.slane %v9228_v31, 1  ;;  %v9235_v41 = vmax.f32 %v9233_v15, %v9234_v53 }
 0x8d1   :  { %v9242_v6 = vmax.f32 %v9240_v44, %v9241_v7  ;;  %v9249_v22 = vmax.f32 %v9247_v12, %v9248_v59  ;;  %v9255_v19 = vrot.slane %v9254_v18, 2  ;;  %v9262_v45 = vrot.slane %v9261_v14, 2 }
 0x8d2   :  { %v9268_v52 = vmax.f32 %v9266_v9, %v9267_v28  ;;  %v9275_v1 = vmax.f32 %v9273_v63, %v9274_v62  ;;  %v9230_v40 = vmax.f32 %v9228_v31, %v9229_v58  ;;  %v9236_v21 = vrot.slane %v9235_v41, 1 }
 0x8d3   :  { %v9243_v11 = vrot.slane %v9242_v6, 1  ;;  %v9250_v57 = vrot.slane %v9249_v22, 1  ;;  %v9256_v35 = vmax.f32 %v9254_v18, %v9255_v19  ;;  %v9263_v43 = vmax.f32 %v9261_v14, %v9262_v45 }
 0x8d4   :  { %v9269_v5 = vrot.slane %v9268_v52, 2  ;;  %v9276_v49 = vrot.slane %v9275_v1, 2  ;;  %v9237_v30 = vmax.f32 %v9235_v41, %v9236_v21  ;;  %v9280_v15 = vsel %vm760_vm0, %v22791_v55, -inf }
 0x8d5   :  { %v9244_v29 = vmax.f32 %v9242_v6, %v9243_v11  ;;  %v9251_v54 = vmax.f32 %v9249_v22, %v9250_v57  ;;  %v9257_v44 = vrot.slane %v9256_v35, 1  ;;  %v9264_v12 = vrot.slane %v9263_v43, 1 }
 0x8d6   :  { %v9270_v3 = vmax.f32 %v9268_v52, %v9269_v5  ;;  %v9277_v53 = vmax.f32 %v9275_v1, %v9276_v49  ;;  %v9281_v9 = vrot.slane %v9280_v15, 4  ;;  %v9420_v63 = vpack.c.bf16 %v22813_v10, %v22813_v10 }
 0x8d7   :  { %v9421_v31 = vpack.c.bf16 %v22815_v24, %v22815_v24  ;;  %v9422_v7 = vpack.c.bf16 %v22817_v25, %v22817_v25  ;;  %v9258_v59 = vmax.f32 %v9256_v35, %v9257_v44  ;;  %v9265_v18 = vmax.f32 %v9263_v43, %v9264_v12 }
 0x8d8   :  { %v9271_v14 = vrot.slane %v9270_v3, 1  ;;  %v9278_v28 = vrot.slane %v9277_v53, 1  ;;  %v9282_v62 = vmax.f32 %v9280_v15, %v9281_v9  ;;  %v9423_v58 = vpack.c.bf16 %v22819_v48, %v22819_v48 }
 0x8d9   :  { %v9424_v41 = vpack.c.bf16 %v9230_v40, %v9230_v40  ;;  %v9425_v6 = vpack.c.bf16 %v9237_v30, %v9237_v30  ;;  %v9426_v45 = vpack.c.bf16 %v9244_v29, %v9244_v29  ;;  %v9427_v10 = vpack.c.bf16 %v9251_v54, %v9251_v54 }
 0x8da   :  { %v9272_v22 = vmax.f32 %v9270_v3, %v9271_v14  ;;  %v9279_v19 = vmax.f32 %v9277_v53, %v9278_v28  ;;  %v9283_v52 = vrot.slane %v9282_v62, 2  ;;  %v9428_v1 = vpack.c.bf16 %v9258_v59, %v9258_v59 }
 0x8db   :  { %v9429_v24 = vpack.c.bf16 %v9265_v18, %v9265_v18  ;;  %v9478_v21 = vunpack.c.l.b16 %v9420_v63  ;;  %v22843_v57 = vunpack.c.l.b16 %v9421_v31  ;;  %v22845_v35 = vunpack.c.l.b16 %v9422_v7 }
 0x8dc   :  { %v9430_v11 = vpack.c.bf16 %v9272_v22, %v9272_v22  ;;  %v9431_v25 = vpack.c.bf16 %v9279_v19, %v9279_v19  ;;  %v9284_v43 = vmax.f32 %v9282_v62, %v9283_v52  ;;  %v22847_v5 = vunpack.c.l.b16 %v9424_v41 }
 0x8dd   :  { %v22849_v48 = vunpack.c.l.b16 %v9425_v6  ;;  %v22851_v40 = vunpack.c.l.b16 %v9426_v45  ;;  %v22853_v49 = vunpack.c.l.b16 %v9428_v1  ;;  %v22855_v30 = vunpack.c.l.b16 %v9429_v24 }
 0x8de   :  { %v22857_v29 = vunpack.c.l.b16 %v9430_v11  ;;  %v22859_v54 = vunpack.c.l.b16 %v9423_v58  ;;  %v9285_v15 = vrot.slane %v9284_v43, 1  ;;  %v22861_v44 = vunpack.c.l.b16 %v9427_v10 }
 0x8df   :  { %v22863_v12 = vunpack.c.l.b16 %v9431_v25  ;;  %v9617_v3 = vsel %vm6830_vm10, %v22843_v57, %v9478_v21  ;;  %v9620_v9 = vsel %vm6830_vm10, %v22849_v48, %v22847_v5  ;;  %v9623_v63 = vsel %vm6830_vm10, %v22855_v30, %v22853_v49 }
 0x8e0   :  { %v9618_v53 = vsel %vm6648_vm11, %v22845_v35, %v9617_v3  ;;  %v8990_v31 = vadd.f32 %v22719_v27, %v22735_v36  ;;  %v9286_v7 = vmax.f32 %v9284_v43, %v9285_v15  ;;  %v9621_v18 = vsel %vm6648_vm11, %v22851_v40, %v9620_v9 }
 0x8e1   :  { %v22879_v59 = vsel %vm6650_vm12, %v22859_v54, %v9618_v53  ;;  %v9624_v14 = vsel %vm6648_vm11, %v22857_v29, %v9623_v63  ;;  %v9622_v28 = vsel %vm6650_vm12, %v22861_v44, %v9621_v18  ;;  %v8991_v58 = vadd.f32 %v22719_v27, %v22749_v13 }
 0x8e2   :  { %v22889_v62 = vsel %vm6650_vm12, %v22863_v12, %v9624_v14  ;;  %v9635_v36 = vpack.c.b16 %v22879_v59, %v22879_v59  ;;  %v9432_v41 = vpack.c.bf16 %v9286_v7, %v9286_v7  ;;  %v9004_v22 = vmax.f32 %v22753_v46, 0.0 }
 0x8e3   :  { %v13387_v6 = vpack.c.b16 %v22889_v62, %v9622_v28  ;;  %v9005_v19 = vmax.f32 %v22765_v23, 0.0  ;;  %v9006_v10 = vmax.f32 %v8990_v31, 0.0  ;;  %v9007_v52 = vmax.f32 %v8991_v58, 0.0 }
 0x8e4   :  { %v9658_v45 = vcombine.low %v25897_v51, %v9635_v36  ;;  %v22902_v1 = vunpack.c.l.b16 %v9447_v39  ;;  %v9632_v46 = vsel %vm6830_vm10, %v22803_v0, %v22799_v34  ;;  %v9502_v42 = vsel %vm6648_vm11, %v22843_v57, %v9478_v21 }
 0x8e5   :  { %v9673_v13 = vrot.slane %v13387_v6, %v25985_v8  ;;  %v9016_v11 = vmax.f32 %v9004_v22, %v9005_v19  ;;  %v9017_v25 = vmax.f32 %v9006_v10, %v9007_v52  ;;  %v9633_v43 = vsel %vm6648_vm11, %v22805_v16, %v9632_v46 }
 0x8e6   :  { %v9666_v23 = vrot.slane %v9658_v45, %v25985_v8  ;;  %v22915_v39 = vunpack.c.l.b16 %v9432_v41  ;;  %v22920_v53 = vsel %vm6650_vm12, %v22902_v1, %v9633_v43  ;;  %v22925_v7 = vsel %vm6650_vm12, %v22845_v35, %v9502_v42 }
 0x8e7   :  { %v9096_v15 = vcombine.high %v9016_v11, %v9016_v11  ;;  %v9103_v3 = vrot.slane %v9016_v11, %v25985_v8  ;;  %v9113_v63 = vcombine.high %v9017_v25, %v9017_v25  ;;  %v9120_v31 = vrot.slane %v9017_v25, %v25985_v8 }
 0x8e8   :  { %v9674_v9 = vcombine.low %v9666_v23, %v9673_v13  ;;  %v22932_v28 = vsel %vm6648_vm11, %v22849_v48, %v22847_v5 }
 0x8e9   :  { %v9110_v18 = vrot.slane %v9096_v15, %v25985_v8  ;;  %v9111_v21 = vcombine.high %v9103_v3, %v9103_v3  ;;  %v9308_v14 = vsel %vm760_vm0, %v9103_v3, -inf  ;;  %v9127_v36 = vrot.slane %v9113_v63, %v25985_v8 }
 0x8ea   :  { %15168 = vmatprep.mubr.bf16.mxu1 %v9674_v9  ;;  %v9128_v58 = vcombine.high %v9120_v31, %v9120_v31  ;;  %v9309_v41 = vrot.slane %v9308_v14, 4  ;;  %v9336_v6 = vsel %vm760_vm0, %v9120_v31, -inf }
 0x8eb   :  { %v9112_v22 = vcombine.high %v9110_v18, %v9110_v18  ;;  %v9315_v19 = vsel %vm760_vm0, %v9111_v21, -inf  ;;  %v9322_v45 = vsel %vm760_vm0, %v9110_v18, -inf  ;;  %v9337_v10 = vrot.slane %v9336_v6, 4 }
 0x8ec   :  { %v9129_v52 = vcombine.high %v9127_v36, %v9127_v36  ;;  %v9310_v13 = vmax.f32 %v9308_v14, %v9309_v41  ;;  %v9316_v11 = vrot.slane %v9315_v19, 4  ;;  %v9323_v46 = vrot.slane %v9322_v45, 4 }
 0x8ed   :  { %v9329_v23 = vsel %vm760_vm0, %v9112_v22, -inf  ;;  %v9338_v25 = vmax.f32 %v9336_v6, %v9337_v10  ;;  %v9343_v43 = vsel %vm760_vm0, %v9128_v58, -inf  ;;  %v9350_v42 = vsel %vm760_vm0, %v9127_v36, -inf }
 0x8ee   :  { %v9311_v15 = vrot.slane %v9310_v13, 2  ;;  %v9317_v3 = vmax.f32 %v9315_v19, %v9316_v11  ;;  %v9324_v9 = vmax.f32 %v9322_v45, %v9323_v46  ;;  %v9330_v63 = vrot.slane %v9329_v23, 4 }
 0x8ef   :  { %v9339_v31 = vrot.slane %v9338_v25, 2  ;;  %v9344_v21 = vrot.slane %v9343_v43, 4  ;;  %v9351_v47 = vrot.slane %v9350_v42, 4  ;;  %v9357_v18 = vsel %vm760_vm0, %v9129_v52, -inf }
 0x8f0   :  { %v9312_v50 = vmax.f32 %v9310_v13, %v9311_v15  ;;  %v9318_v14 = vrot.slane %v9317_v3, 2  ;;  %v9325_v41 = vrot.slane %v9324_v9, 2  ;;  %v9331_v61 = vmax.f32 %v9329_v23, %v9330_v63 }
 0x8f1   :  { %v9340_v24 = vmax.f32 %v9338_v25, %v9339_v31  ;;  %v9345_v22 = vmax.f32 %v9343_v43, %v9344_v21  ;;  %v9352_v6 = vmax.f32 %v9350_v42, %v9351_v47  ;;  %v9358_v10 = vrot.slane %v9357_v18, 4 }
 0x8f2   :  { %v9313_v58 = vrot.slane %v9312_v50, 1  ;;  %v9319_v33 = vmax.f32 %v9317_v3, %v9318_v14  ;;  %v9326_v36 = vmax.f32 %v9324_v9, %v9325_v41  ;;  %v9332_v60 = vrot.slane %v9331_v61, 2 }
 0x8f3   :  { %v9341_v19 = vrot.slane %v9340_v24, 1  ;;  %v9346_v45 = vrot.slane %v9345_v22, 2  ;;  %v9353_v11 = vrot.slane %v9352_v6, 2  ;;  %v9359_v46 = vmax.f32 %v9357_v18, %v9358_v10 }
 0x8f4   :  { %v9314_v32 = vmax.f32 %v9312_v50, %v9313_v58  ;;  %v9320_v20 = vrot.slane %v9319_v33, 1  ;;  %v9327_v38 = vrot.slane %v9326_v36, 1  ;;  %v9333_v52 = vmax.f32 %v9331_v61, %v9332_v60 }
 0x8f5   :  { %v9342_v13 = vmax.f32 %v9340_v24, %v9341_v19  ;;  %v9347_v15 = vmax.f32 %v9345_v22, %v9346_v45  ;;  %v9354_v26 = vmax.f32 %v9352_v6, %v9353_v11  ;;  %v9360_v23 = vrot.slane %v9359_v46, 2 }
 0x8f6   :  { %v9321_v25 = vmax.f32 %v9319_v33, %v9320_v20  ;;  %v9328_v43 = vmax.f32 %v9326_v36, %v9327_v38  ;;  %v9334_v47 = vrot.slane %v9333_v52, 1  ;;  %v9436_v42 = vpack.c.bf16 %v9314_v32, %v9314_v32 }
 0x8f7   :  { %v9348_v63 = vrot.slane %v9347_v15, 1  ;;  %v9355_v3 = vrot.slane %v9354_v26, 1  ;;  %v9361_v9 = vmax.f32 %v9359_v46, %v9360_v23  ;;  %v9440_v31 = vpack.c.bf16 %v9342_v13, %v9342_v13 }
 0x8f8   :  { %v9335_v21 = vmax.f32 %v9333_v52, %v9334_v47  ;;  %v9437_v14 = vpack.c.bf16 %v9321_v25, %v9321_v25  ;;  %v9438_v41 = vpack.c.bf16 %v9328_v43, %v9328_v43  ;;  %v9490_v18 = vunpack.c.l.b16 %v9436_v42 }
 0x8f9   :  { %v9349_v50 = vmax.f32 %v9347_v15, %v9348_v63  ;;  %v9356_v10 = vmax.f32 %v9354_v26, %v9355_v3  ;;  %v9362_v58 = vrot.slane %v9361_v9, 1  ;;  %v22942_v60 = vunpack.c.l.b16 %v9440_v31 }
 0x8fa   :  { %v9439_v61 = vpack.c.bf16 %v9335_v21, %v9335_v21  ;;  %v22944_v24 = vunpack.c.l.b16 %v9437_v14  ;;  %v9492_v33 = vunpack.c.l.b16 %v9438_v41  ;;  %v9505_v38 = vsel %vm6650_vm12, %v22851_v40, %v22932_v28 }
 0x8fb   :  { %v9363_v20 = vmax.f32 %v9361_v9, %v9362_v58  ;;  %v9441_v32 = vpack.c.bf16 %v9349_v50, %v9349_v50  ;;  %v9442_v22 = vpack.c.bf16 %v9356_v10, %v9356_v10  ;;  %v9506_v6 = vsel %vm6648_vm11, %v22855_v30, %v22853_v49 }
 0x8fc   :  { %v22952_v36 = vunpack.c.l.b16 %v9439_v61  ;;  %v9626_v26 = vsel %vm6830_vm10, %v22944_v24, %v9490_v18  ;;  %v9507_v19 = vsel %vm6650_vm12, %v22857_v29, %v9506_v6  ;;  %v9518_v45 = vpack.c.b16 %v22925_v7, %v22925_v7 }
 0x8fd   :  { %v9443_v28 = vpack.c.bf16 %v9363_v20, %v9363_v20  ;;  %v22960_v11 = vunpack.c.l.b16 %v9441_v32  ;;  %v22962_v46 = vunpack.c.l.b16 %v9442_v22  ;;  %v9627_v52 = vsel %vm6648_vm11, %v9492_v33, %v9626_v26 }
 0x8fe   :  { %v22967_v13 = vsel %vm6650_vm12, %v22952_v36, %v9627_v52  ;;  %v9519_v15 = vpack.c.b16 %v9505_v38, %v9505_v38  ;;  %v9520_v23 = vpack.c.b16 %v9507_v19, %v9507_v19  ;;  %v22971_v25 = vsel %vm16543_vm4, 0, %v9518_v45 }
 0x8ff   :  { %v22973_v43 = vunpack.c.l.b16 %v9443_v28  ;;  %v9629_v7 = vsel %vm6830_vm10, %v22960_v11, %v22942_v60  ;;  %v9638_v47 = vpack.c.b16 %v22967_v13, %v22967_v13  ;;  %v9797_v42 = vcombine.low %v25897_v51, %v22971_v25 }
 0x900   :  { %v9630_v63 = vsel %vm6648_vm11, %v22962_v46, %v9629_v7  ;;  %v22986_v3 = vsel %vm16543_vm4, 0, %v9519_v15  ;;  %v22990_v9 = vsel %vm16543_vm4, 0, %v9520_v23  ;;  %v9510_v31 = vsel %vm6648_vm11, %v22944_v24, %v9490_v18 }
 0x901   :  { %v9631_v21 = vsel %vm6650_vm12, %v22973_v43, %v9630_v63  ;;  %v9675_v14 = vcombine.low %v25897_v51, %v9638_v47  ;;  %v9798_v41 = vcombine.low %v22986_v3, %v22990_v9  ;;  %v9805_v50 = vrot.slane %v9797_v42, %v25985_v8  ;;  %v16128_v47 = vld [vmem:[%s24215_s7 + $0x8] sm:$0xff]  }
 0x902   :  { %v13388_v10 = vpack.c.b16 %v22920_v53, %v9631_v21  ;;  %v9511_v58 = vsel %vm6650_vm12, %v9492_v33, %v9510_v31  ;;  %v9512_v61 = vsel %vm6648_vm11, %v22960_v11, %v22942_v60  ;;  %v9514_v18 = vsel %vm6648_vm11, %v22803_v0, %v22799_v34 }
 0x903   :  { %v9683_v38 = vrot.slane %v9675_v14, %v25985_v8  ;;  %v23010_v20 = vrot.slane %v9798_v41, %v25985_v8  ;;  %v9513_v32 = vsel %vm6650_vm12, %v22962_v46, %v9512_v61  ;;  %v9515_v22 = vsel %vm6650_vm12, %v22805_v16, %v9514_v18 }
 0x904   :  { %v9690_v6 = vrot.slane %v13388_v10, %v25985_v8  ;;  %v9522_v26 = vpack.c.b16 %v9511_v58, %v9511_v58  ;;  %v9523_v19 = vpack.c.b16 %v9513_v32, %v9513_v32  ;;  %v9524_v45 = vpack.c.b16 %v9515_v22, %v9515_v22 }
 0x905   :  { %v9813_v28 = vcombine.low %v9805_v50, %v23010_v20  ;;  %v9558_v52 = vsel %vm6830_vm10, %v22845_v35, %v22843_v57  ;;  %v9560_v15 = vsel %vm6830_vm10, %v22851_v40, %v22849_v48  ;;  %v9562_v23 = vsel %vm6830_vm10, %v22857_v29, %v22855_v30 }
 0x906   :  { %v9691_v7 = vcombine.low %v9683_v38, %v9690_v6  ;;  %v23032_v42 = vsel %vm16543_vm4, 0, %v9522_v26  ;;  %v23036_v57 = vsel %vm16543_vm4, 0, %v9523_v19  ;;  %v23040_v35 = vsel %vm16543_vm4, 0, %v9524_v45 }
 0x907   :  { %v9814_v63 = vcombine.low %v25897_v51, %v23032_v42  ;;  %v9815_v31 = vcombine.low %v23036_v57, %v23040_v35  ;;  %v9559_v21 = vsel %vm6648_vm11, %v22859_v54, %v9558_v52  ;;  %v9561_v14 = vsel %vm6648_vm11, %v22861_v44, %v9560_v15  ;;  %v16430_v54 = vld [vmem:[%s24215_s7] sm:$0xff]  }
 0x908   :  { %15169 = vmatmul.mubr.bf16.vlgmr.msra.gmra.mrb[80].mxu1 %v9691_v7  ;;  %v9563_v50 = vsel %vm6648_vm11, %v22863_v12, %v9562_v23  ;;  %v9574_v10 = vpack.c.b16 %v9559_v21, %v9559_v21  ;;  %v9575_v58 = vpack.c.b16 %v9561_v14, %v9561_v14  ;;  %v9566_v61 = vsel %vm6830_vm10, %v9492_v33, %v22944_v24  ;;  %v16129_v24 = vld [vmem:[%s24215_s7 + $0x10] sm:$0xff]  }
 0x909   :  { %15173 = vmatpush3.bf16.msra.mxu1 %v16430_v54  ;;  %15188 = vmatprep.mubr.bf16.mxu1 %v9813_v28  ;;  %v9822_v18 = vrot.slane %v9814_v63, %v25985_v8  ;;  %v23065_v38 = vrot.slane %v9815_v31, %v25985_v8  ;;  %v9576_v32 = vpack.c.b16 %v9563_v50, %v9563_v50 }
 0x90a   :  { %v25988_v22 = vcombine.high %v22791_v55, %v22791_v55  ;;  %15174 = vmatprep.subr.bf16.mxu1 %v16128_v47  ;;  %v23076_v33 = vsel %vm23052_vm7, %v9574_v10, 0  ;;  %v23080_v26 = vsel %vm23052_vm7, %v9575_v58, 0  ;;  %v9567_v19 = vsel %vm6648_vm11, %v22952_v36, %v9566_v61  ;;  %v16130_v58 = vld [vmem:[%s24215_s7 + $0x18] sm:$0xff]  }
 0x90b   :  { %v9568_v55 = vsel %vm6830_vm10, %v22962_v46, %v22960_v11  ;;  %v23088_v45 = vcombine.low %v9822_v18, %v23065_v38  ;;  %v23092_v28 = vsel %vm23052_vm7, %v9576_v32, 0  ;;  %v9953_v52 = vcombine.low %v25897_v51, %v23076_v33 }
 0x90c   :  { %v9287_v6 = vsel %vm760_vm0, %v25988_v22, -inf  ;;  %v9569_v15 = vsel %vm6648_vm11, %v22973_v43, %v9568_v55  ;;  %v9954_v36 = vcombine.low %v23080_v26, %v23092_v28  ;;  %v9570_v23 = vsel %vm6830_vm10, %v22805_v16, %v22803_v0 }
 0x90d   :  { %v9578_v7 = vpack.c.b16 %v9567_v19, %v9567_v19  ;;  %v9579_v63 = vpack.c.b16 %v9569_v15, %v9569_v15  ;;  %15175 = vmatpush3.bf16.msra.mxu1 %v16128_v47  ;;  %v9961_v31 = vrot.slane %v9953_v52, %v25985_v8  ;;  %v9571_v21 = vsel %vm6648_vm11, %v22902_v1, %v9570_v23 }
 0x90e   :  { %v25989_v14 = vcombine.high %v22755_v17, %v22755_v17  ;;  %v9288_v10 = vrot.slane %v9287_v6, 4  ;;  %15176 = vmatprep.subr.bf16.mxu1 %v16129_v24  ;;  %v23114_v61 = vrot.slane %v9954_v36, %v25985_v8  ;;  %v9580_v47 = vpack.c.b16 %v9571_v21, %v9571_v21 }
 0x90f   :  { %v23118_v54 = vsel %vm23052_vm7, %v9578_v7, 0  ;;  %v23122_v18 = vsel %vm23052_vm7, %v9579_v63, 0  ;;  %v10109_v19 = vcombine.low %v22971_v25, %v22986_v3  ;;  %v8972_v36 = vmul.f32 %v22688_v4, %v22706_v37  ;;  %v16131_v7 = vld [vmem:[%s24215_s7 + $0x20] sm:$0xff]  }
 0x910   :  { %v9093_v50 = vrot.slane %v25989_v14, %v25985_v8  ;;  %v9970_v17 = vcombine.low %v25897_v51, %v23118_v54  ;;  %v9289_v32 = vmax.f32 %v9287_v6, %v9288_v10  ;;  %v23130_v55 = vcombine.low %v9961_v31, %v23114_v61 }
 0x911   :  { %v23134_v52 = vsel %vm23052_vm7, %v9580_v47, 0  ;;  %v10267_v6 = vsel %vm6652_vm13, %v22915_v39, %v22889_v62  ;;  %15177 = vmatpush3.bf16.msra.mxu1 %v16129_v24  ;;  %v8973_v4 = vmul.f32 %v22691_v56, %v22706_v37  ;;  %v8994_v31 = vadd.f32 %v22719_v27, %v8972_v36 }
 0x912   :  { %v9294_v22 = vsel %vm760_vm0, %v9093_v50, -inf  ;;  %v9971_v23 = vcombine.low %v23122_v18, %v23134_v52  ;;  %v9978_v25 = vrot.slane %v9970_v17, %v25985_v8  ;;  %v9290_v3 = vrot.slane %v9289_v32, 2  ;;  %15178 = vmatprep.subr.bf16.mxu1 %v16130_v58 }
 0x913   :  { %v9295_v15 = vrot.slane %v9294_v22, 4  ;;  %v10126_v62 = vcombine.low %v23032_v42, %v23036_v57  ;;  %v9095_v14 = vcombine.high %v9093_v50, %v9093_v50  ;;  %v10263_v10 = vsel %vm6652_vm13, %v22847_v5, %v22879_v59  ;;  %v16132_v59 = vld [vmem:[%s24215_s7 + $0x28] sm:$0xff]  }
 0x914   :  { %v23153_v24 = vrot.slane %v9971_v23, %v25985_v8  ;;  %v9291_v21 = vmax.f32 %v9289_v32, %v9290_v3  ;;  %v23159_v17 = vrot.slane %v10109_v19, %v25985_v8  ;;  %v8995_v56 = vadd.f32 %v22719_v27, %v8973_v4 }
 0x915   :  { %v9296_v63 = vmax.f32 %v9294_v22, %v9295_v15  ;;  %v9010_v37 = vmax.f32 %v8994_v31, 0.0  ;;  %15179 = vmatpush3.bf16.msra.mxu1 %v16130_v58  ;;  %v9301_v57 = vsel %vm760_vm0, %v9095_v14, -inf  ;;  %v10264_v50 = vsel %vm6654_vm14, %v22849_v48, %v10263_v10 }
 0x916   :  { %25990 = vst [vmem:[#allocation76_spill] sm:$0xff] %v23153_v24  ;;  %v23163_v22 = vcombine.low %v9978_v25, %v23153_v24  ;;  %v9292_v42 = vrot.slane %v9291_v21, 1  ;;  %15180 = vmatprep.subr.bf16.mxu1 %v16131_v7  ;;  %v9011_v19 = vmax.f32 %v8995_v56, 0.0  ;;  %v9302_v15 = vrot.slane %v9301_v57, 4 }
 0x917   :  { %v9297_v47 = vrot.slane %v9296_v63, 2  ;;  %v10265_v27 = vsel %vm6656_vm15, %v22851_v40, %v10264_v50  ;;  %v23174_v36 = vrot.slane %v10126_v62, %v25985_v8  ;;  %v10271_v23 = vsel %vm6652_vm13, %v22942_v60, %v22967_v13 }
 0x918   :  { %25991 = vst [vmem:[#allocation83_spill] sm:$0xff] %v23163_v22  ;;  %v9293_v58 = vmax.f32 %v9291_v21, %v9292_v42  ;;  %v10403_v25 = vcombine.low %v23076_v33, %v23080_v26  ;;  %v9019_v4 = vmax.f32 %v9010_v37, %v9011_v19  ;;  %v9303_v31 = vmax.f32 %v9301_v57, %v9302_v15  ;;  %v16133_v33 = vld [vmem:[%s24215_s7 + $0x30] sm:$0xff]  }
 0x919   :  { %v9298_v32 = vmax.f32 %v9296_v63, %v9297_v47  ;;  %v10272_v63 = vsel %vm6654_vm14, %v22960_v11, %v10271_v23  ;;  %15181 = vmatpush3.bf16.msra.mxu1 %v16131_v7  ;;  %v23185_v21 = vsel %vm6658_vm1, %v22861_v44, %v10265_v27  ;;  %v10420_v13 = vcombine.low %v23118_v54, %v23122_v18 }
 0x91a   :  { %v9433_v14 = vpack.c.bf16 %v9293_v58, %v9293_v58  ;;  %v10273_v62 = vsel %vm6656_vm15, %v22962_v46, %v10272_v63  ;;  %15182 = vmatprep.subr.bf16.mxu1 %v16132_v59  ;;  %v9147_v10 = vcombine.high %v9019_v4, %v9019_v4  ;;  %v9154_v7 = vrot.slane %v9019_v4, %v25985_v8 }
 0x91b   :  { %v9299_v3 = vrot.slane %v9298_v32, 1  ;;  %v9304_v47 = vrot.slane %v9303_v31, 2  ;;  %v23199_v37 = vsel %vm6658_vm1, %v22973_v43, %v10273_v62  ;;  %v23202_v42 = vrot.slane %v10403_v25, %v25985_v8 }
 0x91c   :  { %v23195_v56 = vunpack.c.l.b16 %v9433_v14  ;;  %v10695_v54 = vrot.slane %v22849_v48, 7  ;;  %v9161_v57 = vrot.slane %v9147_v10, %v25985_v8  ;;  %v9162_v50 = vcombine.high %v9154_v7, %v9154_v7  ;;  %v16134_v48 = vld [vmem:[%s24215_s7 + $0x38] sm:$0xff]  }
 0x91d   :  { %v9300_v26 = vmax.f32 %v9298_v32, %v9299_v3  ;;  %v9392_v32 = vsel %vm760_vm0, %v9154_v7, -inf  ;;  %15183 = vmatpush3.bf16.msra.mxu1 %v16132_v59  ;;  %v9305_v27 = vmax.f32 %v9303_v31, %v9304_v47 }
 0x91e   :  { %v9508_v19 = vsel %vm6648_vm11, %v23195_v56, %v22915_v39  ;;  %v9393_v15 = vrot.slane %v9392_v32, 4  ;;  %v10268_v58 = vsel %vm6654_vm14, %v23195_v56, %v10267_v6  ;;  %15184 = vmatprep.subr.bf16.mxu1 %v16133_v33  ;;  %v9399_v25 = vsel %vm760_vm0, %v9162_v50, -inf  ;;  %v16135_v50 = vld [vmem:[%s24215_s7 + $0x80] sm:$0xff]  }
 0x91f   :  { %v9434_v18 = vpack.c.bf16 %v9300_v26, %v9300_v26  ;;  %v9406_v59 = vsel %vm760_vm0, %v9161_v57, -inf  ;;  %v9163_v3 = vcombine.high %v9161_v57, %v9161_v57  ;;  %v9400_v63 = vrot.slane %v9399_v25, 4 }
 0x920   :  { %v9394_v4 = vmax.f32 %v9392_v32, %v9393_v15  ;;  %v9407_v14 = vrot.slane %v9406_v59, 4  ;;  %v9306_v62 = vrot.slane %v9305_v27, 1  ;;  %v10696_v15 = vsel %vm6830_vm10, %v10695_v54, %v22847_v5 }
 0x921   :  { %v23215_v23 = vunpack.c.l.b16 %v9434_v18  ;;  %v9413_v26 = vsel %vm760_vm0, %v9163_v3, -inf  ;;  %15185 = vmatpush3.bf16.msra.mxu1 %v16133_v33  ;;  %v9401_v18 = vmax.f32 %v9399_v25, %v9400_v63  ;;  %v23238_v5 = vrot.slane %v10420_v13, %v25985_v8 }
 0x922   :  { %v9395_v47 = vrot.slane %v9394_v4, 2  ;;  %v9408_v57 = vmax.f32 %v9406_v59, %v9407_v14  ;;  %15186 = vmatprep.subr.bf16.mxu1 %v16134_v48  ;;  %v9307_v32 = vmax.f32 %v9305_v27, %v9306_v62 }
 0x923   :  { %v9509_v31 = vsel %vm6650_vm12, %v23215_v23, %v9508_v19  ;;  %v10269_v6 = vsel %vm6656_vm15, %v23215_v23, %v10268_v58  ;;  %v9564_v10 = vsel %vm6830_vm10, %v23215_v23, %v23195_v56  ;;  %v9414_v19 = vrot.slane %v9413_v26, 4 }
 0x924   :  { %v9521_v7 = vpack.c.b16 %v9509_v31, %v9509_v31  ;;  %v10697_v58 = vrot.slane %v22851_v40, 6  ;;  %v9396_v33 = vmax.f32 %v9394_v4, %v9395_v47  ;;  %v9402_v31 = vrot.slane %v9401_v18, 2  ;;  %v16136_v40 = vld [vmem:[%s24215_s7 + $0x88] sm:$0xff]  }
 0x925   :  { %v9409_v22 = vrot.slane %v9408_v57, 2  ;;  %v9435_v59 = vpack.c.bf16 %v9307_v32, %v9307_v32  ;;  %v9415_v63 = vmax.f32 %v9413_v26, %v9414_v19  ;;  %15187 = vmatpush3.bf16.msra.mxu1 %v16134_v48  ;;  %v10699_v32 = vrot.slane %v22861_v44, 5 }
 0x926   :  { %v9537_v3 = vsel %vm16543_vm4, 0, %v9521_v7  ;;  %v9397_v27 = vrot.slane %v9396_v33, 1  ;;  %v9403_v62 = vmax.f32 %v9401_v18, %v9402_v31  ;;  %15192 = vmatprep.subr.bf16.mxu1 %v16135_v50 }
 0x927   :  { %v10110_v25 = vcombine.low %v22990_v9, %v9537_v3  ;;  %v10557_v14 = vcombine.low %v9537_v3, %v25897_v51  ;;  %v9410_v24 = vmax.f32 %v9408_v57, %v9409_v22  ;;  %v23246_v9 = vunpack.c.l.b16 %v9435_v59 }
 0x928   :  { %v9416_v4 = vrot.slane %v9415_v63, 2  ;;  %v9398_v48 = vmax.f32 %v9396_v33, %v9397_v27  ;;  %v9404_v7 = vrot.slane %v9403_v62, 1  ;;  %v10698_v22 = vsel %vm6648_vm11, %v10697_v58, %v10696_v15  ;;  %15189 = vmatmul.mubr.bf16.vlgmr.msra.gmra.mrb[80].mxu1 %v23088_v45  ;;  %v16137_v45 = vld [vmem:[%s24215_s7 + $0x90] sm:$0xff]  }
 0x929   :  { %v23244_v54 = vrot.slane %v10110_v25, %v25985_v8  ;;  %v10564_v26 = vrot.slane %v10557_v14, %v25985_v8  ;;  %v9411_v47 = vrot.slane %v9410_v24, 1  ;;  %v23255_v18 = vsel %vm6658_vm1, %v23246_v9, %v10269_v6  ;;  %15193 = vmatpush3.bf16.msra.mxu1 %v16135_v50  ;;  %15208 = vmatprep.mubr.bf16.mxu1 %v23130_v55 }
 0x92a   :  { %v9417_v57 = vmax.f32 %v9415_v63, %v9416_v4  ;;  %v9405_v19 = vmax.f32 %v9403_v62, %v9404_v7  ;;  %v9448_v33 = vpack.c.bf16 %v9398_v48, %v9398_v48  ;;  %v10713_v15 = vrot.slane %v23246_v9, 5  ;;  %15194 = vmatprep.subr.bf16.mxu1 %v16136_v40 }
 0x92b   :  { %v10125_v13 = vcombine.low %v23159_v17, %v23244_v54  ;;  %v9412_v3 = vmax.f32 %v9410_v24, %v9411_v47  ;;  %v10279_v6 = vpack.c.b16 %v23255_v18, %v23185_v21  ;;  %v9565_v44 = vsel %vm6648_vm11, %v23246_v9, %v9564_v10  ;;  %v16148_v17 = vld [vmem:[%s24215_s7 + $0xe8] sm:$0xff]   ;;  %v16149_v54 = vld [vmem:[%s24215_s7 + $0xf0] sm:$0xff]  }
 0x92c   :  { %v9418_v58 = vrot.slane %v9417_v57, 1  ;;  %v23268_v50 = vcombine.low %v23010_v20, %v10564_v26  ;;  %v9449_v55 = vpack.c.bf16 %v9405_v19, %v9405_v19  ;;  %v23270_v31 = vunpack.c.l.b16 %v9448_v33  ;;  %v16156_v21 = vld [vmem:[%s24215_s7 + $0x128] sm:$0xff]   ;;  %v16157_v18 = vld [vmem:[%s24215_s7 + $0x130] sm:$0xff]  }
 0x92d   :  { %v9450_v24 = vpack.c.bf16 %v9412_v3, %v9412_v3  ;;  %v9577_v25 = vpack.c.b16 %v9565_v44, %v9565_v44  ;;  %v10700_v63 = vsel %vm6650_vm12, %v10699_v32, %v10698_v22  ;;  %v10701_v14 = vrot.slane %v22853_v49, 4  ;;  %15195 = vmatpush3.bf16.msra.mxu1 %v16136_v40  ;;  %v16138_v49 = vld [vmem:[%s24215_s7 + $0x98] sm:$0xff]   ;;  %v16139_v44 = vld [vmem:[%s24215_s7 + $0xa0] sm:$0xff]  }
 0x92e   :  { %v9419_v59 = vmax.f32 %v9417_v57, %v9418_v58  ;;  %v10703_v27 = vrot.slane %v22855_v30, 3  ;;  %v23275_v62 = vunpack.c.l.b16 %v9449_v55  ;;  %v10275_v20 = vsel %vm6652_vm13, %v23270_v31, %v22920_v53  ;;  %15196 = vmatprep.subr.bf16.mxu1 %v16137_v45 }
 0x92f   :  { %v23277_v4 = vunpack.c.l.b16 %v9450_v24  ;;  %v23284_v10 = vsel %vm23052_vm7, %v9577_v25, 0  ;;  %v10702_v40 = vsel %vm6652_vm13, %v10701_v14, %v10700_v63  ;;  %v10705_v48 = vrot.slane %v22857_v29, 2 }
 0x930   :  { %v9451_v26 = vpack.c.bf16 %v9419_v59, %v9419_v59  ;;  %v10404_v30 = vcombine.low %v23092_v28, %v23284_v10  ;;  %v9516_v53 = vsel %vm6648_vm11, %v23275_v62, %v23270_v31  ;;  %v10276_v7 = vsel %vm6654_vm14, %v23275_v62, %v10275_v20 }
 0x931   :  { %v9572_v47 = vsel %vm6830_vm10, %v23277_v4, %v23275_v62  ;;  %v10704_v22 = vsel %vm6654_vm14, %v10703_v27, %v10702_v40  ;;  %v9517_v28 = vsel %vm6650_vm12, %v23277_v4, %v9516_v53  ;;  %v10277_v29 = vsel %vm6656_vm15, %v23277_v4, %v10276_v7  ;;  %15197 = vmatpush3.bf16.msra.mxu1 %v16137_v45 }
 0x932   :  { %v23304_v57 = vunpack.c.l.b16 %v9451_v26  ;;  %v23309_v32 = vrot.slane %v10404_v30, %v25985_v8  ;;  %v9525_v19 = vpack.c.b16 %v9517_v28, %v9517_v28  ;;  %v10707_v3 = vrot.slane %v22863_v12, 1  ;;  %15198 = vmatprep.subr.bf16.mxu1 %v16138_v49 }
 0x933   :  { %v10709_v33 = vrot.slane %v23195_v56, 7  ;;  %v10711_v58 = vrot.slane %v23215_v23, 6  ;;  %v10706_v12 = vsel %vm6656_vm15, %v10705_v48, %v10704_v22  ;;  %v10719_v20 = vrot.slane %v22960_v11, 7 }
 0x934   :  { %v23319_v55 = vsel %vm6658_vm1, %v23304_v57, %v10277_v29  ;;  %v10419_v24 = vcombine.low %v23202_v42, %v23309_v32  ;;  %v9573_v45 = vsel %vm6648_vm11, %v23304_v57, %v9572_v47  ;;  %v9541_v56 = vsel %vm16543_vm4, 0, %v9525_v19  ;;  %v16164_v42 = vld [vmem:[%s24215_s7 + $0x168] sm:$0xff]   ;;  %v16165_v32 = vld [vmem:[%s24215_s7 + $0x170] sm:$0xff]  }
 0x935   :  { %v10280_v23 = vpack.c.b16 %v23319_v55, %v23199_v37  ;;  %v10737_v25 = vrot.slane %v23304_v57, 5  ;;  %v9581_v59 = vpack.c.b16 %v9573_v45, %v9573_v45  ;;  %v10127_v63 = vcombine.low %v23040_v35, %v9541_v56  ;;  %15199 = vmatpush3.bf16.msra.mxu1 %v16138_v49  ;;  %v16140_v35 = vld [vmem:[%s24215_s7 + $0xa8] sm:$0xff]   ;;  %v25994_v57 = vld [vmem:[#allocation82_spill] sm:$0xff]  ;;  %v16166_v55 = vld [vmem:[%s24215_s7 + $0x178] sm:$0xff]  }
 0x936   :  { %v10566_v14 = vcombine.low %v9541_v56, %v25897_v51  ;;  %v10710_v27 = vsel %vm6830_vm10, %v10709_v33, %v22915_v39  ;;  %v10721_v40 = vrot.slane %v22962_v46, 6  ;;  %v10723_v48 = vrot.slane %v22973_v43, 5  ;;  %15200 = vmatprep.subr.bf16.mxu1 %v16139_v44  ;;  %v25992_v43 = vld [vmem:[#allocation129_spill] sm:$0xff]  ;;  %v25995_v33 = vld [vmem:[#allocation75_spill] sm:$0xff]  ;;  %v16163_v37 = vld [vmem:[%s24215_s7 + $0x160] sm:$0xff]  }
 0x937   :  { %v9600_v26 = vsel %vm23052_vm7, %v9581_v59, 0  ;;  %v10712_v30 = vsel %vm6648_vm11, %v10711_v58, %v10710_v27  ;;  %v23345_v53 = vrot.slane %v10127_v63, %v25985_v8  ;;  %v23353_v46 = vsel %vm6658_vm1, %v10707_v3, %v10706_v12  ;;  %v16141_v3 = vld [vmem:[%s24215_s7 + $0xb0] sm:$0xff]  }
 0x938   :  { %v10421_v39 = vcombine.low %v23134_v52, %v9600_v26  ;;  %v10573_v11 = vrot.slane %v10566_v14, %v25985_v8  ;;  %v10714_v41 = vsel %vm6650_vm12, %v10713_v15, %v10712_v30  ;;  %v10720_v7 = vsel %vm6830_vm10, %v10719_v20, %v22942_v60  ;;  %v25993_v15 = vld [vmem:[#allocation131_spill] sm:$0xff] }
 0x939   :  { %v10715_v49 = vsel %vm6652_vm13, %v25992_v43, %v10714_v41  ;;  %v10725_v47 = vrot.slane %v22799_v34, 4  ;;  %v10142_v52 = vcombine.low %v23174_v36, %v23345_v53  ;;  %15201 = vmatpush3.bf16.msra.mxu1 %v16139_v44  ;;  %v10722_v60 = vsel %vm6648_vm11, %v10721_v40, %v10720_v7  ;;  %v16145_v7 = vld [vmem:[%s24215_s7 + $0xd0] sm:$0xff]   ;;  %v16155_v36 = vld [vmem:[%s24215_s7 + $0x120] sm:$0xff]  }
 0x93a   :  { %v23363_v22 = vrot.slane %v10421_v39, %v25985_v8  ;;  %v23366_v9 = vcombine.low %v23065_v38, %v10573_v11  ;;  %v10716_v28 = vsel %vm6654_vm14, %v25993_v15, %v10715_v49  ;;  %v10727_v34 = vrot.slane %v22803_v0, 3  ;;  %15202 = vmatprep.subr.bf16.mxu1 %v16140_v35  ;;  %v25996_v39 = vld [vmem:[#allocation76_spill] sm:$0xff]  ;;  %v25997_v49 = vld [vmem:[#allocation83_spill] sm:$0xff]  ;;  %v16159_v53 = vld [vmem:[%s24215_s7 + $0x140] sm:$0xff]  }
 0x93b   :  { %v10717_v29 = vsel %vm6656_vm15, %v25994_v57, %v10716_v28  ;;  %v10729_v19 = vrot.slane %v22805_v16, 2  ;;  %v10724_v44 = vsel %vm6650_vm12, %v10723_v48, %v10722_v60  ;;  %v10733_v45 = vrot.slane %v23275_v62, 7  ;;  %v16151_v28 = vld [vmem:[%s24215_s7 + $0x100] sm:$0xff]   ;;  %v16153_v60 = vld [vmem:[%s24215_s7 + $0x110] sm:$0xff]  }
 0x93c   :  { %v10436_v38 = vcombine.low %v23238_v5, %v23363_v22  ;;  %v23382_v58 = vsel %vm6658_vm1, %v25995_v33, %v10717_v29  ;;  %v10726_v16 = vsel %vm6652_vm13, %v10725_v47, %v10724_v44  ;;  %v10735_v12 = vrot.slane %v23277_v4, 6  ;;  %v16142_v4 = vld [vmem:[%s24215_s7 + $0xb8] sm:$0xff]   ;;  %v16152_v29 = vld [vmem:[%s24215_s7 + $0x108] sm:$0xff]   ;;  %v16169_v44 = vld [vmem:[%s24215_s7 + $0x190] sm:$0xff]  }
 0x93d   :  { %v10743_v0 = vpack.c.b16 %v23382_v58, %v23353_v46  ;;  %v10865_v56 = vcombine.low %v23284_v10, %v25897_v51  ;;  %v10728_v59 = vsel %vm6654_vm14, %v10727_v34, %v10726_v16  ;;  %v10734_v63 = vsel %vm6830_vm10, %v10733_v45, %v23270_v31  ;;  %15203 = vmatpush3.bf16.msra.mxu1 %v16140_v35  ;;  %v16146_v47 = vld [vmem:[%s24215_s7 + $0xd8] sm:$0xff]   ;;  %v16171_v5 = vld [vmem:[%s24215_s7 + $0x1a0] sm:$0xff]   ;;  %v16173_v22 = vld [vmem:[%s24215_s7 + $0x1b0] sm:$0xff]  }
 0x93e   :  { %v10874_v14 = vcombine.low %v9600_v26, %v25897_v51  ;;  %v10730_v62 = vsel %vm6656_vm15, %v10729_v19, %v10728_v59  ;;  %v10736_v27 = vsel %vm6648_vm11, %v10735_v12, %v10734_v63  ;;  %15204 = vmatprep.subr.bf16.mxu1 %v16141_v3  ;;  %v10731_v10 = vrot.slane %v22902_v1, 1  ;;  %v16154_v34 = vld [vmem:[%s24215_s7 + $0x118] sm:$0xff]   ;;  %v16161_v19 = vld [vmem:[%s24215_s7 + $0x150] sm:$0xff]   ;;  %v16175_v16 = vld [vmem:[%s24215_s7 + $0x1c0] sm:$0xff]  }
 0x93f   :  { %v10872_v20 = vrot.slane %v10865_v56, %v25985_v8  ;;  %v10738_v30 = vsel %vm6650_vm12, %v10737_v25, %v10736_v27  ;;  %v16143_v25 = vld [vmem:[%s24215_s7 + $0xc0] sm:$0xff]   ;;  %v16170_v45 = vld [vmem:[%s24215_s7 + $0x198] sm:$0xff]   ;;  %v16176_v12 = vld [vmem:[%s24215_s7 + $0x1c8] sm:$0xff]  }
 0x940   :  { %v10881_v31 = vrot.slane %v10874_v14, %v25985_v8  ;;  %v10739_v26 = vsel %vm6652_vm13, %v25992_v43, %v10738_v30  ;;  %v23411_v48 = vsel %vm6658_vm1, %v10731_v10, %v10730_v62  ;;  %v16144_v43 = vld [vmem:[%s24215_s7 + $0xc8] sm:$0xff]   ;;  %v16177_v56 = vld [vmem:[%s24215_s7 + $0x1d0] sm:$0xff]   ;;  %v16178_v59 = vld [vmem:[%s24215_s7 + $0x1d8] sm:$0xff]  }
 0x941   :  { %v23408_v40 = vcombine.low %v23114_v61, %v10872_v20  ;;  %v10740_v35 = vsel %vm6654_vm14, %v25993_v15, %v10739_v26  ;;  %15205 = vmatpush3.bf16.msra.mxu1 %v16141_v3  ;;  %v16147_v15 = vld [vmem:[%s24215_s7 + $0xe0] sm:$0xff]   ;;  %v16162_v3 = vld [vmem:[%s24215_s7 + $0x158] sm:$0xff]   ;;  %v16180_v46 = vld [vmem:[%s24215_s7 + $0x1e8] sm:$0xff]  }
 0x942   :  { %v23416_v11 = vcombine.low %v25996_v39, %v10881_v31  ;;  %v10741_v1 = vsel %vm6656_vm15, %v25994_v57, %v10740_v35  ;;  %15206 = vmatprep.subr.bf16.mxu1 %v16142_v4  ;;  %v16181_v58 = vld [vmem:[%s24215_s7 + $0x1f0] sm:$0xff]   ;;  %v16183_v63 = vld [vmem:[%s24215_s7 + $0x200] sm:$0xff]   ;;  %v16184_v14 = vld [vmem:[%s24215_s7 + $0x208] sm:$0xff]  }
 0x943   :  { %v23425_v61 = vsel %vm6658_vm1, %v25995_v33, %v10741_v1  ;;  %v16185_v62 = vld [vmem:[%s24215_s7 + $0x210] sm:$0xff]   ;;  %v16186_v27 = vld [vmem:[%s24215_s7 + $0x218] sm:$0xff]   ;;  %v16187_v20 = vld [vmem:[%s24215_s7 + $0x220] sm:$0xff]  }
 0x944   :  { %v10744_v41 = vpack.c.b16 %v23425_v61, %v23411_v48  ;;  %v16189_v10 = vld [vmem:[%s24215_s7 + $0x230] sm:$0xff]   ;;  %v16190_v30 = vld [vmem:[%s24215_s7 + $0x238] sm:$0xff]   ;;  %v16191_v31 = vld [vmem:[%s24218_s10 + $0x80] ss:$8 sps:$4 sm:$0xff]  }
 0x945   :  { %15207 = vmatpush3.bf16.msra.mxu1 %v16142_v4  ;;  %v16188_v4 = vld [vmem:[%s24215_s7 + $0x228] sm:$0xff]   ;;  %v16194_v48 = vld [vmem:[%s24218_s10 + $0x90] ss:$8 sps:$4 sm:$0xff]  }
 0x946   :  { %15212 = vmatprep.subr.bf16.mxu1 %v16143_v25  ;;  %v16193_v26 = vld [vmem:[%s24218_s10 + $0x84] ss:$8 sps:$4 sm:$0xff]   ;;  %v16197_v39 = vld [vmem:[%s24218_s10 + $0xa0] ss:$8 sps:$4 sm:$0xff]   ;;  %v16200_v1 = vld [vmem:[%s24218_s10 + $0xb0] ss:$8 sps:$4 sm:$0xff]  }
 0x947   :  { %v16199_v35 = vld [vmem:[%s24218_s10 + $0xa4] ss:$8 sps:$4 sm:$0xff]   ;;  %v16203_v61 = vld [vmem:[%s24218_s10 + $0xc0] ss:$8 sps:$4 sm:$0xff]  }
 0x948   :  { %15209 = vmatmul.mubr.bf16.vlgmr.msra.gmra.mrb[80].mxu1 %v25997_v49  ;;  %v16211_v49 = vld [vmem:[%s24218_s10 + $0xe4] ss:$8 sps:$4 sm:$0xff]  }
 0x949   :  { %15213 = vmatpush3.bf16.msra.mxu1 %v16143_v25  ;;  %15228 = vmatprep.mubr.bf16.mxu1 %v10125_v13  ;;  %v16150_v13 = vld [vmem:[%s24215_s7 + $0xf8] sm:$0xff]   ;;  %v16205_v25 = vld [vmem:[%s24218_s10 + $0xc4] ss:$8 sps:$4 sm:$0xff]  }
 0x94a   :  { %15214 = vmatprep.subr.bf16.mxu1 %v16144_v43 }
 0x94d   :  { %15215 = vmatpush3.bf16.msra.mxu1 %v16144_v43  ;;  %v16206_v43 = vld [vmem:[%s24218_s10 + $0xd0] ss:$8 sps:$4 sm:$0xff]  }
 0x94e   :  { %15216 = vmatprep.subr.bf16.mxu1 %v16145_v7 }
 0x951   :  { %15217 = vmatpush3.bf16.msra.mxu1 %v16145_v7  ;;  %v16209_v7 = vld [vmem:[%s24218_s10 + $0xe0] ss:$8 sps:$4 sm:$0xff]  }
 0x952   :  { %15218 = vmatprep.subr.bf16.mxu1 %v16146_v47 }
 0x955   :  { %15219 = vmatpush3.bf16.msra.mxu1 %v16146_v47  ;;  %v16214_v47 = vld [vmem:[%s24218_s10 + $0xf4] ss:$8 sps:$4 sm:$0xff]  }
 0x956   :  { %15220 = vmatprep.subr.bf16.mxu1 %v16147_v15 }
 0x959   :  { %15221 = vmatpush3.bf16.msra.mxu1 %v16147_v15  ;;  %v16212_v15 = vld [vmem:[%s24218_s10 + $0xf0] ss:$8 sps:$4 sm:$0xff]  }
 0x95a   :  { %15222 = vmatprep.subr.bf16.mxu1 %v16148_v17 }
 0x95d   :  { %15223 = vmatpush3.bf16.msra.mxu1 %v16148_v17  ;;  %v16217_v17 = vld [vmem:[%s24218_s10 + $0x4] ss:$8 sps:$4 sm:$0xff]  }
 0x95e   :  { %15224 = vmatprep.subr.bf16.mxu1 %v16149_v54 }
 0x961   :  { %15225 = vmatpush3.bf16.msra.mxu1 %v16149_v54 }
 0x962   :  { %15226 = vmatprep.subr.bf16.mxu1 %v16150_v13 }
 0x965   :  { %15227 = vmatpush3.bf16.msra.mxu1 %v16150_v13 }
 0x966   :  { %15232 = vmatprep.subr.bf16.mxu1 %v16151_v28 }
 0x968   :  { %15229 = vmatmul.mubr.bf16.vlgmr.msra.gmra.mrb[80].mxu1 %v10142_v52  ;;  %v16160_v52 = vld [vmem:[%s24215_s7 + $0x148] sm:$0xff]  }
 0x969   :  { %15233 = vmatpush3.bf16.msra.mxu1 %v16151_v28  ;;  %15248 = vmatprep.mubr.bf16.mxu1 %v10279_v6  ;;  %v16158_v6 = vld [vmem:[%s24215_s7 + $0x138] sm:$0xff]  }
 0x96a   :  { %15234 = vmatprep.subr.bf16.mxu1 %v16152_v29 }
 0x96d   :  { %15235 = vmatpush3.bf16.msra.mxu1 %v16152_v29 }
 0x96e   :  { %15236 = vmatprep.subr.bf16.mxu1 %v16153_v60 }
 0x971   :  { %15237 = vmatpush3.bf16.msra.mxu1 %v16153_v60 }
 0x972   :  { %15238 = vmatprep.subr.bf16.mxu1 %v16154_v34 }
 0x975   :  { %15239 = vmatpush3.bf16.msra.mxu1 %v16154_v34 }
 0x976   :  { %15240 = vmatprep.subr.bf16.mxu1 %v16155_v36 }
 0x979   :  { %15241 = vmatpush3.bf16.msra.mxu1 %v16155_v36 }
 0x97a   :  { %15242 = vmatprep.subr.bf16.mxu1 %v16156_v21 }
 0x97d   :  { %15243 = vmatpush3.bf16.msra.mxu1 %v16156_v21 }
 0x97e   :  { %15244 = vmatprep.subr.bf16.mxu1 %v16157_v18 }
 0x981   :  { %15245 = vmatpush3.bf16.msra.mxu1 %v16157_v18 }
 0x982   :  { %15246 = vmatprep.subr.bf16.mxu1 %v16158_v6 }
 0x985   :  { %15247 = vmatpush3.bf16.msra.mxu1 %v16158_v6 }
 0x986   :  { %15252 = vmatprep.subr.bf16.mxu1 %v16159_v53 }
 0x988   :  { %15249 = vmatmul.mubr.bf16.vlgmr.msra.gmra.mrb[80].mxu1 %v10280_v23  ;;  %v16168_v23 = vld [vmem:[%s24215_s7 + $0x188] sm:$0xff]  }
 0x989   :  { %15253 = vmatpush3.bf16.msra.mxu1 %v16159_v53  ;;  %15268 = vmatprep.mubr.bf16.mxu1 %v10419_v24  ;;  %v16167_v24 = vld [vmem:[%s24215_s7 + $0x180] sm:$0xff]  }
 0x98a   :  { %15254 = vmatprep.subr.bf16.mxu1 %v16160_v52 }
 0x98d   :  { %15255 = vmatpush3.bf16.msra.mxu1 %v16160_v52 }
 0x98e   :  { %15256 = vmatprep.subr.bf16.mxu1 %v16161_v19 }
 0x991   :  { %15257 = vmatpush3.bf16.msra.mxu1 %v16161_v19 }
 0x992   :  { %15258 = vmatprep.subr.bf16.mxu1 %v16162_v3 }
 0x995   :  { %15259 = vmatpush3.bf16.msra.mxu1 %v16162_v3 }
 0x996   :  { %15260 = vmatprep.subr.bf16.mxu1 %v16163_v37 }
 0x999   :  { %15261 = vmatpush3.bf16.msra.mxu1 %v16163_v37 }
 0x99a   :  { %15262 = vmatprep.subr.bf16.mxu1 %v16164_v42 }
 0x99d   :  { %15263 = vmatpush3.bf16.msra.mxu1 %v16164_v42 }
 0x99e   :  { %15264 = vmatprep.subr.bf16.mxu1 %v16165_v32 }
 0x9a1   :  { %15265 = vmatpush3.bf16.msra.mxu1 %v16165_v32 }
 0x9a2   :  { %15266 = vmatprep.subr.bf16.mxu1 %v16166_v55 }
 0x9a5   :  { %15267 = vmatpush3.bf16.msra.mxu1 %v16166_v55 }
 0x9a6   :  { %15272 = vmatprep.subr.bf16.mxu1 %v16167_v24 }
 0x9a8   :  { %15269 = vmatmul.mubr.bf16.vlgmr.msra.gmra.mrb[80].mxu1 %v10436_v38  ;;  %v16174_v38 = vld [vmem:[%s24215_s7 + $0x1b8] sm:$0xff]  }
 0x9a9   :  { %15273 = vmatpush3.bf16.msra.mxu1 %v16167_v24  ;;  %15288 = vmatprep.mubr.bf16.mxu1 %v23268_v50  ;;  %v16172_v50 = vld [vmem:[%s24215_s7 + $0x1a8] sm:$0xff]  }
 0x9aa   :  { %15274 = vmatprep.subr.bf16.mxu1 %v16168_v23 }
 0x9ad   :  { %15275 = vmatpush3.bf16.msra.mxu1 %v16168_v23 }
 0x9ae   :  { %15276 = vmatprep.subr.bf16.mxu1 %v16169_v44 }
 0x9b1   :  { %15277 = vmatpush3.bf16.msra.mxu1 %v16169_v44 }
 0x9b2   :  { %15278 = vmatprep.subr.bf16.mxu1 %v16170_v45 }
 0x9b5   :  { %15279 = vmatpush3.bf16.msra.mxu1 %v16170_v45 }
 0x9b6   :  { %15280 = vmatprep.subr.bf16.mxu1 %v16171_v5 }
 0x9b9   :  { %15281 = vmatpush3.bf16.msra.mxu1 %v16171_v5 }
 0x9ba   :  { %15282 = vmatprep.subr.bf16.mxu1 %v16172_v50 }
 0x9bd   :  { %15283 = vmatpush3.bf16.msra.mxu1 %v16172_v50 }
 0x9be   :  { %15284 = vmatprep.subr.bf16.mxu1 %v16173_v22 }
 0x9c1   :  { %15285 = vmatpush3.bf16.msra.mxu1 %v16173_v22 }
 0x9c2   :  { %15286 = vmatprep.subr.bf16.mxu1 %v16174_v38 }
 0x9c5   :  { %15287 = vmatpush3.bf16.msra.mxu1 %v16174_v38 }
 0x9c6   :  { %15292 = vmatprep.subr.bf16.mxu1 %v16175_v16 }
 0x9c8   :  { %15289 = vmatmul.mubr.bf16.vlgmr.msra.gmra.mrb[80].mxu1 %v23366_v9  ;;  %v16179_v9 = vld [vmem:[%s24215_s7 + $0x1e0] sm:$0xff]  }
 0x9c9   :  { %15293 = vmatpush3.bf16.msra.mxu1 %v16175_v16  ;;  %15308 = vmatprep.mubr.bf16.mxu1 %v10743_v0  ;;  %v16182_v0 = vld [vmem:[%s24215_s7 + $0x1f8] sm:$0xff]  }
 0x9ca   :  { %15294 = vmatprep.subr.bf16.mxu1 %v16176_v12 }
 0x9cd   :  { %15295 = vmatpush3.bf16.msra.mxu1 %v16176_v12 }
 0x9ce   :  { %15296 = vmatprep.subr.bf16.mxu1 %v16177_v56 }
 0x9d1   :  { %15297 = vmatpush3.bf16.msra.mxu1 %v16177_v56 }
 0x9d2   :  { %15298 = vmatprep.subr.bf16.mxu1 %v16178_v59 }
 0x9d5   :  { %15299 = vmatpush3.bf16.msra.mxu1 %v16178_v59 }
 0x9d6   :  { %15300 = vmatprep.subr.bf16.mxu1 %v16179_v9 }
 0x9d9   :  { %15301 = vmatpush3.bf16.msra.mxu1 %v16179_v9 }
 0x9da   :  { %15302 = vmatprep.subr.bf16.mxu1 %v16180_v46 }
 0x9dd   :  { %15303 = vmatpush3.bf16.msra.mxu1 %v16180_v46  ;;  %v9452_v46 = vld [vmem:[%s24219_s8] sm:$0x1] }
 0x9de   :  { %15304 = vmatprep.subr.bf16.mxu1 %v16181_v58 }
 0x9e1   :  { %15305 = vmatpush3.bf16.msra.mxu1 %v16181_v58 }
 0x9e2   :  { %15306 = vmatprep.subr.bf16.mxu1 %v16182_v0 }
 0x9e5   :  { %15307 = vmatpush3.bf16.msra.mxu1 %v16182_v0 }
 0x9e6   :  { %15312 = vmatprep.subr.bf16.mxu1 %v16183_v63 }
 0x9e8   :  { %15309 = vmatmul.mubr.bf16.vlgmr.msra.gmra.mrb[80].mxu1 %v10744_v41  ;;  %v16208_v41 = vld [vmem:[%s24218_s10 + $0xd4] ss:$8 sps:$4 sm:$0xff]  }
 0x9e9   :  { %15313 = vmatpush3.bf16.msra.mxu1 %v16183_v63  ;;  %15328 = vmatprep.mubr.bf16.mxu1 %v23408_v40  ;;  %v16196_v40 = vld [vmem:[%s24218_s10 + $0x94] ss:$8 sps:$4 sm:$0xff]   ;;  %v9453_v63 = vld [vmem:[%s24220_s9] sm:$0x1] }
 0x9ea   :  { %15314 = vmatprep.subr.bf16.mxu1 %v16184_v14 }
 0x9ed   :  { %15315 = vmatpush3.bf16.msra.mxu1 %v16184_v14 }
 0x9ee   :  { %15316 = vmatprep.subr.bf16.mxu1 %v16185_v62 }
 0x9f1   :  { %15317 = vmatpush3.bf16.msra.mxu1 %v16185_v62  ;;  %v25998_v62 = vld [vmem:[#allocation39_spill] sm:$0xff] }
 0x9f2   :  { %15318 = vmatprep.subr.bf16.mxu1 %v16186_v27 }
 0x9f5   :  { %15319 = vmatpush3.bf16.msra.mxu1 %v16186_v27 }
 0x9f6   :  { %15320 = vmatprep.subr.bf16.mxu1 %v16187_v20 }
 0x9f9   :  { %15321 = vmatpush3.bf16.msra.mxu1 %v16187_v20 }
 0x9fa   :  { %15322 = vmatprep.subr.bf16.mxu1 %v16188_v4 }
 0x9fd   :  { %15323 = vmatpush3.bf16.msra.mxu1 %v16188_v4 }
 0x9fe   :  { %15324 = vmatprep.subr.bf16.mxu1 %v16189_v10 }
 0xa01   :  { %15325 = vmatpush3.bf16.msra.mxu1 %v16189_v10 }
 0xa02   :  { %15326 = vmatprep.subr.bf16.mxu1 %v16190_v30 }
 0xa05   :  { %15327 = vmatpush3.bf16.msra.mxu1 %v16190_v30 }
 0xa06   :  { %11334 = vmatprep.subr.bf16.mxu1 %v16193_v26 }
 0xa08   :  { %15329 = vmatmul.mubr.bf16.vlgmr.msra.gmra.mrb[80].mxu1 %v23416_v11  ;;  %v16202_v11 = vld [vmem:[%s24218_s10 + $0xb4] ss:$8 sps:$4 sm:$0xff]  }
 0xa09   :  { %11366 = vmatprep.mubr.bf16.mxu1 %v25897_v51  ;;  %11335 = vmatpush1.bf16.msra.mxu1 %v16191_v31 }
 0xa0a   :  { %11336 = vmatprep.subr.bf16.mxu1 %v16196_v40  ;;  %v16433_v40 = vmov 1966171168  }
 0xa0d   :  { %11337 = vmatpush1.bf16.msra.mxu1 %v16194_v48  ;;  %v11232_v48 = vunpack.c.l.s4 %v16433_v40 }
 0xa0e   :  { %11338 = vmatprep.subr.bf16.mxu1 %v16199_v35 }
 0xa11   :  { %11339 = vmatpush1.bf16.msra.mxu1 %v16197_v39 }
 0xa12   :  { %11340 = vmatprep.subr.bf16.mxu1 %v16202_v11 }
 0xa15   :  { %11341 = vmatpush1.bf16.msra.mxu1 %v16200_v1 }
 0xa16   :  { %11342 = vmatprep.subr.bf16.mxu1 %v16205_v25 }
 0xa19   :  { %11343 = vmatpush1.bf16.msra.mxu1 %v16203_v61 }
 0xa1a   :  { %11344 = vmatprep.subr.bf16.mxu1 %v16208_v41 }
 0xa1d   :  { %11345 = vmatpush1.bf16.msra.mxu1 %v16206_v43 }
 0xa1e   :  { %11346 = vmatprep.subr.bf16.mxu1 %v16211_v49  ;;  %v11233_v49 = vunpack.c.0.s8 %v11232_v48 }
 0xa21   :  { %11347 = vmatpush1.bf16.msra.mxu1 %v16209_v7 }
 0xa22   :  { %11348 = vmatprep.subr.bf16.mxu1 %v16214_v47 }
 0xa25   :  { %11349 = vmatpush1.bf16.msra.mxu1 %v16212_v15 }
 0xa26   :  { %11482 = vmatprep.subr.bf16.mxu1 %v16217_v17 }
 0xadb   :  { %v15330_v54 = vpop.f32.mrb[80].mxu1 }
 0xadc   :  { %v10967_v13 = vpop.f32.mrb[81].mxu1  ;;  %v10998_v21 = vmul.f32 %v15330_v54, %v15330_v54 }
 0xadd   :  { %v15331_v28 = vpop.f32.mrb[82].mxu1  ;;  %v10996_v60 = vmul.f32 %v10967_v13, %v10967_v13 }
 0xade   :  { %v10970_v29 = vpop.f32.mrb[83].mxu1  ;;  %v10999_v53 = vmul.f32 %v15331_v28, %v15331_v28 }
 0xadf   :  { %v10986_v34 = vadd.f32 %v10970_v29, %v10967_v13  ;;  %v10997_v36 = vmul.f32 %v10970_v29, %v10970_v29 }
 0xae1   :  { %v10987_v18 = vadd.f32 %v15330_v54, %v10986_v34  ;;  %v11000_v6 = vadd.f32 %v10997_v36, %v10996_v60 }
 0xae3   :  { %v10988_v52 = vadd.f32 %v15331_v28, %v10987_v18  ;;  %v11001_v19 = vadd.f32 %v11000_v6, %v10998_v21 }
 0xae5   :  { %v10989_v3 = vrot.slane %v10988_v52, 4  ;;  %v11002_v37 = vadd.f32 %v11001_v19, %v10999_v53 }
 0xae7   :  { %v10990_v42 = vadd.f32 %v10989_v3, %v10988_v52  ;;  %v11003_v32 = vrot.slane %v11002_v37, 4 }
 0xae9   :  { %v10991_v55 = vrot.slane %v10990_v42, 2  ;;  %v11004_v24 = vadd.f32 %v11003_v32, %v11002_v37  ;;  %v25999_v32 = vld [vmem:[#allocation38_spill] sm:$0xff] }
 0xaeb   :  { %v10992_v23 = vadd.f32 %v10991_v55, %v10990_v42  ;;  %v11005_v44 = vrot.slane %v11004_v24, 2  ;;  %v23672_v55 = vsub.s32 %v11233_v49, %v25999_v32 }
 0xaed   :  { %v10993_v45 = vrot.slane %v10992_v23, 1  ;;  %v11006_v5 = vadd.f32 %v11005_v44, %v11004_v24 }
 0xaef   :  { %v10994_v50 = vadd.f32 %v10993_v45, %v10992_v23  ;;  %v11007_v22 = vrot.slane %v11006_v5, 1 }
 0xaf1   :  { %v10995_v38 = vmul.f32 0.03125, %v10994_v50  ;;  %v11008_v16 = vadd.f32 %v11007_v22, %v11006_v5 }
 0xaf3   :  { %v11009_v12 = vmul.f32 0.03125, %v11008_v16  ;;  %v11010_v56 = vmul.f32 %v10995_v38, %v10995_v38 }
 0xaf5   :  { %v11011_v59 = vsub.f32 %v11009_v12, %v11010_v56 }
 0xaf7   :  { %v11012_v9 = vadd.f32 1e-05, %v11011_v59 }
 0xaf9   :  { %16411 = vrsqrt.f32 %v11012_v9 }
 0xb03   :  { %v16412_v58 = vpop.eup %16411 }
 0xb04   :  { %v11014_v0 = vmul.f32 %v16412_v58, %v9452_v46 }
 0xb06   :  { %v11015_v14 = vmul.f32 %v11014_v0, %v10995_v38  ;;  %v11021_v27 = vrot.slane %v11014_v0, %v25998_v62 }
 0xb08   :  { %v11016_v20 = vsub.f32 %v9453_v63, %v11015_v14  ;;  %v11023_v4 = vmul.f32 %v11021_v27, %v10967_v13  ;;  %v11024_v10 = vmul.f32 %v11021_v27, %v10970_v29  ;;  %v11025_v30 = vmul.f32 %v15330_v54, %v11021_v27 }
 0xb09   :  { %v11026_v31 = vmul.f32 %v15331_v28, %v11021_v27 }
 0xb0a   :  { %v11031_v26 = vrot.slane %v11016_v20, %v25998_v62 }
 0xb0c   :  { %v11033_v35 = vadd.f32 %v11031_v26, %v11023_v4  ;;  %v11034_v39 = vadd.f32 %v11031_v26, %v11024_v10  ;;  %v11035_v11 = vadd.f32 %v11031_v26, %v11025_v30  ;;  %v11036_v1 = vadd.f32 %v11031_v26, %v11026_v31 }
 0xb0e   :  { %v11037_v25 = vmax.f32 %v11033_v35, 0.0  ;;  %v11038_v61 = vmax.f32 %v11034_v39, 0.0  ;;  %v11039_v41 = vmax.f32 %v11035_v11, 0.0  ;;  %v11040_v43 = vmax.f32 %v11036_v1, 0.0 }
 0xb10   :  { %v11045_v7 = vcombine.high %v11037_v25, %v11037_v25  ;;  %v11046_v47 = vcombine.high %v11038_v61, %v11038_v61  ;;  %v11047_v15 = vcombine.high %v11039_v41, %v11039_v41  ;;  %v11048_v17 = vcombine.high %v11040_v43, %v11040_v43 }
 0xb11   :  { %v11054_v54 = vsel %vm6959_vm2, %v11037_v25, -inf  ;;  %v11057_v13 = vsel %vm6959_vm2, %v11038_v61, -inf  ;;  %v11060_v28 = vsel %vm6959_vm2, %v11039_v41, -inf  ;;  %v11063_v29 = vsel %vm6959_vm2, %v11040_v43, -inf }
 0xb12   :  { %v11055_v60 = vsel %vm6959_vm2, %v11045_v7, -inf  ;;  %v11058_v34 = vsel %vm6959_vm2, %v11046_v47, -inf  ;;  %v11061_v36 = vsel %vm6959_vm2, %v11047_v15, -inf  ;;  %v11064_v21 = vsel %vm6959_vm2, %v11048_v17, -inf }
 0xb13   :  { %v11056_v18 = vmax.f32 %v11054_v54, %v11055_v60  ;;  %v11059_v6 = vmax.f32 %v11057_v13, %v11058_v34  ;;  %v11062_v53 = vmax.f32 %v11060_v28, %v11061_v36  ;;  %v11065_v52 = vmax.f32 %v11063_v29, %v11064_v21 }
 0xb15   :  { %v11076_v19 = vrot.slane %v11056_v18, %v25985_v8  ;;  %v11084_v3 = vrot.slane %v11059_v6, %v25985_v8  ;;  %v11092_v37 = vrot.slane %v11062_v53, %v25985_v8  ;;  %v11100_v42 = vrot.slane %v11065_v52, %v25985_v8 }
 0xb17   :  { %v11077_v24 = vcombine.high %v11076_v19, %v11076_v19  ;;  %v11085_v23 = vcombine.high %v11084_v3, %v11084_v3  ;;  %v11093_v44 = vcombine.high %v11092_v37, %v11092_v37  ;;  %v11124_v45 = vsel %vm760_vm0, %v11084_v3, -inf }
 0xb18   :  { %v11125_v5 = vrot.slane %v11124_v45, 4  ;;  %v11110_v50 = vsel %vm760_vm0, %v11076_v19, -inf  ;;  %v11138_v22 = vsel %vm760_vm0, %v11092_v37, -inf  ;;  %v11152_v38 = vsel %vm760_vm0, %v11100_v42, -inf }
 0xb19   :  { %v11131_v16 = vsel %vm760_vm0, %v11085_v23, -inf  ;;  %v11111_v12 = vrot.slane %v11110_v50, 4  ;;  %v11117_v56 = vsel %vm760_vm0, %v11077_v24, -inf  ;;  %v11139_v59 = vrot.slane %v11138_v22, 4 }
 0xb1a   :  { %v11126_v9 = vmax.f32 %v11124_v45, %v11125_v5  ;;  %v11132_v46 = vrot.slane %v11131_v16, 4  ;;  %v11118_v58 = vrot.slane %v11117_v56, 4  ;;  %v11145_v0 = vsel %vm760_vm0, %v11093_v44, -inf }
 0xb1b   :  { %v11112_v63 = vmax.f32 %v11110_v50, %v11111_v12  ;;  %v11140_v14 = vmax.f32 %v11138_v22, %v11139_v59  ;;  %v11146_v27 = vrot.slane %v11145_v0, 4  ;;  %v11153_v20 = vrot.slane %v11152_v38, 4 }
 0xb1c   :  { %v11127_v4 = vrot.slane %v11126_v9, 2  ;;  %v11133_v10 = vmax.f32 %v11131_v16, %v11132_v46  ;;  %v11119_v30 = vmax.f32 %v11117_v56, %v11118_v58  ;;  %v11101_v31 = vcombine.high %v11100_v42, %v11100_v42 }
 0xb1d   :  { %v11113_v26 = vrot.slane %v11112_v63, 2  ;;  %v11141_v40 = vrot.slane %v11140_v14, 2  ;;  %v11147_v48 = vmax.f32 %v11145_v0, %v11146_v27  ;;  %v11154_v35 = vmax.f32 %v11152_v38, %v11153_v20 }
 0xb1e   :  { %v11128_v39 = vmax.f32 %v11126_v9, %v11127_v4  ;;  %v11134_v11 = vrot.slane %v11133_v10, 2  ;;  %v11120_v1 = vrot.slane %v11119_v30, 2  ;;  %v11159_v25 = vsel %vm760_vm0, %v11101_v31, -inf }
 0xb1f   :  { %v11114_v61 = vmax.f32 %v11112_v63, %v11113_v26  ;;  %v11142_v41 = vmax.f32 %v11140_v14, %v11141_v40  ;;  %v11148_v43 = vrot.slane %v11147_v48, 2  ;;  %v11155_v49 = vrot.slane %v11154_v35, 2 }
 0xb20   :  { %v11129_v7 = vrot.slane %v11128_v39, 1  ;;  %v11135_v47 = vmax.f32 %v11133_v10, %v11134_v11  ;;  %v11121_v15 = vmax.f32 %v11119_v30, %v11120_v1  ;;  %v11160_v17 = vrot.slane %v11159_v25, 4 }
 0xb21   :  { %v11115_v54 = vrot.slane %v11114_v61, 1  ;;  %v11143_v13 = vrot.slane %v11142_v41, 1  ;;  %v11149_v28 = vmax.f32 %v11147_v48, %v11148_v43  ;;  %v11156_v29 = vmax.f32 %v11154_v35, %v11155_v49 }
 0xb22   :  { %v11136_v60 = vrot.slane %v11135_v47, 1  ;;  %v11122_v34 = vrot.slane %v11121_v15, 1  ;;  %v11130_v36 = vmax.f32 %v11128_v39, %v11129_v7  ;;  %v11161_v21 = vmax.f32 %v11159_v25, %v11160_v17 }
 0xb23   :  { %v11116_v18 = vmax.f32 %v11114_v61, %v11115_v54  ;;  %v11144_v6 = vmax.f32 %v11142_v41, %v11143_v13  ;;  %v11150_v53 = vrot.slane %v11149_v28, 1  ;;  %v11157_v52 = vrot.slane %v11156_v29, 1 }
 0xb24   :  { %v11137_v19 = vmax.f32 %v11135_v47, %v11136_v60  ;;  %v11123_v3 = vmax.f32 %v11121_v15, %v11122_v34  ;;  %v23682_v37 = vpack.c.bf16 %v11130_v36, %v11130_v36  ;;  %v11162_v42 = vrot.slane %v11161_v21, 2 }
 0xb25   :  { %v11151_v24 = vmax.f32 %v11149_v28, %v11150_v53  ;;  %v11166_v23 = vpack.c.bf16 %v11116_v18, %v11116_v18  ;;  %v11170_v44 = vpack.c.bf16 %v11144_v6, %v11144_v6  ;;  %v11158_v45 = vmax.f32 %v11156_v29, %v11157_v52 }
 0xb26   :  { %v11169_v5 = vpack.c.bf16 %v11137_v19, %v11137_v19  ;;  %v11167_v50 = vpack.c.bf16 %v11123_v3, %v11123_v3  ;;  %v11177_v22 = vsel %vm16543_vm4, 0, %v23682_v37  ;;  %v11878_v38 = vunpack.c.l.b16 %v23682_v37  ;;  %v16215_v3 = vld [vmem:[%s24218_s10] ss:$8 sps:$4 sm:$0xff]  }
 0xb27   :  { %v11171_v16 = vpack.c.bf16 %v11151_v24, %v11151_v24  ;;  %v11204_v12 = vunpack.c.l.b16 %v11166_v23  ;;  %v11206_v56 = vunpack.c.l.b16 %v11170_v44  ;;  %v11176_v59 = vsel %vm16543_vm4, 0, %v11166_v23 }
 0xb28   :  { %v11205_v9 = vunpack.c.l.b16 %v11167_v50  ;;  %v11178_v46 = vsel %vm16543_vm4, 0, %v11170_v44  ;;  %v11377_v58 = vcombine.low %v25897_v51, %v11176_v59  ;;  %v11180_v0 = vsel %vm16543_vm4, %v11167_v50, 0 }
 0xb29   :  { %v11207_v63 = vunpack.c.l.b16 %v11171_v16  ;;  %v11378_v14 = vcombine.low %v25897_v51, %v11178_v46  ;;  %v23698_v27 = vsel %vm16543_vm4, %v11171_v16, 0  ;;  %v11542_v20 = vcombine.low %v25897_v51, %v11180_v0 }
 0xb2a   :  { %v11208_v4 = vsel %vm6830_vm10, %v11205_v9, %v11204_v12  ;;  %v11385_v10 = vrot.slane %v11377_v58, %v23672_v55  ;;  %v11543_v30 = vcombine.low %v25897_v51, %v23698_v27  ;;  %v11172_v31 = vpack.c.bf16 %v11158_v45, %v11158_v45  ;;  %v16220_v45 = vld [vmem:[%s24218_s10 + $0x14] ss:$8 sps:$4 sm:$0xff]  }
 0xb2b   :  { %v11209_v26 = vsel %vm6830_vm10, %v11207_v63, %v11206_v56  ;;  %v11210_v40 = vpack.c.b16 %v11208_v4, %v11208_v4  ;;  %v11392_v48 = vrot.slane %v11378_v14, %v23672_v55  ;;  %v11550_v35 = vrot.slane %v11542_v20, %v23672_v55 }
 0xb2c   :  { %v11211_v39 = vpack.c.b16 %v11209_v26, %v11209_v26  ;;  %v11557_v11 = vrot.slane %v11543_v30, %v23672_v55  ;;  %v11179_v1 = vsel %vm16543_vm4, 0, %v11172_v31  ;;  %v11709_v25 = vcombine.low %v11176_v59, %v11177_v22  ;;  %v16223_v30 = vld [vmem:[%s24218_s10 + $0x24] ss:$8 sps:$4 sm:$0xff]  }
 0xb2d   :  { %v11229_v61 = vcombine.low %v25897_v51, %v11210_v40  ;;  %v23712_v41 = vcombine.low %v11385_v10, %v11392_v48  ;;  %v11710_v43 = vcombine.low %v11178_v46, %v11179_v1  ;;  %v11163_v49 = vmax.f32 %v11161_v21, %v11162_v42 }
 0xb2e   :  { %v11230_v7 = vcombine.low %v25897_v51, %v11211_v39  ;;  %v23715_v47 = vcombine.low %v11550_v35, %v11557_v11  ;;  %v23718_v15 = vrot.slane %v11709_v25, %v23672_v55  ;;  %v11879_v17 = vunpack.c.l.b16 %v11169_v5 }
 0xb2f   :  { %v11237_v54 = vrot.slane %v11229_v61, %v23672_v55  ;;  %v23722_v13 = vrot.slane %v11710_v43, %v23672_v55  ;;  %v11164_v28 = vrot.slane %v11163_v49, 1  ;;  %v11880_v60 = vunpack.c.l.b16 %v11172_v31  ;;  %v16226_v61 = vld [vmem:[%s24218_s10 + $0x34] ss:$8 sps:$4 sm:$0xff]  }
 0xb30   :  { %v11244_v29 = vrot.slane %v11230_v7, %v23672_v55  ;;  %v11882_v34 = vsel %vm6648_vm11, %v11878_v38, %v11208_v4  ;;  %v12362_v6 = vrot.slane %v11879_v17, 7  ;;  %v11181_v19 = vsel %vm16543_vm4, %v11169_v5, 0  ;;  %v16229_v7 = vld [vmem:[%s24218_s10 + $0x44] ss:$8 sps:$4 sm:$0xff]  }
 0xb31   :  { %v11725_v36 = vcombine.low %v23718_v15, %v23722_v13  ;;  %v11165_v21 = vmax.f32 %v11163_v49, %v11164_v28  ;;  %v11883_v18 = vsel %vm6650_vm12, %v11879_v17, %v11882_v34  ;;  %v12366_v24 = vrot.slane %v11880_v60, 4  ;;  %v16224_v49 = vld [vmem:[%s24218_s10 + $0x30] ss:$8 sps:$4 sm:$0xff]   ;;  %v16227_v17 = vld [vmem:[%s24218_s10 + $0x40] ss:$8 sps:$4 sm:$0xff]  }
 0xb32   :  { %v11245_v53 = vcombine.low %v11237_v54, %v11244_v29  ;;  %v11884_v52 = vsel %vm6652_vm13, %v11206_v56, %v11883_v18  ;;  %v12032_v23 = vcombine.low %v11180_v0, %v11181_v19  ;;  %v12197_v16 = vcombine.low %v11177_v22, %v25897_v51  ;;  %v16232_v54 = vld [vmem:[%s24218_s10 + $0x54] ss:$8 sps:$4 sm:$0xff]   ;;  %v16230_v28 = vld [vmem:[%s24218_s10 + $0x50] ss:$8 sps:$4 sm:$0xff]   ;;  %v16235_v29 = vld [vmem:[%s24218_s10 + $0x64] ss:$8 sps:$4 sm:$0xff]  }
 0xb33   :  { %v11173_v37 = vpack.c.bf16 %v11165_v21, %v11165_v21  ;;  %v11885_v42 = vsel %vm6654_vm14, %v11207_v63, %v11884_v52  ;;  %v12198_v5 = vcombine.low %v11179_v1, %v25897_v51  ;;  %v12363_v9 = vsel %vm6830_vm10, %v12362_v6, %v11878_v38  ;;  %v26000_v63 = vld [vmem:[#allocation13_spill] sm:$0xff]  ;;  %v16221_v1 = vld [vmem:[%s24218_s10 + $0x20] ss:$8 sps:$4 sm:$0xff]   ;;  %v16241_v18 = vld [vmem:[%s24218_s10 + $0x104] ss:$8 sps:$4 sm:$0xff]  }
 0xb34   :  { %v11252_v44 = vrot.slane %v11245_v53, %v23672_v55  ;;  %v11886_v50 = vsel %vm6656_vm15, %v11880_v60, %v11885_v42  ;;  %v23746_v59 = vrot.slane %v12032_v23, %v23672_v55  ;;  %v12205_v58 = vrot.slane %v12197_v16, %v23672_v55  ;;  %v16233_v60 = vld [vmem:[%s24218_s10 + $0x60] ss:$8 sps:$4 sm:$0xff]   ;;  %v16238_v34 = vld [vmem:[%s24218_s10 + $0x74] ss:$8 sps:$4 sm:$0xff]   ;;  %v16236_v21 = vld [vmem:[%s24218_s10 + $0x70] ss:$8 sps:$4 sm:$0xff]  }
 0xb35   :  { %v11881_v12 = vunpack.c.l.b16 %v11173_v37  ;;  %v11183_v56 = vsel %vm16543_vm4, %v11173_v37, 0  ;;  %v12212_v0 = vrot.slane %v12198_v5, %v23672_v55  ;;  %v26001_v22 = vrot.slane %v26000_v63, 6  ;;  %v16239_v6 = vld [vmem:[%s24218_s10 + $0x100] ss:$8 sps:$4 sm:$0xff]   ;;  %v16244_v52 = vld [vmem:[%s24218_s10 + $0x114] ss:$8 sps:$4 sm:$0xff]  }
 0xb36   :  { %11367 = vmatmul.mubr.bf16.vlgmr.msra.gmra.mrb[84].mxu1 %v11252_v44  ;;  %v12033_v46 = vcombine.low %v23698_v27, %v11183_v56  ;;  %v26002_v27 = vrot.slane %v26000_v63, 5  ;;  %v12514_v10 = vcombine.low %v11181_v19, %v25897_v51  ;;  %v12515_v35 = vcombine.low %v11183_v56, %v25897_v51  ;;  %v16242_v19 = vld [vmem:[%s24218_s10 + $0x110] ss:$8 sps:$4 sm:$0xff]   ;;  %v16250_v37 = vld [vmem:[%s24218_s10 + $0x134] ss:$8 sps:$4 sm:$0xff]  }
 0xb37   :  { %v12364_v14 = vsel %vm6648_vm11, %v26001_v22, %v12363_v9  ;;  %11483 = vmatpush1.bf16.msra.mxu1 %v16215_v3  ;;  %11514 = vmatprep.mubr.bf16.mxu1 %v25897_v51  ;;  %v23760_v38 = vsel %vm6658_vm1, %v11881_v12, %v11886_v50  ;;  %v12368_v20 = vrot.slane %v11881_v12, 3  ;;  %v23772_v26 = vcombine.low %v12205_v58, %v12212_v0  ;;  %v16247_v3 = vld [vmem:[%s24218_s10 + $0x124] ss:$8 sps:$4 sm:$0xff]   ;;  %v16248_v42 = vld [vmem:[%s24218_s10 + $0x130] ss:$8 sps:$4 sm:$0xff]  }
 0xb38   :  { %v12365_v4 = vsel %vm6650_vm12, %v26002_v27, %v12364_v14  ;;  %11484 = vmatprep.subr.bf16.mxu1 %v16220_v45  ;;  %v23770_v31 = vrot.slane %v12033_v46, %v23672_v55  ;;  %v12522_v39 = vrot.slane %v12514_v10, %v23672_v55  ;;  %v12529_v25 = vrot.slane %v12515_v35, %v23672_v55  ;;  %v16251_v23 = vld [vmem:[%s24218_s10 + $0x140] ss:$8 sps:$4 sm:$0xff]   ;;  %v16256_v44 = vld [vmem:[%s24218_s10 + $0x154] ss:$8 sps:$4 sm:$0xff]   ;;  %v16254_v45 = vld [vmem:[%s24218_s10 + $0x150] ss:$8 sps:$4 sm:$0xff]  }
 0xb39   :  { %v12367_v40 = vsel %vm6652_vm13, %v12366_v24, %v12365_v4  ;;  %v11400_v53 = vrot.slane %v23712_v41, %v23672_v55  ;;  %v16245_v41 = vld [vmem:[%s24218_s10 + $0x120] ss:$8 sps:$4 sm:$0xff]   ;;  %v16253_v24 = vld [vmem:[%s24218_s10 + $0x144] ss:$8 sps:$4 sm:$0xff]   ;;  %v16262_v5 = vld [vmem:[%s24218_s10 + $0x174] ss:$8 sps:$4 sm:$0xff]   ;;  %v11565_v46 = vrot.slane %v23715_v47, %v23672_v55 }
 0xb3a   :  { %v23776_v48 = vsel %vm6654_vm14, %v12368_v20, %v12367_v40  ;;  %v12048_v11 = vcombine.low %v23746_v59, %v23770_v31  ;;  %v23789_v43 = vcombine.low %v12522_v39, %v12529_v25  ;;  %v16259_v50 = vld [vmem:[%s24218_s10 + $0x164] ss:$8 sps:$4 sm:$0xff]   ;;  %v16257_v16 = vld [vmem:[%s24218_s10 + $0x160] ss:$8 sps:$4 sm:$0xff]   ;;  %v16260_v12 = vld [vmem:[%s24218_s10 + $0x170] ss:$8 sps:$4 sm:$0xff]   ;;  %v11732_v25 = vrot.slane %v11725_v36, %v23672_v55 }
 0xb3b   :  { %11485 = vmatpush1.bf16.msra.mxu1 %v16218_v2  ;;  %v16265_v56 = vld [vmem:[%s24218_s10 + $0x184] ss:$8 sps:$4 sm:$0xff]   ;;  %v16263_v9 = vld [vmem:[%s24218_s10 + $0x180] ss:$8 sps:$4 sm:$0xff]   ;;  %v16268_v58 = vld [vmem:[%s24218_s10 + $0x194] ss:$8 sps:$4 sm:$0xff]  }
 0xb3c   :  { %11486 = vmatprep.subr.bf16.mxu1 %v16223_v30  ;;  %v16266_v0 = vld [vmem:[%s24218_s10 + $0x190] ss:$8 sps:$4 sm:$0xff]   ;;  %v16271_v63 = vld [vmem:[%s24218_s10 + $0x1a4] ss:$8 sps:$4 sm:$0xff]   ;;  %v16269_v47 = vld [vmem:[%s24218_s10 + $0x1a0] ss:$8 sps:$4 sm:$0xff]  }
 0xb3d   :  { %v16274_v22 = vld [vmem:[%s24218_s10 + $0x1b4] ss:$8 sps:$4 sm:$0xff]   ;;  %v16272_v14 = vld [vmem:[%s24218_s10 + $0x1b0] ss:$8 sps:$4 sm:$0xff]   ;;  %v16277_v2 = vld [vmem:[%s24218_s10 + $0x1c4] ss:$8 sps:$4 sm:$0xff]  }
 0xb3e   :  { %v16275_v20 = vld [vmem:[%s24218_s10 + $0x1c0] ss:$8 sps:$4 sm:$0xff]   ;;  %v16280_v27 = vld [vmem:[%s24218_s10 + $0x1d4] ss:$8 sps:$4 sm:$0xff]   ;;  %v16278_v4 = vld [vmem:[%s24218_s10 + $0x1d0] ss:$8 sps:$4 sm:$0xff]  }
 0xb3f   :  { %11487 = vmatpush1.bf16.msra.mxu1 %v16221_v1  ;;  %v16283_v10 = vld [vmem:[%s24218_s10 + $0x1e4] ss:$8 sps:$4 sm:$0xff]   ;;  %v16281_v30 = vld [vmem:[%s24218_s10 + $0x1e0] ss:$8 sps:$4 sm:$0xff]   ;;  %v16286_v40 = vld [vmem:[%s24218_s10 + $0x1f4] ss:$8 sps:$4 sm:$0xff]  }
 0xb40   :  { %11488 = vmatprep.subr.bf16.mxu1 %v16226_v61  ;;  %v16284_v35 = vld [vmem:[%s24218_s10 + $0x1f0] ss:$8 sps:$4 sm:$0xff]   ;;  %v16289_v39 = vld [vmem:[%s24218_s10 + $0x204] ss:$8 sps:$4 sm:$0xff]   ;;  %v16287_v1 = vld [vmem:[%s24218_s10 + $0x200] ss:$8 sps:$4 sm:$0xff]  }
 0xb41   :  { %v16292_v61 = vld [vmem:[%s24218_s10 + $0x214] ss:$8 sps:$4 sm:$0xff]   ;;  %v16293_v15 = vld [vmem:[%s24218_s10 + $0x220] ss:$8 sps:$4 sm:$0xff]   ;;  %v16296_v36 = vld [vmem:[%s24218_s10 + $0x230] ss:$8 sps:$4 sm:$0xff]  }
 0xb42   :  { %v16298_v13 = vld [vmem:[%s24218_s10 + $0x234] ss:$8 sps:$4 sm:$0xff]   ;;  %v16341_v59 = vld [vmem:[%s24218_s10 + $0x320] ss:$8 sps:$4 sm:$0xff]  }
 0xb43   :  { %11489 = vmatpush1.bf16.msra.mxu1 %v16224_v49  ;;  %v16290_v49 = vld [vmem:[%s24218_s10 + $0x210] ss:$8 sps:$4 sm:$0xff]   ;;  %v16346_v31 = vld [vmem:[%s24218_s10 + $0x334] ss:$8 sps:$4 sm:$0xff]  }
 0xb44   :  { %11490 = vmatprep.subr.bf16.mxu1 %v16229_v7  ;;  %v16295_v7 = vld [vmem:[%s24218_s10 + $0x224] ss:$8 sps:$4 sm:$0xff]  }
 0xb47   :  { %11491 = vmatpush1.bf16.msra.mxu1 %v16227_v17  ;;  %v16301_v17 = vld [vmem:[%s24218_s10 + $0x244] ss:$8 sps:$4 sm:$0xff]  }
 0xb48   :  { %11492 = vmatprep.subr.bf16.mxu1 %v16232_v54  ;;  %v16299_v54 = vld [vmem:[%s24218_s10 + $0x240] ss:$8 sps:$4 sm:$0xff]  }
 0xb4b   :  { %11493 = vmatpush1.bf16.msra.mxu1 %v16230_v28  ;;  %v16304_v28 = vld [vmem:[%s24218_s10 + $0x254] ss:$8 sps:$4 sm:$0xff]  }
 0xb4c   :  { %11494 = vmatprep.subr.bf16.mxu1 %v16235_v29  ;;  %v16302_v29 = vld [vmem:[%s24218_s10 + $0x250] ss:$8 sps:$4 sm:$0xff]  }
 0xb4f   :  { %11495 = vmatpush1.bf16.msra.mxu1 %v16233_v60  ;;  %v16307_v60 = vld [vmem:[%s24218_s10 + $0x264] ss:$8 sps:$4 sm:$0xff]  }
 0xb50   :  { %11496 = vmatprep.subr.bf16.mxu1 %v16238_v34  ;;  %v16305_v34 = vld [vmem:[%s24218_s10 + $0x260] ss:$8 sps:$4 sm:$0xff]  }
 0xb53   :  { %11497 = vmatpush1.bf16.msra.mxu1 %v16236_v21  ;;  %v16310_v21 = vld [vmem:[%s24218_s10 + $0x274] ss:$8 sps:$4 sm:$0xff]  }
 0xb54   :  { %11647 = vmatprep.subr.bf16.mxu1 %v16241_v18  ;;  %v16308_v18 = vld [vmem:[%s24218_s10 + $0x270] ss:$8 sps:$4 sm:$0xff]  }
 0xb56   :  { %11515 = vmatmul.mubr.bf16.vlgmr.msra.gmra.mrb[84].mxu1 %v11400_v53  ;;  %v16311_v53 = vld [vmem:[%s24218_s10 + $0x280] ss:$8 sps:$4 sm:$0xff]  }
 0xb57   :  { %11648 = vmatpush1.bf16.msra.mxu1 %v16239_v6  ;;  %11679 = vmatprep.mubr.bf16.mxu1 %v25897_v51  ;;  %v16313_v6 = vld [vmem:[%s24218_s10 + $0x284] ss:$8 sps:$4 sm:$0xff]  }
 0xb58   :  { %11649 = vmatprep.subr.bf16.mxu1 %v16244_v52  ;;  %v11888_v52 = vpack.c.b16 %v23760_v38, %v23760_v38  ;;  %v16317_v38 = vld [vmem:[%s24218_s10 + $0x2a0] ss:$8 sps:$4 sm:$0xff]  }
 0xb5b   :  { %11650 = vmatpush1.bf16.msra.mxu1 %v16242_v19  ;;  %v16316_v19 = vld [vmem:[%s24218_s10 + $0x294] ss:$8 sps:$4 sm:$0xff]  }
 0xb5c   :  { %11651 = vmatprep.subr.bf16.mxu1 %v16247_v3  ;;  %v16314_v3 = vld [vmem:[%s24218_s10 + $0x290] ss:$8 sps:$4 sm:$0xff]  }
 0xb5f   :  { %11652 = vmatpush1.bf16.msra.mxu1 %v16245_v41  ;;  %v16319_v41 = vld [vmem:[%s24218_s10 + $0x2a4] ss:$8 sps:$4 sm:$0xff]  }
 0xb60   :  { %11653 = vmatprep.subr.bf16.mxu1 %v16250_v37  ;;  %v16322_v37 = vld [vmem:[%s24218_s10 + $0x2b4] ss:$8 sps:$4 sm:$0xff]  }
 0xb63   :  { %11654 = vmatpush1.bf16.msra.mxu1 %v16248_v42  ;;  %v16320_v42 = vld [vmem:[%s24218_s10 + $0x2b0] ss:$8 sps:$4 sm:$0xff]  }
 0xb64   :  { %11655 = vmatprep.subr.bf16.mxu1 %v16253_v24  ;;  %v16325_v24 = vld [vmem:[%s24218_s10 + $0x2c4] ss:$8 sps:$4 sm:$0xff]  }
 0xb67   :  { %11656 = vmatpush1.bf16.msra.mxu1 %v16251_v23  ;;  %v16323_v23 = vld [vmem:[%s24218_s10 + $0x2c0] ss:$8 sps:$4 sm:$0xff]  }
 0xb68   :  { %11657 = vmatprep.subr.bf16.mxu1 %v16256_v44  ;;  %v16328_v44 = vld [vmem:[%s24218_s10 + $0x2d4] ss:$8 sps:$4 sm:$0xff]  }
 0xb6b   :  { %11658 = vmatpush1.bf16.msra.mxu1 %v16254_v45  ;;  %v16326_v45 = vld [vmem:[%s24218_s10 + $0x2d0] ss:$8 sps:$4 sm:$0xff]  }
 0xb6c   :  { %11659 = vmatprep.subr.bf16.mxu1 %v16259_v50  ;;  %v16331_v50 = vld [vmem:[%s24218_s10 + $0x2e4] ss:$8 sps:$4 sm:$0xff]  }
 0xb6f   :  { %11660 = vmatpush1.bf16.msra.mxu1 %v16257_v16  ;;  %v16329_v16 = vld [vmem:[%s24218_s10 + $0x2e0] ss:$8 sps:$4 sm:$0xff]  }
 0xb70   :  { %11661 = vmatprep.subr.bf16.mxu1 %v16262_v5  ;;  %v16334_v5 = vld [vmem:[%s24218_s10 + $0x2f4] ss:$8 sps:$4 sm:$0xff]  }
 0xb73   :  { %11662 = vmatpush1.bf16.msra.mxu1 %v16260_v12  ;;  %v16332_v12 = vld [vmem:[%s24218_s10 + $0x2f0] ss:$8 sps:$4 sm:$0xff]  }
 0xb74   :  { %11814 = vmatprep.subr.bf16.mxu1 %v16265_v56  ;;  %v16337_v56 = vld [vmem:[%s24218_s10 + $0x304] ss:$8 sps:$4 sm:$0xff]  }
 0xb76   :  { %11680 = vmatmul.mubr.bf16.vlgmr.msra.gmra.mrb[84].mxu1 %v11565_v46  ;;  %v12055_v46 = vrot.slane %v12048_v11, %v23672_v55  ;;  %v16344_v11 = vld [vmem:[%s24218_s10 + $0x330] ss:$8 sps:$4 sm:$0xff]  }
 0xb77   :  { %11815 = vmatpush1.bf16.msra.mxu1 %v16263_v9  ;;  %11846 = vmatprep.mubr.bf16.mxu1 %v25897_v51  ;;  %v16335_v9 = vld [vmem:[%s24218_s10 + $0x300] ss:$8 sps:$4 sm:$0xff]  }
 0xb78   :  { %11816 = vmatprep.subr.bf16.mxu1 %v16268_v58  ;;  %v16340_v58 = vld [vmem:[%s24218_s10 + $0x314] ss:$8 sps:$4 sm:$0xff]  }
 0xb7b   :  { %11817 = vmatpush1.bf16.msra.mxu1 %v16266_v0  ;;  %v16338_v0 = vld [vmem:[%s24218_s10 + $0x310] ss:$8 sps:$4 sm:$0xff]  }
 0xb7c   :  { %11818 = vmatprep.subr.bf16.mxu1 %v16271_v63  ;;  %v16343_v63 = vld [vmem:[%s24218_s10 + $0x324] ss:$8 sps:$4 sm:$0xff]  }
 0xb7f   :  { %11819 = vmatpush1.bf16.msra.mxu1 %v16269_v47  ;;  %v16349_v47 = vld [vmem:[%s24218_s10 + $0x344] ss:$8 sps:$4 sm:$0xff]  }
 0xb80   :  { %11820 = vmatprep.subr.bf16.mxu1 %v16274_v22  ;;  %v16347_v22 = vld [vmem:[%s24218_s10 + $0x340] ss:$8 sps:$4 sm:$0xff]  }
 0xb83   :  { %11821 = vmatpush1.bf16.msra.mxu1 %v16272_v14  ;;  %v16352_v14 = vld [vmem:[%s24218_s10 + $0x354] ss:$8 sps:$4 sm:$0xff]  }
 0xb84   :  { %11822 = vmatprep.subr.bf16.mxu1 %v16277_v2  ;;  %v16350_v2 = vld [vmem:[%s24218_s10 + $0x350] ss:$8 sps:$4 sm:$0xff]  }
 0xb87   :  { %11823 = vmatpush1.bf16.msra.mxu1 %v16275_v20  ;;  %v16355_v20 = vld [vmem:[%s24218_s10 + $0x364] ss:$8 sps:$4 sm:$0xff]  }
 0xb88   :  { %11824 = vmatprep.subr.bf16.mxu1 %v16280_v27  ;;  %v16353_v27 = vld [vmem:[%s24218_s10 + $0x360] ss:$8 sps:$4 sm:$0xff]  }
 0xb8b   :  { %11825 = vmatpush1.bf16.msra.mxu1 %v16278_v4  ;;  %v16358_v4 = vld [vmem:[%s24218_s10 + $0x374] ss:$8 sps:$4 sm:$0xff]  }
 0xb8c   :  { %11826 = vmatprep.subr.bf16.mxu1 %v16283_v10  ;;  %v16356_v10 = vld [vmem:[%s24218_s10 + $0x370] ss:$8 sps:$4 sm:$0xff]  }
 0xb8f   :  { %11827 = vmatpush1.bf16.msra.mxu1 %v16281_v30  ;;  %v16361_v30 = vld [vmem:[%s24218_s10 + $0x384] ss:$8 sps:$4 sm:$0xff]  }
 0xb90   :  { %11828 = vmatprep.subr.bf16.mxu1 %v16286_v40  ;;  %v16359_v40 = vld [vmem:[%s24218_s10 + $0x380] ss:$8 sps:$4 sm:$0xff]  }
 0xb93   :  { %11829 = vmatpush1.bf16.msra.mxu1 %v16284_v35  ;;  %v12220_v35 = vrot.slane %v23772_v26, %v23672_v55  ;;  %v16365_v26 = vld [vmem:[%s24218_s10 + $0x3a0] ss:$8 sps:$4 sm:$0xff]  }
 0xb94   :  { %11970 = vmatprep.subr.bf16.mxu1 %v16289_v39  ;;  %v16364_v39 = vld [vmem:[%s24218_s10 + $0x394] ss:$8 sps:$4 sm:$0xff]  }
 0xb96   :  { %11847 = vmatmul.mubr.bf16.vlgmr.msra.gmra.mrb[84].mxu1 %v11732_v25  ;;  %v16367_v25 = vld [vmem:[%s24218_s10 + $0x3a4] ss:$8 sps:$4 sm:$0xff]  }
 0xb97   :  { %11971 = vmatpush1.bf16.msra.mxu1 %v16287_v1  ;;  %12002 = vmatprep.mubr.bf16.mxu1 %v25897_v51  ;;  %v16362_v1 = vld [vmem:[%s24218_s10 + $0x390] ss:$8 sps:$4 sm:$0xff]  }
 0xb98   :  { %11972 = vmatprep.subr.bf16.mxu1 %v16292_v61  ;;  %v16370_v61 = vld [vmem:[%s24218_s10 + $0x3b4] ss:$8 sps:$4 sm:$0xff]  }
 0xb9b   :  { %11973 = vmatpush1.bf16.msra.mxu1 %v16290_v49  ;;  %v16368_v49 = vld [vmem:[%s24218_s10 + $0x3b0] ss:$8 sps:$4 sm:$0xff]  }
 0xb9c   :  { %11974 = vmatprep.subr.bf16.mxu1 %v16295_v7  ;;  %v16373_v7 = vld [vmem:[%s24218_s10 + $0x3c4] ss:$8 sps:$4 sm:$0xff]  }
 0xb9f   :  { %11975 = vmatpush1.bf16.msra.mxu1 %v16293_v15  ;;  %v16371_v15 = vld [vmem:[%s24218_s10 + $0x3c0] ss:$8 sps:$4 sm:$0xff]  }
 0xba0   :  { %11976 = vmatprep.subr.bf16.mxu1 %v16298_v13  ;;  %v16376_v13 = vld [vmem:[%s24218_s10 + $0x3d4] ss:$8 sps:$4 sm:$0xff]  }
 0xba3   :  { %11977 = vmatpush1.bf16.msra.mxu1 %v16296_v36  ;;  %v16374_v36 = vld [vmem:[%s24218_s10 + $0x3d0] ss:$8 sps:$4 sm:$0xff]  }
 0xba4   :  { %11978 = vmatprep.subr.bf16.mxu1 %v16301_v17  ;;  %v16379_v17 = vld [vmem:[%s24218_s10 + $0x3e4] ss:$8 sps:$4 sm:$0xff]  }
 0xba7   :  { %11979 = vmatpush1.bf16.msra.mxu1 %v16299_v54  ;;  %v16377_v54 = vld [vmem:[%s24218_s10 + $0x3e0] ss:$8 sps:$4 sm:$0xff]  }
 0xba8   :  { %11980 = vmatprep.subr.bf16.mxu1 %v16304_v28  ;;  %v16382_v28 = vld [vmem:[%s24218_s10 + $0x3f4] ss:$8 sps:$4 sm:$0xff]  }
 0xbab   :  { %11981 = vmatpush1.bf16.msra.mxu1 %v16302_v29  ;;  %v12370_v29 = vsel %vm6656_vm15, %v25994_v57, %v23776_v48  ;;  %v16388_v57 = vld [vmem:[%s24218_s10 + $0x414] ss:$8 sps:$4 sm:$0xff]   ;;  %v16386_v48 = vld [vmem:[%s24218_s10 + $0x410] ss:$8 sps:$4 sm:$0xff]  }
 0xbac   :  { %11982 = vmatprep.subr.bf16.mxu1 %v16307_v60  ;;  %v16380_v60 = vld [vmem:[%s24218_s10 + $0x3f0] ss:$8 sps:$4 sm:$0xff]  }
 0xbaf   :  { %11983 = vmatpush1.bf16.msra.mxu1 %v16305_v34  ;;  %v16385_v34 = vld [vmem:[%s24218_s10 + $0x404] ss:$8 sps:$4 sm:$0xff]  }
 0xbb0   :  { %11984 = vmatprep.subr.bf16.mxu1 %v16310_v21  ;;  %v12371_v21 = vsel %vm6658_vm1, %v25995_v33, %v12370_v29  ;;  %v16391_v33 = vld [vmem:[%s24218_s10 + $0x424] ss:$8 sps:$4 sm:$0xff]  }
 0xbb3   :  { %11985 = vmatpush1.bf16.msra.mxu1 %v16308_v18  ;;  %v16383_v18 = vld [vmem:[%s24218_s10 + $0x400] ss:$8 sps:$4 sm:$0xff]  }
 0xbb4   :  { %12137 = vmatprep.subr.bf16.mxu1 %v16313_v6  ;;  %v12372_v6 = vpack.c.b16 %v12371_v21, %v12371_v21 }
 0xbb6   :  { %12003 = vmatmul.mubr.bf16.vlgmr.msra.gmra.mrb[84].mxu1 %v11888_v52  ;;  %v16394_v52 = vld [vmem:[%s24218_s10 + $0x434] ss:$8 sps:$4 sm:$0xff]  }
 0xbb7   :  { %12138 = vmatpush1.bf16.msra.mxu1 %v16311_v53  ;;  %12169 = vmatprep.mubr.bf16.mxu1 %v25897_v51  ;;  %v16389_v53 = vld [vmem:[%s24218_s10 + $0x420] ss:$8 sps:$4 sm:$0xff]  }
 0xbb8   :  { %12139 = vmatprep.subr.bf16.mxu1 %v16316_v19  ;;  %v16397_v19 = vld [vmem:[%s24218_s10 + $0x444] ss:$8 sps:$4 sm:$0xff]  }
 0xbbb   :  { %12140 = vmatpush1.bf16.msra.mxu1 %v16314_v3  ;;  %v16395_v3 = vld [vmem:[%s24218_s10 + $0x440] ss:$8 sps:$4 sm:$0xff]  }
 0xbbc   :  { %12141 = vmatprep.subr.bf16.mxu1 %v16319_v41  ;;  %v16400_v41 = vld [vmem:[%s24218_s10 + $0x454] ss:$8 sps:$4 sm:$0xff]  }
 0xbbf   :  { %12142 = vmatpush1.bf16.msra.mxu1 %v16317_v38  ;;  %v16398_v38 = vld [vmem:[%s24218_s10 + $0x450] ss:$8 sps:$4 sm:$0xff]  }
 0xbc0   :  { %12143 = vmatprep.subr.bf16.mxu1 %v16322_v37  ;;  %v16403_v37 = vld [vmem:[%s24218_s10 + $0x464] ss:$8 sps:$4 sm:$0xff]  }
 0xbc3   :  { %12144 = vmatpush1.bf16.msra.mxu1 %v16320_v42  ;;  %v16401_v42 = vld [vmem:[%s24218_s10 + $0x460] ss:$8 sps:$4 sm:$0xff]  }
 0xbc4   :  { %12145 = vmatprep.subr.bf16.mxu1 %v16325_v24  ;;  %v16406_v24 = vld [vmem:[%s24218_s10 + $0x474] ss:$8 sps:$4 sm:$0xff]  }
 0xbc7   :  { %12146 = vmatpush1.bf16.msra.mxu1 %v16323_v23  ;;  %v16404_v23 = vld [vmem:[%s24218_s10 + $0x470] ss:$8 sps:$4 sm:$0xff]  }
 0xbc8   :  { %12147 = vmatprep.subr.bf16.mxu1 %v16328_v44  ;;  %v12537_v44 = vrot.slane %v23789_v43, %v23672_v55 }
 0xbcb   :  { %12148 = vmatpush1.bf16.msra.mxu1 %v16326_v45 }
 0xbcc   :  { %12149 = vmatprep.subr.bf16.mxu1 %v16331_v50 }
 0xbcf   :  { %12150 = vmatpush1.bf16.msra.mxu1 %v16329_v16 }
 0xbd0   :  { %12151 = vmatprep.subr.bf16.mxu1 %v16334_v5 }
 0xbd3   :  { %12152 = vmatpush1.bf16.msra.mxu1 %v16332_v12 }
 0xbd4   :  { %12302 = vmatprep.subr.bf16.mxu1 %v16337_v56 }
 0xbd6   :  { %12170 = vmatmul.mubr.bf16.vlgmr.msra.gmra.mrb[84].mxu1 %v12055_v46 }
 0xbd7   :  { %12303 = vmatpush1.bf16.msra.mxu1 %v16335_v9  ;;  %12334 = vmatprep.mubr.bf16.mxu1 %v25897_v51 }
 0xbd8   :  { %12304 = vmatprep.subr.bf16.mxu1 %v16340_v58 }
 0xbdb   :  { %12305 = vmatpush1.bf16.msra.mxu1 %v16338_v0 }
 0xbdc   :  { %12306 = vmatprep.subr.bf16.mxu1 %v16343_v63 }
 0xbdf   :  { %12307 = vmatpush1.bf16.msra.mxu1 %v16341_v59 }
 0xbe0   :  { %12308 = vmatprep.subr.bf16.mxu1 %v16346_v31 }
 0xbe3   :  { %12309 = vmatpush1.bf16.msra.mxu1 %v16344_v11 }
 0xbe4   :  { %12310 = vmatprep.subr.bf16.mxu1 %v16349_v47 }
 0xbe7   :  { %12311 = vmatpush1.bf16.msra.mxu1 %v16347_v22 }
 0xbe8   :  { %12312 = vmatprep.subr.bf16.mxu1 %v16352_v14 }
 0xbeb   :  { %12313 = vmatpush1.bf16.msra.mxu1 %v16350_v2 }
 0xbec   :  { %12314 = vmatprep.subr.bf16.mxu1 %v16355_v20 }
 0xbef   :  { %12315 = vmatpush1.bf16.msra.mxu1 %v16353_v27 }
 0xbf0   :  { %12316 = vmatprep.subr.bf16.mxu1 %v16358_v4 }
 0xbf3   :  { %12317 = vmatpush1.bf16.msra.mxu1 %v16356_v10 }
 0xbf4   :  { %12454 = vmatprep.subr.bf16.mxu1 %v16361_v30 }
 0xbf6   :  { %12335 = vmatmul.mubr.bf16.vlgmr.msra.gmra.mrb[84].mxu1 %v12220_v35 }
 0xbf7   :  { %12455 = vmatpush1.bf16.msra.mxu1 %v16359_v40  ;;  %12486 = vmatprep.mubr.bf16.mxu1 %v25897_v51 }
 0xbf8   :  { %12456 = vmatprep.subr.bf16.mxu1 %v16364_v39 }
 0xbfb   :  { %12457 = vmatpush1.bf16.msra.mxu1 %v16362_v1 }
 0xbfc   :  { %12458 = vmatprep.subr.bf16.mxu1 %v16367_v25 }
 0xbff   :  { %12459 = vmatpush1.bf16.msra.mxu1 %v16365_v26 }
 0xc00   :  { %12460 = vmatprep.subr.bf16.mxu1 %v16370_v61 }
 0xc03   :  { %12461 = vmatpush1.bf16.msra.mxu1 %v16368_v49 }
 0xc04   :  { %12462 = vmatprep.subr.bf16.mxu1 %v16373_v7 }
 0xc07   :  { %12463 = vmatpush1.bf16.msra.mxu1 %v16371_v15 }
 0xc08   :  { %12464 = vmatprep.subr.bf16.mxu1 %v16376_v13 }
 0xc0b   :  { %12465 = vmatpush1.bf16.msra.mxu1 %v16374_v36 }
 0xc0c   :  { %12466 = vmatprep.subr.bf16.mxu1 %v16379_v17 }
 0xc0f   :  { %12467 = vmatpush1.bf16.msra.mxu1 %v16377_v54 }
 0xc10   :  { %12468 = vmatprep.subr.bf16.mxu1 %v16382_v28 }
 0xc13   :  { %12469 = vmatpush1.bf16.msra.mxu1 %v16380_v60 }
 0xc14   :  { %12619 = vmatprep.subr.bf16.mxu1 %v16385_v34 }
 0xc16   :  { %12487 = vmatmul.mubr.bf16.vlgmr.msra.gmra.mrb[84].mxu1 %v12372_v6  ;;  %v11174_v6 = vld [vmem:[%s24221_s11] sm:$0x3] }
 0xc17   :  { %12620 = vmatpush1.bf16.msra.mxu1 %v16383_v18  ;;  %12651 = vmatprep.mubr.bf16.mxu1 %v25897_v51  ;;  %v16392_v51 = vld [vmem:[%s24218_s10 + $0x430] ss:$8 sps:$4 sm:$0xff]  }
 0xc18   :  { %12621 = vmatprep.subr.bf16.mxu1 %v16388_v57 }
 0xc1b   :  { %12622 = vmatpush1.bf16.msra.mxu1 %v16386_v48  ;;  %v12726_v48 = vsub.s32 1, %v25999_v32 }
 0xc1c   :  { %12623 = vmatprep.subr.bf16.mxu1 %v16391_v33 }
 0xc1f   :  { %12624 = vmatpush1.bf16.msra.mxu1 %v16389_v53 }
 0xc20   :  { %12625 = vmatprep.subr.bf16.mxu1 %v16394_v52 }
 0xc23   :  { %12626 = vmatpush1.bf16.msra.mxu1 %v16392_v51 }
 0xc24   :  { %12627 = vmatprep.subr.bf16.mxu1 %v16397_v19 }
 0xc27   :  { %12628 = vmatpush1.bf16.msra.mxu1 %v16395_v3 }
 0xc28   :  { %12629 = vmatprep.subr.bf16.mxu1 %v16400_v41 }
 0xc2b   :  { %12630 = vmatpush1.bf16.msra.mxu1 %v16398_v38 }
 0xc2c   :  { %12631 = vmatprep.subr.bf16.mxu1 %v16403_v37 }
 0xc2f   :  { %12632 = vmatpush1.bf16.msra.mxu1 %v16401_v42  ;;  %v11175_v42 = vld [vmem:[%s24222_s12] sm:$0x3] }
 0xc30   :  { %12633 = vmatprep.subr.bf16.mxu1 %v16406_v24 }
 0xc33   :  { %12634 = vmatpush1.bf16.msra.mxu1 %v16404_v23 }
 0xc36   :  { %12652 = vmatmul.mubr.bf16.vlgmr.msra.gmra.mrb[84].mxu1 %v12537_v44 }
 0xd09   :  { %v12653_v45 = vpop.f32.mrb[84].mxu1 }
 0xd0a   :  { %v12662_v50 = vrot.slane %v12653_v45, 4  ;;  %v12676_v16 = vmul.f32 %v12653_v45, %v12653_v45  ;;  %v12655_v5 = vpop.f32.mrb[85].mxu1 }
 0xd0b   :  { %v12668_v12 = vrot.slane %v12655_v5, 4  ;;  %v12677_v56 = vmul.f32 %v12655_v5, %v12655_v5  ;;  %v12657_v9 = vpop.f32.mrb[86].mxu1 }
 0xd0c   :  { %v12663_v46 = vadd.f32 %v12662_v50, %v12653_v45  ;;  %v12678_v58 = vrot.slane %v12676_v16, 4  ;;  %v12658_v0 = vpop.f32.mrb[87].mxu1 }
 0xd0d   :  { %v12669_v63 = vadd.f32 %v12668_v12, %v12655_v5  ;;  %v12684_v59 = vrot.slane %v12677_v56, 4 }
 0xd0e   :  { %v12664_v31 = vrot.slane %v12663_v46, 2  ;;  %v12679_v11 = vadd.f32 %v12678_v58, %v12676_v16 }
 0xd0f   :  { %v12670_v47 = vrot.slane %v12669_v63, 2  ;;  %v12685_v22 = vadd.f32 %v12684_v59, %v12677_v56 }
 0xd10   :  { %v12665_v14 = vadd.f32 %v12664_v31, %v12663_v46  ;;  %v12680_v2 = vrot.slane %v12679_v11, 2 }
 0xd11   :  { %v12671_v43 = vadd.f32 %v12670_v47, %v12669_v63  ;;  %v12686_v20 = vrot.slane %v12685_v22, 2 }
 0xd12   :  { %v12666_v27 = vrot.slane %v12665_v14, 1  ;;  %v12681_v4 = vadd.f32 %v12680_v2, %v12679_v11 }
 0xd13   :  { %v12672_v10 = vrot.slane %v12671_v43, 1  ;;  %v12687_v30 = vadd.f32 %v12686_v20, %v12685_v22 }
 0xd14   :  { %v12667_v40 = vadd.f32 %v12666_v27, %v12665_v14  ;;  %v12682_v35 = vrot.slane %v12681_v4, 1 }
 0xd15   :  { %v12673_v39 = vadd.f32 %v12672_v10, %v12671_v43  ;;  %v12688_v1 = vrot.slane %v12687_v30, 1 }
 0xd16   :  { %v12674_v25 = vmul.f32 0.125, %v12667_v40  ;;  %v12683_v26 = vadd.f32 %v12682_v35, %v12681_v4 }
 0xd17   :  { %v12675_v61 = vmul.f32 0.125, %v12673_v39  ;;  %v12689_v49 = vadd.f32 %v12688_v1, %v12687_v30 }
 0xd18   :  { %v12690_v7 = vmul.f32 0.125, %v12683_v26  ;;  %v12692_v15 = vmul.f32 %v12674_v25, %v12674_v25 }
 0xd19   :  { %v12691_v13 = vmul.f32 0.125, %v12689_v49  ;;  %v12693_v36 = vmul.f32 %v12675_v61, %v12675_v61 }
 0xd1a   :  { %v12694_v17 = vsub.f32 %v12690_v7, %v12692_v15 }
 0xd1b   :  { %v12695_v54 = vsub.f32 %v12691_v13, %v12693_v36 }
 0xd1c   :  { %v12696_v28 = vadd.f32 1e-05, %v12694_v17 }
 0xd1d   :  { %v12697_v29 = vadd.f32 1e-05, %v12695_v54 }
 0xd1e   :  { %16413 = vrsqrt.f32 %v12696_v28 }
 0xd1f   :  { %16415 = vrsqrt.f32 %v12697_v29 }
 0xd28   :  { %v16414_v60 = vpop.eup %16413 }
 0xd29   :  { %v16416_v34 = vpop.eup %16415 }
 0xd2a   :  { %v12702_v21 = vcombine.low %v16414_v60, %v16416_v34 }
 0xd2c   :  { %v12709_v18 = vrot.slane %v12702_v21, %v23672_v55 }
 0xd2e   :  { %v12716_v57 = vrot.slane %v12709_v18, %v23672_v55 }
 0xd30   :  { %v12718_v33 = vmul.f32 %v12716_v57, %v11174_v6 }
 0xd32   :  { %v12723_v53 = vrot.slane %v12718_v33, %v25998_v62  ;;  %v12727_v52 = vrot.slane %v12718_v33, %v12726_v48 }
 0xd34   :  { %v12730_v51 = vmul.f32 %v12723_v53, %v12674_v25  ;;  %v12731_v19 = vmul.f32 %v12727_v52, %v12675_v61  ;;  %v12751_v3 = vmul.f32 %v12723_v53, %v12653_v45  ;;  %v12752_v41 = vmul.f32 %v12727_v52, %v12655_v5 }
 0xd36   :  { %v12734_v38 = vcombine.low %v12730_v51, %v12731_v19 }
 0xd38   :  { %v12741_v37 = vrot.slane %v12734_v38, %v23672_v55 }
 0xd3a   :  { %v12748_v24 = vrot.slane %v12741_v37, %v23672_v55 }
 0xd3c   :  { %v12750_v23 = vsub.f32 %v11175_v42, %v12748_v24 }
 0xd3e   :  { %v12757_v32 = vrot.slane %v12750_v23, %v25998_v62  ;;  %v12761_v44 = vrot.slane %v12750_v23, %v12726_v48 }
 0xd40   :  { %v12764_v50 = vadd.f32 %v12757_v32, %v12751_v3  ;;  %v12765_v16 = vadd.f32 %v12761_v44, %v12752_v41 }
 0xd42   :  { %v12766_v12 = vmax.f32 %v12764_v50, 0.0  ;;  %v12767_v56 = vmax.f32 %v12765_v16, 0.0 }
 0xd44   :  { %v12770_v9 = vcombine.low %v12766_v12, %v12767_v56  ;;  %v12771_v45 = vcombine.high %v12766_v12, %v12767_v56  ;;  %v13845_v5 = vcombine.low %v12767_v56, %v12767_v56  ;;  %v13846_v46 = vcombine.high %v12767_v56, %v12767_v56 }
 0xd46   :  { %v12778_v58 = vsel %vm6959_vm2, %v12770_v9, 0.0  ;;  %v12785_v0 = vsel %vm6959_vm2, %v13845_v5, 0.0  ;;  %v12792_v63 = vsel %vm6959_vm2, %v12771_v45, 0.0  ;;  %v12799_v55 = vsel %vm6959_vm2, %v13846_v46, 0.0 }
 0xd47   :  { %v12779_v59 = vrot.slane %v12778_v58, 4  ;;  %v12786_v31 = vrot.slane %v12785_v0, 4  ;;  %v12793_v62 = vrot.slane %v12792_v63, 4  ;;  %v12800_v11 = vrot.slane %v12799_v55, 4 }
 0xd49   :  { %v12780_v47 = vadd.f32 %v12779_v59, %v12778_v58  ;;  %v12787_v22 = vadd.f32 %v12786_v31, %v12785_v0  ;;  %v12794_v14 = vadd.f32 %v12793_v62, %v12792_v63  ;;  %v12801_v2 = vadd.f32 %v12800_v11, %v12799_v55 }
 0xd4b   :  { %v12781_v43 = vrot.slane %v12780_v47, 2  ;;  %v12788_v20 = vrot.slane %v12787_v22, 2  ;;  %v12795_v27 = vrot.slane %v12794_v14, 2  ;;  %v12802_v4 = vrot.slane %v12801_v2, 2 }
 0xd4d   :  { %v12782_v10 = vadd.f32 %v12781_v43, %v12780_v47  ;;  %v12789_v30 = vadd.f32 %v12788_v20, %v12787_v22  ;;  %v12796_v40 = vadd.f32 %v12795_v27, %v12794_v14  ;;  %v12803_v35 = vadd.f32 %v12802_v4, %v12801_v2 }
 0xd4f   :  { %v12783_v39 = vrot.slane %v12782_v10, 1  ;;  %v12790_v1 = vrot.slane %v12789_v30, 1  ;;  %v12797_v25 = vrot.slane %v12796_v40, 1  ;;  %v12804_v26 = vrot.slane %v12803_v35, 1 }
 0xd51   :  { %v12784_v61 = vadd.f32 %v12783_v39, %v12782_v10  ;;  %v12791_v49 = vadd.f32 %v12790_v1, %v12789_v30  ;;  %v12798_v7 = vadd.f32 %v12797_v25, %v12796_v40  ;;  %v12805_v15 = vadd.f32 %v12804_v26, %v12803_v35 }
 0xd53   :  { %v12807_v13 = vmul.f32 0.25, %v12784_v61  ;;  %v12808_v36 = vmul.f32 0.25, %v12791_v49  ;;  %v12809_v17 = vmul.f32 0.25, %v12798_v7  ;;  %v12810_v54 = vmul.f32 0.25, %v12805_v15 }
 0xd55   :  { %v12815_v28 = vcombine.low %v12807_v13, %v12808_v36  ;;  %v12823_v29 = vcombine.low %v12809_v17, %v12810_v54 }
 0xd57   :  { %v12830_v60 = vrot.slane %v12823_v29, %v25985_v8  ;;  %v12822_v34 = vrot.slane %v12815_v28, %v25985_v8 }
 0xd59   :  { %v12833_v21 = vrot.slane %v12830_v60, 7 }
 0xd5b   :  { %v12834_v18 = vsel %vm6830_vm10, %v12833_v21, %v12822_v34 }
 0xd5c   :  { %v12835_v6 = vsel %vm6650_vm12, %v12833_v21, %v12834_v18 }
 0xd5d   :  { %v12836_v57 = vsel %vm6654_vm14, %v12833_v21, %v12835_v6 }
 0xd5e   :  { %v12837_v48 = vsel %vm6658_vm1, %v12833_v21, %v12836_v57 }
 0xd5f   :  { %12839 = vst [vmem:[%s24223_s13] sm:$0xf] %v12837_v48 }

</bundles_post_ra>
